<compile_context>
chip_gen: v7x
topology: tpu7x:2x2x1
jax: 0.10.0
libtpu: 0.0.40
codegen_flags: <defaults>
</compile_context>

<pallas_src>
import functools

import jax
import jax.numpy as jnp
import numpy as np
from jax import lax
from jax.experimental import pallas as pl
from jax.experimental.pallas import tpu as pltpu

HI = lax.Precision.HIGHEST        # reference (verification) only
EPS_IN = 1e-5                     # torch.nn.InstanceNorm2d default eps


def _inorm_softmax(a):
    """InstanceNorm (affine=False) over the full 2-D tile, then softmax over last axis."""
    m = jnp.mean(a)
    v = jnp.mean((a - m) ** 2)
    a = (a - m) * lax.rsqrt(v + EPS_IN)
    a = a - jnp.max(a, axis=-1, keepdims=True)
    p = jnp.exp(a)
    return p * pl.reciprocal(jnp.sum(p, axis=-1, keepdims=True), approx=True)


# ----------------------------- fused kernel ---------------------------------------


def fused_attention_kernel(embc_ref, x_ref, wqc_ref, wkc_ref, wvc_ref,
                           wq_ref, wk_ref, wv_ref, wout_ref, sel_ref,
                           o_ref, m_ref, *, n, H, E):
    """One batch element per grid step.

    embc_ref : (1, n, C)    channel-attention input (C = 4E = 128 lanes)
    x_ref    : (1, n, C)    the 4 spatial-scale embeddings packed along lanes
    wqc/wkc/wvc_ref : (C, C)   channel projections, stored (in, out)
    wq/wk/wv/wout_ref : (C, C) block-diagonal per-scale / per-KV-block weights, (in, out)
    sel_ref  : (n, n)       0/1 permutation used for the raw-view head merge (scales 2..4)
    o_ref    : (1, n, C)    lane-dense output slab, scale s at lanes [sE:(s+1)E)
    m_ref    : (n, C) VMEM  merged-context scratch slab
    """
    hd = E // H            # head size
    rpb = n // H           # output rows per head in the raw-view merge
    bf16 = jnp.bfloat16
    f32 = jnp.float32

    # ---------------- channel (cross-scale) attention ----------------
    xc = embc_ref[0].astype(bf16)                                          # (n, C)
    qc = jnp.dot(xc, wqc_ref[...], preferred_element_type=f32)
    kc = jnp.dot(xc, wkc_ref[...], preferred_element_type=f32)
    vc = jnp.dot(xc, wvc_ref[...], preferred_element_type=f32)

    # attn = Q_C^T @ K_C -> (C, C)
    attn_c = lax.dot_general(qc.astype(bf16), kc.astype(bf16),
                             (((0,), (0,)), ((), ())),
                             preferred_element_type=f32)
    sim_c = _inorm_softmax(attn_c)                                         # (C, C)
    # T_hat = (sim @ V_C^T)^T = V_C @ sim^T -> (n, C); KV_S block j lives at lanes [jE:(j+1)E)
    t_hat = lax.dot_general(vc.astype(bf16), sim_c.astype(bf16),
                            (((1,), (1,)), ((), ())),
                            preferred_element_type=f32)                    # (n, C)

    # ---------------- lane-dense projections (all scales / KV blocks at once) -------
    t_b = t_hat.astype(bf16)
    k_b = jnp.dot(t_b, wk_ref[...], preferred_element_type=f32).astype(bf16)   # (n, C)
    v_b = jnp.dot(t_b, wv_ref[...], preferred_element_type=f32).astype(bf16)   # (n, C)
    q_b = jnp.dot(x_ref[0].astype(bf16), wq_ref[...],
                  preferred_element_type=f32).astype(bf16)                     # (n, C)

    sel = sel_ref[...]                                                     # (n, n) bf16

    # ---------------- multi-head spatial attention (unrolled, 2-D dots) -------------
    for h in range(H):
        # per-head K / V over all 4 KV blocks: (4n, hd)
        kh = jnp.concatenate(
            [k_b[:, j * E + h * hd: j * E + (h + 1) * hd] for j in range(4)], axis=0)
        vh = jnp.concatenate(
            [v_b[:, j * E + h * hd: j * E + (h + 1) * hd] for j in range(4)], axis=0)
        for s in range(4):
            qh = q_b[:, s * E + h * hd: s * E + (h + 1) * hd]              # (n, hd)
            attn = lax.dot_general(qh, kh, (((1,), (1,)), ((), ())),
                                   preferred_element_type=f32)             # (n, 4n)
            sim = _inorm_softmax(attn)
            ctx = jnp.dot(sim.astype(bf16), vh,
                          preferred_element_type=f32)                      # (n, hd)
            if s == 0:
                # scale 1: proper head concat (permute(0,2,1,3) + view)
                m_ref[:, h * hd:(h + 1) * hd] = ctx
            else:
                # scales 2..4: raw row-major view of (H, n, hd) as (n, E).
                # P = SEL @ ctx reorders rows so the view becomes contiguous slab writes.
                p = jnp.dot(sel, ctx.astype(bf16), preferred_element_type=f32)
                for m in range(H):
                    m_ref[h * rpb:(h + 1) * rpb,
                          s * E + m * hd: s * E + (m + 1) * hd] = p[m * rpb:(m + 1) * rpb, :]

    # ---------------- fused output projections, single lane-dense store -------------
    o_ref[0] = jnp.dot(m_ref[...].astype(bf16), wout_ref[...],
                       preferred_element_type=f32)


# ----------------------------- wrapper ----------------------------------------------


def attention_forward(emb1, emb2, emb3, emb4, emb_c, params, *, num_heads):
    B, n, E = emb1.shape
    C = emb_c.shape[-1]
    assert C == 4 * E, "KV_size (channel) must equal 4 * embedding_channels"
    H = num_heads
    assert E % H == 0 and n % H == 0
    f32 = jnp.float32
    bf16 = jnp.bfloat16
    bd = jax.scipy.linalg.block_diag

    # weights pre-transposed to (in, out); per-scale / per-KV-block weights packed
    # block-diagonally so each projection is one lane-dense (n,128)x(128,128) matmul.
    wqc_t = params["WqC"].T.astype(bf16)
    wkc_t = params["WkC"].T.astype(bf16)
    wvc_t = params["WvC"].T.astype(bf16)
    wq_bd = bd(*[params["Wq"][s].T for s in range(4)]).astype(bf16)
    wk_bd = bd(*([params["Wk"].T] * 4)).astype(bf16)
    wv_bd = bd(*([params["Wv"].T] * 4)).astype(bf16)
    wout_bd = bd(*[params["Wout"][s].T for s in range(4)]).astype(bf16)

    # pack the 4 spatial scales along the (128-wide) lane axis
    x_dense = jnp.concatenate([emb1, emb2, emb3, emb4], axis=-1)           # (B, n, C)

    # permutation used for the raw-view head merge (scales 2..4): P = SEL @ ctx with
    # P[m*(n//H) + r] = ctx[r*H + m]
    rpb = n // H
    sel_np = np.zeros((n, n), dtype=np.float32)
    for p_ in range(n):
        sel_np[p_, (p_ % rpb) * H + p_ // rpb] = 1.0
    sel = jnp.asarray(sel_np, dtype=bf16)

    kernel = functools.partial(fused_attention_kernel, n=n, H=H, E=E)
    wspec = pl.BlockSpec((C, C), lambda b: (0, 0))
    o_dense = pl.pallas_call(
        kernel,
        out_shape=jax.ShapeDtypeStruct((B, n, C), f32),
        grid=(B,),
        in_specs=[
            pl.BlockSpec((1, n, C), lambda b: (b, 0, 0)),   # emb_C
            pl.BlockSpec((1, n, C), lambda b: (b, 0, 0)),   # packed emb1..emb4
            wspec, wspec, wspec,                            # WqC^T, WkC^T, WvC^T
            wspec, wspec, wspec, wspec,                     # blockdiag Wq/Wk/Wv/Wout^T
            pl.BlockSpec((n, n), lambda b: (0, 0)),         # SEL
        ],
        out_specs=pl.BlockSpec((1, n, C), lambda b: (b, 0, 0)),
        scratch_shapes=[pltpu.VMEM((n, C), f32)],
        compiler_params=pltpu.CompilerParams(dimension_semantics=("parallel",)),
    )(emb_c, x_dense, wqc_t, wkc_t, wvc_t, wq_bd, wk_bd, wv_bd, wout_bd, sel)

    # attn_dropout / proj_dropout: eval-mode identity.  Split the lane-dense slab.
    return tuple(o_dense[..., s * E:(s + 1) * E] for s in range(4))


# ----------------------- pure-JAX reference (for verification) ----------------------


def reference_forward(emb1, emb2, emb3, emb4, emb_c, params, *, num_heads):
    B, n, E = emb1.shape
    H = num_heads
    hd = E // H
    mm = functools.partial(jnp.matmul, precision=HI)

    def inorm(a):
        m = a.mean(axis=(-2, -1), keepdims=True)
        v = ((a - m) ** 2).mean(axis=(-2, -1), keepdims=True)
        return (a - m) / jnp.sqrt(v + EPS_IN)

    Qc = mm(emb_c, params["WqC"].T)
    Kc = mm(emb_c, params["WkC"].T)
    Vc = mm(emb_c, params["WvC"].T)
    attn = mm(jnp.swapaxes(Qc, -1, -2), Kc)
    sim = jax.nn.softmax(inorm(attn), axis=-1)
    ctx = mm(sim, jnp.swapaxes(Vc, -1, -2))
    t_hat = jnp.swapaxes(ctx, -1, -2)
    kv_s = jnp.concatenate(jnp.split(t_hat, 4, axis=2), axis=1)

    def heads(x):
        b, s, _ = x.shape
        return jnp.transpose(x.reshape(b, s, H, hd), (0, 2, 1, 3))

    K = heads(mm(kv_s, params["Wk"].T))
    V = heads(mm(kv_s, params["Wv"].T))
    embs = [emb1, emb2, emb3, emb4]
    outs = []
    for i in range(4):
        Q = heads(mm(embs[i], params["Wq"][i].T))
        a = mm(Q, jnp.swapaxes(K, -1, -2))
        s = jax.nn.softmax(inorm(a), axis=-1)
        c = mm(s, V)
        if i == 0:
            c = jnp.transpose(c, (0, 2, 1, 3)).reshape(B, n, E)
        else:
            c = c.reshape(B, n, E)  # raw view, as in the PyTorch code
        outs.append(mm(c, params["Wout"][i].T))
    return tuple(outs)


# ----------------------------- main --------------------------------------------------

if __name__ == "__main__":
    # config: embedding_channels = KV_size_S = 32, KV_size (channel) = 128, num_heads = 4
    B, n, E, H = 2, 16, 32, 4
    C = 4 * E

    key = jax.random.PRNGKey(0)
    ks = jax.random.split(key, 12)
    emb1 = jax.random.normal(ks[0], (B, n, E), dtype=jnp.float32)
    emb2 = jax.random.normal(ks[1], (B, n, E), dtype=jnp.float32)
    emb3 = jax.random.normal(ks[2], (B, n, E), dtype=jnp.float32)
    emb4 = jax.random.normal(ks[3], (B, n, E), dtype=jnp.float32)
    emb_c = jax.random.normal(ks[4], (B, n, C), dtype=jnp.float32)

    w = lambda k, shape: 0.1 * jax.random.normal(k, shape, dtype=jnp.float32)
    params = {
        "WqC": w(ks[5], (C, C)),       # PyTorch Linear weights: (out, in)
        "WkC": w(ks[6], (C, C)),
        "WvC": w(ks[7], (C, C)),
        "Wq": w(ks[8], (4, E, E)),     # query1..query4 stacked
        "Wk": w(ks[9], (E, E)),
        "Wv": w(ks[10], (E, E)),
        "Wout": w(ks[11], (4, E, E)),  # out1..out4 stacked
    }

    outs = attention_forward(emb1, emb2, emb3, emb4, emb_c, params, num_heads=H)
    outs = jax.block_until_ready(outs)

    refs = reference_forward(emb1, emb2, emb3, emb4, emb_c, params, num_heads=H)
    # kernel runs bf16 matmuls with f32 accumulation; reference is full-f32 (HIGHEST)
    for o, r in zip(outs, refs):
        np.testing.assert_allclose(np.asarray(o), np.asarray(r), rtol=5e-2, atol=3e-3)

    print("KERNEL_OK")
</pallas_src>

<mosaic_0001>
module attributes {stable_mosaic.version = 11 : i64} {
  func.func @fused_attention_kernel(%arg0: i32, %arg1: memref<1x16x128xf32, #tpu.memory_space<vmem>>, %arg2: memref<1x16x128xf32, #tpu.memory_space<vmem>>, %arg3: memref<128x128xbf16, #tpu.memory_space<vmem>>, %arg4: memref<128x128xbf16, #tpu.memory_space<vmem>>, %arg5: memref<128x128xbf16, #tpu.memory_space<vmem>>, %arg6: memref<128x128xbf16, #tpu.memory_space<vmem>>, %arg7: memref<128x128xbf16, #tpu.memory_space<vmem>>, %arg8: memref<128x128xbf16, #tpu.memory_space<vmem>>, %arg9: memref<128x128xbf16, #tpu.memory_space<vmem>>, %arg10: memref<16x16xbf16, #tpu.memory_space<vmem>>, %arg11: memref<1x16x128xf32, #tpu.memory_space<vmem>>, %arg12: memref<16x128xf32, #tpu.memory_space<vmem>>) attributes {dimension_semantics = [#tpu.dimension_semantics<parallel>], iteration_bounds = array<i64: 2>, scalar_prefetch = 0 : i64, scratch_operands = 1 : i64, tpu.core_type = #tpu.core_type<tc>, window_params = [{transform_indices = @transform_0, window_bounds = array<i64: 1, 16, 128>}, {transform_indices = @transform_1, window_bounds = array<i64: 1, 16, 128>}, {pipeline_mode = #tpu.pipeline_mode<synchronous>, transform_indices = @transform_2, window_bounds = array<i64: 128, 128>}, {pipeline_mode = #tpu.pipeline_mode<synchronous>, transform_indices = @transform_3, window_bounds = array<i64: 128, 128>}, {pipeline_mode = #tpu.pipeline_mode<synchronous>, transform_indices = @transform_4, window_bounds = array<i64: 128, 128>}, {pipeline_mode = #tpu.pipeline_mode<synchronous>, transform_indices = @transform_5, window_bounds = array<i64: 128, 128>}, {pipeline_mode = #tpu.pipeline_mode<synchronous>, transform_indices = @transform_6, window_bounds = array<i64: 128, 128>}, {pipeline_mode = #tpu.pipeline_mode<synchronous>, transform_indices = @transform_7, window_bounds = array<i64: 128, 128>}, {pipeline_mode = #tpu.pipeline_mode<synchronous>, transform_indices = @transform_8, window_bounds = array<i64: 128, 128>}, {pipeline_mode = #tpu.pipeline_mode<synchronous>, transform_indices = @transform_9, window_bounds = array<i64: 16, 16>}, {transform_indices = @transform_10, window_bounds = array<i64: 1, 16, 128>}]} {
    %c0 = arith.constant 0 : index
    %c0_0 = arith.constant 0 : index
    %c0_1 = arith.constant 0 : index
    %0 = vector.load %arg1[%c0, %c0_0, %c0_1] : memref<1x16x128xf32, #tpu.memory_space<vmem>>, vector<1x16x128xf32>
    %1 = vector.shape_cast %0 : vector<1x16x128xf32> to vector<16x128xf32>
    %2 = arith.truncf %1 : vector<16x128xf32> to vector<16x128xbf16>
    %c0_2 = arith.constant 0 : index
    %c0_3 = arith.constant 0 : index
    %3 = vector.load %arg3[%c0_2, %c0_3] : memref<128x128xbf16, #tpu.memory_space<vmem>>, vector<128x128xbf16>
    %cst = arith.constant dense<0.000000e+00> : vector<16x128xf32>
    %4 = tpu.matmul %2, %3, %cst {dimension_numbers = #tpu.dot_dimension_numbers<[1], [0], [0], [1], [0, 0, 1, 1], [], []>} : vector<16x128xbf16>, vector<128x128xbf16>, vector<16x128xf32> -> vector<16x128xf32>
    %c0_4 = arith.constant 0 : index
    %c0_5 = arith.constant 0 : index
    %5 = vector.load %arg4[%c0_4, %c0_5] : memref<128x128xbf16, #tpu.memory_space<vmem>>, vector<128x128xbf16>
    %cst_6 = arith.constant dense<0.000000e+00> : vector<16x128xf32>
    %6 = tpu.matmul %2, %5, %cst_6 {dimension_numbers = #tpu.dot_dimension_numbers<[1], [0], [0], [1], [0, 0, 1, 1], [], []>} : vector<16x128xbf16>, vector<128x128xbf16>, vector<16x128xf32> -> vector<16x128xf32>
    %c0_7 = arith.constant 0 : index
    %c0_8 = arith.constant 0 : index
    %7 = vector.load %arg5[%c0_7, %c0_8] : memref<128x128xbf16, #tpu.memory_space<vmem>>, vector<128x128xbf16>
    %cst_9 = arith.constant dense<0.000000e+00> : vector<16x128xf32>
    %8 = tpu.matmul %2, %7, %cst_9 {dimension_numbers = #tpu.dot_dimension_numbers<[1], [0], [0], [1], [0, 0, 1, 1], [], []>} : vector<16x128xbf16>, vector<128x128xbf16>, vector<16x128xf32> -> vector<16x128xf32>
    %9 = arith.truncf %4 : vector<16x128xf32> to vector<16x128xbf16>
    %10 = arith.truncf %6 : vector<16x128xf32> to vector<16x128xbf16>
    %cst_10 = arith.constant dense<0.000000e+00> : vector<128x128xf32>
    %11 = tpu.matmul %9, %10, %cst_10 {dimension_numbers = #tpu.dot_dimension_numbers<[0], [0], [1], [1], [0, 1, 1, 1], [], []>} : vector<16x128xbf16>, vector<16x128xbf16>, vector<128x128xf32> -> vector<128x128xf32>
    %12 = vector.shape_cast %11 : vector<128x128xf32> to vector<1x128x128xf32>
    %cst_11 = arith.constant dense<0.000000e+00> : vector<1xf32>
    %13 = vector.multi_reduction <add>, %12, %cst_11 [1, 2] : vector<1x128x128xf32> to vector<1xf32>
    %14 = vector.shape_cast %13 : vector<1xf32> to vector<1x1x1xf32>
    %15 = vector.extract %14[0, 0, 0] : f32 from vector<1x1x1xf32>
    %cst_12 = arith.constant 1.638400e+04 : f32
    %16 = arith.divf %15, %cst_12 : f32
    %17 = vector.broadcast %16 : f32 to vector<128x128xf32>
    %18 = arith.subf %11, %17 : vector<128x128xf32>
    %19 = arith.mulf %18, %18 : vector<128x128xf32>
    %20 = vector.shape_cast %19 : vector<128x128xf32> to vector<1x128x128xf32>
    %cst_13 = arith.constant dense<0.000000e+00> : vector<1xf32>
    %21 = vector.multi_reduction <add>, %20, %cst_13 [1, 2] : vector<1x128x128xf32> to vector<1xf32>
    %22 = vector.shape_cast %21 : vector<1xf32> to vector<1x1x1xf32>
    %23 = vector.extract %22[0, 0, 0] : f32 from vector<1x1x1xf32>
    %cst_14 = arith.constant 1.638400e+04 : f32
    %24 = arith.divf %23, %cst_14 : f32
    %25 = vector.broadcast %16 : f32 to vector<128x128xf32>
    %26 = arith.subf %11, %25 : vector<128x128xf32>
    %cst_15 = arith.constant 9.99999974E-6 : f32
    %27 = arith.addf %24, %cst_15 : f32
    %28 = math.rsqrt %27 : f32
    %29 = vector.broadcast %28 : f32 to vector<128x128xf32>
    %30 = arith.mulf %26, %29 : vector<128x128xf32>
    %cst_16 = arith.constant dense<0xFF800000> : vector<128xf32>
    %31 = vector.multi_reduction <maximumf>, %30, %cst_16 [1] : vector<128x128xf32> to vector<128xf32>
    %32 = vector.shape_cast %31 : vector<128xf32> to vector<128x1xf32>
    %33 = vector.broadcast %32 : vector<128x1xf32> to vector<128x128xf32>
    %34 = arith.subf %30, %33 : vector<128x128xf32>
    %35 = math.exp %34 : vector<128x128xf32>
    %cst_17 = arith.constant dense<0.000000e+00> : vector<128xf32>
    %36 = vector.multi_reduction <add>, %35, %cst_17 [1] : vector<128x128xf32> to vector<128xf32>
    %37 = vector.shape_cast %36 : vector<128xf32> to vector<128x1xf32>
    %38 = tpu.reciprocal %37 {approx = true} : vector<128x1xf32> -> vector<128x1xf32>
    %39 = vector.broadcast %38 : vector<128x1xf32> to vector<128x128xf32>
    %40 = arith.mulf %35, %39 : vector<128x128xf32>
    %41 = arith.truncf %8 : vector<16x128xf32> to vector<16x128xbf16>
    %42 = arith.truncf %40 : vector<128x128xf32> to vector<128x128xbf16>
    %cst_18 = arith.constant dense<0.000000e+00> : vector<16x128xf32>
    %43 = tpu.matmul %41, %42, %cst_18 {dimension_numbers = #tpu.dot_dimension_numbers<[1], [1], [0], [0], [0, 0, 1, 0], [], []>} : vector<16x128xbf16>, vector<128x128xbf16>, vector<16x128xf32> -> vector<16x128xf32>
    %44 = arith.truncf %43 : vector<16x128xf32> to vector<16x128xbf16>
    %c0_19 = arith.constant 0 : index
    %c0_20 = arith.constant 0 : index
    %45 = vector.load %arg7[%c0_19, %c0_20] : memref<128x128xbf16, #tpu.memory_space<vmem>>, vector<128x128xbf16>
    %cst_21 = arith.constant dense<0.000000e+00> : vector<16x128xf32>
    %46 = tpu.matmul %44, %45, %cst_21 {dimension_numbers = #tpu.dot_dimension_numbers<[1], [0], [0], [1], [0, 0, 1, 1], [], []>} : vector<16x128xbf16>, vector<128x128xbf16>, vector<16x128xf32> -> vector<16x128xf32>
    %47 = arith.truncf %46 : vector<16x128xf32> to vector<16x128xbf16>
    %c0_22 = arith.constant 0 : index
    %c0_23 = arith.constant 0 : index
    %48 = vector.load %arg8[%c0_22, %c0_23] : memref<128x128xbf16, #tpu.memory_space<vmem>>, vector<128x128xbf16>
    %cst_24 = arith.constant dense<0.000000e+00> : vector<16x128xf32>
    %49 = tpu.matmul %44, %48, %cst_24 {dimension_numbers = #tpu.dot_dimension_numbers<[1], [0], [0], [1], [0, 0, 1, 1], [], []>} : vector<16x128xbf16>, vector<128x128xbf16>, vector<16x128xf32> -> vector<16x128xf32>
    %50 = arith.truncf %49 : vector<16x128xf32> to vector<16x128xbf16>
    %c0_25 = arith.constant 0 : index
    %c0_26 = arith.constant 0 : index
    %c0_27 = arith.constant 0 : index
    %51 = vector.load %arg2[%c0_25, %c0_26, %c0_27] : memref<1x16x128xf32, #tpu.memory_space<vmem>>, vector<1x16x128xf32>
    %52 = vector.shape_cast %51 : vector<1x16x128xf32> to vector<16x128xf32>
    %53 = arith.truncf %52 : vector<16x128xf32> to vector<16x128xbf16>
    %c0_28 = arith.constant 0 : index
    %c0_29 = arith.constant 0 : index
    %54 = vector.load %arg6[%c0_28, %c0_29] : memref<128x128xbf16, #tpu.memory_space<vmem>>, vector<128x128xbf16>
    %cst_30 = arith.constant dense<0.000000e+00> : vector<16x128xf32>
    %55 = tpu.matmul %53, %54, %cst_30 {dimension_numbers = #tpu.dot_dimension_numbers<[1], [0], [0], [1], [0, 0, 1, 1], [], []>} : vector<16x128xbf16>, vector<128x128xbf16>, vector<16x128xf32> -> vector<16x128xf32>
    %56 = arith.truncf %55 : vector<16x128xf32> to vector<16x128xbf16>
    %c0_31 = arith.constant 0 : index
    %c0_32 = arith.constant 0 : index
    %57 = vector.load %arg10[%c0_31, %c0_32] : memref<16x16xbf16, #tpu.memory_space<vmem>>, vector<16x16xbf16>
    %58 = vector.extract_strided_slice %47 {offsets = [0, 0], sizes = [16, 8], strides = [1, 1]} : vector<16x128xbf16> to vector<16x8xbf16>
    %59 = vector.extract_strided_slice %47 {offsets = [0, 32], sizes = [16, 8], strides = [1, 1]} : vector<16x128xbf16> to vector<16x8xbf16>
    %60 = vector.extract_strided_slice %47 {offsets = [0, 64], sizes = [16, 8], strides = [1, 1]} : vector<16x128xbf16> to vector<16x8xbf16>
    %61 = vector.extract_strided_slice %47 {offsets = [0, 96], sizes = [16, 8], strides = [1, 1]} : vector<16x128xbf16> to vector<16x8xbf16>
    %62 = tpu.concatenate %58, %59, %60, %61 in 0 : vector<16x8xbf16>, vector<16x8xbf16>, vector<16x8xbf16>, vector<16x8xbf16> -> vector<64x8xbf16>
    %63 = vector.extract_strided_slice %50 {offsets = [0, 0], sizes = [16, 8], strides = [1, 1]} : vector<16x128xbf16> to vector<16x8xbf16>
    %64 = vector.extract_strided_slice %50 {offsets = [0, 32], sizes = [16, 8], strides = [1, 1]} : vector<16x128xbf16> to vector<16x8xbf16>
    %65 = vector.extract_strided_slice %50 {offsets = [0, 64], sizes = [16, 8], strides = [1, 1]} : vector<16x128xbf16> to vector<16x8xbf16>
    %66 = vector.extract_strided_slice %50 {offsets = [0, 96], sizes = [16, 8], strides = [1, 1]} : vector<16x128xbf16> to vector<16x8xbf16>
    %67 = tpu.concatenate %63, %64, %65, %66 in 0 : vector<16x8xbf16>, vector<16x8xbf16>, vector<16x8xbf16>, vector<16x8xbf16> -> vector<64x8xbf16>
    %68 = vector.extract_strided_slice %56 {offsets = [0, 0], sizes = [16, 8], strides = [1, 1]} : vector<16x128xbf16> to vector<16x8xbf16>
    %cst_33 = arith.constant dense<0.000000e+00> : vector<16x64xf32>
    %69 = tpu.matmul %68, %62, %cst_33 {dimension_numbers = #tpu.dot_dimension_numbers<[1], [1], [0], [0], [0, 0, 1, 0], [], []>} : vector<16x8xbf16>, vector<64x8xbf16>, vector<16x64xf32> -> vector<16x64xf32>
    %70 = vector.shape_cast %69 : vector<16x64xf32> to vector<1x16x64xf32>
    %cst_34 = arith.constant dense<0.000000e+00> : vector<1xf32>
    %71 = vector.multi_reduction <add>, %70, %cst_34 [1, 2] : vector<1x16x64xf32> to vector<1xf32>
    %72 = vector.shape_cast %71 : vector<1xf32> to vector<1x1x1xf32>
    %73 = vector.extract %72[0, 0, 0] : f32 from vector<1x1x1xf32>
    %cst_35 = arith.constant 1.024000e+03 : f32
    %74 = arith.divf %73, %cst_35 : f32
    %75 = vector.broadcast %74 : f32 to vector<16x64xf32>
    %76 = arith.subf %69, %75 : vector<16x64xf32>
    %77 = arith.mulf %76, %76 : vector<16x64xf32>
    %78 = vector.shape_cast %77 : vector<16x64xf32> to vector<1x16x64xf32>
    %cst_36 = arith.constant dense<0.000000e+00> : vector<1xf32>
    %79 = vector.multi_reduction <add>, %78, %cst_36 [1, 2] : vector<1x16x64xf32> to vector<1xf32>
    %80 = vector.shape_cast %79 : vector<1xf32> to vector<1x1x1xf32>
    %81 = vector.extract %80[0, 0, 0] : f32 from vector<1x1x1xf32>
    %cst_37 = arith.constant 1.024000e+03 : f32
    %82 = arith.divf %81, %cst_37 : f32
    %83 = vector.broadcast %74 : f32 to vector<16x64xf32>
    %84 = arith.subf %69, %83 : vector<16x64xf32>
    %cst_38 = arith.constant 9.99999974E-6 : f32
    %85 = arith.addf %82, %cst_38 : f32
    %86 = math.rsqrt %85 : f32
    %87 = vector.broadcast %86 : f32 to vector<16x64xf32>
    %88 = arith.mulf %84, %87 : vector<16x64xf32>
    %cst_39 = arith.constant dense<0xFF800000> : vector<16xf32>
    %89 = vector.multi_reduction <maximumf>, %88, %cst_39 [1] : vector<16x64xf32> to vector<16xf32>
    %90 = vector.shape_cast %89 : vector<16xf32> to vector<16x1xf32>
    %91 = vector.broadcast %90 : vector<16x1xf32> to vector<16x64xf32>
    %92 = arith.subf %88, %91 : vector<16x64xf32>
    %93 = math.exp %92 : vector<16x64xf32>
    %cst_40 = arith.constant dense<0.000000e+00> : vector<16xf32>
    %94 = vector.multi_reduction <add>, %93, %cst_40 [1] : vector<16x64xf32> to vector<16xf32>
    %95 = vector.shape_cast %94 : vector<16xf32> to vector<16x1xf32>
    %96 = tpu.reciprocal %95 {approx = true} : vector<16x1xf32> -> vector<16x1xf32>
    %97 = vector.broadcast %96 : vector<16x1xf32> to vector<16x64xf32>
    %98 = arith.mulf %93, %97 : vector<16x64xf32>
    %99 = arith.truncf %98 : vector<16x64xf32> to vector<16x64xbf16>
    %cst_41 = arith.constant dense<0.000000e+00> : vector<16x8xf32>
    %100 = tpu.matmul %99, %67, %cst_41 {dimension_numbers = #tpu.dot_dimension_numbers<[1], [0], [0], [1], [0, 0, 1, 1], [], []>} : vector<16x64xbf16>, vector<64x8xbf16>, vector<16x8xf32> -> vector<16x8xf32>
    %c0_42 = arith.constant 0 : index
    %c0_43 = arith.constant 0 : index
    %101 = vector.load %arg12[%c0_42, %c0_43] : memref<16x128xf32, #tpu.memory_space<vmem>>, vector<16x8xf32>
    tpu.vector_store %arg12[%c0_42, %c0_43], %100 {strides = array<i32>} : memref<16x128xf32, #tpu.memory_space<vmem>>, vector<16x8xf32>,
    %102 = vector.extract_strided_slice %56 {offsets = [0, 32], sizes = [16, 8], strides = [1, 1]} : vector<16x128xbf16> to vector<16x8xbf16>
    %cst_44 = arith.constant dense<0.000000e+00> : vector<16x64xf32>
    %103 = tpu.matmul %102, %62, %cst_44 {dimension_numbers = #tpu.dot_dimension_numbers<[1], [1], [0], [0], [0, 0, 1, 0], [], []>} : vector<16x8xbf16>, vector<64x8xbf16>, vector<16x64xf32> -> vector<16x64xf32>
    %104 = vector.shape_cast %103 : vector<16x64xf32> to vector<1x16x64xf32>
    %cst_45 = arith.constant dense<0.000000e+00> : vector<1xf32>
    %105 = vector.multi_reduction <add>, %104, %cst_45 [1, 2] : vector<1x16x64xf32> to vector<1xf32>
    %106 = vector.shape_cast %105 : vector<1xf32> to vector<1x1x1xf32>
    %107 = vector.extract %106[0, 0, 0] : f32 from vector<1x1x1xf32>
    %cst_46 = arith.constant 1.024000e+03 : f32
    %108 = arith.divf %107, %cst_46 : f32
    %109 = vector.broadcast %108 : f32 to vector<16x64xf32>
    %110 = arith.subf %103, %109 : vector<16x64xf32>
    %111 = arith.mulf %110, %110 : vector<16x64xf32>
    %112 = vector.shape_cast %111 : vector<16x64xf32> to vector<1x16x64xf32>
    %cst_47 = arith.constant dense<0.000000e+00> : vector<1xf32>
    %113 = vector.multi_reduction <add>, %112, %cst_47 [1, 2] : vector<1x16x64xf32> to vector<1xf32>
    %114 = vector.shape_cast %113 : vector<1xf32> to vector<1x1x1xf32>
    %115 = vector.extract %114[0, 0, 0] : f32 from vector<1x1x1xf32>
    %cst_48 = arith.constant 1.024000e+03 : f32
    %116 = arith.divf %115, %cst_48 : f32
    %117 = vector.broadcast %108 : f32 to vector<16x64xf32>
    %118 = arith.subf %103, %117 : vector<16x64xf32>
    %cst_49 = arith.constant 9.99999974E-6 : f32
    %119 = arith.addf %116, %cst_49 : f32
    %120 = math.rsqrt %119 : f32
    %121 = vector.broadcast %120 : f32 to vector<16x64xf32>
    %122 = arith.mulf %118, %121 : vector<16x64xf32>
    %cst_50 = arith.constant dense<0xFF800000> : vector<16xf32>
    %123 = vector.multi_reduction <maximumf>, %122, %cst_50 [1] : vector<16x64xf32> to vector<16xf32>
    %124 = vector.shape_cast %123 : vector<16xf32> to vector<16x1xf32>
    %125 = vector.broadcast %124 : vector<16x1xf32> to vector<16x64xf32>
    %126 = arith.subf %122, %125 : vector<16x64xf32>
    %127 = math.exp %126 : vector<16x64xf32>
    %cst_51 = arith.constant dense<0.000000e+00> : vector<16xf32>
    %128 = vector.multi_reduction <add>, %127, %cst_51 [1] : vector<16x64xf32> to vector<16xf32>
    %129 = vector.shape_cast %128 : vector<16xf32> to vector<16x1xf32>
    %130 = tpu.reciprocal %129 {approx = true} : vector<16x1xf32> -> vector<16x1xf32>
    %131 = vector.broadcast %130 : vector<16x1xf32> to vector<16x64xf32>
    %132 = arith.mulf %127, %131 : vector<16x64xf32>
    %133 = arith.truncf %132 : vector<16x64xf32> to vector<16x64xbf16>
    %cst_52 = arith.constant dense<0.000000e+00> : vector<16x8xf32>
    %134 = tpu.matmul %133, %67, %cst_52 {dimension_numbers = #tpu.dot_dimension_numbers<[1], [0], [0], [1], [0, 0, 1, 1], [], []>} : vector<16x64xbf16>, vector<64x8xbf16>, vector<16x8xf32> -> vector<16x8xf32>
    %135 = arith.truncf %134 : vector<16x8xf32> to vector<16x8xbf16>
    %cst_53 = arith.constant dense<0.000000e+00> : vector<16x8xf32>
    %136 = tpu.matmul %57, %135, %cst_53 {dimension_numbers = #tpu.dot_dimension_numbers<[1], [0], [0], [1], [0, 0, 1, 1], [], []>} : vector<16x16xbf16>, vector<16x8xbf16>, vector<16x8xf32> -> vector<16x8xf32>
    %137 = vector.extract_strided_slice %136 {offsets = [0, 0], sizes = [4, 8], strides = [1, 1]} : vector<16x8xf32> to vector<4x8xf32>
    %c0_54 = arith.constant 0 : index
    %c32 = arith.constant 32 : index
    %138 = vector.load %arg12[%c0_54, %c32] : memref<16x128xf32, #tpu.memory_space<vmem>>, vector<4x8xf32>
    tpu.vector_store %arg12[%c0_54, %c32], %137 {strides = array<i32>} : memref<16x128xf32, #tpu.memory_space<vmem>>, vector<4x8xf32>,
    %139 = vector.extract_strided_slice %136 {offsets = [4, 0], sizes = [4, 8], strides = [1, 1]} : vector<16x8xf32> to vector<4x8xf32>
    %c0_55 = arith.constant 0 : index
    %c40 = arith.constant 40 : index
    %140 = vector.load %arg12[%c0_55, %c40] : memref<16x128xf32, #tpu.memory_space<vmem>>, vector<4x8xf32>
    tpu.vector_store %arg12[%c0_55, %c40], %139 {strides = array<i32>} : memref<16x128xf32, #tpu.memory_space<vmem>>, vector<4x8xf32>,
    %141 = vector.extract_strided_slice %136 {offsets = [8, 0], sizes = [4, 8], strides = [1, 1]} : vector<16x8xf32> to vector<4x8xf32>
    %c0_56 = arith.constant 0 : index
    %c48 = arith.constant 48 : index
    %142 = vector.load %arg12[%c0_56, %c48] : memref<16x128xf32, #tpu.memory_space<vmem>>, vector<4x8xf32>
    tpu.vector_store %arg12[%c0_56, %c48], %141 {strides = array<i32>} : memref<16x128xf32, #tpu.memory_space<vmem>>, vector<4x8xf32>,
    %143 = vector.extract_strided_slice %136 {offsets = [12, 0], sizes = [4, 8], strides = [1, 1]} : vector<16x8xf32> to vector<4x8xf32>
    %c0_57 = arith.constant 0 : index
    %c56 = arith.constant 56 : index
    %144 = vector.load %arg12[%c0_57, %c56] : memref<16x128xf32, #tpu.memory_space<vmem>>, vector<4x8xf32>
    tpu.vector_store %arg12[%c0_57, %c56], %143 {strides = array<i32>} : memref<16x128xf32, #tpu.memory_space<vmem>>, vector<4x8xf32>,
    %145 = vector.extract_strided_slice %56 {offsets = [0, 64], sizes = [16, 8], strides = [1, 1]} : vector<16x128xbf16> to vector<16x8xbf16>
    %cst_58 = arith.constant dense<0.000000e+00> : vector<16x64xf32>
    %146 = tpu.matmul %145, %62, %cst_58 {dimension_numbers = #tpu.dot_dimension_numbers<[1], [1], [0], [0], [0, 0, 1, 0], [], []>} : vector<16x8xbf16>, vector<64x8xbf16>, vector<16x64xf32> -> vector<16x64xf32>
    %147 = vector.shape_cast %146 : vector<16x64xf32> to vector<1x16x64xf32>
    %cst_59 = arith.constant dense<0.000000e+00> : vector<1xf32>
    %148 = vector.multi_reduction <add>, %147, %cst_59 [1, 2] : vector<1x16x64xf32> to vector<1xf32>
    %149 = vector.shape_cast %148 : vector<1xf32> to vector<1x1x1xf32>
    %150 = vector.extract %149[0, 0, 0] : f32 from vector<1x1x1xf32>
    %cst_60 = arith.constant 1.024000e+03 : f32
    %151 = arith.divf %150, %cst_60 : f32
    %152 = vector.broadcast %151 : f32 to vector<16x64xf32>
    %153 = arith.subf %146, %152 : vector<16x64xf32>
    %154 = arith.mulf %153, %153 : vector<16x64xf32>
    %155 = vector.shape_cast %154 : vector<16x64xf32> to vector<1x16x64xf32>
    %cst_61 = arith.constant dense<0.000000e+00> : vector<1xf32>
    %156 = vector.multi_reduction <add>, %155, %cst_61 [1, 2] : vector<1x16x64xf32> to vector<1xf32>
    %157 = vector.shape_cast %156 : vector<1xf32> to vector<1x1x1xf32>
    %158 = vector.extract %157[0, 0, 0] : f32 from vector<1x1x1xf32>
    %cst_62 = arith.constant 1.024000e+03 : f32
    %159 = arith.divf %158, %cst_62 : f32
    %160 = vector.broadcast %151 : f32 to vector<16x64xf32>
    %161 = arith.subf %146, %160 : vector<16x64xf32>
    %cst_63 = arith.constant 9.99999974E-6 : f32
    %162 = arith.addf %159, %cst_63 : f32
    %163 = math.rsqrt %162 : f32
    %164 = vector.broadcast %163 : f32 to vector<16x64xf32>
    %165 = arith.mulf %161, %164 : vector<16x64xf32>
    %cst_64 = arith.constant dense<0xFF800000> : vector<16xf32>
    %166 = vector.multi_reduction <maximumf>, %165, %cst_64 [1] : vector<16x64xf32> to vector<16xf32>
    %167 = vector.shape_cast %166 : vector<16xf32> to vector<16x1xf32>
    %168 = vector.broadcast %167 : vector<16x1xf32> to vector<16x64xf32>
    %169 = arith.subf %165, %168 : vector<16x64xf32>
    %170 = math.exp %169 : vector<16x64xf32>
    %cst_65 = arith.constant dense<0.000000e+00> : vector<16xf32>
    %171 = vector.multi_reduction <add>, %170, %cst_65 [1] : vector<16x64xf32> to vector<16xf32>
    %172 = vector.shape_cast %171 : vector<16xf32> to vector<16x1xf32>
    %173 = tpu.reciprocal %172 {approx = true} : vector<16x1xf32> -> vector<16x1xf32>
    %174 = vector.broadcast %173 : vector<16x1xf32> to vector<16x64xf32>
    %175 = arith.mulf %170, %174 : vector<16x64xf32>
    %176 = arith.truncf %175 : vector<16x64xf32> to vector<16x64xbf16>
    %cst_66 = arith.constant dense<0.000000e+00> : vector<16x8xf32>
    %177 = tpu.matmul %176, %67, %cst_66 {dimension_numbers = #tpu.dot_dimension_numbers<[1], [0], [0], [1], [0, 0, 1, 1], [], []>} : vector<16x64xbf16>, vector<64x8xbf16>, vector<16x8xf32> -> vector<16x8xf32>
    %178 = arith.truncf %177 : vector<16x8xf32> to vector<16x8xbf16>
    %cst_67 = arith.constant dense<0.000000e+00> : vector<16x8xf32>
    %179 = tpu.matmul %57, %178, %cst_67 {dimension_numbers = #tpu.dot_dimension_numbers<[1], [0], [0], [1], [0, 0, 1, 1], [], []>} : vector<16x16xbf16>, vector<16x8xbf16>, vector<16x8xf32> -> vector<16x8xf32>
    %180 = vector.extract_strided_slice %179 {offsets = [0, 0], sizes = [4, 8], strides = [1, 1]} : vector<16x8xf32> to vector<4x8xf32>
    %c0_68 = arith.constant 0 : index
    %c64 = arith.constant 64 : index
    %181 = vector.load %arg12[%c0_68, %c64] : memref<16x128xf32, #tpu.memory_space<vmem>>, vector<4x8xf32>
    tpu.vector_store %arg12[%c0_68, %c64], %180 {strides = array<i32>} : memref<16x128xf32, #tpu.memory_space<vmem>>, vector<4x8xf32>,
    %182 = vector.extract_strided_slice %179 {offsets = [4, 0], sizes = [4, 8], strides = [1, 1]} : vector<16x8xf32> to vector<4x8xf32>
    %c0_69 = arith.constant 0 : index
    %c72 = arith.constant 72 : index
    %183 = vector.load %arg12[%c0_69, %c72] : memref<16x128xf32, #tpu.memory_space<vmem>>, vector<4x8xf32>
    tpu.vector_store %arg12[%c0_69, %c72], %182 {strides = array<i32>} : memref<16x128xf32, #tpu.memory_space<vmem>>, vector<4x8xf32>,
    %184 = vector.extract_strided_slice %179 {offsets = [8, 0], sizes = [4, 8], strides = [1, 1]} : vector<16x8xf32> to vector<4x8xf32>
    %c0_70 = arith.constant 0 : index
    %c80 = arith.constant 80 : index
    %185 = vector.load %arg12[%c0_70, %c80] : memref<16x128xf32, #tpu.memory_space<vmem>>, vector<4x8xf32>
    tpu.vector_store %arg12[%c0_70, %c80], %184 {strides = array<i32>} : memref<16x128xf32, #tpu.memory_space<vmem>>, vector<4x8xf32>,
    %186 = vector.extract_strided_slice %179 {offsets = [12, 0], sizes = [4, 8], strides = [1, 1]} : vector<16x8xf32> to vector<4x8xf32>
    %c0_71 = arith.constant 0 : index
    %c88 = arith.constant 88 : index
    %187 = vector.load %arg12[%c0_71, %c88] : memref<16x128xf32, #tpu.memory_space<vmem>>, vector<4x8xf32>
    tpu.vector_store %arg12[%c0_71, %c88], %186 {strides = array<i32>} : memref<16x128xf32, #tpu.memory_space<vmem>>, vector<4x8xf32>,
    %188 = vector.extract_strided_slice %56 {offsets = [0, 96], sizes = [16, 8], strides = [1, 1]} : vector<16x128xbf16> to vector<16x8xbf16>
    %cst_72 = arith.constant dense<0.000000e+00> : vector<16x64xf32>
    %189 = tpu.matmul %188, %62, %cst_72 {dimension_numbers = #tpu.dot_dimension_numbers<[1], [1], [0], [0], [0, 0, 1, 0], [], []>} : vector<16x8xbf16>, vector<64x8xbf16>, vector<16x64xf32> -> vector<16x64xf32>
    %190 = vector.shape_cast %189 : vector<16x64xf32> to vector<1x16x64xf32>
    %cst_73 = arith.constant dense<0.000000e+00> : vector<1xf32>
    %191 = vector.multi_reduction <add>, %190, %cst_73 [1, 2] : vector<1x16x64xf32> to vector<1xf32>
    %192 = vector.shape_cast %191 : vector<1xf32> to vector<1x1x1xf32>
    %193 = vector.extract %192[0, 0, 0] : f32 from vector<1x1x1xf32>
    %cst_74 = arith.constant 1.024000e+03 : f32
    %194 = arith.divf %193, %cst_74 : f32
    %195 = vector.broadcast %194 : f32 to vector<16x64xf32>
    %196 = arith.subf %189, %195 : vector<16x64xf32>
    %197 = arith.mulf %196, %196 : vector<16x64xf32>
    %198 = vector.shape_cast %197 : vector<16x64xf32> to vector<1x16x64xf32>
    %cst_75 = arith.constant dense<0.000000e+00> : vector<1xf32>
    %199 = vector.multi_reduction <add>, %198, %cst_75 [1, 2] : vector<1x16x64xf32> to vector<1xf32>
    %200 = vector.shape_cast %199 : vector<1xf32> to vector<1x1x1xf32>
    %201 = vector.extract %200[0, 0, 0] : f32 from vector<1x1x1xf32>
    %cst_76 = arith.constant 1.024000e+03 : f32
    %202 = arith.divf %201, %cst_76 : f32
    %203 = vector.broadcast %194 : f32 to vector<16x64xf32>
    %204 = arith.subf %189, %203 : vector<16x64xf32>
    %cst_77 = arith.constant 9.99999974E-6 : f32
    %205 = arith.addf %202, %cst_77 : f32
    %206 = math.rsqrt %205 : f32
    %207 = vector.broadcast %206 : f32 to vector<16x64xf32>
    %208 = arith.mulf %204, %207 : vector<16x64xf32>
    %cst_78 = arith.constant dense<0xFF800000> : vector<16xf32>
    %209 = vector.multi_reduction <maximumf>, %208, %cst_78 [1] : vector<16x64xf32> to vector<16xf32>
    %210 = vector.shape_cast %209 : vector<16xf32> to vector<16x1xf32>
    %211 = vector.broadcast %210 : vector<16x1xf32> to vector<16x64xf32>
    %212 = arith.subf %208, %211 : vector<16x64xf32>
    %213 = math.exp %212 : vector<16x64xf32>
    %cst_79 = arith.constant dense<0.000000e+00> : vector<16xf32>
    %214 = vector.multi_reduction <add>, %213, %cst_79 [1] : vector<16x64xf32> to vector<16xf32>
    %215 = vector.shape_cast %214 : vector<16xf32> to vector<16x1xf32>
    %216 = tpu.reciprocal %215 {approx = true} : vector<16x1xf32> -> vector<16x1xf32>
    %217 = vector.broadcast %216 : vector<16x1xf32> to vector<16x64xf32>
    %218 = arith.mulf %213, %217 : vector<16x64xf32>
    %219 = arith.truncf %218 : vector<16x64xf32> to vector<16x64xbf16>
    %cst_80 = arith.constant dense<0.000000e+00> : vector<16x8xf32>
    %220 = tpu.matmul %219, %67, %cst_80 {dimension_numbers = #tpu.dot_dimension_numbers<[1], [0], [0], [1], [0, 0, 1, 1], [], []>} : vector<16x64xbf16>, vector<64x8xbf16>, vector<16x8xf32> -> vector<16x8xf32>
    %221 = arith.truncf %220 : vector<16x8xf32> to vector<16x8xbf16>
    %cst_81 = arith.constant dense<0.000000e+00> : vector<16x8xf32>
    %222 = tpu.matmul %57, %221, %cst_81 {dimension_numbers = #tpu.dot_dimension_numbers<[1], [0], [0], [1], [0, 0, 1, 1], [], []>} : vector<16x16xbf16>, vector<16x8xbf16>, vector<16x8xf32> -> vector<16x8xf32>
    %223 = vector.extract_strided_slice %222 {offsets = [0, 0], sizes = [4, 8], strides = [1, 1]} : vector<16x8xf32> to vector<4x8xf32>
    %c0_82 = arith.constant 0 : index
    %c96 = arith.constant 96 : index
    %224 = vector.load %arg12[%c0_82, %c96] : memref<16x128xf32, #tpu.memory_space<vmem>>, vector<4x8xf32>
    tpu.vector_store %arg12[%c0_82, %c96], %223 {strides = array<i32>} : memref<16x128xf32, #tpu.memory_space<vmem>>, vector<4x8xf32>,
    %225 = vector.extract_strided_slice %222 {offsets = [4, 0], sizes = [4, 8], strides = [1, 1]} : vector<16x8xf32> to vector<4x8xf32>
    %c0_83 = arith.constant 0 : index
    %c104 = arith.constant 104 : index
    %226 = vector.load %arg12[%c0_83, %c104] : memref<16x128xf32, #tpu.memory_space<vmem>>, vector<4x8xf32>
    tpu.vector_store %arg12[%c0_83, %c104], %225 {strides = array<i32>} : memref<16x128xf32, #tpu.memory_space<vmem>>, vector<4x8xf32>,
    %227 = vector.extract_strided_slice %222 {offsets = [8, 0], sizes = [4, 8], strides = [1, 1]} : vector<16x8xf32> to vector<4x8xf32>
    %c0_84 = arith.constant 0 : index
    %c112 = arith.constant 112 : index
    %228 = vector.load %arg12[%c0_84, %c112] : memref<16x128xf32, #tpu.memory_space<vmem>>, vector<4x8xf32>
    tpu.vector_store %arg12[%c0_84, %c112], %227 {strides = array<i32>} : memref<16x128xf32, #tpu.memory_space<vmem>>, vector<4x8xf32>,
    %229 = vector.extract_strided_slice %222 {offsets = [12, 0], sizes = [4, 8], strides = [1, 1]} : vector<16x8xf32> to vector<4x8xf32>
    %c0_85 = arith.constant 0 : index
    %c120 = arith.constant 120 : index
    %230 = vector.load %arg12[%c0_85, %c120] : memref<16x128xf32, #tpu.memory_space<vmem>>, vector<4x8xf32>
    tpu.vector_store %arg12[%c0_85, %c120], %229 {strides = array<i32>} : memref<16x128xf32, #tpu.memory_space<vmem>>, vector<4x8xf32>,
    %231 = vector.extract_strided_slice %47 {offsets = [0, 8], sizes = [16, 8], strides = [1, 1]} : vector<16x128xbf16> to vector<16x8xbf16>
    %232 = vector.extract_strided_slice %47 {offsets = [0, 40], sizes = [16, 8], strides = [1, 1]} : vector<16x128xbf16> to vector<16x8xbf16>
    %233 = vector.extract_strided_slice %47 {offsets = [0, 72], sizes = [16, 8], strides = [1, 1]} : vector<16x128xbf16> to vector<16x8xbf16>
    %234 = vector.extract_strided_slice %47 {offsets = [0, 104], sizes = [16, 8], strides = [1, 1]} : vector<16x128xbf16> to vector<16x8xbf16>
    %235 = tpu.concatenate %231, %232, %233, %234 in 0 : vector<16x8xbf16>, vector<16x8xbf16>, vector<16x8xbf16>, vector<16x8xbf16> -> vector<64x8xbf16>
    %236 = vector.extract_strided_slice %50 {offsets = [0, 8], sizes = [16, 8], strides = [1, 1]} : vector<16x128xbf16> to vector<16x8xbf16>
    %237 = vector.extract_strided_slice %50 {offsets = [0, 40], sizes = [16, 8], strides = [1, 1]} : vector<16x128xbf16> to vector<16x8xbf16>
    %238 = vector.extract_strided_slice %50 {offsets = [0, 72], sizes = [16, 8], strides = [1, 1]} : vector<16x128xbf16> to vector<16x8xbf16>
    %239 = vector.extract_strided_slice %50 {offsets = [0, 104], sizes = [16, 8], strides = [1, 1]} : vector<16x128xbf16> to vector<16x8xbf16>
    %240 = tpu.concatenate %236, %237, %238, %239 in 0 : vector<16x8xbf16>, vector<16x8xbf16>, vector<16x8xbf16>, vector<16x8xbf16> -> vector<64x8xbf16>
    %241 = vector.extract_strided_slice %56 {offsets = [0, 8], sizes = [16, 8], strides = [1, 1]} : vector<16x128xbf16> to vector<16x8xbf16>
    %cst_86 = arith.constant dense<0.000000e+00> : vector<16x64xf32>
    %242 = tpu.matmul %241, %235, %cst_86 {dimension_numbers = #tpu.dot_dimension_numbers<[1], [1], [0], [0], [0, 0, 1, 0], [], []>} : vector<16x8xbf16>, vector<64x8xbf16>, vector<16x64xf32> -> vector<16x64xf32>
    %243 = vector.shape_cast %242 : vector<16x64xf32> to vector<1x16x64xf32>
    %cst_87 = arith.constant dense<0.000000e+00> : vector<1xf32>
    %244 = vector.multi_reduction <add>, %243, %cst_87 [1, 2] : vector<1x16x64xf32> to vector<1xf32>
    %245 = vector.shape_cast %244 : vector<1xf32> to vector<1x1x1xf32>
    %246 = vector.extract %245[0, 0, 0] : f32 from vector<1x1x1xf32>
    %cst_88 = arith.constant 1.024000e+03 : f32
    %247 = arith.divf %246, %cst_88 : f32
    %248 = vector.broadcast %247 : f32 to vector<16x64xf32>
    %249 = arith.subf %242, %248 : vector<16x64xf32>
    %250 = arith.mulf %249, %249 : vector<16x64xf32>
    %251 = vector.shape_cast %250 : vector<16x64xf32> to vector<1x16x64xf32>
    %cst_89 = arith.constant dense<0.000000e+00> : vector<1xf32>
    %252 = vector.multi_reduction <add>, %251, %cst_89 [1, 2] : vector<1x16x64xf32> to vector<1xf32>
    %253 = vector.shape_cast %252 : vector<1xf32> to vector<1x1x1xf32>
    %254 = vector.extract %253[0, 0, 0] : f32 from vector<1x1x1xf32>
    %cst_90 = arith.constant 1.024000e+03 : f32
    %255 = arith.divf %254, %cst_90 : f32
    %256 = vector.broadcast %247 : f32 to vector<16x64xf32>
    %257 = arith.subf %242, %256 : vector<16x64xf32>
    %cst_91 = arith.constant 9.99999974E-6 : f32
    %258 = arith.addf %255, %cst_91 : f32
    %259 = math.rsqrt %258 : f32
    %260 = vector.broadcast %259 : f32 to vector<16x64xf32>
    %261 = arith.mulf %257, %260 : vector<16x64xf32>
    %cst_92 = arith.constant dense<0xFF800000> : vector<16xf32>
    %262 = vector.multi_reduction <maximumf>, %261, %cst_92 [1] : vector<16x64xf32> to vector<16xf32>
    %263 = vector.shape_cast %262 : vector<16xf32> to vector<16x1xf32>
    %264 = vector.broadcast %263 : vector<16x1xf32> to vector<16x64xf32>
    %265 = arith.subf %261, %264 : vector<16x64xf32>
    %266 = math.exp %265 : vector<16x64xf32>
    %cst_93 = arith.constant dense<0.000000e+00> : vector<16xf32>
    %267 = vector.multi_reduction <add>, %266, %cst_93 [1] : vector<16x64xf32> to vector<16xf32>
    %268 = vector.shape_cast %267 : vector<16xf32> to vector<16x1xf32>
    %269 = tpu.reciprocal %268 {approx = true} : vector<16x1xf32> -> vector<16x1xf32>
    %270 = vector.broadcast %269 : vector<16x1xf32> to vector<16x64xf32>
    %271 = arith.mulf %266, %270 : vector<16x64xf32>
    %272 = arith.truncf %271 : vector<16x64xf32> to vector<16x64xbf16>
    %cst_94 = arith.constant dense<0.000000e+00> : vector<16x8xf32>
    %273 = tpu.matmul %272, %240, %cst_94 {dimension_numbers = #tpu.dot_dimension_numbers<[1], [0], [0], [1], [0, 0, 1, 1], [], []>} : vector<16x64xbf16>, vector<64x8xbf16>, vector<16x8xf32> -> vector<16x8xf32>
    %c0_95 = arith.constant 0 : index
    %c8 = arith.constant 8 : index
    %274 = vector.load %arg12[%c0_95, %c8] : memref<16x128xf32, #tpu.memory_space<vmem>>, vector<16x8xf32>
    tpu.vector_store %arg12[%c0_95, %c8], %273 {strides = array<i32>} : memref<16x128xf32, #tpu.memory_space<vmem>>, vector<16x8xf32>,
    %275 = vector.extract_strided_slice %56 {offsets = [0, 40], sizes = [16, 8], strides = [1, 1]} : vector<16x128xbf16> to vector<16x8xbf16>
    %cst_96 = arith.constant dense<0.000000e+00> : vector<16x64xf32>
    %276 = tpu.matmul %275, %235, %cst_96 {dimension_numbers = #tpu.dot_dimension_numbers<[1], [1], [0], [0], [0, 0, 1, 0], [], []>} : vector<16x8xbf16>, vector<64x8xbf16>, vector<16x64xf32> -> vector<16x64xf32>
    %277 = vector.shape_cast %276 : vector<16x64xf32> to vector<1x16x64xf32>
    %cst_97 = arith.constant dense<0.000000e+00> : vector<1xf32>
    %278 = vector.multi_reduction <add>, %277, %cst_97 [1, 2] : vector<1x16x64xf32> to vector<1xf32>
    %279 = vector.shape_cast %278 : vector<1xf32> to vector<1x1x1xf32>
    %280 = vector.extract %279[0, 0, 0] : f32 from vector<1x1x1xf32>
    %cst_98 = arith.constant 1.024000e+03 : f32
    %281 = arith.divf %280, %cst_98 : f32
    %282 = vector.broadcast %281 : f32 to vector<16x64xf32>
    %283 = arith.subf %276, %282 : vector<16x64xf32>
    %284 = arith.mulf %283, %283 : vector<16x64xf32>
    %285 = vector.shape_cast %284 : vector<16x64xf32> to vector<1x16x64xf32>
    %cst_99 = arith.constant dense<0.000000e+00> : vector<1xf32>
    %286 = vector.multi_reduction <add>, %285, %cst_99 [1, 2] : vector<1x16x64xf32> to vector<1xf32>
    %287 = vector.shape_cast %286 : vector<1xf32> to vector<1x1x1xf32>
    %288 = vector.extract %287[0, 0, 0] : f32 from vector<1x1x1xf32>
    %cst_100 = arith.constant 1.024000e+03 : f32
    %289 = arith.divf %288, %cst_100 : f32
    %290 = vector.broadcast %281 : f32 to vector<16x64xf32>
    %291 = arith.subf %276, %290 : vector<16x64xf32>
    %cst_101 = arith.constant 9.99999974E-6 : f32
    %292 = arith.addf %289, %cst_101 : f32
    %293 = math.rsqrt %292 : f32
    %294 = vector.broadcast %293 : f32 to vector<16x64xf32>
    %295 = arith.mulf %291, %294 : vector<16x64xf32>
    %cst_102 = arith.constant dense<0xFF800000> : vector<16xf32>
    %296 = vector.multi_reduction <maximumf>, %295, %cst_102 [1] : vector<16x64xf32> to vector<16xf32>
    %297 = vector.shape_cast %296 : vector<16xf32> to vector<16x1xf32>
    %298 = vector.broadcast %297 : vector<16x1xf32> to vector<16x64xf32>
    %299 = arith.subf %295, %298 : vector<16x64xf32>
    %300 = math.exp %299 : vector<16x64xf32>
    %cst_103 = arith.constant dense<0.000000e+00> : vector<16xf32>
    %301 = vector.multi_reduction <add>, %300, %cst_103 [1] : vector<16x64xf32> to vector<16xf32>
    %302 = vector.shape_cast %301 : vector<16xf32> to vector<16x1xf32>
    %303 = tpu.reciprocal %302 {approx = true} : vector<16x1xf32> -> vector<16x1xf32>
    %304 = vector.broadcast %303 : vector<16x1xf32> to vector<16x64xf32>
    %305 = arith.mulf %300, %304 : vector<16x64xf32>
    %306 = arith.truncf %305 : vector<16x64xf32> to vector<16x64xbf16>
    %cst_104 = arith.constant dense<0.000000e+00> : vector<16x8xf32>
    %307 = tpu.matmul %306, %240, %cst_104 {dimension_numbers = #tpu.dot_dimension_numbers<[1], [0], [0], [1], [0, 0, 1, 1], [], []>} : vector<16x64xbf16>, vector<64x8xbf16>, vector<16x8xf32> -> vector<16x8xf32>
    %308 = arith.truncf %307 : vector<16x8xf32> to vector<16x8xbf16>
    %cst_105 = arith.constant dense<0.000000e+00> : vector<16x8xf32>
    %309 = tpu.matmul %57, %308, %cst_105 {dimension_numbers = #tpu.dot_dimension_numbers<[1], [0], [0], [1], [0, 0, 1, 1], [], []>} : vector<16x16xbf16>, vector<16x8xbf16>, vector<16x8xf32> -> vector<16x8xf32>
    %310 = vector.extract_strided_slice %309 {offsets = [0, 0], sizes = [4, 8], strides = [1, 1]} : vector<16x8xf32> to vector<4x8xf32>
    %c4 = arith.constant 4 : index
    %c32_106 = arith.constant 32 : index
    %311 = vector.load %arg12[%c4, %c32_106] : memref<16x128xf32, #tpu.memory_space<vmem>>, vector<4x8xf32>
    tpu.vector_store %arg12[%c4, %c32_106], %310 {strides = array<i32>} : memref<16x128xf32, #tpu.memory_space<vmem>>, vector<4x8xf32>,
    %312 = vector.extract_strided_slice %309 {offsets = [4, 0], sizes = [4, 8], strides = [1, 1]} : vector<16x8xf32> to vector<4x8xf32>
    %c4_107 = arith.constant 4 : index
    %c40_108 = arith.constant 40 : index
    %313 = vector.load %arg12[%c4_107, %c40_108] : memref<16x128xf32, #tpu.memory_space<vmem>>, vector<4x8xf32>
    tpu.vector_store %arg12[%c4_107, %c40_108], %312 {strides = array<i32>} : memref<16x128xf32, #tpu.memory_space<vmem>>, vector<4x8xf32>,
    %314 = vector.extract_strided_slice %309 {offsets = [8, 0], sizes = [4, 8], strides = [1, 1]} : vector<16x8xf32> to vector<4x8xf32>
    %c4_109 = arith.constant 4 : index
    %c48_110 = arith.constant 48 : index
    %315 = vector.load %arg12[%c4_109, %c48_110] : memref<16x128xf32, #tpu.memory_space<vmem>>, vector<4x8xf32>
    tpu.vector_store %arg12[%c4_109, %c48_110], %314 {strides = array<i32>} : memref<16x128xf32, #tpu.memory_space<vmem>>, vector<4x8xf32>,
    %316 = vector.extract_strided_slice %309 {offsets = [12, 0], sizes = [4, 8], strides = [1, 1]} : vector<16x8xf32> to vector<4x8xf32>
    %c4_111 = arith.constant 4 : index
    %c56_112 = arith.constant 56 : index
    %317 = vector.load %arg12[%c4_111, %c56_112] : memref<16x128xf32, #tpu.memory_space<vmem>>, vector<4x8xf32>
    tpu.vector_store %arg12[%c4_111, %c56_112], %316 {strides = array<i32>} : memref<16x128xf32, #tpu.memory_space<vmem>>, vector<4x8xf32>,
    %318 = vector.extract_strided_slice %56 {offsets = [0, 72], sizes = [16, 8], strides = [1, 1]} : vector<16x128xbf16> to vector<16x8xbf16>
    %cst_113 = arith.constant dense<0.000000e+00> : vector<16x64xf32>
    %319 = tpu.matmul %318, %235, %cst_113 {dimension_numbers = #tpu.dot_dimension_numbers<[1], [1], [0], [0], [0, 0, 1, 0], [], []>} : vector<16x8xbf16>, vector<64x8xbf16>, vector<16x64xf32> -> vector<16x64xf32>
    %320 = vector.shape_cast %319 : vector<16x64xf32> to vector<1x16x64xf32>
    %cst_114 = arith.constant dense<0.000000e+00> : vector<1xf32>
    %321 = vector.multi_reduction <add>, %320, %cst_114 [1, 2] : vector<1x16x64xf32> to vector<1xf32>
    %322 = vector.shape_cast %321 : vector<1xf32> to vector<1x1x1xf32>
    %323 = vector.extract %322[0, 0, 0] : f32 from vector<1x1x1xf32>
    %cst_115 = arith.constant 1.024000e+03 : f32
    %324 = arith.divf %323, %cst_115 : f32
    %325 = vector.broadcast %324 : f32 to vector<16x64xf32>
    %326 = arith.subf %319, %325 : vector<16x64xf32>
    %327 = arith.mulf %326, %326 : vector<16x64xf32>
    %328 = vector.shape_cast %327 : vector<16x64xf32> to vector<1x16x64xf32>
    %cst_116 = arith.constant dense<0.000000e+00> : vector<1xf32>
    %329 = vector.multi_reduction <add>, %328, %cst_116 [1, 2] : vector<1x16x64xf32> to vector<1xf32>
    %330 = vector.shape_cast %329 : vector<1xf32> to vector<1x1x1xf32>
    %331 = vector.extract %330[0, 0, 0] : f32 from vector<1x1x1xf32>
    %cst_117 = arith.constant 1.024000e+03 : f32
    %332 = arith.divf %331, %cst_117 : f32
    %333 = vector.broadcast %324 : f32 to vector<16x64xf32>
    %334 = arith.subf %319, %333 : vector<16x64xf32>
    %cst_118 = arith.constant 9.99999974E-6 : f32
    %335 = arith.addf %332, %cst_118 : f32
    %336 = math.rsqrt %335 : f32
    %337 = vector.broadcast %336 : f32 to vector<16x64xf32>
    %338 = arith.mulf %334, %337 : vector<16x64xf32>
    %cst_119 = arith.constant dense<0xFF800000> : vector<16xf32>
    %339 = vector.multi_reduction <maximumf>, %338, %cst_119 [1] : vector<16x64xf32> to vector<16xf32>
    %340 = vector.shape_cast %339 : vector<16xf32> to vector<16x1xf32>
    %341 = vector.broadcast %340 : vector<16x1xf32> to vector<16x64xf32>
    %342 = arith.subf %338, %341 : vector<16x64xf32>
    %343 = math.exp %342 : vector<16x64xf32>
    %cst_120 = arith.constant dense<0.000000e+00> : vector<16xf32>
    %344 = vector.multi_reduction <add>, %343, %cst_120 [1] : vector<16x64xf32> to vector<16xf32>
    %345 = vector.shape_cast %344 : vector<16xf32> to vector<16x1xf32>
    %346 = tpu.reciprocal %345 {approx = true} : vector<16x1xf32> -> vector<16x1xf32>
    %347 = vector.broadcast %346 : vector<16x1xf32> to vector<16x64xf32>
    %348 = arith.mulf %343, %347 : vector<16x64xf32>
    %349 = arith.truncf %348 : vector<16x64xf32> to vector<16x64xbf16>
    %cst_121 = arith.constant dense<0.000000e+00> : vector<16x8xf32>
    %350 = tpu.matmul %349, %240, %cst_121 {dimension_numbers = #tpu.dot_dimension_numbers<[1], [0], [0], [1], [0, 0, 1, 1], [], []>} : vector<16x64xbf16>, vector<64x8xbf16>, vector<16x8xf32> -> vector<16x8xf32>
    %351 = arith.truncf %350 : vector<16x8xf32> to vector<16x8xbf16>
    %cst_122 = arith.constant dense<0.000000e+00> : vector<16x8xf32>
    %352 = tpu.matmul %57, %351, %cst_122 {dimension_numbers = #tpu.dot_dimension_numbers<[1], [0], [0], [1], [0, 0, 1, 1], [], []>} : vector<16x16xbf16>, vector<16x8xbf16>, vector<16x8xf32> -> vector<16x8xf32>
    %353 = vector.extract_strided_slice %352 {offsets = [0, 0], sizes = [4, 8], strides = [1, 1]} : vector<16x8xf32> to vector<4x8xf32>
    %c4_123 = arith.constant 4 : index
    %c64_124 = arith.constant 64 : index
    %354 = vector.load %arg12[%c4_123, %c64_124] : memref<16x128xf32, #tpu.memory_space<vmem>>, vector<4x8xf32>
    tpu.vector_store %arg12[%c4_123, %c64_124], %353 {strides = array<i32>} : memref<16x128xf32, #tpu.memory_space<vmem>>, vector<4x8xf32>,
    %355 = vector.extract_strided_slice %352 {offsets = [4, 0], sizes = [4, 8], strides = [1, 1]} : vector<16x8xf32> to vector<4x8xf32>
    %c4_125 = arith.constant 4 : index
    %c72_126 = arith.constant 72 : index
    %356 = vector.load %arg12[%c4_125, %c72_126] : memref<16x128xf32, #tpu.memory_space<vmem>>, vector<4x8xf32>
    tpu.vector_store %arg12[%c4_125, %c72_126], %355 {strides = array<i32>} : memref<16x128xf32, #tpu.memory_space<vmem>>, vector<4x8xf32>,
    %357 = vector.extract_strided_slice %352 {offsets = [8, 0], sizes = [4, 8], strides = [1, 1]} : vector<16x8xf32> to vector<4x8xf32>
    %c4_127 = arith.constant 4 : index
    %c80_128 = arith.constant 80 : index
    %358 = vector.load %arg12[%c4_127, %c80_128] : memref<16x128xf32, #tpu.memory_space<vmem>>, vector<4x8xf32>
    tpu.vector_store %arg12[%c4_127, %c80_128], %357 {strides = array<i32>} : memref<16x128xf32, #tpu.memory_space<vmem>>, vector<4x8xf32>,
    %359 = vector.extract_strided_slice %352 {offsets = [12, 0], sizes = [4, 8], strides = [1, 1]} : vector<16x8xf32> to vector<4x8xf32>
    %c4_129 = arith.constant 4 : index
    %c88_130 = arith.constant 88 : index
    %360 = vector.load %arg12[%c4_129, %c88_130] : memref<16x128xf32, #tpu.memory_space<vmem>>, vector<4x8xf32>
    tpu.vector_store %arg12[%c4_129, %c88_130], %359 {strides = array<i32>} : memref<16x128xf32, #tpu.memory_space<vmem>>, vector<4x8xf32>,
    %361 = vector.extract_strided_slice %56 {offsets = [0, 104], sizes = [16, 8], strides = [1, 1]} : vector<16x128xbf16> to vector<16x8xbf16>
    %cst_131 = arith.constant dense<0.000000e+00> : vector<16x64xf32>
    %362 = tpu.matmul %361, %235, %cst_131 {dimension_numbers = #tpu.dot_dimension_numbers<[1], [1], [0], [0], [0, 0, 1, 0], [], []>} : vector<16x8xbf16>, vector<64x8xbf16>, vector<16x64xf32> -> vector<16x64xf32>
    %363 = vector.shape_cast %362 : vector<16x64xf32> to vector<1x16x64xf32>
    %cst_132 = arith.constant dense<0.000000e+00> : vector<1xf32>
    %364 = vector.multi_reduction <add>, %363, %cst_132 [1, 2] : vector<1x16x64xf32> to vector<1xf32>
    %365 = vector.shape_cast %364 : vector<1xf32> to vector<1x1x1xf32>
    %366 = vector.extract %365[0, 0, 0] : f32 from vector<1x1x1xf32>
    %cst_133 = arith.constant 1.024000e+03 : f32
    %367 = arith.divf %366, %cst_133 : f32
    %368 = vector.broadcast %367 : f32 to vector<16x64xf32>
    %369 = arith.subf %362, %368 : vector<16x64xf32>
    %370 = arith.mulf %369, %369 : vector<16x64xf32>
    %371 = vector.shape_cast %370 : vector<16x64xf32> to vector<1x16x64xf32>
    %cst_134 = arith.constant dense<0.000000e+00> : vector<1xf32>
    %372 = vector.multi_reduction <add>, %371, %cst_134 [1, 2] : vector<1x16x64xf32> to vector<1xf32>
    %373 = vector.shape_cast %372 : vector<1xf32> to vector<1x1x1xf32>
    %374 = vector.extract %373[0, 0, 0] : f32 from vector<1x1x1xf32>
    %cst_135 = arith.constant 1.024000e+03 : f32
    %375 = arith.divf %374, %cst_135 : f32
    %376 = vector.broadcast %367 : f32 to vector<16x64xf32>
    %377 = arith.subf %362, %376 : vector<16x64xf32>
    %cst_136 = arith.constant 9.99999974E-6 : f32
    %378 = arith.addf %375, %cst_136 : f32
    %379 = math.rsqrt %378 : f32
    %380 = vector.broadcast %379 : f32 to vector<16x64xf32>
    %381 = arith.mulf %377, %380 : vector<16x64xf32>
    %cst_137 = arith.constant dense<0xFF800000> : vector<16xf32>
    %382 = vector.multi_reduction <maximumf>, %381, %cst_137 [1] : vector<16x64xf32> to vector<16xf32>
    %383 = vector.shape_cast %382 : vector<16xf32> to vector<16x1xf32>
    %384 = vector.broadcast %383 : vector<16x1xf32> to vector<16x64xf32>
    %385 = arith.subf %381, %384 : vector<16x64xf32>
    %386 = math.exp %385 : vector<16x64xf32>
    %cst_138 = arith.constant dense<0.000000e+00> : vector<16xf32>
    %387 = vector.multi_reduction <add>, %386, %cst_138 [1] : vector<16x64xf32> to vector<16xf32>
    %388 = vector.shape_cast %387 : vector<16xf32> to vector<16x1xf32>
    %389 = tpu.reciprocal %388 {approx = true} : vector<16x1xf32> -> vector<16x1xf32>
    %390 = vector.broadcast %389 : vector<16x1xf32> to vector<16x64xf32>
    %391 = arith.mulf %386, %390 : vector<16x64xf32>
    %392 = arith.truncf %391 : vector<16x64xf32> to vector<16x64xbf16>
    %cst_139 = arith.constant dense<0.000000e+00> : vector<16x8xf32>
    %393 = tpu.matmul %392, %240, %cst_139 {dimension_numbers = #tpu.dot_dimension_numbers<[1], [0], [0], [1], [0, 0, 1, 1], [], []>} : vector<16x64xbf16>, vector<64x8xbf16>, vector<16x8xf32> -> vector<16x8xf32>
    %394 = arith.truncf %393 : vector<16x8xf32> to vector<16x8xbf16>
    %cst_140 = arith.constant dense<0.000000e+00> : vector<16x8xf32>
    %395 = tpu.matmul %57, %394, %cst_140 {dimension_numbers = #tpu.dot_dimension_numbers<[1], [0], [0], [1], [0, 0, 1, 1], [], []>} : vector<16x16xbf16>, vector<16x8xbf16>, vector<16x8xf32> -> vector<16x8xf32>
    %396 = vector.extract_strided_slice %395 {offsets = [0, 0], sizes = [4, 8], strides = [1, 1]} : vector<16x8xf32> to vector<4x8xf32>
    %c4_141 = arith.constant 4 : index
    %c96_142 = arith.constant 96 : index
    %397 = vector.load %arg12[%c4_141, %c96_142] : memref<16x128xf32, #tpu.memory_space<vmem>>, vector<4x8xf32>
    tpu.vector_store %arg12[%c4_141, %c96_142], %396 {strides = array<i32>} : memref<16x128xf32, #tpu.memory_space<vmem>>, vector<4x8xf32>,
    %398 = vector.extract_strided_slice %395 {offsets = [4, 0], sizes = [4, 8], strides = [1, 1]} : vector<16x8xf32> to vector<4x8xf32>
    %c4_143 = arith.constant 4 : index
    %c104_144 = arith.constant 104 : index
    %399 = vector.load %arg12[%c4_143, %c104_144] : memref<16x128xf32, #tpu.memory_space<vmem>>, vector<4x8xf32>
    tpu.vector_store %arg12[%c4_143, %c104_144], %398 {strides = array<i32>} : memref<16x128xf32, #tpu.memory_space<vmem>>, vector<4x8xf32>,
    %400 = vector.extract_strided_slice %395 {offsets = [8, 0], sizes = [4, 8], strides = [1, 1]} : vector<16x8xf32> to vector<4x8xf32>
    %c4_145 = arith.constant 4 : index
    %c112_146 = arith.constant 112 : index
    %401 = vector.load %arg12[%c4_145, %c112_146] : memref<16x128xf32, #tpu.memory_space<vmem>>, vector<4x8xf32>
    tpu.vector_store %arg12[%c4_145, %c112_146], %400 {strides = array<i32>} : memref<16x128xf32, #tpu.memory_space<vmem>>, vector<4x8xf32>,
    %402 = vector.extract_strided_slice %395 {offsets = [12, 0], sizes = [4, 8], strides = [1, 1]} : vector<16x8xf32> to vector<4x8xf32>
    %c4_147 = arith.constant 4 : index
    %c120_148 = arith.constant 120 : index
    %403 = vector.load %arg12[%c4_147, %c120_148] : memref<16x128xf32, #tpu.memory_space<vmem>>, vector<4x8xf32>
    tpu.vector_store %arg12[%c4_147, %c120_148], %402 {strides = array<i32>} : memref<16x128xf32, #tpu.memory_space<vmem>>, vector<4x8xf32>,
    %404 = vector.extract_strided_slice %47 {offsets = [0, 16], sizes = [16, 8], strides = [1, 1]} : vector<16x128xbf16> to vector<16x8xbf16>
    %405 = vector.extract_strided_slice %47 {offsets = [0, 48], sizes = [16, 8], strides = [1, 1]} : vector<16x128xbf16> to vector<16x8xbf16>
    %406 = vector.extract_strided_slice %47 {offsets = [0, 80], sizes = [16, 8], strides = [1, 1]} : vector<16x128xbf16> to vector<16x8xbf16>
    %407 = vector.extract_strided_slice %47 {offsets = [0, 112], sizes = [16, 8], strides = [1, 1]} : vector<16x128xbf16> to vector<16x8xbf16>
    %408 = tpu.concatenate %404, %405, %406, %407 in 0 : vector<16x8xbf16>, vector<16x8xbf16>, vector<16x8xbf16>, vector<16x8xbf16> -> vector<64x8xbf16>
    %409 = vector.extract_strided_slice %50 {offsets = [0, 16], sizes = [16, 8], strides = [1, 1]} : vector<16x128xbf16> to vector<16x8xbf16>
    %410 = vector.extract_strided_slice %50 {offsets = [0, 48], sizes = [16, 8], strides = [1, 1]} : vector<16x128xbf16> to vector<16x8xbf16>
    %411 = vector.extract_strided_slice %50 {offsets = [0, 80], sizes = [16, 8], strides = [1, 1]} : vector<16x128xbf16> to vector<16x8xbf16>
    %412 = vector.extract_strided_slice %50 {offsets = [0, 112], sizes = [16, 8], strides = [1, 1]} : vector<16x128xbf16> to vector<16x8xbf16>
    %413 = tpu.concatenate %409, %410, %411, %412 in 0 : vector<16x8xbf16>, vector<16x8xbf16>, vector<16x8xbf16>, vector<16x8xbf16> -> vector<64x8xbf16>
    %414 = vector.extract_strided_slice %56 {offsets = [0, 16], sizes = [16, 8], strides = [1, 1]} : vector<16x128xbf16> to vector<16x8xbf16>
    %cst_149 = arith.constant dense<0.000000e+00> : vector<16x64xf32>
    %415 = tpu.matmul %414, %408, %cst_149 {dimension_numbers = #tpu.dot_dimension_numbers<[1], [1], [0], [0], [0, 0, 1, 0], [], []>} : vector<16x8xbf16>, vector<64x8xbf16>, vector<16x64xf32> -> vector<16x64xf32>
    %416 = vector.shape_cast %415 : vector<16x64xf32> to vector<1x16x64xf32>
    %cst_150 = arith.constant dense<0.000000e+00> : vector<1xf32>
    %417 = vector.multi_reduction <add>, %416, %cst_150 [1, 2] : vector<1x16x64xf32> to vector<1xf32>
    %418 = vector.shape_cast %417 : vector<1xf32> to vector<1x1x1xf32>
    %419 = vector.extract %418[0, 0, 0] : f32 from vector<1x1x1xf32>
    %cst_151 = arith.constant 1.024000e+03 : f32
    %420 = arith.divf %419, %cst_151 : f32
    %421 = vector.broadcast %420 : f32 to vector<16x64xf32>
    %422 = arith.subf %415, %421 : vector<16x64xf32>
    %423 = arith.mulf %422, %422 : vector<16x64xf32>
    %424 = vector.shape_cast %423 : vector<16x64xf32> to vector<1x16x64xf32>
    %cst_152 = arith.constant dense<0.000000e+00> : vector<1xf32>
    %425 = vector.multi_reduction <add>, %424, %cst_152 [1, 2] : vector<1x16x64xf32> to vector<1xf32>
    %426 = vector.shape_cast %425 : vector<1xf32> to vector<1x1x1xf32>
    %427 = vector.extract %426[0, 0, 0] : f32 from vector<1x1x1xf32>
    %cst_153 = arith.constant 1.024000e+03 : f32
    %428 = arith.divf %427, %cst_153 : f32
    %429 = vector.broadcast %420 : f32 to vector<16x64xf32>
    %430 = arith.subf %415, %429 : vector<16x64xf32>
    %cst_154 = arith.constant 9.99999974E-6 : f32
    %431 = arith.addf %428, %cst_154 : f32
    %432 = math.rsqrt %431 : f32
    %433 = vector.broadcast %432 : f32 to vector<16x64xf32>
    %434 = arith.mulf %430, %433 : vector<16x64xf32>
    %cst_155 = arith.constant dense<0xFF800000> : vector<16xf32>
    %435 = vector.multi_reduction <maximumf>, %434, %cst_155 [1] : vector<16x64xf32> to vector<16xf32>
    %436 = vector.shape_cast %435 : vector<16xf32> to vector<16x1xf32>
    %437 = vector.broadcast %436 : vector<16x1xf32> to vector<16x64xf32>
    %438 = arith.subf %434, %437 : vector<16x64xf32>
    %439 = math.exp %438 : vector<16x64xf32>
    %cst_156 = arith.constant dense<0.000000e+00> : vector<16xf32>
    %440 = vector.multi_reduction <add>, %439, %cst_156 [1] : vector<16x64xf32> to vector<16xf32>
    %441 = vector.shape_cast %440 : vector<16xf32> to vector<16x1xf32>
    %442 = tpu.reciprocal %441 {approx = true} : vector<16x1xf32> -> vector<16x1xf32>
    %443 = vector.broadcast %442 : vector<16x1xf32> to vector<16x64xf32>
    %444 = arith.mulf %439, %443 : vector<16x64xf32>
    %445 = arith.truncf %444 : vector<16x64xf32> to vector<16x64xbf16>
    %cst_157 = arith.constant dense<0.000000e+00> : vector<16x8xf32>
    %446 = tpu.matmul %445, %413, %cst_157 {dimension_numbers = #tpu.dot_dimension_numbers<[1], [0], [0], [1], [0, 0, 1, 1], [], []>} : vector<16x64xbf16>, vector<64x8xbf16>, vector<16x8xf32> -> vector<16x8xf32>
    %c0_158 = arith.constant 0 : index
    %c16 = arith.constant 16 : index
    %447 = vector.load %arg12[%c0_158, %c16] : memref<16x128xf32, #tpu.memory_space<vmem>>, vector<16x8xf32>
    tpu.vector_store %arg12[%c0_158, %c16], %446 {strides = array<i32>} : memref<16x128xf32, #tpu.memory_space<vmem>>, vector<16x8xf32>,
    %448 = vector.extract_strided_slice %56 {offsets = [0, 48], sizes = [16, 8], strides = [1, 1]} : vector<16x128xbf16> to vector<16x8xbf16>
    %cst_159 = arith.constant dense<0.000000e+00> : vector<16x64xf32>
    %449 = tpu.matmul %448, %408, %cst_159 {dimension_numbers = #tpu.dot_dimension_numbers<[1], [1], [0], [0], [0, 0, 1, 0], [], []>} : vector<16x8xbf16>, vector<64x8xbf16>, vector<16x64xf32> -> vector<16x64xf32>
    %450 = vector.shape_cast %449 : vector<16x64xf32> to vector<1x16x64xf32>
    %cst_160 = arith.constant dense<0.000000e+00> : vector<1xf32>
    %451 = vector.multi_reduction <add>, %450, %cst_160 [1, 2] : vector<1x16x64xf32> to vector<1xf32>
    %452 = vector.shape_cast %451 : vector<1xf32> to vector<1x1x1xf32>
    %453 = vector.extract %452[0, 0, 0] : f32 from vector<1x1x1xf32>
    %cst_161 = arith.constant 1.024000e+03 : f32
    %454 = arith.divf %453, %cst_161 : f32
    %455 = vector.broadcast %454 : f32 to vector<16x64xf32>
    %456 = arith.subf %449, %455 : vector<16x64xf32>
    %457 = arith.mulf %456, %456 : vector<16x64xf32>
    %458 = vector.shape_cast %457 : vector<16x64xf32> to vector<1x16x64xf32>
    %cst_162 = arith.constant dense<0.000000e+00> : vector<1xf32>
    %459 = vector.multi_reduction <add>, %458, %cst_162 [1, 2] : vector<1x16x64xf32> to vector<1xf32>
    %460 = vector.shape_cast %459 : vector<1xf32> to vector<1x1x1xf32>
    %461 = vector.extract %460[0, 0, 0] : f32 from vector<1x1x1xf32>
    %cst_163 = arith.constant 1.024000e+03 : f32
    %462 = arith.divf %461, %cst_163 : f32
    %463 = vector.broadcast %454 : f32 to vector<16x64xf32>
    %464 = arith.subf %449, %463 : vector<16x64xf32>
    %cst_164 = arith.constant 9.99999974E-6 : f32
    %465 = arith.addf %462, %cst_164 : f32
    %466 = math.rsqrt %465 : f32
    %467 = vector.broadcast %466 : f32 to vector<16x64xf32>
    %468 = arith.mulf %464, %467 : vector<16x64xf32>
    %cst_165 = arith.constant dense<0xFF800000> : vector<16xf32>
    %469 = vector.multi_reduction <maximumf>, %468, %cst_165 [1] : vector<16x64xf32> to vector<16xf32>
    %470 = vector.shape_cast %469 : vector<16xf32> to vector<16x1xf32>
    %471 = vector.broadcast %470 : vector<16x1xf32> to vector<16x64xf32>
    %472 = arith.subf %468, %471 : vector<16x64xf32>
    %473 = math.exp %472 : vector<16x64xf32>
    %cst_166 = arith.constant dense<0.000000e+00> : vector<16xf32>
    %474 = vector.multi_reduction <add>, %473, %cst_166 [1] : vector<16x64xf32> to vector<16xf32>
    %475 = vector.shape_cast %474 : vector<16xf32> to vector<16x1xf32>
    %476 = tpu.reciprocal %475 {approx = true} : vector<16x1xf32> -> vector<16x1xf32>
    %477 = vector.broadcast %476 : vector<16x1xf32> to vector<16x64xf32>
    %478 = arith.mulf %473, %477 : vector<16x64xf32>
    %479 = arith.truncf %478 : vector<16x64xf32> to vector<16x64xbf16>
    %cst_167 = arith.constant dense<0.000000e+00> : vector<16x8xf32>
    %480 = tpu.matmul %479, %413, %cst_167 {dimension_numbers = #tpu.dot_dimension_numbers<[1], [0], [0], [1], [0, 0, 1, 1], [], []>} : vector<16x64xbf16>, vector<64x8xbf16>, vector<16x8xf32> -> vector<16x8xf32>
    %481 = arith.truncf %480 : vector<16x8xf32> to vector<16x8xbf16>
    %cst_168 = arith.constant dense<0.000000e+00> : vector<16x8xf32>
    %482 = tpu.matmul %57, %481, %cst_168 {dimension_numbers = #tpu.dot_dimension_numbers<[1], [0], [0], [1], [0, 0, 1, 1], [], []>} : vector<16x16xbf16>, vector<16x8xbf16>, vector<16x8xf32> -> vector<16x8xf32>
    %483 = vector.extract_strided_slice %482 {offsets = [0, 0], sizes = [4, 8], strides = [1, 1]} : vector<16x8xf32> to vector<4x8xf32>
    %c8_169 = arith.constant 8 : index
    %c32_170 = arith.constant 32 : index
    %484 = vector.load %arg12[%c8_169, %c32_170] : memref<16x128xf32, #tpu.memory_space<vmem>>, vector<4x8xf32>
    tpu.vector_store %arg12[%c8_169, %c32_170], %483 {strides = array<i32>} : memref<16x128xf32, #tpu.memory_space<vmem>>, vector<4x8xf32>,
    %485 = vector.extract_strided_slice %482 {offsets = [4, 0], sizes = [4, 8], strides = [1, 1]} : vector<16x8xf32> to vector<4x8xf32>
    %c8_171 = arith.constant 8 : index
    %c40_172 = arith.constant 40 : index
    %486 = vector.load %arg12[%c8_171, %c40_172] : memref<16x128xf32, #tpu.memory_space<vmem>>, vector<4x8xf32>
    tpu.vector_store %arg12[%c8_171, %c40_172], %485 {strides = array<i32>} : memref<16x128xf32, #tpu.memory_space<vmem>>, vector<4x8xf32>,
    %487 = vector.extract_strided_slice %482 {offsets = [8, 0], sizes = [4, 8], strides = [1, 1]} : vector<16x8xf32> to vector<4x8xf32>
    %c8_173 = arith.constant 8 : index
    %c48_174 = arith.constant 48 : index
    %488 = vector.load %arg12[%c8_173, %c48_174] : memref<16x128xf32, #tpu.memory_space<vmem>>, vector<4x8xf32>
    tpu.vector_store %arg12[%c8_173, %c48_174], %487 {strides = array<i32>} : memref<16x128xf32, #tpu.memory_space<vmem>>, vector<4x8xf32>,
    %489 = vector.extract_strided_slice %482 {offsets = [12, 0], sizes = [4, 8], strides = [1, 1]} : vector<16x8xf32> to vector<4x8xf32>
    %c8_175 = arith.constant 8 : index
    %c56_176 = arith.constant 56 : index
    %490 = vector.load %arg12[%c8_175, %c56_176] : memref<16x128xf32, #tpu.memory_space<vmem>>, vector<4x8xf32>
    tpu.vector_store %arg12[%c8_175, %c56_176], %489 {strides = array<i32>} : memref<16x128xf32, #tpu.memory_space<vmem>>, vector<4x8xf32>,
    %491 = vector.extract_strided_slice %56 {offsets = [0, 80], sizes = [16, 8], strides = [1, 1]} : vector<16x128xbf16> to vector<16x8xbf16>
    %cst_177 = arith.constant dense<0.000000e+00> : vector<16x64xf32>
    %492 = tpu.matmul %491, %408, %cst_177 {dimension_numbers = #tpu.dot_dimension_numbers<[1], [1], [0], [0], [0, 0, 1, 0], [], []>} : vector<16x8xbf16>, vector<64x8xbf16>, vector<16x64xf32> -> vector<16x64xf32>
    %493 = vector.shape_cast %492 : vector<16x64xf32> to vector<1x16x64xf32>
    %cst_178 = arith.constant dense<0.000000e+00> : vector<1xf32>
    %494 = vector.multi_reduction <add>, %493, %cst_178 [1, 2] : vector<1x16x64xf32> to vector<1xf32>
    %495 = vector.shape_cast %494 : vector<1xf32> to vector<1x1x1xf32>
    %496 = vector.extract %495[0, 0, 0] : f32 from vector<1x1x1xf32>
    %cst_179 = arith.constant 1.024000e+03 : f32
    %497 = arith.divf %496, %cst_179 : f32
    %498 = vector.broadcast %497 : f32 to vector<16x64xf32>
    %499 = arith.subf %492, %498 : vector<16x64xf32>
    %500 = arith.mulf %499, %499 : vector<16x64xf32>
    %501 = vector.shape_cast %500 : vector<16x64xf32> to vector<1x16x64xf32>
    %cst_180 = arith.constant dense<0.000000e+00> : vector<1xf32>
    %502 = vector.multi_reduction <add>, %501, %cst_180 [1, 2] : vector<1x16x64xf32> to vector<1xf32>
    %503 = vector.shape_cast %502 : vector<1xf32> to vector<1x1x1xf32>
    %504 = vector.extract %503[0, 0, 0] : f32 from vector<1x1x1xf32>
    %cst_181 = arith.constant 1.024000e+03 : f32
    %505 = arith.divf %504, %cst_181 : f32
    %506 = vector.broadcast %497 : f32 to vector<16x64xf32>
    %507 = arith.subf %492, %506 : vector<16x64xf32>
    %cst_182 = arith.constant 9.99999974E-6 : f32
    %508 = arith.addf %505, %cst_182 : f32
    %509 = math.rsqrt %508 : f32
    %510 = vector.broadcast %509 : f32 to vector<16x64xf32>
    %511 = arith.mulf %507, %510 : vector<16x64xf32>
    %cst_183 = arith.constant dense<0xFF800000> : vector<16xf32>
    %512 = vector.multi_reduction <maximumf>, %511, %cst_183 [1] : vector<16x64xf32> to vector<16xf32>
    %513 = vector.shape_cast %512 : vector<16xf32> to vector<16x1xf32>
    %514 = vector.broadcast %513 : vector<16x1xf32> to vector<16x64xf32>
    %515 = arith.subf %511, %514 : vector<16x64xf32>
    %516 = math.exp %515 : vector<16x64xf32>
    %cst_184 = arith.constant dense<0.000000e+00> : vector<16xf32>
    %517 = vector.multi_reduction <add>, %516, %cst_184 [1] : vector<16x64xf32> to vector<16xf32>
    %518 = vector.shape_cast %517 : vector<16xf32> to vector<16x1xf32>
    %519 = tpu.reciprocal %518 {approx = true} : vector<16x1xf32> -> vector<16x1xf32>
    %520 = vector.broadcast %519 : vector<16x1xf32> to vector<16x64xf32>
    %521 = arith.mulf %516, %520 : vector<16x64xf32>
    %522 = arith.truncf %521 : vector<16x64xf32> to vector<16x64xbf16>
    %cst_185 = arith.constant dense<0.000000e+00> : vector<16x8xf32>
    %523 = tpu.matmul %522, %413, %cst_185 {dimension_numbers = #tpu.dot_dimension_numbers<[1], [0], [0], [1], [0, 0, 1, 1], [], []>} : vector<16x64xbf16>, vector<64x8xbf16>, vector<16x8xf32> -> vector<16x8xf32>
    %524 = arith.truncf %523 : vector<16x8xf32> to vector<16x8xbf16>
    %cst_186 = arith.constant dense<0.000000e+00> : vector<16x8xf32>
    %525 = tpu.matmul %57, %524, %cst_186 {dimension_numbers = #tpu.dot_dimension_numbers<[1], [0], [0], [1], [0, 0, 1, 1], [], []>} : vector<16x16xbf16>, vector<16x8xbf16>, vector<16x8xf32> -> vector<16x8xf32>
    %526 = vector.extract_strided_slice %525 {offsets = [0, 0], sizes = [4, 8], strides = [1, 1]} : vector<16x8xf32> to vector<4x8xf32>
    %c8_187 = arith.constant 8 : index
    %c64_188 = arith.constant 64 : index
    %527 = vector.load %arg12[%c8_187, %c64_188] : memref<16x128xf32, #tpu.memory_space<vmem>>, vector<4x8xf32>
    tpu.vector_store %arg12[%c8_187, %c64_188], %526 {strides = array<i32>} : memref<16x128xf32, #tpu.memory_space<vmem>>, vector<4x8xf32>,
    %528 = vector.extract_strided_slice %525 {offsets = [4, 0], sizes = [4, 8], strides = [1, 1]} : vector<16x8xf32> to vector<4x8xf32>
    %c8_189 = arith.constant 8 : index
    %c72_190 = arith.constant 72 : index
    %529 = vector.load %arg12[%c8_189, %c72_190] : memref<16x128xf32, #tpu.memory_space<vmem>>, vector<4x8xf32>
    tpu.vector_store %arg12[%c8_189, %c72_190], %528 {strides = array<i32>} : memref<16x128xf32, #tpu.memory_space<vmem>>, vector<4x8xf32>,
    %530 = vector.extract_strided_slice %525 {offsets = [8, 0], sizes = [4, 8], strides = [1, 1]} : vector<16x8xf32> to vector<4x8xf32>
    %c8_191 = arith.constant 8 : index
    %c80_192 = arith.constant 80 : index
    %531 = vector.load %arg12[%c8_191, %c80_192] : memref<16x128xf32, #tpu.memory_space<vmem>>, vector<4x8xf32>
    tpu.vector_store %arg12[%c8_191, %c80_192], %530 {strides = array<i32>} : memref<16x128xf32, #tpu.memory_space<vmem>>, vector<4x8xf32>,
    %532 = vector.extract_strided_slice %525 {offsets = [12, 0], sizes = [4, 8], strides = [1, 1]} : vector<16x8xf32> to vector<4x8xf32>
    %c8_193 = arith.constant 8 : index
    %c88_194 = arith.constant 88 : index
    %533 = vector.load %arg12[%c8_193, %c88_194] : memref<16x128xf32, #tpu.memory_space<vmem>>, vector<4x8xf32>
    tpu.vector_store %arg12[%c8_193, %c88_194], %532 {strides = array<i32>} : memref<16x128xf32, #tpu.memory_space<vmem>>, vector<4x8xf32>,
    %534 = vector.extract_strided_slice %56 {offsets = [0, 112], sizes = [16, 8], strides = [1, 1]} : vector<16x128xbf16> to vector<16x8xbf16>
    %cst_195 = arith.constant dense<0.000000e+00> : vector<16x64xf32>
    %535 = tpu.matmul %534, %408, %cst_195 {dimension_numbers = #tpu.dot_dimension_numbers<[1], [1], [0], [0], [0, 0, 1, 0], [], []>} : vector<16x8xbf16>, vector<64x8xbf16>, vector<16x64xf32> -> vector<16x64xf32>
    %536 = vector.shape_cast %535 : vector<16x64xf32> to vector<1x16x64xf32>
    %cst_196 = arith.constant dense<0.000000e+00> : vector<1xf32>
    %537 = vector.multi_reduction <add>, %536, %cst_196 [1, 2] : vector<1x16x64xf32> to vector<1xf32>
    %538 = vector.shape_cast %537 : vector<1xf32> to vector<1x1x1xf32>
    %539 = vector.extract %538[0, 0, 0] : f32 from vector<1x1x1xf32>
    %cst_197 = arith.constant 1.024000e+03 : f32
    %540 = arith.divf %539, %cst_197 : f32
    %541 = vector.broadcast %540 : f32 to vector<16x64xf32>
    %542 = arith.subf %535, %541 : vector<16x64xf32>
    %543 = arith.mulf %542, %542 : vector<16x64xf32>
    %544 = vector.shape_cast %543 : vector<16x64xf32> to vector<1x16x64xf32>
    %cst_198 = arith.constant dense<0.000000e+00> : vector<1xf32>
    %545 = vector.multi_reduction <add>, %544, %cst_198 [1, 2] : vector<1x16x64xf32> to vector<1xf32>
    %546 = vector.shape_cast %545 : vector<1xf32> to vector<1x1x1xf32>
    %547 = vector.extract %546[0, 0, 0] : f32 from vector<1x1x1xf32>
    %cst_199 = arith.constant 1.024000e+03 : f32
    %548 = arith.divf %547, %cst_199 : f32
    %549 = vector.broadcast %540 : f32 to vector<16x64xf32>
    %550 = arith.subf %535, %549 : vector<16x64xf32>
    %cst_200 = arith.constant 9.99999974E-6 : f32
    %551 = arith.addf %548, %cst_200 : f32
    %552 = math.rsqrt %551 : f32
    %553 = vector.broadcast %552 : f32 to vector<16x64xf32>
    %554 = arith.mulf %550, %553 : vector<16x64xf32>
    %cst_201 = arith.constant dense<0xFF800000> : vector<16xf32>
    %555 = vector.multi_reduction <maximumf>, %554, %cst_201 [1] : vector<16x64xf32> to vector<16xf32>
    %556 = vector.shape_cast %555 : vector<16xf32> to vector<16x1xf32>
    %557 = vector.broadcast %556 : vector<16x1xf32> to vector<16x64xf32>
    %558 = arith.subf %554, %557 : vector<16x64xf32>
    %559 = math.exp %558 : vector<16x64xf32>
    %cst_202 = arith.constant dense<0.000000e+00> : vector<16xf32>
    %560 = vector.multi_reduction <add>, %559, %cst_202 [1] : vector<16x64xf32> to vector<16xf32>
    %561 = vector.shape_cast %560 : vector<16xf32> to vector<16x1xf32>
    %562 = tpu.reciprocal %561 {approx = true} : vector<16x1xf32> -> vector<16x1xf32>
    %563 = vector.broadcast %562 : vector<16x1xf32> to vector<16x64xf32>
    %564 = arith.mulf %559, %563 : vector<16x64xf32>
    %565 = arith.truncf %564 : vector<16x64xf32> to vector<16x64xbf16>
    %cst_203 = arith.constant dense<0.000000e+00> : vector<16x8xf32>
    %566 = tpu.matmul %565, %413, %cst_203 {dimension_numbers = #tpu.dot_dimension_numbers<[1], [0], [0], [1], [0, 0, 1, 1], [], []>} : vector<16x64xbf16>, vector<64x8xbf16>, vector<16x8xf32> -> vector<16x8xf32>
    %567 = arith.truncf %566 : vector<16x8xf32> to vector<16x8xbf16>
    %cst_204 = arith.constant dense<0.000000e+00> : vector<16x8xf32>
    %568 = tpu.matmul %57, %567, %cst_204 {dimension_numbers = #tpu.dot_dimension_numbers<[1], [0], [0], [1], [0, 0, 1, 1], [], []>} : vector<16x16xbf16>, vector<16x8xbf16>, vector<16x8xf32> -> vector<16x8xf32>
    %569 = vector.extract_strided_slice %568 {offsets = [0, 0], sizes = [4, 8], strides = [1, 1]} : vector<16x8xf32> to vector<4x8xf32>
    %c8_205 = arith.constant 8 : index
    %c96_206 = arith.constant 96 : index
    %570 = vector.load %arg12[%c8_205, %c96_206] : memref<16x128xf32, #tpu.memory_space<vmem>>, vector<4x8xf32>
    tpu.vector_store %arg12[%c8_205, %c96_206], %569 {strides = array<i32>} : memref<16x128xf32, #tpu.memory_space<vmem>>, vector<4x8xf32>,
    %571 = vector.extract_strided_slice %568 {offsets = [4, 0], sizes = [4, 8], strides = [1, 1]} : vector<16x8xf32> to vector<4x8xf32>
    %c8_207 = arith.constant 8 : index
    %c104_208 = arith.constant 104 : index
    %572 = vector.load %arg12[%c8_207, %c104_208] : memref<16x128xf32, #tpu.memory_space<vmem>>, vector<4x8xf32>
    tpu.vector_store %arg12[%c8_207, %c104_208], %571 {strides = array<i32>} : memref<16x128xf32, #tpu.memory_space<vmem>>, vector<4x8xf32>,
    %573 = vector.extract_strided_slice %568 {offsets = [8, 0], sizes = [4, 8], strides = [1, 1]} : vector<16x8xf32> to vector<4x8xf32>
    %c8_209 = arith.constant 8 : index
    %c112_210 = arith.constant 112 : index
    %574 = vector.load %arg12[%c8_209, %c112_210] : memref<16x128xf32, #tpu.memory_space<vmem>>, vector<4x8xf32>
    tpu.vector_store %arg12[%c8_209, %c112_210], %573 {strides = array<i32>} : memref<16x128xf32, #tpu.memory_space<vmem>>, vector<4x8xf32>,
    %575 = vector.extract_strided_slice %568 {offsets = [12, 0], sizes = [4, 8], strides = [1, 1]} : vector<16x8xf32> to vector<4x8xf32>
    %c8_211 = arith.constant 8 : index
    %c120_212 = arith.constant 120 : index
    %576 = vector.load %arg12[%c8_211, %c120_212] : memref<16x128xf32, #tpu.memory_space<vmem>>, vector<4x8xf32>
    tpu.vector_store %arg12[%c8_211, %c120_212], %575 {strides = array<i32>} : memref<16x128xf32, #tpu.memory_space<vmem>>, vector<4x8xf32>,
    %577 = vector.extract_strided_slice %47 {offsets = [0, 24], sizes = [16, 8], strides = [1, 1]} : vector<16x128xbf16> to vector<16x8xbf16>
    %578 = vector.extract_strided_slice %47 {offsets = [0, 56], sizes = [16, 8], strides = [1, 1]} : vector<16x128xbf16> to vector<16x8xbf16>
    %579 = vector.extract_strided_slice %47 {offsets = [0, 88], sizes = [16, 8], strides = [1, 1]} : vector<16x128xbf16> to vector<16x8xbf16>
    %580 = vector.extract_strided_slice %47 {offsets = [0, 120], sizes = [16, 8], strides = [1, 1]} : vector<16x128xbf16> to vector<16x8xbf16>
    %581 = tpu.concatenate %577, %578, %579, %580 in 0 : vector<16x8xbf16>, vector<16x8xbf16>, vector<16x8xbf16>, vector<16x8xbf16> -> vector<64x8xbf16>
    %582 = vector.extract_strided_slice %50 {offsets = [0, 24], sizes = [16, 8], strides = [1, 1]} : vector<16x128xbf16> to vector<16x8xbf16>
    %583 = vector.extract_strided_slice %50 {offsets = [0, 56], sizes = [16, 8], strides = [1, 1]} : vector<16x128xbf16> to vector<16x8xbf16>
    %584 = vector.extract_strided_slice %50 {offsets = [0, 88], sizes = [16, 8], strides = [1, 1]} : vector<16x128xbf16> to vector<16x8xbf16>
    %585 = vector.extract_strided_slice %50 {offsets = [0, 120], sizes = [16, 8], strides = [1, 1]} : vector<16x128xbf16> to vector<16x8xbf16>
    %586 = tpu.concatenate %582, %583, %584, %585 in 0 : vector<16x8xbf16>, vector<16x8xbf16>, vector<16x8xbf16>, vector<16x8xbf16> -> vector<64x8xbf16>
    %587 = vector.extract_strided_slice %56 {offsets = [0, 24], sizes = [16, 8], strides = [1, 1]} : vector<16x128xbf16> to vector<16x8xbf16>
    %cst_213 = arith.constant dense<0.000000e+00> : vector<16x64xf32>
    %588 = tpu.matmul %587, %581, %cst_213 {dimension_numbers = #tpu.dot_dimension_numbers<[1], [1], [0], [0], [0, 0, 1, 0], [], []>} : vector<16x8xbf16>, vector<64x8xbf16>, vector<16x64xf32> -> vector<16x64xf32>
    %589 = vector.shape_cast %588 : vector<16x64xf32> to vector<1x16x64xf32>
    %cst_214 = arith.constant dense<0.000000e+00> : vector<1xf32>
    %590 = vector.multi_reduction <add>, %589, %cst_214 [1, 2] : vector<1x16x64xf32> to vector<1xf32>
    %591 = vector.shape_cast %590 : vector<1xf32> to vector<1x1x1xf32>
    %592 = vector.extract %591[0, 0, 0] : f32 from vector<1x1x1xf32>
    %cst_215 = arith.constant 1.024000e+03 : f32
    %593 = arith.divf %592, %cst_215 : f32
    %594 = vector.broadcast %593 : f32 to vector<16x64xf32>
    %595 = arith.subf %588, %594 : vector<16x64xf32>
    %596 = arith.mulf %595, %595 : vector<16x64xf32>
    %597 = vector.shape_cast %596 : vector<16x64xf32> to vector<1x16x64xf32>
    %cst_216 = arith.constant dense<0.000000e+00> : vector<1xf32>
    %598 = vector.multi_reduction <add>, %597, %cst_216 [1, 2] : vector<1x16x64xf32> to vector<1xf32>
    %599 = vector.shape_cast %598 : vector<1xf32> to vector<1x1x1xf32>
    %600 = vector.extract %599[0, 0, 0] : f32 from vector<1x1x1xf32>
    %cst_217 = arith.constant 1.024000e+03 : f32
    %601 = arith.divf %600, %cst_217 : f32
    %602 = vector.broadcast %593 : f32 to vector<16x64xf32>
    %603 = arith.subf %588, %602 : vector<16x64xf32>
    %cst_218 = arith.constant 9.99999974E-6 : f32
    %604 = arith.addf %601, %cst_218 : f32
    %605 = math.rsqrt %604 : f32
    %606 = vector.broadcast %605 : f32 to vector<16x64xf32>
    %607 = arith.mulf %603, %606 : vector<16x64xf32>
    %cst_219 = arith.constant dense<0xFF800000> : vector<16xf32>
    %608 = vector.multi_reduction <maximumf>, %607, %cst_219 [1] : vector<16x64xf32> to vector<16xf32>
    %609 = vector.shape_cast %608 : vector<16xf32> to vector<16x1xf32>
    %610 = vector.broadcast %609 : vector<16x1xf32> to vector<16x64xf32>
    %611 = arith.subf %607, %610 : vector<16x64xf32>
    %612 = math.exp %611 : vector<16x64xf32>
    %cst_220 = arith.constant dense<0.000000e+00> : vector<16xf32>
    %613 = vector.multi_reduction <add>, %612, %cst_220 [1] : vector<16x64xf32> to vector<16xf32>
    %614 = vector.shape_cast %613 : vector<16xf32> to vector<16x1xf32>
    %615 = tpu.reciprocal %614 {approx = true} : vector<16x1xf32> -> vector<16x1xf32>
    %616 = vector.broadcast %615 : vector<16x1xf32> to vector<16x64xf32>
    %617 = arith.mulf %612, %616 : vector<16x64xf32>
    %618 = arith.truncf %617 : vector<16x64xf32> to vector<16x64xbf16>
    %cst_221 = arith.constant dense<0.000000e+00> : vector<16x8xf32>
    %619 = tpu.matmul %618, %586, %cst_221 {dimension_numbers = #tpu.dot_dimension_numbers<[1], [0], [0], [1], [0, 0, 1, 1], [], []>} : vector<16x64xbf16>, vector<64x8xbf16>, vector<16x8xf32> -> vector<16x8xf32>
    %c0_222 = arith.constant 0 : index
    %c24 = arith.constant 24 : index
    %620 = vector.load %arg12[%c0_222, %c24] : memref<16x128xf32, #tpu.memory_space<vmem>>, vector<16x8xf32>
    tpu.vector_store %arg12[%c0_222, %c24], %619 {strides = array<i32>} : memref<16x128xf32, #tpu.memory_space<vmem>>, vector<16x8xf32>,
    %621 = vector.extract_strided_slice %56 {offsets = [0, 56], sizes = [16, 8], strides = [1, 1]} : vector<16x128xbf16> to vector<16x8xbf16>
    %cst_223 = arith.constant dense<0.000000e+00> : vector<16x64xf32>
    %622 = tpu.matmul %621, %581, %cst_223 {dimension_numbers = #tpu.dot_dimension_numbers<[1], [1], [0], [0], [0, 0, 1, 0], [], []>} : vector<16x8xbf16>, vector<64x8xbf16>, vector<16x64xf32> -> vector<16x64xf32>
    %623 = vector.shape_cast %622 : vector<16x64xf32> to vector<1x16x64xf32>
    %cst_224 = arith.constant dense<0.000000e+00> : vector<1xf32>
    %624 = vector.multi_reduction <add>, %623, %cst_224 [1, 2] : vector<1x16x64xf32> to vector<1xf32>
    %625 = vector.shape_cast %624 : vector<1xf32> to vector<1x1x1xf32>
    %626 = vector.extract %625[0, 0, 0] : f32 from vector<1x1x1xf32>
    %cst_225 = arith.constant 1.024000e+03 : f32
    %627 = arith.divf %626, %cst_225 : f32
    %628 = vector.broadcast %627 : f32 to vector<16x64xf32>
    %629 = arith.subf %622, %628 : vector<16x64xf32>
    %630 = arith.mulf %629, %629 : vector<16x64xf32>
    %631 = vector.shape_cast %630 : vector<16x64xf32> to vector<1x16x64xf32>
    %cst_226 = arith.constant dense<0.000000e+00> : vector<1xf32>
    %632 = vector.multi_reduction <add>, %631, %cst_226 [1, 2] : vector<1x16x64xf32> to vector<1xf32>
    %633 = vector.shape_cast %632 : vector<1xf32> to vector<1x1x1xf32>
    %634 = vector.extract %633[0, 0, 0] : f32 from vector<1x1x1xf32>
    %cst_227 = arith.constant 1.024000e+03 : f32
    %635 = arith.divf %634, %cst_227 : f32
    %636 = vector.broadcast %627 : f32 to vector<16x64xf32>
    %637 = arith.subf %622, %636 : vector<16x64xf32>
    %cst_228 = arith.constant 9.99999974E-6 : f32
    %638 = arith.addf %635, %cst_228 : f32
    %639 = math.rsqrt %638 : f32
    %640 = vector.broadcast %639 : f32 to vector<16x64xf32>
    %641 = arith.mulf %637, %640 : vector<16x64xf32>
    %cst_229 = arith.constant dense<0xFF800000> : vector<16xf32>
    %642 = vector.multi_reduction <maximumf>, %641, %cst_229 [1] : vector<16x64xf32> to vector<16xf32>
    %643 = vector.shape_cast %642 : vector<16xf32> to vector<16x1xf32>
    %644 = vector.broadcast %643 : vector<16x1xf32> to vector<16x64xf32>
    %645 = arith.subf %641, %644 : vector<16x64xf32>
    %646 = math.exp %645 : vector<16x64xf32>
    %cst_230 = arith.constant dense<0.000000e+00> : vector<16xf32>
    %647 = vector.multi_reduction <add>, %646, %cst_230 [1] : vector<16x64xf32> to vector<16xf32>
    %648 = vector.shape_cast %647 : vector<16xf32> to vector<16x1xf32>
    %649 = tpu.reciprocal %648 {approx = true} : vector<16x1xf32> -> vector<16x1xf32>
    %650 = vector.broadcast %649 : vector<16x1xf32> to vector<16x64xf32>
    %651 = arith.mulf %646, %650 : vector<16x64xf32>
    %652 = arith.truncf %651 : vector<16x64xf32> to vector<16x64xbf16>
    %cst_231 = arith.constant dense<0.000000e+00> : vector<16x8xf32>
    %653 = tpu.matmul %652, %586, %cst_231 {dimension_numbers = #tpu.dot_dimension_numbers<[1], [0], [0], [1], [0, 0, 1, 1], [], []>} : vector<16x64xbf16>, vector<64x8xbf16>, vector<16x8xf32> -> vector<16x8xf32>
    %654 = arith.truncf %653 : vector<16x8xf32> to vector<16x8xbf16>
    %cst_232 = arith.constant dense<0.000000e+00> : vector<16x8xf32>
    %655 = tpu.matmul %57, %654, %cst_232 {dimension_numbers = #tpu.dot_dimension_numbers<[1], [0], [0], [1], [0, 0, 1, 1], [], []>} : vector<16x16xbf16>, vector<16x8xbf16>, vector<16x8xf32> -> vector<16x8xf32>
    %656 = vector.extract_strided_slice %655 {offsets = [0, 0], sizes = [4, 8], strides = [1, 1]} : vector<16x8xf32> to vector<4x8xf32>
    %c12 = arith.constant 12 : index
    %c32_233 = arith.constant 32 : index
    %657 = vector.load %arg12[%c12, %c32_233] : memref<16x128xf32, #tpu.memory_space<vmem>>, vector<4x8xf32>
    tpu.vector_store %arg12[%c12, %c32_233], %656 {strides = array<i32>} : memref<16x128xf32, #tpu.memory_space<vmem>>, vector<4x8xf32>,
    %658 = vector.extract_strided_slice %655 {offsets = [4, 0], sizes = [4, 8], strides = [1, 1]} : vector<16x8xf32> to vector<4x8xf32>
    %c12_234 = arith.constant 12 : index
    %c40_235 = arith.constant 40 : index
    %659 = vector.load %arg12[%c12_234, %c40_235] : memref<16x128xf32, #tpu.memory_space<vmem>>, vector<4x8xf32>
    tpu.vector_store %arg12[%c12_234, %c40_235], %658 {strides = array<i32>} : memref<16x128xf32, #tpu.memory_space<vmem>>, vector<4x8xf32>,
    %660 = vector.extract_strided_slice %655 {offsets = [8, 0], sizes = [4, 8], strides = [1, 1]} : vector<16x8xf32> to vector<4x8xf32>
    %c12_236 = arith.constant 12 : index
    %c48_237 = arith.constant 48 : index
    %661 = vector.load %arg12[%c12_236, %c48_237] : memref<16x128xf32, #tpu.memory_space<vmem>>, vector<4x8xf32>
    tpu.vector_store %arg12[%c12_236, %c48_237], %660 {strides = array<i32>} : memref<16x128xf32, #tpu.memory_space<vmem>>, vector<4x8xf32>,
    %662 = vector.extract_strided_slice %655 {offsets = [12, 0], sizes = [4, 8], strides = [1, 1]} : vector<16x8xf32> to vector<4x8xf32>
    %c12_238 = arith.constant 12 : index
    %c56_239 = arith.constant 56 : index
    %663 = vector.load %arg12[%c12_238, %c56_239] : memref<16x128xf32, #tpu.memory_space<vmem>>, vector<4x8xf32>
    tpu.vector_store %arg12[%c12_238, %c56_239], %662 {strides = array<i32>} : memref<16x128xf32, #tpu.memory_space<vmem>>, vector<4x8xf32>,
    %664 = vector.extract_strided_slice %56 {offsets = [0, 88], sizes = [16, 8], strides = [1, 1]} : vector<16x128xbf16> to vector<16x8xbf16>
    %cst_240 = arith.constant dense<0.000000e+00> : vector<16x64xf32>
    %665 = tpu.matmul %664, %581, %cst_240 {dimension_numbers = #tpu.dot_dimension_numbers<[1], [1], [0], [0], [0, 0, 1, 0], [], []>} : vector<16x8xbf16>, vector<64x8xbf16>, vector<16x64xf32> -> vector<16x64xf32>
    %666 = vector.shape_cast %665 : vector<16x64xf32> to vector<1x16x64xf32>
    %cst_241 = arith.constant dense<0.000000e+00> : vector<1xf32>
    %667 = vector.multi_reduction <add>, %666, %cst_241 [1, 2] : vector<1x16x64xf32> to vector<1xf32>
    %668 = vector.shape_cast %667 : vector<1xf32> to vector<1x1x1xf32>
    %669 = vector.extract %668[0, 0, 0] : f32 from vector<1x1x1xf32>
    %cst_242 = arith.constant 1.024000e+03 : f32
    %670 = arith.divf %669, %cst_242 : f32
    %671 = vector.broadcast %670 : f32 to vector<16x64xf32>
    %672 = arith.subf %665, %671 : vector<16x64xf32>
    %673 = arith.mulf %672, %672 : vector<16x64xf32>
    %674 = vector.shape_cast %673 : vector<16x64xf32> to vector<1x16x64xf32>
    %cst_243 = arith.constant dense<0.000000e+00> : vector<1xf32>
    %675 = vector.multi_reduction <add>, %674, %cst_243 [1, 2] : vector<1x16x64xf32> to vector<1xf32>
    %676 = vector.shape_cast %675 : vector<1xf32> to vector<1x1x1xf32>
    %677 = vector.extract %676[0, 0, 0] : f32 from vector<1x1x1xf32>
    %cst_244 = arith.constant 1.024000e+03 : f32
    %678 = arith.divf %677, %cst_244 : f32
    %679 = vector.broadcast %670 : f32 to vector<16x64xf32>
    %680 = arith.subf %665, %679 : vector<16x64xf32>
    %cst_245 = arith.constant 9.99999974E-6 : f32
    %681 = arith.addf %678, %cst_245 : f32
    %682 = math.rsqrt %681 : f32
    %683 = vector.broadcast %682 : f32 to vector<16x64xf32>
    %684 = arith.mulf %680, %683 : vector<16x64xf32>
    %cst_246 = arith.constant dense<0xFF800000> : vector<16xf32>
    %685 = vector.multi_reduction <maximumf>, %684, %cst_246 [1] : vector<16x64xf32> to vector<16xf32>
    %686 = vector.shape_cast %685 : vector<16xf32> to vector<16x1xf32>
    %687 = vector.broadcast %686 : vector<16x1xf32> to vector<16x64xf32>
    %688 = arith.subf %684, %687 : vector<16x64xf32>
    %689 = math.exp %688 : vector<16x64xf32>
    %cst_247 = arith.constant dense<0.000000e+00> : vector<16xf32>
    %690 = vector.multi_reduction <add>, %689, %cst_247 [1] : vector<16x64xf32> to vector<16xf32>
    %691 = vector.shape_cast %690 : vector<16xf32> to vector<16x1xf32>
    %692 = tpu.reciprocal %691 {approx = true} : vector<16x1xf32> -> vector<16x1xf32>
    %693 = vector.broadcast %692 : vector<16x1xf32> to vector<16x64xf32>
    %694 = arith.mulf %689, %693 : vector<16x64xf32>
    %695 = arith.truncf %694 : vector<16x64xf32> to vector<16x64xbf16>
    %cst_248 = arith.constant dense<0.000000e+00> : vector<16x8xf32>
    %696 = tpu.matmul %695, %586, %cst_248 {dimension_numbers = #tpu.dot_dimension_numbers<[1], [0], [0], [1], [0, 0, 1, 1], [], []>} : vector<16x64xbf16>, vector<64x8xbf16>, vector<16x8xf32> -> vector<16x8xf32>
    %697 = arith.truncf %696 : vector<16x8xf32> to vector<16x8xbf16>
    %cst_249 = arith.constant dense<0.000000e+00> : vector<16x8xf32>
    %698 = tpu.matmul %57, %697, %cst_249 {dimension_numbers = #tpu.dot_dimension_numbers<[1], [0], [0], [1], [0, 0, 1, 1], [], []>} : vector<16x16xbf16>, vector<16x8xbf16>, vector<16x8xf32> -> vector<16x8xf32>
    %699 = vector.extract_strided_slice %698 {offsets = [0, 0], sizes = [4, 8], strides = [1, 1]} : vector<16x8xf32> to vector<4x8xf32>
    %c12_250 = arith.constant 12 : index
    %c64_251 = arith.constant 64 : index
    %700 = vector.load %arg12[%c12_250, %c64_251] : memref<16x128xf32, #tpu.memory_space<vmem>>, vector<4x8xf32>
    tpu.vector_store %arg12[%c12_250, %c64_251], %699 {strides = array<i32>} : memref<16x128xf32, #tpu.memory_space<vmem>>, vector<4x8xf32>,
    %701 = vector.extract_strided_slice %698 {offsets = [4, 0], sizes = [4, 8], strides = [1, 1]} : vector<16x8xf32> to vector<4x8xf32>
    %c12_252 = arith.constant 12 : index
    %c72_253 = arith.constant 72 : index
    %702 = vector.load %arg12[%c12_252, %c72_253] : memref<16x128xf32, #tpu.memory_space<vmem>>, vector<4x8xf32>
    tpu.vector_store %arg12[%c12_252, %c72_253], %701 {strides = array<i32>} : memref<16x128xf32, #tpu.memory_space<vmem>>, vector<4x8xf32>,
    %703 = vector.extract_strided_slice %698 {offsets = [8, 0], sizes = [4, 8], strides = [1, 1]} : vector<16x8xf32> to vector<4x8xf32>
    %c12_254 = arith.constant 12 : index
    %c80_255 = arith.constant 80 : index
    %704 = vector.load %arg12[%c12_254, %c80_255] : memref<16x128xf32, #tpu.memory_space<vmem>>, vector<4x8xf32>
    tpu.vector_store %arg12[%c12_254, %c80_255], %703 {strides = array<i32>} : memref<16x128xf32, #tpu.memory_space<vmem>>, vector<4x8xf32>,
    %705 = vector.extract_strided_slice %698 {offsets = [12, 0], sizes = [4, 8], strides = [1, 1]} : vector<16x8xf32> to vector<4x8xf32>
    %c12_256 = arith.constant 12 : index
    %c88_257 = arith.constant 88 : index
    %706 = vector.load %arg12[%c12_256, %c88_257] : memref<16x128xf32, #tpu.memory_space<vmem>>, vector<4x8xf32>
    tpu.vector_store %arg12[%c12_256, %c88_257], %705 {strides = array<i32>} : memref<16x128xf32, #tpu.memory_space<vmem>>, vector<4x8xf32>,
    %707 = vector.extract_strided_slice %56 {offsets = [0, 120], sizes = [16, 8], strides = [1, 1]} : vector<16x128xbf16> to vector<16x8xbf16>
    %cst_258 = arith.constant dense<0.000000e+00> : vector<16x64xf32>
    %708 = tpu.matmul %707, %581, %cst_258 {dimension_numbers = #tpu.dot_dimension_numbers<[1], [1], [0], [0], [0, 0, 1, 0], [], []>} : vector<16x8xbf16>, vector<64x8xbf16>, vector<16x64xf32> -> vector<16x64xf32>
    %709 = vector.shape_cast %708 : vector<16x64xf32> to vector<1x16x64xf32>
    %cst_259 = arith.constant dense<0.000000e+00> : vector<1xf32>
    %710 = vector.multi_reduction <add>, %709, %cst_259 [1, 2] : vector<1x16x64xf32> to vector<1xf32>
    %711 = vector.shape_cast %710 : vector<1xf32> to vector<1x1x1xf32>
    %712 = vector.extract %711[0, 0, 0] : f32 from vector<1x1x1xf32>
    %cst_260 = arith.constant 1.024000e+03 : f32
    %713 = arith.divf %712, %cst_260 : f32
    %714 = vector.broadcast %713 : f32 to vector<16x64xf32>
    %715 = arith.subf %708, %714 : vector<16x64xf32>
    %716 = arith.mulf %715, %715 : vector<16x64xf32>
    %717 = vector.shape_cast %716 : vector<16x64xf32> to vector<1x16x64xf32>
    %cst_261 = arith.constant dense<0.000000e+00> : vector<1xf32>
    %718 = vector.multi_reduction <add>, %717, %cst_261 [1, 2] : vector<1x16x64xf32> to vector<1xf32>
    %719 = vector.shape_cast %718 : vector<1xf32> to vector<1x1x1xf32>
    %720 = vector.extract %719[0, 0, 0] : f32 from vector<1x1x1xf32>
    %cst_262 = arith.constant 1.024000e+03 : f32
    %721 = arith.divf %720, %cst_262 : f32
    %722 = vector.broadcast %713 : f32 to vector<16x64xf32>
    %723 = arith.subf %708, %722 : vector<16x64xf32>
    %cst_263 = arith.constant 9.99999974E-6 : f32
    %724 = arith.addf %721, %cst_263 : f32
    %725 = math.rsqrt %724 : f32
    %726 = vector.broadcast %725 : f32 to vector<16x64xf32>
    %727 = arith.mulf %723, %726 : vector<16x64xf32>
    %cst_264 = arith.constant dense<0xFF800000> : vector<16xf32>
    %728 = vector.multi_reduction <maximumf>, %727, %cst_264 [1] : vector<16x64xf32> to vector<16xf32>
    %729 = vector.shape_cast %728 : vector<16xf32> to vector<16x1xf32>
    %730 = vector.broadcast %729 : vector<16x1xf32> to vector<16x64xf32>
    %731 = arith.subf %727, %730 : vector<16x64xf32>
    %732 = math.exp %731 : vector<16x64xf32>
    %cst_265 = arith.constant dense<0.000000e+00> : vector<16xf32>
    %733 = vector.multi_reduction <add>, %732, %cst_265 [1] : vector<16x64xf32> to vector<16xf32>
    %734 = vector.shape_cast %733 : vector<16xf32> to vector<16x1xf32>
    %735 = tpu.reciprocal %734 {approx = true} : vector<16x1xf32> -> vector<16x1xf32>
    %736 = vector.broadcast %735 : vector<16x1xf32> to vector<16x64xf32>
    %737 = arith.mulf %732, %736 : vector<16x64xf32>
    %738 = arith.truncf %737 : vector<16x64xf32> to vector<16x64xbf16>
    %cst_266 = arith.constant dense<0.000000e+00> : vector<16x8xf32>
    %739 = tpu.matmul %738, %586, %cst_266 {dimension_numbers = #tpu.dot_dimension_numbers<[1], [0], [0], [1], [0, 0, 1, 1], [], []>} : vector<16x64xbf16>, vector<64x8xbf16>, vector<16x8xf32> -> vector<16x8xf32>
    %740 = arith.truncf %739 : vector<16x8xf32> to vector<16x8xbf16>
    %cst_267 = arith.constant dense<0.000000e+00> : vector<16x8xf32>
    %741 = tpu.matmul %57, %740, %cst_267 {dimension_numbers = #tpu.dot_dimension_numbers<[1], [0], [0], [1], [0, 0, 1, 1], [], []>} : vector<16x16xbf16>, vector<16x8xbf16>, vector<16x8xf32> -> vector<16x8xf32>
    %742 = vector.extract_strided_slice %741 {offsets = [0, 0], sizes = [4, 8], strides = [1, 1]} : vector<16x8xf32> to vector<4x8xf32>
    %c12_268 = arith.constant 12 : index
    %c96_269 = arith.constant 96 : index
    %743 = vector.load %arg12[%c12_268, %c96_269] : memref<16x128xf32, #tpu.memory_space<vmem>>, vector<4x8xf32>
    tpu.vector_store %arg12[%c12_268, %c96_269], %742 {strides = array<i32>} : memref<16x128xf32, #tpu.memory_space<vmem>>, vector<4x8xf32>,
    %744 = vector.extract_strided_slice %741 {offsets = [4, 0], sizes = [4, 8], strides = [1, 1]} : vector<16x8xf32> to vector<4x8xf32>
    %c12_270 = arith.constant 12 : index
    %c104_271 = arith.constant 104 : index
    %745 = vector.load %arg12[%c12_270, %c104_271] : memref<16x128xf32, #tpu.memory_space<vmem>>, vector<4x8xf32>
    tpu.vector_store %arg12[%c12_270, %c104_271], %744 {strides = array<i32>} : memref<16x128xf32, #tpu.memory_space<vmem>>, vector<4x8xf32>,
    %746 = vector.extract_strided_slice %741 {offsets = [8, 0], sizes = [4, 8], strides = [1, 1]} : vector<16x8xf32> to vector<4x8xf32>
    %c12_272 = arith.constant 12 : index
    %c112_273 = arith.constant 112 : index
    %747 = vector.load %arg12[%c12_272, %c112_273] : memref<16x128xf32, #tpu.memory_space<vmem>>, vector<4x8xf32>
    tpu.vector_store %arg12[%c12_272, %c112_273], %746 {strides = array<i32>} : memref<16x128xf32, #tpu.memory_space<vmem>>, vector<4x8xf32>,
    %748 = vector.extract_strided_slice %741 {offsets = [12, 0], sizes = [4, 8], strides = [1, 1]} : vector<16x8xf32> to vector<4x8xf32>
    %c12_274 = arith.constant 12 : index
    %c120_275 = arith.constant 120 : index
    %749 = vector.load %arg12[%c12_274, %c120_275] : memref<16x128xf32, #tpu.memory_space<vmem>>, vector<4x8xf32>
    tpu.vector_store %arg12[%c12_274, %c120_275], %748 {strides = array<i32>} : memref<16x128xf32, #tpu.memory_space<vmem>>, vector<4x8xf32>,
    %c0_276 = arith.constant 0 : index
    %c0_277 = arith.constant 0 : index
    %750 = vector.load %arg12[%c0_276, %c0_277] : memref<16x128xf32, #tpu.memory_space<vmem>>, vector<16x128xf32>
    %751 = arith.truncf %750 : vector<16x128xf32> to vector<16x128xbf16>
    %c0_278 = arith.constant 0 : index
    %c0_279 = arith.constant 0 : index
    %752 = vector.load %arg9[%c0_278, %c0_279] : memref<128x128xbf16, #tpu.memory_space<vmem>>, vector<128x128xbf16>
    %cst_280 = arith.constant dense<0.000000e+00> : vector<16x128xf32>
    %753 = tpu.matmul %751, %752, %cst_280 {dimension_numbers = #tpu.dot_dimension_numbers<[1], [0], [0], [1], [0, 0, 1, 1], [], []>} : vector<16x128xbf16>, vector<128x128xbf16>, vector<16x128xf32> -> vector<16x128xf32>
    %c0_281 = arith.constant 0 : index
    %c0_282 = arith.constant 0 : index
    %c0_283 = arith.constant 0 : index
    %754 = vector.load %arg11[%c0_281, %c0_282, %c0_283] : memref<1x16x128xf32, #tpu.memory_space<vmem>>, vector<1x16x128xf32>
    %755 = vector.shape_cast %754 : vector<1x16x128xf32> to vector<16x128xf32>
    %756 = vector.shape_cast %753 : vector<16x128xf32> to vector<1x16x128xf32>
    tpu.vector_store %arg11[%c0_281, %c0_282, %c0_283], %756 {strides = array<i32>} : memref<1x16x128xf32, #tpu.memory_space<vmem>>, vector<1x16x128xf32>,
    return
  }
  func.func @transform_0(%arg0: i32) -> (i32, i32, i32) {
    %c0_i32 = arith.constant 0 : i32
    %c0_i32_0 = arith.constant 0 : i32
    %c0_i32_1 = arith.constant 0 : i32
    return %arg0, %c0_i32, %c0_i32_0 : i32, i32, i32
  }
  func.func @transform_1(%arg0: i32) -> (i32, i32, i32) {
    %c0_i32 = arith.constant 0 : i32
    %c0_i32_0 = arith.constant 0 : i32
    %c0_i32_1 = arith.constant 0 : i32
    return %arg0, %c0_i32, %c0_i32_0 : i32, i32, i32
  }
  func.func @transform_2(%arg0: i32) -> (i32, i32) {
    %c0_i32 = arith.constant 0 : i32
    %c0_i32_0 = arith.constant 0 : i32
    %c0_i32_1 = arith.constant 0 : i32
    return %c0_i32, %c0_i32_0 : i32, i32
  }
  func.func @transform_3(%arg0: i32) -> (i32, i32) {
    %c0_i32 = arith.constant 0 : i32
    %c0_i32_0 = arith.constant 0 : i32
    %c0_i32_1 = arith.constant 0 : i32
    return %c0_i32, %c0_i32_0 : i32, i32
  }
  func.func @transform_4(%arg0: i32) -> (i32, i32) {
    %c0_i32 = arith.constant 0 : i32
    %c0_i32_0 = arith.constant 0 : i32
    %c0_i32_1 = arith.constant 0 : i32
    return %c0_i32, %c0_i32_0 : i32, i32
  }
  func.func @transform_5(%arg0: i32) -> (i32, i32) {
    %c0_i32 = arith.constant 0 : i32
    %c0_i32_0 = arith.constant 0 : i32
    %c0_i32_1 = arith.constant 0 : i32
    return %c0_i32, %c0_i32_0 : i32, i32
  }
  func.func @transform_6(%arg0: i32) -> (i32, i32) {
    %c0_i32 = arith.constant 0 : i32
    %c0_i32_0 = arith.constant 0 : i32
    %c0_i32_1 = arith.constant 0 : i32
    return %c0_i32, %c0_i32_0 : i32, i32
  }
  func.func @transform_7(%arg0: i32) -> (i32, i32) {
    %c0_i32 = arith.constant 0 : i32
    %c0_i32_0 = arith.constant 0 : i32
    %c0_i32_1 = arith.constant 0 : i32
    return %c0_i32, %c0_i32_0 : i32, i32
  }
  func.func @transform_8(%arg0: i32) -> (i32, i32) {
    %c0_i32 = arith.constant 0 : i32
    %c0_i32_0 = arith.constant 0 : i32
    %c0_i32_1 = arith.constant 0 : i32
    return %c0_i32, %c0_i32_0 : i32, i32
  }
  func.func @transform_9(%arg0: i32) -> (i32, i32) {
    %c0_i32 = arith.constant 0 : i32
    %c0_i32_0 = arith.constant 0 : i32
    %c0_i32_1 = arith.constant 0 : i32
    return %c0_i32, %c0_i32_0 : i32, i32
  }
  func.func @transform_10(%arg0: i32) -> (i32, i32, i32) {
    %c0_i32 = arith.constant 0 : i32
    %c0_i32_0 = arith.constant 0 : i32
    %c0_i32_1 = arith.constant 0 : i32
    return %arg0, %c0_i32, %c0_i32_0 : i32, i32, i32
  }
}

</mosaic_0001>

<bundles_post_ra>
// kernel: tpu_custom_call.1
= control target key start
LH: loop header
LB: loop body
LE: loop exit
PB: predicated region body
PF: predicated region fallthrough
CT: control target
= control target key end

     0   :  { %s8927_s0 = inlined_call_operand.hbm [shape: f32[2,16,128], index: 0, kind: input, shape index: {}]   ;;  %s8928_s1 = inlined_call_operand.hbm [shape: f32[2,16,128], index: 1, kind: input, shape index: {}]   ;;  %s8929_s2 = inlined_call_operand.hbm [shape: bf16[128,128], index: 2, kind: input, shape index: {}]   ;;  %s8930_s3 = inlined_call_operand.hbm [shape: bf16[128,128], index: 3, kind: input, shape index: {}]   ;;  %s8931_s4 = inlined_call_operand.hbm [shape: bf16[128,128], index: 4, kind: input, shape index: {}]   ;;  %s8932_s5 = inlined_call_operand.hbm [shape: bf16[128,128], index: 5, kind: input, shape index: {}]   ;;  %s8933_s6 = inlined_call_operand.hbm [shape: bf16[128,128], index: 6, kind: input, shape index: {}]   ;;  %s8934_s7 = inlined_call_operand.hbm [shape: bf16[128,128], index: 7, kind: input, shape index: {}]   ;;  %s8935_s8 = inlined_call_operand.hbm [shape: bf16[128,128], index: 8, kind: input, shape index: {}]   ;;  %s8936_s9 = inlined_call_operand.vmem [shape: bf16[16,16], index: 9, kind: input, shape index: {}]   ;;  %s8937_s10 = inlined_call_operand.hbm [shape: f32[2,16,128], index: 10, kind: output, shape index: {}]  }
   0x1   :  { %8965 = sst [smem:[#allocation26_spill]] %s8927_s0 }
   0x2   :  { %8966 = sst [smem:[#allocation27_spill]] %s8929_s2 }
   0x3   :  { %8967 = sst [smem:[#allocation28_spill]] %s8930_s3 }
   0x4   :  { %8968 = sst [smem:[#allocation29_spill]] %s8931_s4 }
   0x5   :  { %8969 = sst [smem:[#allocation30_spill]] %s8932_s5 }
   0x6   :  { %8970 = sst [smem:[#allocation31_spill]] %s8936_s9 }
   0x7   :  { %8971 = sst [smem:[#allocation32_spill]] %s8937_s10 }
   0x8   :  { %15 = vsyncpa [#allocation4], 0 }
   0x9   :  { %17 = vsyncpa [#allocation4 + $0x1], 0 }
   0xa   :  { %18 = vsyncpa [#allocation7], 0 }
   0xb   :  { %20 = vsyncpa [#allocation7 + $0x1], 0 }
   0xc   :  { %21 = vsyncpa [#allocation10], 0 }
   0xd   :  { %22 = vsyncpa [#allocation13], 0 }
   0xe   :  { %23 = vsyncpa [#allocation16], 0 }
   0xf   :  { %24 = vsyncpa [#allocation5], 0 }
  0x10   :  { %26 = vsyncpa [#allocation5 + $0x1], 0  ;;  %s7278_s13 = smov 0   ;;  %s7280_s14 = smov 0  }
  0x11   :  { %s7282_s15 = smov 0   ;;  %s7284_s16 = smov 0  }
  0x12 LB: > { %s7191_s17 = smov [#allocation8]   ;;  %s7299_s19 = sadd.s32 4294967295, %s7189_s16   ;;  %s7189_s16 = sphi %s7284_s16, %s9026_s16   ;;  %s7185_s15 = sphi %s7282_s15, %s9025_s15   ;;  %s7181_s14 = sphi %s7280_s14, %s9024_s14   ;;  %s7177_s13 = sphi %s7278_s13, %s9023_s13  }
  0x13   : > { %s295_s18 = sshll.u32 %s7191_s17, 4  ;;  %p5272_p0 = scmp.ge.s32.totalorder %s7189_s16, 1  ;;  %s7304_s18 = int_to_ptr.vmem [resolvable:$true] %s295_s18 }
  0x14   : > { %p8940_p1 = scmp.eq.s32.totalorder %s7299_s19, 0  ;;  %p283_p2 = scmp.lt.s32.totalorder %s7189_s16, 3 }
  0x15   : > { %s7192_s21 = smov [#allocation9]   ;;  %s7193_s24 = smov [#allocation12]  }
  0x16   : > { %p7306_p3 = pnand %p5272_p0, %p283_p2  ;;  %s308_s22 = sshll.u32 %s7192_s21, 4  ;;  %s7319_s22 = int_to_ptr.vmem [resolvable:$true] %s308_s22 }
  0x17   : > { %s334_s25 = sshll.u32 %s7193_s24, 4  ;;  %s8974_s2 = sld [smem:[#allocation27_spill]]  ;;  %s7321_s25 = int_to_ptr.vmem [resolvable:$true] %s334_s25 }
  0x18   : > { %s8972_s20 = scalar_select %p7306_p3, 1, 0 }
  0x19   : > { %p6450_p5 = pneg %p7306_p3 }
  0x1b   : > { %p7315_p6 = pnand %p6450_p5, %p8940_p1 }
  0x1d   : > { %s6847_s28 = scalar_lea.hbm %s8974_s2, 1024  ;;  %p7331_p8 = pneg %p7315_p6 }
  0x1e   : > { %p6848_p7 = scmp.ne.s32.totalorder %s8974_s2, %s6847_s28  ;;  %p6854_p11 = scmp.lt.u32.totalorder %s6847_s28, %s8974_s2 }
  0x20   : > { %p6850_p9 = pnand %p7331_p8, %p6848_p7 }
  0x22   : > { %p6851_p10 = pneg %p6850_p9 }
  0x24   : > { %p6856_p12 = pnand %p6854_p11, %p6851_p10 }
  0x26   : > { %6859 = shalt.err (!%p6856_p12)
}
  0x27   : > { %s6860_s21 = scalar_lea.vmem %s7304_s18, 1024  ;;  %p6868_p5 = scmp.lt.s32.totalorder %s7304_s18, %s7304_s18 }
  0x28   : > { %p6861_p13 = scmp.ne.s32.totalorder %s7304_s18, %s6860_s21  ;;  %p6869_p4 = scmp.lt.s32.totalorder %s6860_s21, %s6860_s21 }
  0x2a   : > { %p6863_p0 = pnand %p6861_p13, %p7331_p8  ;;  %p6870_p7 = por %p6869_p4, %p6868_p5 }
  0x2c   : > { %p6864_p2 = pneg %p6863_p0 }
  0x2e   : > { %p6871_p9 = pnand %p6870_p7, %p6864_p2 }
  0x30   : > { %6874 = shalt.err (!%p6871_p9)
}
  0x31   : > { %s7194_s24 = smov 64   ;;  %s7195_s26 = smov 4  }
  0x32   : > { %6453 = dma.hbm_to_vmem [thread:$0]  (!%p7315_p6), %s8974_s2, 1024, %s7304_s18, [#allocation7], %s7194_s24, %s7194_s24, %s7195_s26  }
  0x33   : > { %s8976_s3 = sld [smem:[#allocation28_spill]] }
  0x39   : > { %s6875_s12 = scalar_lea.hbm %s8976_s3, 1024 }
  0x3a   : > { %p6876_p4 = scmp.ne.s32.totalorder %s8976_s3, %s6875_s12  ;;  %p6882_p12 = scmp.lt.u32.totalorder %s6875_s12, %s8976_s3 }
  0x3c   : > { %p6878_p10 = pnand %p6876_p4, %p7331_p8 }
  0x3e   : > { %p6879_p11 = pneg %p6878_p10 }
  0x40   : > { %p6884_p13 = pnand %p6882_p12, %p6879_p11 }
  0x42   : > { %6887 = shalt.err (!%p6884_p13)
}
  0x43   : > { %s6888_s18 = scalar_lea.vmem %s7319_s22, 1024  ;;  %p6896_p7 = scmp.lt.s32.totalorder %s7319_s22, %s7319_s22 }
  0x44   : > { %p6889_p0 = scmp.ne.s32.totalorder %s7319_s22, %s6888_s18  ;;  %p6897_p9 = scmp.lt.s32.totalorder %s6888_s18, %s6888_s18 }
  0x46   : > { %p6891_p2 = pnand %p6889_p0, %p7331_p8  ;;  %p6898_p4 = por %p6897_p9, %p6896_p7 }
  0x48   : > { %p6892_p5 = pneg %p6891_p2 }
  0x4a   : > { %p6899_p10 = pnand %p6898_p4, %p6892_p5 }
  0x4c   : > { %6902 = shalt.err (!%p6899_p10)
}
  0x4d   : > { %6456 = dma.hbm_to_vmem [thread:$0]  (!%p7315_p6), %s8976_s3, 1024, %s7319_s22, [#allocation10], %s7194_s24, %s7194_s24, %s7195_s26  }
  0x4e   : > { %s8977_s5 = sld [smem:[#allocation30_spill]] }
  0x54   : > { %s6903_s29 = scalar_lea.hbm %s8977_s5, 1024 }
  0x55   : > { %p6904_p11 = scmp.ne.s32.totalorder %s8977_s5, %s6903_s29  ;;  %p6910_p0 = scmp.lt.u32.totalorder %s6903_s29, %s8977_s5 }
  0x57   : > { %p6906_p12 = pnand %p6904_p11, %p7331_p8 }
  0x59   : > { %p6907_p13 = pneg %p6906_p12 }
  0x5b   : > { %p6912_p2 = pnand %p6910_p0, %p6907_p13 }
  0x5d   : > { %6915 = shalt.err (!%p6912_p2)
}
  0x5e   : > { %s6916_s22 = scalar_lea.vmem %s7321_s25, 1024  ;;  %p6924_p4 = scmp.lt.s32.totalorder %s7321_s25, %s7321_s25 }
  0x5f   : > { %p6917_p5 = scmp.ne.s32.totalorder %s7321_s25, %s6916_s22  ;;  %p6925_p10 = scmp.lt.s32.totalorder %s6916_s22, %s6916_s22 }
  0x61   : > { %p6919_p7 = pnand %p6917_p5, %p7331_p8  ;;  %p6926_p11 = por %p6925_p10, %p6924_p4 }
  0x63   : > { %p6920_p9 = pneg %p6919_p7 }
  0x65   : > { %p6927_p12 = pnand %p6926_p11, %p6920_p9 }
  0x67   : > { %6930 = shalt.err (!%p6927_p12)
}
  0x68   : > { %6462 = dma.hbm_to_vmem [thread:$0]  (!%p7315_p6), %s8977_s5, 1024, %s7321_s25, [#allocation13], %s7194_s24, %s7194_s24, %s7195_s26  }
  0x69   : > { %s7196_s10 = smov [#allocation15]   ;;  %s7197_s28 = smov [#allocation11]  }
  0x6a   : > { %s360_s27 = sshll.u32 %s7196_s10, 4  ;;  %s321_s29 = sshll.u32 %s7197_s28, 4  ;;  %s361_s27 = int_to_ptr.vmem [resolvable:$true] %s360_s27  ;;  %s322_s29 = int_to_ptr.vmem [resolvable:$true] %s321_s29 }
  0x6b   : > { %s6931_s17 = scalar_lea.hbm %s8934_s7, 1024 }
  0x6c   : > { %p6932_p13 = scmp.ne.s32.totalorder %s8934_s7, %s6931_s17  ;;  %p6938_p5 = scmp.lt.u32.totalorder %s6931_s17, %s8934_s7 }
  0x6e   : > { %p6934_p0 = pnand %p6932_p13, %p7331_p8 }
  0x70   : > { %p6935_p2 = pneg %p6934_p0 }
  0x72   : > { %p6940_p7 = pnand %p6938_p5, %p6935_p2 }
  0x74   : > { %6943 = shalt.err (!%p6940_p7)
}
  0x75   : > { %s6944_s25 = scalar_lea.vmem %s361_s27, 1024  ;;  %p6952_p11 = scmp.lt.s32.totalorder %s361_s27, %s361_s27 }
  0x76   : > { %p6945_p9 = scmp.ne.s32.totalorder %s361_s27, %s6944_s25  ;;  %p6953_p12 = scmp.lt.s32.totalorder %s6944_s25, %s6944_s25 }
  0x78   : > { %p6947_p4 = pnand %p6945_p9, %p7331_p8  ;;  %p6954_p1 = por %p6953_p12, %p6952_p11 }
  0x7a   : > { %p6948_p10 = pneg %p6947_p4 }
  0x7c   : > { %p6955_p3 = pnand %p6954_p1, %p6948_p10 }
  0x7e   : > { %6958 = shalt.err (!%p6955_p3)
}
  0x7f   : > { %6468 = dma.hbm_to_vmem [thread:$0]  (!%p7315_p6), %s8934_s7, 1024, %s361_s27, [#allocation16], %s7194_s24, %s7194_s24, %s7195_s26  }
  0x80   : > { %s8978_s4 = sld [smem:[#allocation29_spill]] }
  0x86   : > { %s6959_s30 = scalar_lea.hbm %s8978_s4, 1024 }
  0x87   : > { %p6960_p1 = scmp.ne.s32.totalorder %s8978_s4, %s6959_s30  ;;  %p6966_p0 = scmp.lt.u32.totalorder %s6959_s30, %s8978_s4 }
  0x89   : > { %p6962_p3 = pnand %p6960_p1, %p7331_p8 }
  0x8b   : > { %p6963_p13 = pneg %p6962_p3 }
  0x8d   : > { %p6968_p2 = pnand %p6966_p0, %p6963_p13 }
  0x8f   : > { %6971 = shalt.err (!%p6968_p2)
}
  0x90   : > { %s6972_s18 = scalar_lea.vmem %s322_s29, 1024  ;;  %p6980_p4 = scmp.lt.s32.totalorder %s322_s29, %s322_s29 }
  0x91   : > { %p6973_p5 = scmp.ne.s32.totalorder %s322_s29, %s6972_s18  ;;  %p6981_p10 = scmp.lt.s32.totalorder %s6972_s18, %s6972_s18 }
  0x93   : > { %p6975_p7 = pnand %p6973_p5, %p7331_p8  ;;  %p6982_p11 = por %p6981_p10, %p6980_p4 }
  0x95   : > { %p6976_p9 = pneg %p6975_p7 }
  0x97   : > { %p6983_p12 = pnand %p6982_p11, %p6976_p9 }
  0x99   : > { %6986 = shalt.err (!%p6983_p12)
}
  0x9a   : > { %6459 = dma.hbm_to_vmem [thread:$0]  (!%p7315_p6), %s8978_s4, 1024, %s322_s29, [#allocation10], %s7194_s24, %s7194_s24, %s7195_s26  }
  0x9b   : > { %s7198_s2 = smov [#allocation14]   ;;  %s7199_s10 = smov [#allocation17]  }
  0x9c   : > { %s347_s9 = sshll.u32 %s7198_s2, 4  ;;  %s373_s28 = sshll.u32 %s7199_s10, 4  ;;  %s348_s9 = int_to_ptr.vmem [resolvable:$true] %s347_s9  ;;  %s374_s28 = int_to_ptr.vmem [resolvable:$true] %s373_s28 }
  0x9d   : > { %s6987_s17 = scalar_lea.hbm %s8933_s6, 1024 }
  0x9e   : > { %p6988_p1 = scmp.ne.s32.totalorder %s8933_s6, %s6987_s17  ;;  %p6994_p0 = scmp.lt.u32.totalorder %s6987_s17, %s8933_s6 }
  0xa0   : > { %p6990_p3 = pnand %p6988_p1, %p7331_p8 }
  0xa2   : > { %p6991_p13 = pneg %p6990_p3 }
  0xa4   : > { %p6996_p2 = pnand %p6994_p0, %p6991_p13 }
  0xa6   : > { %6999 = shalt.err (!%p6996_p2)
}
  0xa7   : > { %s7000_s29 = scalar_lea.vmem %s348_s9, 1024  ;;  %p7008_p4 = scmp.lt.s32.totalorder %s348_s9, %s348_s9 }
  0xa8   : > { %p7001_p5 = scmp.ne.s32.totalorder %s348_s9, %s7000_s29  ;;  %p7009_p10 = scmp.lt.s32.totalorder %s7000_s29, %s7000_s29 }
  0xaa   : > { %p7003_p7 = pnand %p7001_p5, %p7331_p8  ;;  %p7010_p11 = por %p7009_p10, %p7008_p4 }
  0xac   : > { %p7004_p9 = pneg %p7003_p7 }
  0xae   : > { %p7011_p12 = pnand %p7010_p11, %p7004_p9 }
  0xb0   : > { %7014 = shalt.err (!%p7011_p12)
}
  0xb1   : > { %6465 = dma.hbm_to_vmem [thread:$0]  (!%p7315_p6), %s8933_s6, 1024, %s348_s9, [#allocation13], %s7194_s24, %s7194_s24, %s7195_s26  }
  0xb2   : > { %s7015_s12 = scalar_lea.hbm %s8935_s8, 1024 }
  0xb3   : > { %p7016_p1 = scmp.ne.s32.totalorder %s8935_s8, %s7015_s12  ;;  %p7022_p0 = scmp.lt.u32.totalorder %s7015_s12, %s8935_s8 }
  0xb5   : > { %p7018_p3 = pnand %p7016_p1, %p7331_p8 }
  0xb7   : > { %p7019_p13 = pneg %p7018_p3 }
  0xb9   : > { %p7024_p2 = pnand %p7022_p0, %p7019_p13 }
  0xbb   : > { %7027 = shalt.err (!%p7024_p2)
}
  0xbc   : > { %s7028_s27 = scalar_lea.vmem %s374_s28, 1024  ;;  %p7036_p4 = scmp.lt.s32.totalorder %s374_s28, %s374_s28 }
  0xbd   : > { %p7029_p5 = scmp.ne.s32.totalorder %s374_s28, %s7028_s27  ;;  %p7037_p10 = scmp.lt.s32.totalorder %s7028_s27, %s7028_s27 }
  0xbf   : > { %p7031_p7 = pnand %p7029_p5, %p7331_p8  ;;  %p7038_p11 = por %p7037_p10, %p7036_p4 }
  0xc1   : > { %p7032_p9 = pneg %p7031_p7 }
  0xc3   : > { %p7039_p12 = pnand %p7038_p11, %p7032_p9 }
  0xc5   : > { %7042 = shalt.err (!%p7039_p12)
}
  0xc6   : > { %6471 = dma.hbm_to_vmem [thread:$0]  (!%p7315_p6), %s8935_s8, 1024, %s374_s28, [#allocation16], %s7194_s24, %s7194_s24, %s7195_s26  }
  0xc7   : > { %s5271_s23 = sadd.s32 4294967294, %s7189_s16   ;;  %s7493_s11 = sadd.s32 1, %s7189_s16  }
  0xc8   : > { %s39_s25 = sadd.s32 1, %s7185_s15  ;;  %s36_s2 = ssub.s32 %s7189_s16, %s7493_s11 }
  0xc9   : > { %p46_p8 = scmp.ne.s32.totalorder %s7185_s15, %s7181_s14  ;;  %p37_p1 = scmp.eq.s32.totalorder %s36_s2, 0 }
  0xca   : > { %p47_p3 = scmp.eq.s32.totalorder %s7189_s16, 0  ;;  %p52_p13 = scmp.ne.s32.totalorder %s7181_s14, %s7177_s13 }
  0xcb   : > { %p270_p0 = scmp.eq.s32.totalorder %s7299_s19, 1  ;;  %p8979_p5 = scmp.eq.s32.totalorder %s7299_s19, 0 }
  0xcc   : > { %s7505_s10 = scalar_select %p37_p1, %s7185_s15, %s39_s25  }
  0xcd   : > { %p48_p2 = por %p47_p3, %p46_p8  ;;  %p7509_p7 = por %p8979_p5, %p52_p13 }
  0xce   : > { %p7513_p6 = por %p270_p0, %p46_p8  ;;  %p276_p9 = scmp.eq.s32.totalorder %s5271_s23, 1 }
  0xcf   : > { %p6490_p4 = scmp.lt.s32.totalorder %s7189_s16, 2  ;;  %s390_s28 = sand.u32 1, %s7185_s15  }
  0xd0   : > { %s8981_s26 = scalar_select %p7513_p6, 1, 0 }
  0xd1   : > { %p7519_p10 = por %p276_p9, %p52_p13  ;;  %s7523_s12 = sshll.u32 %s390_s28, 4 }
  0xd2   : > { %s8942_s17 = sshll.u32 %s7189_s16, 8  ;;  %s8983_s0 = sld [smem:[#allocation26_spill]] }
  0xd3   : > { %s8982_s30 = scalar_select %p7519_p10, 1, 0 }
  0xd4   : > { %s394_s27 = scalar_lea.vmem [#allocation3], %s7523_s12  ;;  %p7534_p11 = pnand %p6490_p4, %p48_p2 }
  0xd5   : > { %s401_s9 = sshll.u32 %s394_s27, 4  ;;  %s7540_s23 = scalar_lea.sflag [#allocation4], %s390_s28  ;;  %s7538_s9 = int_to_ptr.vmem [resolvable:$true] %s401_s9 }
  0xd6   : > { %p7045_p8 = pneg %p7534_p11 }
  0xd8   : > { %s7531_s18 = scalar_lea.hbm %s8983_s0, %s8942_s17  ;;  %s7048_s22 = scalar_lea.hbm %s8983_s0, 512 }
  0xd9   : > { %s7043_s25 = scalar_lea.hbm %s7531_s18, 256  ;;  %p7049_p13 = scmp.lt.u32.totalorder %s7531_s18, %s8983_s0 }
  0xda   : > { %p7044_p12 = scmp.ne.s32.totalorder %s7531_s18, %s7043_s25  ;;  %p7050_p0 = scmp.lt.u32.totalorder %s7048_s22, %s7043_s25 }
  0xdb   : > { %p7052_p5 = scmp.lt.u32.totalorder %s7043_s25, %s7531_s18 }
  0xdc   : > { %p7046_p1 = pnand %p7045_p8, %p7044_p12  ;;  %p7051_p2 = por %p7050_p0, %p7049_p13 }
  0xde   : > { %p7047_p3 = pneg %p7046_p1  ;;  %p7053_p9 = por %p7052_p5, %p7051_p2 }
  0xe0   : > { %p7054_p4 = pnand %p7053_p9, %p7047_p3 }
  0xe2   : > { %7057 = shalt.err (!%p7054_p4)
}
  0xe3   : > { %s7058_s28 = scalar_lea.vmem %s7538_s9, 256  ;;  %s7200_s2 = smov [#allocation3]  }
  0xe4   : > { %p7059_p12 = scmp.ne.s32.totalorder %s7538_s9, %s7058_s28  ;;  %s7063_s21 = sshll.u32 %s7200_s2, 4  ;;  %s7064_s21 = int_to_ptr.vmem [resolvable:$false] %s7063_s21 }
  0xe5   : > { %s7065_s17 = scalar_lea.vmem %s7064_s21, 512  ;;  %p7066_p6 = scmp.lt.s32.totalorder %s7538_s9, %s7064_s21 }
  0xe6   : > { %p7061_p1 = pnand %p7059_p12, %p7045_p8  ;;  %p7067_p13 = scmp.lt.s32.totalorder %s7065_s17, %s7058_s28 }
  0xe8   : > { %p7062_p10 = pneg %p7061_p1  ;;  %p7068_p0 = por %p7067_p13, %p7066_p6 }
  0xea   : > { %p7069_p2 = pnand %p7068_p0, %p7062_p10 }
  0xec   : > { %7072 = shalt.err (!%p7069_p2)
}
  0xed   : > { %s7201_s25 = smov 128   ;;  %s7202_s22 = smov 8  }
  0xee   : > { %6475 = dma.hbm_to_vmem [thread:$0]  (!%p7534_p11), %s7531_s18, 256, %s7538_s9, %s7540_s23, %s7201_s25, %s7201_s25, %s7202_s22  }
  0xef   : > { %s8985_s27 = sshll.u32 %s7189_s16, 8  ;;  %s415_s17 = scalar_lea.vmem [#allocation6], %s7523_s12 }
  0xf0   : > { %s7576_s21 = scalar_lea.hbm %s8928_s1, %s8985_s27  ;;  %s422_s0 = sshll.u32 %s415_s17, 4  ;;  %s7580_s0 = int_to_ptr.vmem [resolvable:$true] %s422_s0 }
  0xf1   : > { %s411_s3 = sand.u32 1, %s7189_s16   ;;  %s7073_s5 = scalar_lea.hbm %s7576_s21, 256 }
  0xf2   : > { %s7582_s4 = scalar_lea.sflag [#allocation7], %s411_s3  ;;  %p7074_p6 = scmp.ne.s32.totalorder %s7576_s21, %s7073_s5 }
  0xf3   : > { %s7078_s23 = scalar_lea.hbm %s8928_s1, 512  ;;  %p7079_p5 = scmp.lt.u32.totalorder %s7576_s21, %s8928_s1 }
  0xf4   : > { %p7076_p10 = pnand %p7074_p6, %p7045_p8  ;;  %p7080_p9 = scmp.lt.u32.totalorder %s7078_s23, %s7073_s5 }
  0xf5   : > { %p7082_p12 = scmp.lt.u32.totalorder %s7073_s5, %s7576_s21 }
  0xf6   : > { %p7077_p3 = pneg %p7076_p10  ;;  %p7081_p4 = por %p7080_p9, %p7079_p5 }
  0xf8   : > { %p7083_p1 = por %p7082_p12, %p7081_p4 }
  0xfa   : > { %p7084_p13 = pnand %p7083_p1, %p7077_p3 }
  0xfc   : > { %7087 = shalt.err (!%p7084_p13)
}
  0xfd   : > { %s7088_s3 = scalar_lea.vmem %s7580_s0, 256  ;;  %s7203_s12 = smov [#allocation6]  }
  0xfe   : > { %p7089_p0 = scmp.ne.s32.totalorder %s7580_s0, %s7088_s3  ;;  %s7093_s2 = sshll.u32 %s7203_s12, 4  ;;  %s7094_s2 = int_to_ptr.vmem [resolvable:$false] %s7093_s2 }
  0xff   : > { %s7095_s17 = scalar_lea.vmem %s7094_s2, 512  ;;  %p7096_p10 = scmp.lt.s32.totalorder %s7580_s0, %s7094_s2 }
 0x100   : > { %p7091_p2 = pnand %p7089_p0, %p7045_p8  ;;  %p7097_p5 = scmp.lt.s32.totalorder %s7095_s17, %s7088_s3 }
 0x102   : > { %p7092_p6 = pneg %p7091_p2  ;;  %p7098_p9 = por %p7097_p5, %p7096_p10 }
 0x104   : > { %p7099_p4 = pnand %p7098_p9, %p7092_p6 }
 0x106   : > { %7102 = shalt.err (!%p7099_p4)
}
 0x107   : > { %6478 = dma.hbm_to_vmem [thread:$0]  (!%p7534_p11), %s7576_s21, 256, %s7580_s0, %s7582_s4, %s7201_s25, %s7201_s25, %s7202_s22  }
 0x108   : > { %p8986_p8 = scmp.ne.s32.totalorder %s8972_s20, 0 }
 0x109   : > { %s7614_s5 = sand.u32 (!%p8986_p8), 1, %s7181_s14  }
 0x10a   : > { %434 = sbr.rel (%p8986_p8) target bundleno = 19481 (0x4c19), region = 60  ;;  %s7617_s18 = sshll.u32 (!%p8986_p8), %s7614_s5, 4 }
 0x10b   : > { %s437_s29 = scalar_lea.sflag (!%p8986_p8), [#allocation4], %s7614_s5  ;;  %s440_s9 = scalar_lea.vmem (!%p8986_p8), [#allocation3], %s7617_s18 }
 0x111   : > { %7148 = dma.done.wait (%p7509_p7), %s437_s29, 256  }
 0x112   : > { %7150 = vsyncadd (%p7509_p7), %s437_s29, 4294967040  ;;  %s445_s0 = sand.u32 1, %s7299_s19   ;;  %s449_s20 = scalar_lea.vmem [#allocation6], %s7617_s18 }
 0x113   : > { %s446_s4 = scalar_lea.sflag [#allocation7], %s445_s0 }
 0x114   : > { %7152 = dma.done.wait (%p7509_p7), %s446_s4, 256  }
 0x115   : > { %7154 = vsyncadd (%p7509_p7), %s446_s4, 4294967040  ;;  %p8987_p11 = scmp.eq.s32.totalorder %s7299_s19, 0 }
 0x117   : > { %7156 = dma.done.wait (%p8987_p11), [#allocation7], 1024   ;;  %p8988_p3 = pmov %p8987_p11 }
 0x119   : > { %7158 = vsyncadd (%p8988_p3), [#allocation7], 4294966272  ;;  %p8989_p12 = pmov %p8988_p3 }
 0x11a   : > { %p8990_p1 = pmov %p8988_p3 }
 0x11b   : > { %7160 = dma.done.wait (%p8989_p12), [#allocation10], 2048  }
 0x11c   : > { %7162 = vsyncadd (%p8990_p1), [#allocation10], 4294965248  ;;  %p8991_p13 = pmov %p8990_p1 }
 0x11d   : > { %p8992_p0 = pmov %p8990_p1 }
 0x11e   : > { %7164 = dma.done.wait (%p8991_p13), [#allocation13], 2048  }
 0x11f   : > { %7166 = vsyncadd (%p8992_p0), [#allocation13], 4294965248  ;;  %p8993_p7 = pmov %p8992_p0 }
 0x120   : > { %p8994_p2 = pmov %p8992_p0 }
 0x121   : > { %7168 = dma.done.wait (%p8993_p7), [#allocation16], 2048  }
 0x122   : > { %7170 = vsyncadd (%p8994_p2), [#allocation16], 4294965248  ;;  %v7204_v0 = vmov 0.0   ;;  %vm7205_vm0 = vmmov 0   ;;  %v6561_v1 = vld [vmem:[#allocation8] sm:$0xff]   ;;  %v6562_v2 = vld [vmem:[#allocation8 + $0x8] sm:$0xff]  }
 0x123   : > { %5680 = vmatprep.subr.bf16.mxu0 %v7204_v0  ;;  %5696 = vmatprep.mubr.msk.bf16.mxu0 %vm7205_vm0, %v7204_v0  ;;  %v6563_v3 = vld [vmem:[#allocation8 + $0x10] sm:$0xff]   ;;  %v6569_v4 = vld [vmem:[#allocation9] sm:$0xff]   ;;  %v6564_v5 = vld [vmem:[#allocation8 + $0x18] sm:$0xff]   ;;  %vm8957_vm1 = vcmask 130048   ;;  %vm1621_vm2 = vcmask 64512   ;;  %s7206_s28 = smov 64  }
 0x124   : > { %5700 = vmatprep.subr.bf16.mxu1 %v7204_v0  ;;  %5716 = vmatprep.mubr.msk.bf16.mxu1 %vm7205_vm0, %v7204_v0  ;;  %v6570_v6 = vld [vmem:[#allocation9 + $0x8] sm:$0xff]   ;;  %v6565_v7 = vld [vmem:[#allocation8 + $0x20] sm:$0xff]   ;;  %v6571_v8 = vld [vmem:[#allocation9 + $0x10] sm:$0xff]   ;;  %s8952_s3 = smov 96   ;;  %s8959_s12 = smov 32   ;;  %vm8954_vm3 = vcmask 523264  }
 0x125   : > { %5681 = vmatpush3.bf16.msra.mxu0 %v6561_v1  ;;  %5701 = vmatpush3.bf16.msra.mxu1 %v6569_v4  ;;  %v6566_v9 = vld [vmem:[#allocation8 + $0x28] sm:$0xff]   ;;  %v6572_v10 = vld [vmem:[#allocation9 + $0x18] sm:$0xff]   ;;  %v6567_v11 = vld [vmem:[#allocation8 + $0x30] sm:$0xff]   ;;  %vm2000_vm4 = vcmask 322816   ;;  %vm2005_vm5 = vcmask 392516   ;;  %vm2011_vm6 = vcmask 454016  }
 0x126   : > { %5682 = vmatprep.subr.bf16.mxu0 %v7204_v0  ;;  %5702 = vmatprep.subr.bf16.mxu1 %v7204_v0  ;;  %v6573_v12 = vld [vmem:[#allocation9 + $0x20] sm:$0xff]   ;;  %v6568_v13 = vld [vmem:[#allocation8 + $0x38] sm:$0xff]   ;;  %v6574_v16 = vld [vmem:[#allocation9 + $0x28] sm:$0xff]   ;;  %vm2016_vm7 = vcmask 523716   ;;  %vm8955_vm8 = vcmask 585216   ;;  %vm2224_vm9 = vcmask 654916  }
 0x127   : > { %v520_v14 = vld [vmem:[%s440_s9] sm:$0xff]  ;;  %v521_v15 = vld [vmem:[%s440_s9 + $0x8] sm:$0xff]  ;;  %vm8956_vm10 = vcmask 716416   ;;  %vm2235_vm11 = vcmask 786116   ;;  %vm2438_vm12 = vcmask 847616   ;;  %vm2443_vm13 = vcmask 917316  }
 0x128   : > { %v522_v17 = vpack.c.bf16 %v521_v15, %v520_v14  ;;  %v6575_v18 = vld [vmem:[#allocation9 + $0x30] sm:$0xff]   ;;  %v6576_v19 = vld [vmem:[#allocation9 + $0x38] sm:$0xff]   ;;  %v6577_v20 = vld [vmem:[#allocation11] sm:$0xff]   ;;  %vm2449_vm14 = vcmask 978816   ;;  %vm8964_vm15 = vcmask 1048516   ;;  %p9020_p10 = scmp.ne.s32.totalorder %s8981_s26, 0 }
 0x129   : > { %5683 = vmatpush3.bf16.msra.mxu0 %v6562_v2  ;;  %5703 = vmatpush3.bf16.msra.mxu1 %v6570_v6  ;;  %v6578_v21 = vld [vmem:[#allocation11 + $0x8] sm:$0xff]   ;;  %v6579_v22 = vld [vmem:[#allocation11 + $0x10] sm:$0xff]   ;;  %v6580_v23 = vld [vmem:[#allocation11 + $0x18] sm:$0xff]  }
 0x12a   : > { %5684 = vmatprep.subr.bf16.mxu0 %v7204_v0  ;;  %5704 = vmatprep.subr.bf16.mxu1 %v7204_v0  ;;  %v6581_v24 = vld [vmem:[#allocation11 + $0x20] sm:$0xff]   ;;  %v6582_v25 = vld [vmem:[#allocation11 + $0x28] sm:$0xff]   ;;  %v6583_v26 = vld [vmem:[#allocation11 + $0x30] sm:$0xff]  }
 0x12b   : > { %v6584_v27 = vld [vmem:[#allocation11 + $0x38] sm:$0xff]  }
 0x12d   : > { %5685 = vmatpush3.bf16.msra.mxu0 %v6563_v3  ;;  %5705 = vmatpush3.bf16.msra.mxu1 %v6571_v8 }
 0x12e   : > { %5686 = vmatprep.subr.bf16.mxu0 %v7204_v0  ;;  %5706 = vmatprep.subr.bf16.mxu1 %v7204_v0 }
 0x131   : > { %5687 = vmatpush3.bf16.msra.mxu0 %v6564_v5  ;;  %5707 = vmatpush3.bf16.msra.mxu1 %v6572_v10 }
 0x132   : > { %5688 = vmatprep.subr.bf16.mxu0 %v7204_v0  ;;  %5708 = vmatprep.subr.bf16.mxu1 %v7204_v0 }
 0x135   : > { %5689 = vmatpush3.bf16.msra.mxu0 %v6565_v7  ;;  %5709 = vmatpush3.bf16.msra.mxu1 %v6573_v12 }
 0x136   : > { %5690 = vmatprep.subr.bf16.mxu0 %v7204_v0  ;;  %5710 = vmatprep.subr.bf16.mxu1 %v7204_v0 }
 0x139   : > { %5691 = vmatpush3.bf16.msra.mxu0 %v6566_v9  ;;  %5711 = vmatpush3.bf16.msra.mxu1 %v6574_v16 }
 0x13a   : > { %5692 = vmatprep.subr.bf16.mxu0 %v7204_v0  ;;  %5712 = vmatprep.subr.bf16.mxu1 %v7204_v0 }
 0x13d   : > { %5693 = vmatpush3.bf16.msra.mxu0 %v6567_v11  ;;  %5713 = vmatpush3.bf16.msra.mxu1 %v6575_v18 }
 0x13e   : > { %5694 = vmatprep.subr.bf16.mxu0 %v7204_v0  ;;  %5714 = vmatprep.subr.bf16.mxu1 %v7204_v0 }
 0x141   : > { %5695 = vmatpush3.bf16.msra.mxu0 %v6568_v13  ;;  %5715 = vmatpush3.bf16.msra.mxu1 %v6576_v19 }
 0x142   : > { %5720 = vmatprep.subr.bf16.mxu0 %v7204_v0  ;;  %5758 = vmatprep.subr.bf16.mxu1 %v7204_v0 }
 0x144   : > { %5697 = vmatmul.mubr.bf16.vlgmr.msra.gmra.mrb[0].mxu0 %v522_v17  ;;  %5717 = vmatmul.mubr.bf16.vlgmr.msra.gmra.mrb[0].mxu1 %v522_v17 }
 0x145   : > { %5736 = vmatprep.mubr.msk.bf16.mxu0 %vm7205_vm0, %v7204_v0  ;;  %5774 = vmatprep.mubr.msk.bf16.mxu1 %vm7205_vm0, %v7204_v0 }
 0x146   : > { %5721 = vmatpush3.bf16.msra.mxu0 %v6577_v20 }
 0x147   : > { %5722 = vmatprep.subr.bf16.mxu0 %v7204_v0 }
 0x14a   : > { %5723 = vmatpush3.bf16.msra.mxu0 %v6578_v21 }
 0x14b   : > { %5724 = vmatprep.subr.bf16.mxu0 %v7204_v0 }
 0x14e   : > { %5725 = vmatpush3.bf16.msra.mxu0 %v6579_v22 }
 0x14f   : > { %5726 = vmatprep.subr.bf16.mxu0 %v7204_v0 }
 0x152   : > { %5727 = vmatpush3.bf16.msra.mxu0 %v6580_v23 }
 0x153   : > { %5728 = vmatprep.subr.bf16.mxu0 %v7204_v0 }
 0x156   : > { %5729 = vmatpush3.bf16.msra.mxu0 %v6581_v24 }
 0x157   : > { %5730 = vmatprep.subr.bf16.mxu0 %v7204_v0 }
 0x15a   : > { %5731 = vmatpush3.bf16.msra.mxu0 %v6582_v25 }
 0x15b   : > { %5732 = vmatprep.subr.bf16.mxu0 %v7204_v0 }
 0x15e   : > { %5733 = vmatpush3.bf16.msra.mxu0 %v6583_v26 }
 0x15f   : > { %5734 = vmatprep.subr.bf16.mxu0 %v7204_v0 }
 0x162   : > { %5735 = vmatpush3.bf16.msra.mxu0 %v6584_v27 }
 0x165   : > { %5737 = vmatmul.mubr.bf16.vlgmr.msra.gmra.mrb[4].mxu0 %v522_v17 }
 0x217   : > { %v621_v28 = vpop.f32.mrb[0].mxu0  ;;  %v726_v33 = vpop.f32.mrb[0].mxu1 }
 0x218   : > { %v5698_v29 = vpop.f32.mrb[1].mxu0  ;;  %v5718_v34 = vpop.f32.mrb[1].mxu1 }
 0x219   : > { %v624_v30 = vpop.f32.mrb[2].mxu0  ;;  %v729_v35 = vpop.f32.mrb[2].mxu1 }
 0x21a   : > { %v5699_v31 = vpop.f32.mrb[3].mxu0  ;;  %v838_v32 = vpack.c.bf16 %v624_v30, %v621_v28  ;;  %v839_v36 = vpack.c.bf16 %v729_v35, %v726_v33  ;;  %v5719_v37 = vpop.f32.mrb[3].mxu1 }
 0x21c   : > { %840 = vxpose.xlu0.c.b16.start.end [1/1] (short) %v838_v32, 128  ;;  %5740 = vmatprep.subr.bf16.mxu0 %v839_v36 }
 0x21d   : > { %5741 = vmatpush3.bf16.msra.mxu0 %v839_v36 }
 0x21e   : > { %5778 = vmatprep.subr.bf16.mxu0 %v7204_v0 }
 0x238   : > { %v7689_v42 = vpop.f32.mrb[4].mxu0 }
 0x239   : > { %v5738_v43 = vpop.f32.mrb[5].mxu0 }
 0x23a   : > { %v7691_v45 = vpop.f32.mrb[6].mxu0 }
 0x23b   : > { %v1230_v46 = vpack.c.bf16 %v7691_v45, %v7689_v42  ;;  %v5739_v47 = vpop.f32.mrb[7].mxu0  ;;  %v6604_v42 = vld [vmem:[#allocation12 + $0x18] sm:$0xff]   ;;  %v6605_v45 = vld [vmem:[#allocation12 + $0x20] sm:$0xff]  }
 0x282   : > { %v848_v38 = vpop.trf.xlu0 }
 0x283   : > { %5742 = vmatprep.mubr.msk.bf16.mxu0 %vm8957_vm1, %v848_v38 }
 0x286   : > { %v849_v39 = vpop.trf.xlu0 }
 0x287   : > { %5743 = vmatmul.mubr.msk.bf16.vlgmr.msra.gmra.mrb[8].mxu0 %vm8957_vm1, %v849_v39 }
 0x28a   : > { %v850_v40 = vpop.trf.xlu0 }
 0x28b   : > { %5746 = vmatprep.mubr.msk.bf16.mxu0 %vm8957_vm1, %v850_v40 }
 0x28e   : > { %v851_v41 = vpop.trf.xlu0 }
 0x28f   : > { %5747 = vmatmul.mubr.msk.bf16.gmra.mrb[12].mxu0 %vm8957_vm1, %v851_v41 }
 0x292   : > { %v852_v44 = vpop.trf.xlu0 }
 0x293   : > { %5750 = vmatprep.mubr.msk.bf16.mxu0 %vm8957_vm1, %v852_v44 }
 0x296   : > { %v853_v48 = vpop.trf.xlu0 }
 0x297   : > { %5751 = vmatmul.mubr.msk.bf16.gmra.mrb[16].mxu0 %vm8957_vm1, %v853_v48 }
 0x29a   : > { %v854_v49 = vpop.trf.xlu0 }
 0x29b   : > { %5754 = vmatprep.mubr.msk.bf16.mxu0 %vm8957_vm1, %v854_v49 }
 0x29e   : > { %v855_v50 = vpop.trf.xlu0 }
 0x29f   : > { %5755 = vmatmul.mubr.msk.bf16.gmra.mrb[20].mxu0 %vm8957_vm1, %v855_v50 }
 0x2a0   : > { %5794 = vmatprep.mubr.msk.bf16.mxu0 %vm7205_vm0, %v7204_v0 }
 0x35a   : > { %v5744_v51 = vpop.f32.mrb[8].mxu0 }
 0x35b   : > { %v915_v52 = vpop.f32.mrb[9].mxu0 }
 0x35c   : > { %v5745_v53 = vpop.f32.mrb[10].mxu0 }
 0x35d   : > { %v918_v54 = vpop.f32.mrb[11].mxu0 }
 0x35e   : > { %v978_v55 = vadd.f32 %v918_v54, %v915_v52 }
 0x360   : > { %v979_v56 = vadd.f32 %v5744_v51, %v978_v55 }
 0x362   : > { %v5748_v57 = vpop.f32.mrb[12].mxu0  ;;  %v980_v58 = vadd.f32 %v5745_v53, %v979_v56 }
 0x363   : > { %v931_v59 = vpop.f32.mrb[13].mxu0 }
 0x364   : > { %v981_v60 = vadd.f32 %v980_v58, %v931_v59  ;;  %v5749_v61 = vpop.f32.mrb[14].mxu0 }
 0x365   : > { %v934_v62 = vpop.f32.mrb[15].mxu0 }
 0x366   : > { %v982_v63 = vadd.f32 %v981_v60, %v934_v62 }
 0x368   : > { %v983_v1 = vadd.f32 %v5748_v57, %v982_v63 }
 0x36a   : > { %v5752_v2 = vpop.f32.mrb[16].mxu0  ;;  %v984_v3 = vadd.f32 %v5749_v61, %v983_v1 }
 0x36b   : > { %v947_v4 = vpop.f32.mrb[17].mxu0 }
 0x36c   : > { %v985_v5 = vadd.f32 %v984_v3, %v947_v4  ;;  %v5753_v6 = vpop.f32.mrb[18].mxu0 }
 0x36d   : > { %v950_v7 = vpop.f32.mrb[19].mxu0 }
 0x36e   : > { %v986_v8 = vadd.f32 %v985_v5, %v950_v7 }
 0x370   : > { %v987_v9 = vadd.f32 %v5752_v2, %v986_v8 }
 0x372   : > { %v5756_v10 = vpop.f32.mrb[20].mxu0  ;;  %v988_v11 = vadd.f32 %v5753_v6, %v987_v9 }
 0x373   : > { %v963_v12 = vpop.f32.mrb[21].mxu0 }
 0x374   : > { %v989_v13 = vadd.f32 %v988_v11, %v963_v12  ;;  %v5757_v14 = vpop.f32.mrb[22].mxu0 }
 0x375   : > { %v966_v15 = vpop.f32.mrb[23].mxu0 }
 0x376   : > { %v990_v16 = vadd.f32 %v989_v13, %v966_v15 }
 0x378   : > { %v991_v17 = vadd.f32 %v5756_v10, %v990_v16 }
 0x37a   : > { %v992_v18 = vadd.f32 %v5757_v14, %v991_v17 }
 0x37c   : > { %993 = vadd.xlane.f32.xlu0 %v992_v18 }
 0x409   : > { %v994_v19 = vpop.xlane.xlu0 %993 }
 0x40a   : > { %v995_v20 = vrot.slane %v994_v19, 4 }
 0x40c   : > { %v996_v21 = vadd.f32 %v995_v20, %v994_v19 }
 0x40e   : > { %v997_v22 = vrot.slane %v996_v21, 2 }
 0x410   : > { %v998_v23 = vadd.f32 %v997_v22, %v996_v21 }
 0x412   : > { %v999_v24 = vrot.slane %v998_v23, 1 }
 0x414   : > { %v1000_v25 = vadd.f32 %v999_v24, %v998_v23 }
 0x416   : > { %6314 = vpush %v1000_v25 }
 0x447   : > { %s6315_s24 = spop %6314 }
 0x448   : > { %s1004_s25 = smul.f32 6.1035156e-05, %s6315_s24 }
 0x44a   : > { %v1005_v26 = vstv %s1004_s25 }
 0x44b   : > { %v7701_v27 = vsub.f32 %v915_v52, %v1005_v26  ;;  %v7703_v28 = vsub.f32 %v918_v54, %v1005_v26  ;;  %v7705_v29 = vsub.f32 %v5744_v51, %v1005_v26  ;;  %v7711_v32 = vsub.f32 %v5745_v53, %v1005_v26 }
 0x44c   : > { %v7713_v33 = vsub.f32 %v931_v59, %v1005_v26  ;;  %v7717_v36 = vsub.f32 %v934_v62, %v1005_v26  ;;  %v7721_v39 = vsub.f32 %v5748_v57, %v1005_v26  ;;  %v7725_v43 = vsub.f32 %v5749_v61, %v1005_v26 }
 0x44d   : > { %v1022_v30 = vmul.f32 %v7701_v27, %v7701_v27  ;;  %v1023_v31 = vmul.f32 %v7703_v28, %v7703_v28  ;;  %v1024_v34 = vmul.f32 %v7705_v29, %v7705_v29  ;;  %v1025_v37 = vmul.f32 %v7711_v32, %v7711_v32 }
 0x44e   : > { %v1026_v40 = vmul.f32 %v7713_v33, %v7713_v33  ;;  %v1027_v44 = vmul.f32 %v7717_v36, %v7717_v36  ;;  %v7729_v48 = vsub.f32 %v947_v4, %v1005_v26  ;;  %v1028_v49 = vmul.f32 %v7721_v39, %v7721_v39 }
 0x44f   : > { %v1038_v35 = vadd.f32 %v1023_v31, %v1022_v30  ;;  %v7733_v51 = vsub.f32 %v950_v7, %v1005_v26  ;;  %v1029_v52 = vmul.f32 %v7725_v43, %v7725_v43  ;;  %v7737_v54 = vsub.f32 %v5752_v2, %v1005_v26 }
 0x450   : > { %v1030_v55 = vmul.f32 %v7729_v48, %v7729_v48  ;;  %v1017_v57 = vsub.f32 %v5753_v6, %v1005_v26  ;;  %v7743_v60 = vsub.f32 %v963_v12, %v1005_v26  ;;  %v1019_v63 = vsub.f32 %v966_v15, %v1005_v26 }
 0x451   : > { %v1039_v38 = vadd.f32 %v1038_v35, %v1024_v34  ;;  %v1031_v58 = vmul.f32 %v7733_v51, %v7733_v51  ;;  %v1032_v61 = vmul.f32 %v7737_v54, %v7737_v54  ;;  %v1020_v2 = vsub.f32 %v5756_v10, %v1005_v26 }
 0x452   : > { %v1033_v1 = vmul.f32 %v1017_v57, %v1017_v57  ;;  %v1034_v4 = vmul.f32 %v7743_v60, %v7743_v60  ;;  %v1021_v7 = vsub.f32 %v5757_v14, %v1005_v26  ;;  %v1035_v6 = vmul.f32 %v1019_v63, %v1019_v63 }
 0x453   : > { %v1040_v41 = vadd.f32 %v1039_v38, %v1025_v37  ;;  %v1036_v9 = vmul.f32 %v1020_v2, %v1020_v2 }
 0x454   : > { %v1037_v13 = vmul.f32 %v1021_v7, %v1021_v7 }
 0x455   : > { %v1041_v47 = vadd.f32 %v1040_v41, %v1026_v40 }
 0x457   : > { %v1042_v50 = vadd.f32 %v1041_v47, %v1027_v44 }
 0x459   : > { %v1043_v53 = vadd.f32 %v1042_v50, %v1028_v49 }
 0x45b   : > { %v1044_v56 = vadd.f32 %v1043_v53, %v1029_v52 }
 0x45d   : > { %v1045_v59 = vadd.f32 %v1044_v56, %v1030_v55 }
 0x45f   : > { %v1046_v62 = vadd.f32 %v1045_v59, %v1031_v58 }
 0x461   : > { %v1047_v3 = vadd.f32 %v1046_v62, %v1032_v61 }
 0x463   : > { %v1048_v5 = vadd.f32 %v1047_v3, %v1033_v1 }
 0x465   : > { %v1049_v8 = vadd.f32 %v1048_v5, %v1034_v4 }
 0x467   : > { %v1050_v11 = vadd.f32 %v1049_v8, %v1035_v6 }
 0x469   : > { %v1051_v12 = vadd.f32 %v1050_v11, %v1036_v9 }
 0x46b   : > { %v1052_v16 = vadd.f32 %v1051_v12, %v1037_v13 }
 0x46d   : > { %1053 = vadd.xlane.f32.xlu1 %v1052_v16 }
 0x4fa   : > { %v1054_v17 = vpop.xlane.xlu1 %1053 }
 0x4fb   : > { %v1055_v18 = vrot.slane %v1054_v17, 4 }
 0x4fd   : > { %v1056_v19 = vadd.f32 %v1055_v18, %v1054_v17 }
 0x4ff   : > { %v1057_v15 = vrot.slane %v1056_v19, 2 }
 0x501   : > { %v1058_v20 = vadd.f32 %v1057_v15, %v1056_v19 }
 0x503   : > { %v1059_v21 = vrot.slane %v1058_v20, 1 }
 0x505   : > { %v1060_v10 = vadd.f32 %v1059_v21, %v1058_v20 }
 0x507   : > { %6316 = vpush %v1060_v10 }
 0x538   : > { %s6317_s22 = spop %6316 }
 0x539   : > { %s1064_s21 = smul.f32 6.1035156e-05, %s6317_s22 }
 0x53b   : > { %s1065_s23 = sadd.f32 1e-05, %s1064_s21 }
 0x53d   : > { %v1066_v14 = vstv %s1065_s23 }
 0x53e   : > { %6618 = vrsqrt.f32 %v1066_v14 }
 0x548   : > { %v6619_v22 = vpop.eup %6618 }
 0x549   : > { %6318 = vpush %v6619_v22 }
 0x57a   : > { %s6319_s27 = spop %6318 }
 0x57b   : > { %v1069_v23 = vstv %s6319_s27 }
 0x57c   : > { %v7749_v24 = vmul.f32 %v1069_v23, %v1017_v57  ;;  %v1070_v25 = vmul.f32 %v1069_v23, %v7701_v27  ;;  %v7753_v26 = vmul.f32 %v1069_v23, %v1019_v63  ;;  %v1071_v30 = vmul.f32 %v1069_v23, %v7703_v28 }
 0x57d   : > { %v7757_v31 = vmul.f32 %v1069_v23, %v1021_v7  ;;  %v1072_v34 = vmul.f32 %v1069_v23, %v7705_v29  ;;  %v1073_v35 = vmul.f32 %v1069_v23, %v7711_v32  ;;  %v1074_v27 = vmul.f32 %v1069_v23, %v7713_v33 }
 0x57e   : > { %1108 = vmax.xlane.f32.xlu0 %v7749_v24  ;;  %1086 = vmax.xlane.f32.xlu1 %v1070_v25  ;;  %v1075_v37 = vmul.f32 %v1069_v23, %v7717_v36  ;;  %v1076_v28 = vmul.f32 %v1069_v23, %v7721_v39  ;;  %v1077_v38 = vmul.f32 %v1069_v23, %v7725_v43 }
 0x57f   : > { %v1078_v29 = vmul.f32 %v1069_v23, %v7729_v48  ;;  %v1079_v40 = vmul.f32 %v1069_v23, %v7733_v51  ;;  %v7769_v32 = vmul.f32 %v1069_v23, %v7737_v54  ;;  %v7773_v33 = vmul.f32 %v1069_v23, %v7743_v60 }
 0x580   : > { %v7776_v36 = vmul.f32 %v1069_v23, %v1020_v2 }
 0x582   : > { %1112 = vmax.xlane.f32.xlu0 %v7753_v26  ;;  %1088 = vmax.xlane.f32.xlu1 %v1071_v30 }
 0x586   : > { %1116 = vmax.xlane.f32.xlu0 %v7757_v31  ;;  %1090 = vmax.xlane.f32.xlu1 %v1072_v34 }
 0x58a   : > { %1092 = vmax.xlane.f32.xlu1 %v1073_v35 }
 0x58e   : > { %1094 = vmax.xlane.f32.xlu1 %v1074_v27 }
 0x592   : > { %1096 = vmax.xlane.f32.xlu1 %v1075_v37 }
 0x596   : > { %1098 = vmax.xlane.f32.xlu1 %v1076_v28 }
 0x59a   : > { %1100 = vmax.xlane.f32.xlu1 %v1077_v38 }
 0x59e   : > { %1102 = vmax.xlane.f32.xlu1 %v1078_v29 }
 0x5a2   : > { %1104 = vmax.xlane.f32.xlu1 %v1079_v40 }
 0x5a6   : > { %1106 = vmax.xlane.f32.xlu1 %v7769_v32 }
 0x5aa   : > { %1110 = vmax.xlane.f32.xlu1 %v7773_v33 }
 0x5ae   : > { %1114 = vmax.xlane.f32.xlu1 %v7776_v36 }
 0x60b   : > { %v1087_v39 = vpop.xlane.xlu1 %1086  ;;  %v1109_v7 = vpop.xlane.xlu0 %1108 }
 0x60c   : > { %v1118_v41 = vsub.f32 %v1070_v25, %v1087_v39  ;;  %v1129_v18 = vsub.f32 %v7749_v24, %v1109_v7 }
 0x60e   : > { %v1134_v43 = vmul.f32 1.442695, %v1118_v41  ;;  %v1156_v10 = vmul.f32 1.442695, %v1129_v18 }
 0x60f   : > { %v1089_v44 = vpop.xlane.xlu1 %1088  ;;  %v1113_v16 = vpop.xlane.xlu0 %1112 }
 0x610   : > { %v1119_v47 = vsub.f32 %v1071_v30, %v1089_v44  ;;  %6620 = vpow2.f32 %v1134_v43  ;;  %v1131_v14 = vsub.f32 %v7753_v26, %v1113_v16 }
 0x612   : > { %v1136_v48 = vmul.f32 1.442695, %v1119_v47  ;;  %v6585_v47 = vld [vmem:[#allocation14] sm:$0xff]  }
 0x613   : > { %v1091_v49 = vpop.xlane.xlu1 %1090  ;;  %v1117_v23 = vpop.xlane.xlu0 %1116  ;;  %5779 = vmatpush3.bf16.msra.mxu0 %v6585_v47 }
 0x614   : > { %v1120_v50 = vsub.f32 %v1072_v34, %v1091_v49  ;;  %6622 = vpow2.f32 %v1136_v48  ;;  %v1160_v34 = vmul.f32 1.442695, %v1131_v14  ;;  %v6586_v48 = vld [vmem:[#allocation14 + $0x8] sm:$0xff]   ;;  %5780 = vmatprep.subr.bf16.mxu0 %v7204_v0  ;;  %v6587_v49 = vld [vmem:[#allocation14 + $0x10] sm:$0xff]  }
 0x616   : > { %v1138_v51 = vmul.f32 1.442695, %v1120_v50  ;;  %v6588_v50 = vld [vmem:[#allocation14 + $0x18] sm:$0xff]  }
 0x617   : > { %v1093_v52 = vpop.xlane.xlu1 %1092  ;;  %5781 = vmatpush3.bf16.msra.mxu0 %v6586_v48 }
 0x618   : > { %v1121_v53 = vsub.f32 %v1073_v35, %v1093_v52  ;;  %6624 = vpow2.f32 %v1138_v51  ;;  %v1133_v35 = vsub.f32 %v7757_v31, %v1117_v23  ;;  %5782 = vmatprep.subr.bf16.mxu0 %v7204_v0  ;;  %v6589_v51 = vld [vmem:[#allocation14 + $0x20] sm:$0xff]   ;;  %v6590_v52 = vld [vmem:[#allocation14 + $0x28] sm:$0xff]  }
 0x61a   : > { %v1140_v54 = vmul.f32 1.442695, %v1121_v53  ;;  %v7779_v55 = vpop.eup %6620  ;;  %v6591_v53 = vld [vmem:[#allocation14 + $0x30] sm:$0xff]  }
 0x61b   : > { %v1095_v56 = vpop.xlane.xlu1 %1094  ;;  %1166 = vadd.xlane.f32.xlu1 %v7779_v55  ;;  %5783 = vmatpush3.bf16.msra.mxu0 %v6587_v49 }
 0x61c   : > { %6626 = vpow2.f32 %v1140_v54  ;;  %v1122_v57 = vsub.f32 %v1074_v27, %v1095_v56  ;;  %5784 = vmatprep.subr.bf16.mxu0 %v7204_v0 }
 0x61e   : > { %v1142_v58 = vmul.f32 1.442695, %v1122_v57  ;;  %v7782_v59 = vpop.eup %6622 }
 0x61f   : > { %v1097_v60 = vpop.xlane.xlu1 %1096  ;;  %1168 = vadd.xlane.f32.xlu0 %v7782_v59  ;;  %5785 = vmatpush3.bf16.msra.mxu0 %v6588_v50 }
 0x620   : > { %6628 = vpow2.f32 %v1142_v58  ;;  %v1123_v61 = vsub.f32 %v1075_v37, %v1097_v60  ;;  %5786 = vmatprep.subr.bf16.mxu0 %v7204_v0 }
 0x622   : > { %v1144_v62 = vmul.f32 1.442695, %v1123_v61  ;;  %v7785_v63 = vpop.eup %6624 }
 0x623   : > { %v1099_v1 = vpop.xlane.xlu1 %1098  ;;  %1170 = vadd.xlane.f32.xlu1 %v7785_v63  ;;  %5787 = vmatpush3.bf16.msra.mxu0 %v6589_v51 }
 0x624   : > { %6630 = vpow2.f32 %v1144_v62  ;;  %v1124_v3 = vsub.f32 %v1076_v28, %v1099_v1  ;;  %5788 = vmatprep.subr.bf16.mxu0 %v7204_v0 }
 0x626   : > { %v7788_v2 = vpop.eup %6626  ;;  %v1146_v4 = vmul.f32 1.442695, %v1124_v3 }
 0x627   : > { %1172 = vadd.xlane.f32.xlu0 %v7788_v2  ;;  %v1101_v5 = vpop.xlane.xlu1 %1100  ;;  %5789 = vmatpush3.bf16.msra.mxu0 %v6590_v52 }
 0x628   : > { %6632 = vpow2.f32 %v1146_v4  ;;  %v1125_v6 = vsub.f32 %v1077_v38, %v1101_v5  ;;  %v1164_v38 = vmul.f32 1.442695, %v1133_v35  ;;  %5790 = vmatprep.subr.bf16.mxu0 %v7204_v0 }
 0x62a   : > { %v7791_v8 = vpop.eup %6628  ;;  %v1148_v9 = vmul.f32 1.442695, %v1125_v6 }
 0x62b   : > { %1174 = vadd.xlane.f32.xlu1 %v7791_v8  ;;  %v1103_v11 = vpop.xlane.xlu1 %1102  ;;  %5791 = vmatpush3.bf16.msra.mxu0 %v6591_v53 }
 0x62c   : > { %6634 = vpow2.f32 %v1148_v9  ;;  %v1126_v13 = vsub.f32 %v1078_v29, %v1103_v11  ;;  %5792 = vmatprep.subr.bf16.mxu0 %v7204_v0 }
 0x62e   : > { %v7794_v12 = vpop.eup %6630  ;;  %v1150_v17 = vmul.f32 1.442695, %v1126_v13 }
 0x62f   : > { %1176 = vadd.xlane.f32.xlu0 %v7794_v12  ;;  %v1105_v19 = vpop.xlane.xlu1 %1104 }
 0x630   : > { %6636 = vpow2.f32 %v1150_v17  ;;  %v1127_v15 = vsub.f32 %v1079_v40, %v1105_v19 }
 0x632   : > { %v7798_v20 = vpop.eup %6632  ;;  %v1152_v21 = vmul.f32 1.442695, %v1127_v15 }
 0x633   : > { %1178 = vadd.xlane.f32.xlu1 %v7798_v20  ;;  %v1107_v22 = vpop.xlane.xlu1 %1106 }
 0x634   : > { %6638 = vpow2.f32 %v1152_v21  ;;  %v1128_v25 = vsub.f32 %v7769_v32, %v1107_v22 }
 0x635   : > { %6640 = vpow2.f32 %v1156_v10 }
 0x636   : > { %v7803_v30 = vpop.eup %6634  ;;  %v1154_v24 = vmul.f32 1.442695, %v1128_v25 }
 0x637   : > { %1180 = vadd.xlane.f32.xlu0 %v7803_v30  ;;  %v1111_v27 = vpop.xlane.xlu1 %1110 }
 0x638   : > { %6642 = vpow2.f32 %v1154_v24  ;;  %v1130_v26 = vsub.f32 %v7773_v33, %v1111_v27 }
 0x639   : > { %6644 = vpow2.f32 %v1160_v34 }
 0x63a   : > { %v7808_v37 = vpop.eup %6636  ;;  %v1158_v28 = vmul.f32 1.442695, %v1130_v26 }
 0x63b   : > { %1182 = vadd.xlane.f32.xlu1 %v7808_v37  ;;  %v1115_v29 = vpop.xlane.xlu1 %1114 }
 0x63c   : > { %6646 = vpow2.f32 %v1158_v28  ;;  %v1132_v40 = vsub.f32 %v7776_v36, %v1115_v29 }
 0x63d   : > { %6648 = vpow2.f32 %v1164_v38 }
 0x63e   : > { %v7812_v32 = vpop.eup %6638  ;;  %v1162_v31 = vmul.f32 1.442695, %v1132_v40 }
 0x63f   : > { %1184 = vadd.xlane.f32.xlu0 %v7812_v32  ;;  %v7815_v39 = vpop.eup %6640 }
 0x640   : > { %6650 = vpow2.f32 %v1162_v31 }
 0x642   : > { %v7817_v33 = vpop.eup %6642 }
 0x643   : > { %1188 = vadd.xlane.f32.xlu0 %v7815_v39  ;;  %1186 = vadd.xlane.f32.xlu1 %v7817_v33  ;;  %v7821_v41 = vpop.eup %6644 }
 0x646   : > { %v7823_v43 = vpop.eup %6646 }
 0x647   : > { %1192 = vadd.xlane.f32.xlu0 %v7821_v41  ;;  %1190 = vadd.xlane.f32.xlu1 %v7823_v43  ;;  %v7827_v36 = vpop.eup %6648 }
 0x64a   : > { %v7829_v44 = vpop.eup %6650 }
 0x64b   : > { %1196 = vadd.xlane.f32.xlu0 %v7827_v36  ;;  %1194 = vadd.xlane.f32.xlu1 %v7829_v44 }
 0x6a8   : > { %v1167_v54 = vpop.xlane.xlu1 %1166 }
 0x6a9   : > { %6652 = vrcp.f32 %v1167_v54  ;;  %v6607_v54 = vld [vmem:[#allocation12 + $0x30] sm:$0xff]  }
 0x6ac   : > { %v1169_v56 = vpop.xlane.xlu0 %1168 }
 0x6ad   : > { %6654 = vrcp.f32 %v1169_v56  ;;  %v6608_v56 = vld [vmem:[#allocation12 + $0x38] sm:$0xff]  }
 0x6b0   : > { %v1171_v57 = vpop.xlane.xlu1 %1170 }
 0x6b1   : > { %6656 = vrcp.f32 %v1171_v57  ;;  %v1493_v57 = vld [vmem:[%s449_s20] sm:$0xff] }
 0x6b3   : > { %v6653_v60 = vpop.eup %6652 }
 0x6b4   : > { %v1173_v58 = vpop.xlane.xlu0 %1172  ;;  %v1214_v1 = vmul.f32 %v6653_v60, %v7779_v55 }
 0x6b5   : > { %6658 = vrcp.f32 %v1173_v58  ;;  %v1494_v58 = vld [vmem:[%s449_s20 + $0x8] sm:$0xff] }
 0x6b6   : > { %v1495_v60 = vpack.c.bf16 %v1494_v58, %v1493_v57 }
 0x6b7   : > { %v6655_v61 = vpop.eup %6654 }
 0x6b8   : > { %v1175_v62 = vpop.xlane.xlu1 %1174  ;;  %v1215_v3 = vmul.f32 %v6655_v61, %v7782_v59 }
 0x6b9   : > { %6660 = vrcp.f32 %v1175_v62 }
 0x6ba   : > { %v1231_v4 = vpack.c.bf16 %v1215_v3, %v1214_v1  ;;  %v6593_v3 = vld [vmem:[#allocation15] sm:$0xff]  }
 0x6bb   : > { %v6657_v7 = vpop.eup %6656 }
 0x6bc   : > { %v1177_v5 = vpop.xlane.xlu0 %1176  ;;  %5759 = vmatpush3.bf16.xpose.msra.mxu1 %v1231_v4  ;;  %v1216_v11 = vmul.f32 %v6657_v7, %v7785_v63  ;;  %v6594_v7 = vld [vmem:[#allocation15 + $0x8] sm:$0xff]  }
 0x6bd   : > { %6662 = vrcp.f32 %v1177_v5  ;;  %5760 = vmatprep.subr.bf16.mxu1 %v7204_v0 }
 0x6bf   : > { %v6659_v6 = vpop.eup %6658 }
 0x6c0   : > { %v1179_v9 = vpop.xlane.xlu1 %1178  ;;  %v1217_v13 = vmul.f32 %v6659_v6, %v7788_v2  ;;  %v6595_v6 = vld [vmem:[#allocation15 + $0x10] sm:$0xff]  }
 0x6c1   : > { %6664 = vrcp.f32 %v1179_v9  ;;  %v6596_v9 = vld [vmem:[#allocation15 + $0x18] sm:$0xff]  }
 0x6c2   : > { %v1232_v16 = vpack.c.bf16 %v1217_v13, %v1216_v11  ;;  %v6597_v11 = vld [vmem:[#allocation15 + $0x20] sm:$0xff]   ;;  %v6598_v13 = vld [vmem:[#allocation15 + $0x28] sm:$0xff]  }
 0x6c3   : > { %v6661_v55 = vpop.eup %6660 }
 0x6c4   : > { %v1181_v17 = vpop.xlane.xlu0 %1180  ;;  %5761 = vmatpush3.bf16.xpose.msra.mxu1 %v1232_v16  ;;  %v1218_v19 = vmul.f32 %v6661_v55, %v7791_v8  ;;  %v6599_v16 = vld [vmem:[#allocation15 + $0x30] sm:$0xff]  }
 0x6c5   : > { %6666 = vrcp.f32 %v1181_v17  ;;  %5762 = vmatprep.subr.bf16.mxu1 %v7204_v0  ;;  %v6600_v17 = vld [vmem:[#allocation15 + $0x38] sm:$0xff]  }
 0x6c7   : > { %v6663_v59 = vpop.eup %6662 }
 0x6c8   : > { %v1183_v18 = vpop.xlane.xlu1 %1182  ;;  %v1219_v15 = vmul.f32 %v6663_v59, %v7794_v12 }
 0x6c9   : > { %6668 = vrcp.f32 %v1183_v18 }
 0x6ca   : > { %v1233_v21 = vpack.c.bf16 %v1219_v15, %v1218_v19 }
 0x6cb   : > { %v6665_v63 = vpop.eup %6664 }
 0x6cc   : > { %v1185_v10 = vpop.xlane.xlu0 %1184  ;;  %5763 = vmatpush3.bf16.xpose.msra.mxu1 %v1233_v21  ;;  %v1220_v23 = vmul.f32 %v6665_v63, %v7798_v20 }
 0x6cd   : > { %6670 = vrcp.f32 %v1185_v10  ;;  %5764 = vmatprep.subr.bf16.mxu1 %v7204_v0 }
 0x6cf   : > { %v6667_v2 = vpop.eup %6666 }
 0x6d0   : > { %v1189_v14 = vpop.xlane.xlu0 %1188  ;;  %v1187_v22 = vpop.xlane.xlu1 %1186  ;;  %v1221_v25 = vmul.f32 %v6667_v2, %v7803_v30 }
 0x6d1   : > { %6672 = vrcp.f32 %v1189_v14 }
 0x6d2   : > { %6674 = vrcp.f32 %v1187_v22  ;;  %v1234_v8 = vpack.c.bf16 %v1221_v25, %v1220_v23 }
 0x6d3   : > { %v6669_v24 = vpop.eup %6668 }
 0x6d4   : > { %5765 = vmatpush3.bf16.xpose.msra.mxu1 %v1234_v8  ;;  %v1193_v12 = vpop.xlane.xlu0 %1192  ;;  %v1191_v35 = vpop.xlane.xlu1 %1190  ;;  %v1222_v27 = vmul.f32 %v6669_v24, %v7808_v37 }
 0x6d5   : > { %5766 = vmatprep.subr.bf16.mxu1 %v7204_v0  ;;  %6676 = vrcp.f32 %v1193_v12 }
 0x6d6   : > { %6678 = vrcp.f32 %v1191_v35 }
 0x6d7   : > { %v6671_v34 = vpop.eup %6670 }
 0x6d8   : > { %v1223_v26 = vmul.f32 %v6671_v34, %v7812_v32  ;;  %v1197_v30 = vpop.xlane.xlu0 %1196  ;;  %v1195_v29 = vpop.xlane.xlu1 %1194 }
 0x6d9   : > { %6680 = vrcp.f32 %v1197_v30 }
 0x6da   : > { %v1235_v28 = vpack.c.bf16 %v1223_v26, %v1222_v27  ;;  %6682 = vrcp.f32 %v1195_v29 }
 0x6db   : > { %v6673_v20 = vpop.eup %6672 }
 0x6dc   : > { %v6675_v38 = vpop.eup %6674  ;;  %5767 = vmatpush3.bf16.xpose.msra.mxu1 %v1235_v28  ;;  %v1225_v31 = vmul.f32 %v6673_v20, %v7815_v39 }
 0x6dd   : > { %5768 = vmatprep.subr.bf16.mxu1 %v7204_v0  ;;  %v1224_v40 = vmul.f32 %v6675_v38, %v7817_v33 }
 0x6df   : > { %v6677_v47 = vpop.eup %6676  ;;  %v1236_v37 = vpack.c.bf16 %v1225_v31, %v1224_v40 }
 0x6e0   : > { %v6679_v48 = vpop.eup %6678  ;;  %v1227_v49 = vmul.f32 %v6677_v47, %v7821_v41  ;;  %v6592_v41 = vld [vmem:[#allocation14 + $0x38] sm:$0xff]  }
 0x6e1   : > { %v1226_v32 = vmul.f32 %v6679_v48, %v7823_v43  ;;  %5793 = vmatpush3.bf16.msra.mxu0 %v6592_v41  ;;  %v6601_v43 = vld [vmem:[#allocation12] sm:$0xff]  }
 0x6e2   : > { %5798 = vmatprep.subr.bf16.mxu0 %v7204_v0 }
 0x6e3   : > { %v6681_v50 = vpop.eup %6680  ;;  %v1237_v51 = vpack.c.bf16 %v1227_v49, %v1226_v32 }
 0x6e4   : > { %5769 = vmatpush3.bf16.xpose.msra.mxu1 %v1236_v37  ;;  %v6683_v52 = vpop.eup %6682  ;;  %v1229_v33 = vmul.f32 %v6681_v50, %v7827_v36  ;;  %v6603_v36 = vld [vmem:[#allocation12 + $0x10] sm:$0xff]  }
 0x6e5   : > { %5770 = vmatprep.subr.bf16.mxu1 %v7204_v0  ;;  %v1228_v39 = vmul.f32 %v6683_v52, %v7829_v44  ;;  %v6602_v44 = vld [vmem:[#allocation12 + $0x8] sm:$0xff]  }
 0x6e7   : > { %v1238_v53 = vpack.c.bf16 %v1229_v33, %v1228_v39 }
 0x6ec   : > { %5771 = vmatpush3.bf16.xpose.msra.mxu1 %v1237_v51 }
 0x6ed   : > { %5772 = vmatprep.subr.bf16.mxu1 %v7204_v0 }
 0x6f4   : > { %5773 = vmatpush3.bf16.xpose.msra.mxu1 %v1238_v53 }
 0x6f5   : > { %5818 = vmatprep.subr.bf16.mxu1 %v7204_v0 }
 0x6fb   : > { %5775 = vmatmul.mubr.bf16.vlgmr.msra.gmra.mrb[4].mxu1 %v1230_v46  ;;  %v6606_v46 = vld [vmem:[#allocation12 + $0x28] sm:$0xff]  }
 0x6fc   : > { %5834 = vmatprep.mubr.msk.bf16.mxu1 %vm7205_vm0, %v7204_v0  ;;  %5819 = vmatpush3.bf16.msra.mxu1 %v6601_v43 }
 0x6fd   : > { %5820 = vmatprep.subr.bf16.mxu1 %v7204_v0 }
 0x700   : > { %5821 = vmatpush3.bf16.msra.mxu1 %v6602_v44 }
 0x701   : > { %5822 = vmatprep.subr.bf16.mxu1 %v7204_v0 }
 0x704   : > { %5823 = vmatpush3.bf16.msra.mxu1 %v6603_v36 }
 0x705   : > { %5824 = vmatprep.subr.bf16.mxu1 %v7204_v0 }
 0x708   : > { %5825 = vmatpush3.bf16.msra.mxu1 %v6604_v42 }
 0x709   : > { %5826 = vmatprep.subr.bf16.mxu1 %v7204_v0 }
 0x70c   : > { %5827 = vmatpush3.bf16.msra.mxu1 %v6605_v45 }
 0x70d   : > { %5828 = vmatprep.subr.bf16.mxu1 %v7204_v0 }
 0x710   : > { %5829 = vmatpush3.bf16.msra.mxu1 %v6606_v46 }
 0x711   : > { %5830 = vmatprep.subr.bf16.mxu1 %v7204_v0 }
 0x714   : > { %5831 = vmatpush3.bf16.msra.mxu1 %v6607_v54 }
 0x715   : > { %5832 = vmatprep.subr.bf16.mxu1 %v7204_v0 }
 0x718   : > { %5833 = vmatpush3.bf16.msra.mxu1 %v6608_v56 }
 0x719   : > { %5850 = vmatprep.subr.bf16.mxu1 %v7204_v0 }
 0x71b   : > { %5835 = vmatmul.mubr.bf16.vlgmr.msra.gmra.mrb[8].mxu1 %v1495_v60 }
 0x71c   : > { %5858 = vmatprep.mubr.msk.bf16.mxu1 %vm7205_vm0, %v7204_v0 }
 0x7ce   : > { %v1273_v61 = vpop.f32.mrb[4].mxu1 }
 0x7cf   : > { %v5776_v62 = vpop.f32.mrb[5].mxu1 }
 0x7d0   : > { %v1276_v1 = vpop.f32.mrb[6].mxu1 }
 0x7d1   : > { %v1280_v4 = vpack.c.bf16 %v1276_v1, %v1273_v61  ;;  %v5777_v5 = vpop.f32.mrb[7].mxu1 }
 0x7d3   : > { %5795 = vmatmul.mubr.bf16.vlgmr.msra.gmra.mrb[24].mxu0 %v1280_v4 }
 0x7d4   : > { %5799 = vmatpush3.bf16.msra.mxu0 %v6593_v3  ;;  %5814 = vmatprep.mubr.msk.bf16.mxu0 %vm7205_vm0, %v7204_v0 }
 0x7d5   : > { %5800 = vmatprep.subr.bf16.mxu0 %v7204_v0 }
 0x7d8   : > { %5801 = vmatpush3.bf16.msra.mxu0 %v6594_v7 }
 0x7d9   : > { %5802 = vmatprep.subr.bf16.mxu0 %v7204_v0 }
 0x7dc   : > { %5803 = vmatpush3.bf16.msra.mxu0 %v6595_v6 }
 0x7dd   : > { %5804 = vmatprep.subr.bf16.mxu0 %v7204_v0 }
 0x7e0   : > { %5805 = vmatpush3.bf16.msra.mxu0 %v6596_v9 }
 0x7e1   : > { %5806 = vmatprep.subr.bf16.mxu0 %v7204_v0 }
 0x7e4   : > { %5807 = vmatpush3.bf16.msra.mxu0 %v6597_v11 }
 0x7e5   : > { %5808 = vmatprep.subr.bf16.mxu0 %v7204_v0 }
 0x7e8   : > { %5809 = vmatpush3.bf16.msra.mxu0 %v6598_v13 }
 0x7e9   : > { %5810 = vmatprep.subr.bf16.mxu0 %v7204_v0 }
 0x7ec   : > { %5811 = vmatpush3.bf16.msra.mxu0 %v6599_v16 }
 0x7ed   : > { %5812 = vmatprep.subr.bf16.mxu0 %v7204_v0 }
 0x7ee   : > { %v1594_v18 = vpop.f32.mrb[8].mxu1 }
 0x7ef   : > { %v5836_v15 = vpop.f32.mrb[9].mxu1 }
 0x7f0   : > { %5813 = vmatpush3.bf16.msra.mxu0 %v6600_v17  ;;  %v1597_v2 = vpop.f32.mrb[10].mxu1 }
 0x7f1   : > { %5838 = vmatprep.subr.bf16.mxu0 %v7204_v0  ;;  %v7910_v14 = vpack.c.bf16 %v1597_v2, %v1594_v18  ;;  %v5837_v22 = vpop.f32.mrb[11].mxu1 }
 0x7f3   : > { %5815 = vmatmul.mubr.bf16.vlgmr.msra.gmra.mrb[28].mxu0 %v1280_v4 }
 0x7f4   : > { %5846 = vmatprep.mubr.msk.bf16.mxu0 %vm7205_vm0, %v7204_v0 }
 0x8a6   : > { %v1379_v55 = vpop.f32.mrb[24].mxu0 }
 0x8a7   : > { %v5796_v59 = vpop.f32.mrb[25].mxu0 }
 0x8a8   : > { %v1382_v19 = vpop.f32.mrb[26].mxu0 }
 0x8a9   : > { %v7896_v21 = vpack.c.bf16 %v1382_v19, %v1379_v55  ;;  %v5797_v10 = vpop.f32.mrb[27].mxu0 }
 0x8ab   : > { %1607 = vrot.lane.b32.xlu0 %v7896_v21, %s7206_s28  ;;  %1605 = vrot.lane.b32.xlu1 %v7896_v21, %s8952_s3  ;;  %v7904_v63 = vsel %vm1621_vm2, %v7896_v21, 0 }
 0x8ac   : > { %5839 = vmatpush3.bf16.xpose.msra.mxu0 %v7904_v63 }
 0x8ad   : > { %5840 = vmatprep.subr.bf16.mxu0 %v7204_v0 }
 0x8af   : > { %1609 = vrot.lane.b32.xlu1 %v7896_v21, %s8959_s12 }
 0x8c6   : > { %v1485_v23 = vpop.f32.mrb[28].mxu0 }
 0x8c7   : > { %v5816_v25 = vpop.f32.mrb[29].mxu0 }
 0x8c8   : > { %v1488_v8 = vpop.f32.mrb[30].mxu0 }
 0x8c9   : > { %v7912_v24 = vpack.c.bf16 %v1488_v8, %v1485_v23  ;;  %v5817_v12 = vpop.f32.mrb[31].mxu0 }
 0x8cb   : > { %5851 = vmatpush3.bf16.msra.mxu1 %v7912_v24 }
 0x8cc   : > { %5852 = vmatprep.subr.bf16.mxu1 %v7204_v0 }
 0x91d   : > { %v7916_v34 = vpop.permute.xlu1 %1605  ;;  %v7924_v27 = vpop.permute.xlu0 %1607 }
 0x91e   : > { %v7920_v35 = vsel %vm1621_vm2, %v7916_v34, 0  ;;  %v7928_v26 = vsel %vm1621_vm2, %v7924_v27, 0 }
 0x91f   : > { %5841 = vmatpush3.bf16.xpose.msra.mxu0 %v7920_v35 }
 0x920   : > { %5842 = vmatprep.subr.bf16.mxu0 %v7204_v0 }
 0x921   : > { %v7932_v28 = vpop.permute.xlu1 %1609 }
 0x922   : > { %v7936_v20 = vsel %vm1621_vm2, %v7932_v28, 0 }
 0x927   : > { %5843 = vmatpush3.bf16.xpose.msra.mxu0 %v7928_v26 }
 0x928   : > { %5844 = vmatprep.subr.bf16.mxu0 %v7204_v0 }
 0x92f   : > { %5845 = vmatpush3.bf16.xpose.msra.mxu0 %v7936_v20 }
 0x930   : > { %5874 = vmatprep.subr.bf16.mxu0 %v7204_v0 }
 0x936   : > { %5847 = vmatmul.mubr.msk.bf16.vlgmr.msra.gmra.mrb[32].mxu0 %vm1621_vm2, %v7910_v14 }
 0x937   : > { %5875 = vmatpush3.bf16.msra.mxu0 %v7912_v24  ;;  %5882 = vmatprep.mubr.msk.bf16.mxu0 %vm7205_vm0, %v7204_v0 }
 0x938   : > { %5876 = vmatprep.subr.bf16.mxu0 %v7204_v0 }
 0xa09   : > { %v1671_v38 = vpop.f32.mrb[32].mxu0 }
 0xa0a   : > { %v5848_v30 = vpop.f32.mrb[33].mxu0  ;;  %v1679_v40 = vsel %vm8954_vm3, %v1671_v38, 0.0 }
 0xa0b   : > { %v1674_v29 = vpop.f32.mrb[34].mxu0 }
 0xa0c   : > { %v1680_v31 = vsel %vm8954_vm3, %v1674_v29, 0.0  ;;  %v5849_v47 = vpop.f32.mrb[35].mxu0 }
 0xa0d   : > { %v1681_v37 = vadd.f32 %v1680_v31, %v1679_v40 }
 0xa0f   : > { %1682 = vadd.xlane.f32.xlu1 %v1681_v37 }
 0xa9c   : > { %v1683_v48 = vpop.xlane.xlu1 %1682 }
 0xa9d   : > { %v1684_v32 = vrot.slane %v1683_v48, 4 }
 0xa9f   : > { %v1685_v49 = vadd.f32 %v1684_v32, %v1683_v48 }
 0xaa1   : > { %v1686_v50 = vrot.slane %v1685_v49, 2 }
 0xaa3   : > { %v1687_v51 = vadd.f32 %v1686_v50, %v1685_v49 }
 0xaa5   : > { %v1688_v52 = vrot.slane %v1687_v51, 1 }
 0xaa7   : > { %v1689_v39 = vadd.f32 %v1688_v52, %v1687_v51 }
 0xaa9   : > { %6320 = vpush %v1689_v39 }
 0xada   : > { %s6321_s2 = spop %6320 }
 0xadb   : > { %s1693_s17 = smul.f32 0.0009765625, %s6321_s2 }
 0xadd   : > { %v1694_v33 = vstv %s1693_s17  ;;  %s8995_s17 = sld [smem:[#allocation31_spill]] }
 0xade   : > { %v1695_v53 = vsub.f32 %v1671_v38, %v1694_v33  ;;  %v1696_v41 = vsub.f32 %v1674_v29, %v1694_v33 }
 0xae0   : > { %v1697_v43 = vmul.f32 %v1695_v53, %v1695_v53  ;;  %v1698_v44 = vmul.f32 %v1696_v41, %v1696_v41 }
 0xae2   : > { %v1699_v36 = vsel %vm8954_vm3, %v1697_v43, 0.0  ;;  %v1700_v42 = vsel %vm8954_vm3, %v1698_v44, 0.0 }
 0xae3   : > { %v1701_v45 = vadd.f32 %v1700_v42, %v1699_v36 }
 0xae5   : > { %1702 = vadd.xlane.f32.xlu0 %v1701_v45 }
 0xb72   : > { %v1703_v46 = vpop.xlane.xlu0 %1702 }
 0xb73   : > { %v1704_v54 = vrot.slane %v1703_v46, 4 }
 0xb75   : > { %v1705_v56 = vadd.f32 %v1704_v54, %v1703_v46 }
 0xb77   : > { %v1706_v57 = vrot.slane %v1705_v56, 2 }
 0xb79   : > { %v1707_v58 = vadd.f32 %v1706_v57, %v1705_v56 }
 0xb7b   : > { %v1708_v60 = vrot.slane %v1707_v58, 1 }
 0xb7d   : > { %v1709_v61 = vadd.f32 %v1708_v60, %v1707_v58 }
 0xb7f   : > { %6322 = vpush %v1709_v61 }
 0xbb0   : > { %s6323_s29 = spop %6322 }
 0xbb1   : > { %s1713_s9 = smul.f32 0.0009765625, %s6323_s29 }
 0xbb3   : > { %s1714_s0 = sadd.f32 1e-05, %s1713_s9 }
 0xbb5   : > { %v1715_v62 = vstv %s1714_s0 }
 0xbb6   : > { %6684 = vrsqrt.f32 %v1715_v62 }
 0xbc0   : > { %v6685_v1 = vpop.eup %6684 }
 0xbc1   : > { %6324 = vpush %v6685_v1 }
 0xbf2   : > { %s6325_s4 = spop %6324 }
 0xbf3   : > { %v1718_v3 = vstv %s6325_s4 }
 0xbf4   : > { %v1719_v4 = vmul.f32 %v1718_v3, %v1695_v53  ;;  %v1720_v5 = vmul.f32 %v1718_v3, %v1696_v41 }
 0xbf6   : > { %v1724_v7 = vsel %vm8954_vm3, %v1720_v5, -inf  ;;  %v1721_v6 = vsel %vm8954_vm3, %v1719_v4, -inf }
 0xbf7   : > { %1725 = vmax.xlane.f32.xlu1 %v1724_v7  ;;  %1722 = vmax.xlane.f32.xlu0 %v1721_v6 }
 0xc08   : > { %1615 = vrot.lane.b32.xlu1 %v7912_v24, %s7206_s28 }
 0xc84   : > { %v1726_v9 = vpop.xlane.xlu1 %1725  ;;  %v1723_v11 = vpop.xlane.xlu0 %1722 }
 0xc85   : > { %v1728_v13 = vsub.f32 %v1720_v5, %v1726_v9  ;;  %v1727_v16 = vsub.f32 %v1719_v4, %v1723_v11 }
 0xc87   : > { %v1731_v17 = vmul.f32 1.442695, %v1728_v13  ;;  %v1729_v55 = vmul.f32 1.442695, %v1727_v16 }
 0xc88   : > { %v7962_v10 = vpop.permute.xlu1 %1615 }
 0xc89   : > { %6686 = vpow2.f32 %v1731_v17 }
 0xc8a   : > { %6688 = vpow2.f32 %v1729_v55 }
 0xc93   : > { %v6687_v59 = vpop.eup %6686 }
 0xc94   : > { %v6689_v18 = vpop.eup %6688  ;;  %v1736_v19 = vsel %vm8954_vm3, %v6687_v59, 0.0 }
 0xc95   : > { %1737 = vadd.xlane.f32.xlu1 %v1736_v19  ;;  %v1733_v15 = vsel %vm8954_vm3, %v6689_v18, 0.0 }
 0xc96   : > { %1734 = vadd.xlane.f32.xlu0 %v1733_v15 }
 0xca6   : > { %1618 = vrot.lane.b32.xlu1 %v7912_v24, %s8959_s12 }
 0xcac   : > { %1612 = vrot.lane.b32.xlu0 %v7912_v24, %s8952_s3 }
 0xcb0   : > { %1791 = vrot.lane.b32.xlu0 %v7910_v14, %s8952_s3 }
 0xd22   : > { %v1738_v2 = vpop.xlane.xlu1 %1737 }
 0xd23   : > { %6690 = vrcp.f32 %v1738_v2  ;;  %v1735_v22 = vpop.xlane.xlu0 %1734 }
 0xd24   : > { %6692 = vrcp.f32 %v1735_v22 }
 0xd26   : > { %v7974_v30 = vpop.permute.xlu1 %1618 }
 0xd27   : > { %v7964_v23 = vpop.permute.xlu0 %1612 }
 0xd28   : > { %5853 = vmatpush3.bf16.msra.mxu1 %v7964_v23  ;;  %5877 = vmatpush3.bf16.msra.mxu0 %v7964_v23 }
 0xd29   : > { %5854 = vmatprep.subr.bf16.mxu1 %v7204_v0  ;;  %5878 = vmatprep.subr.bf16.mxu0 %v7204_v0 }
 0xd2b   : > { %v1792_v40 = vpop.permute.xlu0 %1791 }
 0xd2c   : > { %5855 = vmatpush3.bf16.msra.mxu1 %v7962_v10  ;;  %5879 = vmatpush3.bf16.msra.mxu0 %v7962_v10 }
 0xd2d   : > { %v6691_v25 = vpop.eup %6690  ;;  %5856 = vmatprep.subr.bf16.mxu1 %v7204_v0  ;;  %5880 = vmatprep.subr.bf16.mxu0 %v7204_v0 }
 0xd2e   : > { %v6693_v8 = vpop.eup %6692  ;;  %v1742_v12 = vmul.f32 %v6691_v25, %v6687_v59 }
 0xd2f   : > { %v1741_v38 = vmul.f32 %v6693_v8, %v6689_v18 }
 0xd30   : > { %5857 = vmatpush3.bf16.msra.mxu1 %v7974_v30  ;;  %5881 = vmatpush3.bf16.msra.mxu0 %v7974_v30 }
 0xd31   : > { %v1743_v29 = vpack.c.bf16 %v1742_v12, %v1741_v38  ;;  %5862 = vmatprep.subr.bf16.mxu1 %v7204_v0  ;;  %5886 = vmatprep.subr.bf16.mxu0 %v7204_v0 }
 0xd33   : > { %5859 = vmatmul.mubr.msk.bf16.vlgmr.msra.gmra.mrb[12].mxu1 %vm8954_vm3, %v1743_v29 }
 0xd34   : > { %5870 = vmatprep.mubr.msk.bf16.mxu1 %vm7205_vm0, %v7204_v0 }
 0xd39   : > { %5863 = vmatpush3.bf16.xpose.msra.mxu1 %v7904_v63 }
 0xd3a   : > { %5864 = vmatprep.subr.bf16.mxu1 %v7204_v0 }
 0xd41   : > { %5865 = vmatpush3.bf16.xpose.msra.mxu1 %v7920_v35 }
 0xd42   : > { %5866 = vmatprep.subr.bf16.mxu1 %v7204_v0 }
 0xd49   : > { %5867 = vmatpush3.bf16.xpose.msra.mxu1 %v7928_v26 }
 0xd4a   : > { %5868 = vmatprep.subr.bf16.mxu1 %v7204_v0 }
 0xd51   : > { %5869 = vmatpush3.bf16.xpose.msra.mxu1 %v7936_v20 }
 0xd52   : > { %5904 = vmatprep.subr.bf16.mxu1 %v7204_v0 }
 0xd58   : > { %5871 = vmatmul.mubr.msk.bf16.vlgmr.msra.gmra.mrb[16].mxu1 %vm1621_vm2, %v1792_v40 }
 0xd59   : > { %5905 = vmatpush3.bf16.msra.mxu1 %v7912_v24  ;;  %5912 = vmatprep.mubr.msk.bf16.mxu1 %vm7205_vm0, %v7204_v0 }
 0xd5a   : > { %5906 = vmatprep.subr.bf16.mxu1 %v7204_v0 }
 0xd5d   : > { %5907 = vmatpush3.bf16.msra.mxu1 %v7964_v23 }
 0xd5e   : > { %5908 = vmatprep.subr.bf16.mxu1 %v7204_v0 }
 0xd61   : > { %5909 = vmatpush3.bf16.msra.mxu1 %v7962_v10 }
 0xd62   : > { %5910 = vmatprep.subr.bf16.mxu1 %v7204_v0 }
 0xd65   : > { %5911 = vmatpush3.bf16.msra.mxu1 %v7974_v30 }
 0xd66   : > { %5916 = vmatprep.subr.bf16.mxu1 %v7204_v0 }
 0xe06   : > { %v1781_v31 = vpop.f32.mrb[12].mxu1 }
 0xe07   : > { %1788 = vst.msk [vmem:[#allocation2] sm:$0xff] %vm1621_vm2, %v1781_v31  ;;  %v5860_v47 = vpop.f32.mrb[13].mxu1 }
 0xe08   : > { %v1784_v37 = vpop.f32.mrb[14].mxu1 }
 0xe09   : > { %1789 = vst.msk [vmem:[#allocation2 + $0x8] sm:$0xff] %vm1621_vm2, %v1784_v37  ;;  %v5861_v48 = vpop.f32.mrb[15].mxu1 }
 0xe2b   : > { %v1830_v32 = vpop.f32.mrb[16].mxu1 }
 0xe2c   : > { %v5872_v49 = vpop.f32.mrb[17].mxu1  ;;  %v1837_v51 = vsel %vm8954_vm3, %v1830_v32, 0.0 }
 0xe2d   : > { %v1833_v50 = vpop.f32.mrb[18].mxu1 }
 0xe2e   : > { %v1838_v52 = vsel %vm8954_vm3, %v1833_v50, 0.0  ;;  %v5873_v39 = vpop.f32.mrb[19].mxu1 }
 0xe2f   : > { %v1839_v33 = vadd.f32 %v1838_v52, %v1837_v51 }
 0xe31   : > { %1840 = vadd.xlane.f32.xlu1 %v1839_v33 }
 0xebe   : > { %v1841_v53 = vpop.xlane.xlu1 %1840 }
 0xebf   : > { %v1842_v41 = vrot.slane %v1841_v53, 4 }
 0xec1   : > { %v1843_v43 = vadd.f32 %v1842_v41, %v1841_v53  ;;  %v8020_v41 = vld [vmem:[%s8995_s17] sm:$0xff]  }
 0xec3   : > { %v1844_v44 = vrot.slane %v1843_v43, 2 }
 0xec5   : > { %v1845_v36 = vadd.f32 %v1844_v44, %v1843_v43 }
 0xec7   : > { %v1846_v42 = vrot.slane %v1845_v36, 1 }
 0xec9   : > { %v1847_v45 = vadd.f32 %v1846_v42, %v1845_v36 }
 0xecb   : > { %6326 = vpush %v1847_v45 }
 0xefc   : > { %s6327_s20 = spop %6326 }
 0xefd   : > { %s1851_s24 = smul.f32 0.0009765625, %s6327_s20 }
 0xeff   : > { %v1852_v46 = vstv %s1851_s24 }
 0xf00   : > { %v1853_v54 = vsub.f32 %v1830_v32, %v1852_v46  ;;  %v1854_v56 = vsub.f32 %v1833_v50, %v1852_v46 }
 0xf02   : > { %v1855_v57 = vmul.f32 %v1853_v54, %v1853_v54  ;;  %v1856_v58 = vmul.f32 %v1854_v56, %v1854_v56 }
 0xf04   : > { %v1857_v60 = vsel %vm8954_vm3, %v1855_v57, 0.0  ;;  %v1858_v61 = vsel %vm8954_vm3, %v1856_v58, 0.0 }
 0xf05   : > { %v1859_v62 = vadd.f32 %v1858_v61, %v1857_v60 }
 0xf07   : > { %1860 = vadd.xlane.f32.xlu0 %v1859_v62 }
 0xf94   : > { %v1861_v1 = vpop.xlane.xlu0 %1860 }
 0xf95   : > { %v1862_v3 = vrot.slane %v1861_v1, 4 }
 0xf97   : > { %v1863_v4 = vadd.f32 %v1862_v3, %v1861_v1 }
 0xf99   : > { %v1864_v5 = vrot.slane %v1863_v4, 2 }
 0xf9b   : > { %v1865_v7 = vadd.f32 %v1864_v5, %v1863_v4 }
 0xf9d   : > { %v1866_v6 = vrot.slane %v1865_v7, 1 }
 0xf9f   : > { %v1867_v9 = vadd.f32 %v1866_v6, %v1865_v7 }
 0xfa1   : > { %6328 = vpush %v1867_v9 }
 0xfd2   : > { %s6329_s25 = spop %6328 }
 0xfd3   : > { %s1871_s22 = smul.f32 0.0009765625, %s6329_s25  ;;  %s8946_s25 = smov 120  }
 0xfd5   : > { %s1872_s21 = sadd.f32 1e-05, %s1871_s22 }
 0xfd7   : > { %v1873_v11 = vstv %s1872_s21 }
 0xfd8   : > { %6694 = vrsqrt.f32 %v1873_v11 }
 0xfe2   : > { %v6695_v13 = vpop.eup %6694 }
 0xfe3   : > { %6330 = vpush %v6695_v13 }
0x1014   : > { %s6331_s23 = spop %6330 }
0x1015   : > { %v1876_v16 = vstv %s6331_s23 }
0x1016   : > { %v1877_v17 = vmul.f32 %v1876_v16, %v1853_v54  ;;  %v1878_v55 = vmul.f32 %v1876_v16, %v1854_v56 }
0x1018   : > { %v1882_v59 = vsel %vm8954_vm3, %v1878_v55, -inf  ;;  %v1879_v18 = vsel %vm8954_vm3, %v1877_v17, -inf }
0x1019   : > { %1883 = vmax.xlane.f32.xlu1 %v1882_v59  ;;  %1880 = vmax.xlane.f32.xlu0 %v1879_v18 }
0x10a6   : > { %v1884_v19 = vpop.xlane.xlu1 %1883  ;;  %v1881_v15 = vpop.xlane.xlu0 %1880 }
0x10a7   : > { %v1886_v2 = vsub.f32 %v1878_v55, %v1884_v19  ;;  %v1885_v22 = vsub.f32 %v1877_v17, %v1881_v15 }
0x10a9   : > { %v1889_v25 = vmul.f32 1.442695, %v1886_v2  ;;  %v1887_v8 = vmul.f32 1.442695, %v1885_v22 }
0x10ab   : > { %6696 = vpow2.f32 %v1889_v25 }
0x10ac   : > { %6698 = vpow2.f32 %v1887_v8 }
0x10b5   : > { %v6697_v12 = vpop.eup %6696 }
0x10b6   : > { %v6699_v38 = vpop.eup %6698  ;;  %v1894_v29 = vsel %vm8954_vm3, %v6697_v12, 0.0 }
0x10b7   : > { %1895 = vadd.xlane.f32.xlu1 %v1894_v29  ;;  %v1891_v40 = vsel %vm8954_vm3, %v6699_v38, 0.0 }
0x10b8   : > { %1892 = vadd.xlane.f32.xlu0 %v1891_v40 }
0x10ce   : > { %2018 = vrot.lane.b32.xlu0 %v7910_v14, %s7206_s28 }
0x1144   : > { %v1896_v31 = vpop.xlane.xlu1 %1895 }
0x1145   : > { %6700 = vrcp.f32 %v1896_v31  ;;  %v1893_v47 = vpop.xlane.xlu0 %1892 }
0x1146   : > { %6702 = vrcp.f32 %v1893_v47 }
0x1149   : > { %v2019_v43 = vpop.permute.xlu0 %2018 }
0x114f   : > { %v6701_v37 = vpop.eup %6700 }
0x1150   : > { %v6703_v48 = vpop.eup %6702  ;;  %v1900_v32 = vmul.f32 %v6701_v37, %v6697_v12 }
0x1151   : > { %v1899_v49 = vmul.f32 %v6703_v48, %v6699_v38 }
0x1153   : > { %v1901_v50 = vpack.c.bf16 %v1900_v32, %v1899_v49 }
0x1155   : > { %5883 = vmatmul.mubr.msk.bf16.vlgmr.msra.gmra.mrb[36].mxu0 %vm8954_vm3, %v1901_v50 }
0x1156   : > { %5888 = vmatprep.mubr.msk.bf16.mxu0 %vm7205_vm0, %v7204_v0 }
0x1228   : > { %v1939_v51 = vpop.f32.mrb[36].mxu0 }
0x1229   : > { %v5884_v52 = vpop.f32.mrb[37].mxu0 }
0x122a   : > { %v1942_v39 = vpop.f32.mrb[38].mxu0 }
0x122b   : > { %v1946_v33 = vpack.c.bf16 %v1942_v39, %v1939_v51  ;;  %v5885_v53 = vpop.f32.mrb[39].mxu0 }
0x122d   : > { %5887 = vmatpush3.bf16.msra.mxu0 %v1946_v33 }
0x122e   : > { %5892 = vmatprep.subr.bf16.mxu0 %v7204_v0 }
0x1230   : > { %5889 = vmatmul.mubr.msk.bf16.vlgmr.msra.gmra.mrb[40].mxu0 %vm8957_vm1, %v8020_v41 }
0x1231   : > { %5900 = vmatprep.mubr.msk.bf16.mxu0 %vm7205_vm0, %v7204_v0 }
0x1236   : > { %5893 = vmatpush3.bf16.xpose.msra.mxu0 %v7904_v63 }
0x1237   : > { %5894 = vmatprep.subr.bf16.mxu0 %v7204_v0 }
0x123e   : > { %5895 = vmatpush3.bf16.xpose.msra.mxu0 %v7920_v35 }
0x123f   : > { %5896 = vmatprep.subr.bf16.mxu0 %v7204_v0 }
0x1246   : > { %5897 = vmatpush3.bf16.xpose.msra.mxu0 %v7928_v26 }
0x1247   : > { %5898 = vmatprep.subr.bf16.mxu0 %v7204_v0 }
0x124e   : > { %5899 = vmatpush3.bf16.xpose.msra.mxu0 %v7936_v20 }
0x124f   : > { %5934 = vmatprep.subr.bf16.mxu0 %v7204_v0 }
0x1255   : > { %5901 = vmatmul.mubr.msk.bf16.vlgmr.msra.gmra.mrb[44].mxu0 %vm1621_vm2, %v2019_v43 }
0x1256   : > { %5935 = vmatpush3.bf16.msra.mxu0 %v7912_v24  ;;  %5942 = vmatprep.mubr.msk.bf16.mxu0 %vm7205_vm0, %v7204_v0 }
0x1257   : > { %5936 = vmatprep.subr.bf16.mxu0 %v7204_v0 }
0x125a   : > { %5937 = vmatpush3.bf16.msra.mxu0 %v7964_v23 }
0x125b   : > { %5938 = vmatprep.subr.bf16.mxu0 %v7204_v0 }
0x125e   : > { %5939 = vmatpush3.bf16.msra.mxu0 %v7962_v10 }
0x125f   : > { %5940 = vmatprep.subr.bf16.mxu0 %v7204_v0 }
0x1262   : > { %5941 = vmatpush3.bf16.msra.mxu0 %v7974_v30 }
0x1263   : > { %5946 = vmatprep.subr.bf16.mxu0 %v7204_v0 }
0x1303   : > { %v8046_v44 = vpop.f32.mrb[40].mxu0 }
0x1304   : > { %v5890_v36 = vpop.f32.mrb[41].mxu0 }
0x1305   : > { %v8048_v42 = vpop.f32.mrb[42].mxu0 }
0x1306   : > { %v5891_v45 = vpop.f32.mrb[43].mxu0 }
0x1328   : > { %v2057_v46 = vpop.f32.mrb[44].mxu0 }
0x1329   : > { %v5902_v54 = vpop.f32.mrb[45].mxu0  ;;  %v2064_v57 = vsel %vm8954_vm3, %v2057_v46, 0.0 }
0x132a   : > { %v2060_v56 = vpop.f32.mrb[46].mxu0 }
0x132b   : > { %v2065_v58 = vsel %vm8954_vm3, %v2060_v56, 0.0  ;;  %v5903_v60 = vpop.f32.mrb[47].mxu0 }
0x132c   : > { %v2066_v61 = vadd.f32 %v2065_v58, %v2064_v57 }
0x132e   : > { %2067 = vadd.xlane.f32.xlu1 %v2066_v61 }
0x13bb   : > { %v2068_v62 = vpop.xlane.xlu1 %2067 }
0x13bc   : > { %v2069_v1 = vrot.slane %v2068_v62, 4 }
0x13be   : > { %v2070_v3 = vadd.f32 %v2069_v1, %v2068_v62 }
0x13c0   : > { %v2071_v4 = vrot.slane %v2070_v3, 2 }
0x13c2   : > { %v2072_v5 = vadd.f32 %v2071_v4, %v2070_v3 }
0x13c4   : > { %v2073_v7 = vrot.slane %v2072_v5, 1 }
0x13c6   : > { %v2074_v6 = vadd.f32 %v2073_v7, %v2072_v5 }
0x13c8   : > { %6332 = vpush %v2074_v6 }
0x13f9   : > { %s6333_s29 = spop %6332 }
0x13fa   : > { %s2078_s9 = smul.f32 0.0009765625, %s6333_s29 }
0x13fc   : > { %v2079_v9 = vstv %s2078_s9 }
0x13fd   : > { %v2080_v11 = vsub.f32 %v2057_v46, %v2079_v9  ;;  %v2081_v13 = vsub.f32 %v2060_v56, %v2079_v9 }
0x13ff   : > { %v2082_v16 = vmul.f32 %v2080_v11, %v2080_v11  ;;  %v2083_v17 = vmul.f32 %v2081_v13, %v2081_v13 }
0x1401   : > { %v2084_v55 = vsel %vm8954_vm3, %v2082_v16, 0.0  ;;  %v2085_v59 = vsel %vm8954_vm3, %v2083_v17, 0.0 }
0x1402   : > { %v2086_v18 = vadd.f32 %v2085_v59, %v2084_v55 }
0x1404   : > { %2087 = vadd.xlane.f32.xlu1 %v2086_v18 }
0x1491   : > { %v2088_v19 = vpop.xlane.xlu1 %2087 }
0x1492   : > { %v2089_v15 = vrot.slane %v2088_v19, 4 }
0x1494   : > { %v2090_v2 = vadd.f32 %v2089_v15, %v2088_v19 }
0x1496   : > { %v2091_v22 = vrot.slane %v2090_v2, 2 }
0x1498   : > { %v2092_v25 = vadd.f32 %v2091_v22, %v2090_v2 }
0x149a   : > { %v2093_v8 = vrot.slane %v2092_v25, 1 }
0x149c   : > { %v2094_v12 = vadd.f32 %v2093_v8, %v2092_v25 }
0x149e   : > { %6334 = vpush %v2094_v12 }
0x14cf   : > { %s6335_s0 = spop %6334 }
0x14d0   : > { %s2098_s4 = smul.f32 0.0009765625, %s6335_s0 }
0x14d2   : > { %s2099_s20 = sadd.f32 1e-05, %s2098_s4 }
0x14d4   : > { %v2100_v38 = vstv %s2099_s20 }
0x14d5   : > { %6704 = vrsqrt.f32 %v2100_v38 }
0x14df   : > { %v6705_v29 = vpop.eup %6704 }
0x14e0   : > { %6336 = vpush %v6705_v29 }
0x1511   : > { %s6337_s24 = spop %6336 }
0x1512   : > { %v2103_v40 = vstv %s6337_s24 }
0x1513   : > { %v2104_v31 = vmul.f32 %v2103_v40, %v2080_v11  ;;  %v2105_v47 = vmul.f32 %v2103_v40, %v2081_v13 }
0x1515   : > { %v2106_v37 = vsel %vm8954_vm3, %v2104_v31, -inf  ;;  %v2109_v48 = vsel %vm8954_vm3, %v2105_v47, -inf }
0x1516   : > { %2107 = vmax.xlane.f32.xlu1 %v2106_v37 }
0x151a   : > { %2110 = vmax.xlane.f32.xlu1 %v2109_v48 }
0x15a3   : > { %v2108_v32 = vpop.xlane.xlu1 %2107 }
0x15a4   : > { %v2112_v49 = vsub.f32 %v2104_v31, %v2108_v32 }
0x15a6   : > { %v2114_v50 = vmul.f32 1.442695, %v2112_v49 }
0x15a7   : > { %v2111_v51 = vpop.xlane.xlu1 %2110 }
0x15a8   : > { %6706 = vpow2.f32 %v2114_v50  ;;  %v2113_v52 = vsub.f32 %v2105_v47, %v2111_v51 }
0x15aa   : > { %v2116_v39 = vmul.f32 1.442695, %v2113_v52 }
0x15ac   : > { %6708 = vpow2.f32 %v2116_v39 }
0x15b2   : > { %v6707_v33 = vpop.eup %6706 }
0x15b3   : > { %v2118_v53 = vsel %vm8954_vm3, %v6707_v33, 0.0 }
0x15b4   : > { %2119 = vadd.xlane.f32.xlu1 %v2118_v53 }
0x15b6   : > { %v6709_v43 = vpop.eup %6708 }
0x15b7   : > { %v2121_v36 = vsel %vm8954_vm3, %v6709_v43, 0.0 }
0x15b8   : > { %2122 = vadd.xlane.f32.xlu0 %v2121_v36 }
0x15c5   : > { %2237 = vrot.lane.b32.xlu1 %v7910_v14, %s8959_s12 }
0x1641   : > { %v2120_v45 = vpop.xlane.xlu1 %2119 }
0x1642   : > { %6710 = vrcp.f32 %v2120_v45 }
0x1645   : > { %v2123_v46 = vpop.xlane.xlu0 %2122  ;;  %v2238_v5 = vpop.permute.xlu1 %2237 }
0x1646   : > { %6712 = vrcp.f32 %v2123_v46 }
0x164c   : > { %v6711_v54 = vpop.eup %6710 }
0x164d   : > { %v2126_v57 = vmul.f32 %v6711_v54, %v6707_v33 }
0x1650   : > { %v6713_v56 = vpop.eup %6712 }
0x1651   : > { %v2127_v58 = vmul.f32 %v6713_v56, %v6709_v43 }
0x1653   : > { %v2128_v60 = vpack.c.bf16 %v2127_v58, %v2126_v57 }
0x1655   : > { %5913 = vmatmul.mubr.msk.bf16.vlgmr.msra.gmra.mrb[20].mxu1 %vm8954_vm3, %v2128_v60 }
0x1656   : > { %5918 = vmatprep.mubr.msk.bf16.mxu1 %vm7205_vm0, %v7204_v0 }
0x1728   : > { %v2166_v61 = vpop.f32.mrb[20].mxu1 }
0x1729   : > { %v5914_v62 = vpop.f32.mrb[21].mxu1 }
0x172a   : > { %v2169_v1 = vpop.f32.mrb[22].mxu1 }
0x172b   : > { %v2173_v3 = vpack.c.bf16 %v2169_v1, %v2166_v61  ;;  %v5915_v4 = vpop.f32.mrb[23].mxu1 }
0x172d   : > { %5917 = vmatpush3.bf16.msra.mxu1 %v2173_v3 }
0x172e   : > { %5922 = vmatprep.subr.bf16.mxu1 %v7204_v0 }
0x1730   : > { %5919 = vmatmul.mubr.msk.bf16.vlgmr.msra.gmra.mrb[24].mxu1 %vm8957_vm1, %v8020_v41 }
0x1731   : > { %5930 = vmatprep.mubr.msk.bf16.mxu1 %vm7205_vm0, %v7204_v0 }
0x1736   : > { %5923 = vmatpush3.bf16.xpose.msra.mxu1 %v7904_v63 }
0x1737   : > { %5924 = vmatprep.subr.bf16.mxu1 %v7204_v0 }
0x173e   : > { %5925 = vmatpush3.bf16.xpose.msra.mxu1 %v7920_v35 }
0x173f   : > { %5926 = vmatprep.subr.bf16.mxu1 %v7204_v0 }
0x1746   : > { %5927 = vmatpush3.bf16.xpose.msra.mxu1 %v7928_v26 }
0x1747   : > { %5928 = vmatprep.subr.bf16.mxu1 %v7204_v0 }
0x174e   : > { %5929 = vmatpush3.bf16.xpose.msra.mxu1 %v7936_v20 }
0x174f   : > { %5964 = vmatprep.subr.bf16.mxu1 %v7204_v0 }
0x1755   : > { %5931 = vmatmul.mubr.msk.bf16.vlgmr.msra.gmra.mrb[28].mxu1 %vm1621_vm2, %v2238_v5 }
0x1756   : > { %5972 = vmatprep.mubr.msk.bf16.mxu1 %vm7205_vm0, %v7204_v0 }
0x1803   : > { %v8079_v63 = vpop.f32.mrb[24].mxu1 }
0x1804   : > { %v5920_v7 = vpop.f32.mrb[25].mxu1 }
0x1805   : > { %v8081_v35 = vpop.f32.mrb[26].mxu1 }
0x1806   : > { %v5921_v6 = vpop.f32.mrb[27].mxu1 }
0x1828   : > { %v2276_v9 = vpop.f32.mrb[28].mxu1 }
0x1829   : > { %v5932_v26 = vpop.f32.mrb[29].mxu1  ;;  %v2283_v13 = vsel %vm8954_vm3, %v2276_v9, 0.0 }
0x182a   : > { %v2279_v11 = vpop.f32.mrb[30].mxu1 }
0x182b   : > { %v2284_v20 = vsel %vm8954_vm3, %v2279_v11, 0.0  ;;  %v5933_v16 = vpop.f32.mrb[31].mxu1 }
0x182c   : > { %v2285_v17 = vadd.f32 %v2284_v20, %v2283_v13 }
0x182e   : > { %2286 = vadd.xlane.f32.xlu1 %v2285_v17 }
0x183f   : > { %2460 = vrot.lane.b32.xlu1 %v7916_v34, %s8946_s25 }
0x1843   : > { %2462 = vrot.lane.b32.xlu1 %v7924_v27, %s8946_s25 }
0x1847   : > { %2456 = vrot.lane.b32.xlu1 %v7910_v14, %s8946_s25 }
0x18bb   : > { %v2287_v55 = vpop.xlane.xlu1 %2286 }
0x18bc   : > { %v2288_v59 = vrot.slane %v2287_v55, 4 }
0x18be   : > { %v2289_v18 = vadd.f32 %v2288_v59, %v2287_v55 }
0x18c0   : > { %v2290_v19 = vrot.slane %v2289_v18, 2 }
0x18c2   : > { %v2291_v15 = vadd.f32 %v2290_v19, %v2289_v18 }
0x18c4   : > { %v2292_v2 = vrot.slane %v2291_v15, 1 }
0x18c6   : > { %v2293_v22 = vadd.f32 %v2292_v2, %v2291_v15  ;;  %v2461_v15 = vpop.permute.xlu1 %2460 }
0x18c7   : > { %v8115_v2 = vsel %vm1621_vm2, %v2461_v15, 0 }
0x18c8   : > { %6338 = vpush %v2293_v22 }
0x18f9   : > { %s6339_s22 = spop %6338 }
0x18fa   : > { %s2297_s21 = smul.f32 0.0009765625, %s6339_s22 }
0x18fc   : > { %v2298_v25 = vstv %s2297_s21  ;;  %s7210_s21 = smov 56  }
0x18fd   : > { %v2299_v8 = vsub.f32 %v2276_v9, %v2298_v25  ;;  %v2300_v12 = vsub.f32 %v2279_v11, %v2298_v25 }
0x18ff   : > { %v2301_v38 = vmul.f32 %v2299_v8, %v2299_v8  ;;  %v2302_v29 = vmul.f32 %v2300_v12, %v2300_v12 }
0x1901   : > { %v2303_v40 = vsel %vm8954_vm3, %v2301_v38, 0.0  ;;  %v2304_v31 = vsel %vm8954_vm3, %v2302_v29, 0.0 }
0x1902   : > { %v2305_v47 = vadd.f32 %v2304_v31, %v2303_v40 }
0x1904   : > { %2306 = vadd.xlane.f32.xlu0 %v2305_v47 }
0x1991   : > { %v2307_v37 = vpop.xlane.xlu0 %2306 }
0x1992   : > { %v2308_v48 = vrot.slane %v2307_v37, 4 }
0x1994   : > { %v2309_v32 = vadd.f32 %v2308_v48, %v2307_v37 }
0x1996   : > { %v2310_v49 = vrot.slane %v2309_v32, 2 }
0x1998   : > { %v2311_v50 = vadd.f32 %v2310_v49, %v2309_v32 }
0x199a   : > { %v2312_v51 = vrot.slane %v2311_v50, 1 }
0x199c   : > { %v2313_v52 = vadd.f32 %v2312_v51, %v2311_v50 }
0x199e   : > { %6340 = vpush %v2313_v52 }
0x19cf   : > { %s6341_s23 = spop %6340 }
0x19d0   : > { %s2317_s27 = smul.f32 0.0009765625, %s6341_s23  ;;  %s8960_s23 = smov 88  }
0x19d2   : > { %s2318_s2 = sadd.f32 1e-05, %s2317_s27 }
0x19d4   : > { %v2319_v39 = vstv %s2318_s2 }
0x19d5   : > { %6714 = vrsqrt.f32 %v2319_v39 }
0x19df   : > { %v6715_v33 = vpop.eup %6714 }
0x19e0   : > { %6342 = vpush %v6715_v33 }
0x1a11   : > { %s6343_s29 = spop %6342 }
0x1a12   : > { %v2322_v53 = vstv %s6343_s29 }
0x1a13   : > { %v2323_v43 = vmul.f32 %v2322_v53, %v2299_v8  ;;  %v2324_v36 = vmul.f32 %v2322_v53, %v2300_v12 }
0x1a15   : > { %v2325_v45 = vsel %vm8954_vm3, %v2323_v43, -inf  ;;  %v2328_v46 = vsel %vm8954_vm3, %v2324_v36, -inf }
0x1a16   : > { %2326 = vmax.xlane.f32.xlu0 %v2325_v45 }
0x1a1a   : > { %2329 = vmax.xlane.f32.xlu0 %v2328_v46 }
0x1aa3   : > { %v2327_v54 = vpop.xlane.xlu0 %2326 }
0x1aa4   : > { %v2331_v56 = vsub.f32 %v2323_v43, %v2327_v54 }
0x1aa6   : > { %v2333_v57 = vmul.f32 1.442695, %v2331_v56 }
0x1aa7   : > { %v2330_v58 = vpop.xlane.xlu0 %2329 }
0x1aa8   : > { %6716 = vpow2.f32 %v2333_v57  ;;  %v2332_v60 = vsub.f32 %v2324_v36, %v2330_v58 }
0x1aaa   : > { %v2335_v61 = vmul.f32 1.442695, %v2332_v60 }
0x1aac   : > { %6718 = vpow2.f32 %v2335_v61 }
0x1ab2   : > { %v6717_v62 = vpop.eup %6716 }
0x1ab3   : > { %v2337_v1 = vsel %vm8954_vm3, %v6717_v62, 0.0 }
0x1ab4   : > { %2338 = vadd.xlane.f32.xlu0 %v2337_v1 }
0x1ab6   : > { %v6719_v3 = vpop.eup %6718 }
0x1ab7   : > { %v2340_v4 = vsel %vm8954_vm3, %v6719_v3, 0.0 }
0x1ab8   : > { %2341 = vadd.xlane.f32.xlu0 %v2340_v4 }
0x1ace   : > { %2458 = vrot.lane.b32.xlu0 %v7896_v21, %s8946_s25 }
0x1ad2   : > { %2464 = vrot.lane.b32.xlu0 %v7932_v28, %s8946_s25 }
0x1b41   : > { %v2339_v5 = vpop.xlane.xlu0 %2338 }
0x1b42   : > { %6720 = vrcp.f32 %v2339_v5 }
0x1b45   : > { %v2342_v7 = vpop.xlane.xlu0 %2341 }
0x1b46   : > { %6722 = vrcp.f32 %v2342_v7 }
0x1b49   : > { %v2459_v18 = vpop.permute.xlu0 %2458 }
0x1b4a   : > { %v8110_v19 = vsel %vm1621_vm2, %v2459_v18, 0 }
0x1b4c   : > { %v6721_v6 = vpop.eup %6720 }
0x1b4d   : > { %v2345_v26 = vmul.f32 %v6721_v6, %v6717_v62  ;;  %v2465_v25 = vpop.permute.xlu0 %2464 }
0x1b4e   : > { %v8125_v8 = vsel %vm1621_vm2, %v2465_v25, 0 }
0x1b50   : > { %v6723_v9 = vpop.eup %6722 }
0x1b51   : > { %v2346_v11 = vmul.f32 %v6723_v9, %v6719_v3 }
0x1b53   : > { %v2347_v13 = vpack.c.bf16 %v2346_v11, %v2345_v26 }
0x1b55   : > { %5943 = vmatmul.mubr.msk.bf16.vlgmr.msra.gmra.mrb[48].mxu0 %vm8954_vm3, %v2347_v13 }
0x1b56   : > { %5948 = vmatprep.mubr.msk.bf16.mxu0 %vm7205_vm0, %v7204_v0 }
0x1c28   : > { %v2385_v20 = vpop.f32.mrb[48].mxu0 }
0x1c29   : > { %v5944_v16 = vpop.f32.mrb[49].mxu0 }
0x1c2a   : > { %v2388_v17 = vpop.f32.mrb[50].mxu0 }
0x1c2b   : > { %v2392_v55 = vpack.c.bf16 %v2388_v17, %v2385_v20  ;;  %v5945_v59 = vpop.f32.mrb[51].mxu0 }
0x1c2d   : > { %5947 = vmatpush3.bf16.msra.mxu0 %v2392_v55 }
0x1c2e   : > { %5952 = vmatprep.subr.bf16.mxu0 %v7204_v0 }
0x1c30   : > { %5949 = vmatmul.mubr.msk.bf16.vlgmr.msra.gmra.mrb[52].mxu0 %vm8957_vm1, %v8020_v41  ;;  %v2463_v41 = vpop.permute.xlu1 %2462 }
0x1c31   : > { %5960 = vmatprep.mubr.msk.bf16.mxu0 %vm7205_vm0, %v7204_v0  ;;  %v8120_v22 = vsel %vm1621_vm2, %v2463_v41, 0 }
0x1c34   : > { %v2457_v12 = vpop.permute.xlu1 %2456 }
0x1c36   : > { %5953 = vmatpush3.bf16.xpose.msra.mxu0 %v8110_v19 }
0x1c37   : > { %5954 = vmatprep.subr.bf16.mxu0 %v7204_v0 }
0x1c3e   : > { %5955 = vmatpush3.bf16.xpose.msra.mxu0 %v8115_v2 }
0x1c3f   : > { %5956 = vmatprep.subr.bf16.mxu0 %v7204_v0 }
0x1c46   : > { %5957 = vmatpush3.bf16.xpose.msra.mxu0 %v8120_v22 }
0x1c47   : > { %5958 = vmatprep.subr.bf16.mxu0 %v7204_v0 }
0x1c4e   : > { %5959 = vmatpush3.bf16.xpose.msra.mxu0 %v8125_v8 }
0x1c4f   : > { %5988 = vmatprep.subr.bf16.mxu0 %v7204_v0 }
0x1c55   : > { %5961 = vmatmul.mubr.msk.bf16.vlgmr.msra.gmra.mrb[56].mxu0 %vm1621_vm2, %v2457_v12 }
0x1c56   : > { %5996 = vmatprep.mubr.msk.bf16.mxu0 %vm7205_vm0, %v7204_v0 }
0x1d03   : > { %v8132_v38 = vpop.f32.mrb[52].mxu0 }
0x1d04   : > { %v5950_v29 = vpop.f32.mrb[53].mxu0 }
0x1d05   : > { %v8134_v40 = vpop.f32.mrb[54].mxu0 }
0x1d06   : > { %v5951_v31 = vpop.f32.mrb[55].mxu0 }
0x1d28   : > { %v2515_v47 = vpop.f32.mrb[56].mxu0 }
0x1d29   : > { %v5962_v37 = vpop.f32.mrb[57].mxu0  ;;  %v2522_v32 = vsel %vm8954_vm3, %v2515_v47, 0.0 }
0x1d2a   : > { %v2518_v48 = vpop.f32.mrb[58].mxu0 }
0x1d2b   : > { %v2523_v49 = vsel %vm8954_vm3, %v2518_v48, 0.0  ;;  %v5963_v50 = vpop.f32.mrb[59].mxu0 }
0x1d2c   : > { %v2524_v51 = vadd.f32 %v2523_v49, %v2522_v32 }
0x1d2e   : > { %2525 = vadd.xlane.f32.xlu0 %v2524_v51 }
0x1dbb   : > { %v2526_v52 = vpop.xlane.xlu0 %2525 }
0x1dbc   : > { %v2527_v39 = vrot.slane %v2526_v52, 4 }
0x1dbe   : > { %v2528_v33 = vadd.f32 %v2527_v39, %v2526_v52 }
0x1dc0   : > { %v2529_v53 = vrot.slane %v2528_v33, 2 }
0x1dc2   : > { %v2530_v43 = vadd.f32 %v2529_v53, %v2528_v33 }
0x1dc4   : > { %v2531_v36 = vrot.slane %v2530_v43, 1 }
0x1dc6   : > { %v2532_v45 = vadd.f32 %v2531_v36, %v2530_v43 }
0x1dc8   : > { %6344 = vpush %v2532_v45 }
0x1df9   : > { %s6345_s9 = spop %6344 }
0x1dfa   : > { %s2536_s0 = smul.f32 0.0009765625, %s6345_s9 }
0x1dfc   : > { %v2537_v46 = vstv %s2536_s0 }
0x1dfd   : > { %v2538_v54 = vsub.f32 %v2515_v47, %v2537_v46  ;;  %v2539_v56 = vsub.f32 %v2518_v48, %v2537_v46 }
0x1dff   : > { %v2540_v57 = vmul.f32 %v2538_v54, %v2538_v54  ;;  %v2541_v58 = vmul.f32 %v2539_v56, %v2539_v56 }
0x1e01   : > { %v2542_v60 = vsel %vm8954_vm3, %v2540_v57, 0.0  ;;  %v2543_v61 = vsel %vm8954_vm3, %v2541_v58, 0.0 }
0x1e02   : > { %v2544_v62 = vadd.f32 %v2543_v61, %v2542_v60 }
0x1e04   : > { %2545 = vadd.xlane.f32.xlu1 %v2544_v62 }
0x1e15   : > { %2587 = vrot.lane.b32.xlu1 %v7912_v24, %s8946_s25 }
0x1e91   : > { %v2546_v1 = vpop.xlane.xlu1 %2545 }
0x1e92   : > { %v2547_v3 = vrot.slane %v2546_v1, 4 }
0x1e94   : > { %v2548_v4 = vadd.f32 %v2547_v3, %v2546_v1 }
0x1e95   : > { %v8142_v5 = vpop.permute.xlu1 %2587 }
0x1e96   : > { %5965 = vmatpush3.bf16.msra.mxu1 %v8142_v5  ;;  %5989 = vmatpush3.bf16.msra.mxu0 %v8142_v5  ;;  %v2549_v7 = vrot.slane %v2548_v4, 2 }
0x1e97   : > { %5966 = vmatprep.subr.bf16.mxu1 %v7204_v0  ;;  %5990 = vmatprep.subr.bf16.mxu0 %v7204_v0 }
0x1e98   : > { %v2550_v6 = vadd.f32 %v2549_v7, %v2548_v4 }
0x1e9a   : > { %v2551_v9 = vrot.slane %v2550_v6, 1 }
0x1e9c   : > { %v2552_v26 = vadd.f32 %v2551_v9, %v2550_v6 }
0x1e9e   : > { %6346 = vpush %v2552_v26 }
0x1ecf   : > { %s6347_s4 = spop %6346 }
0x1ed0   : > { %s2556_s20 = smul.f32 0.0009765625, %s6347_s4 }
0x1ed2   : > { %s2557_s24 = sadd.f32 1e-05, %s2556_s20 }
0x1ed4   : > { %v2558_v11 = vstv %s2557_s24 }
0x1ed5   : > { %6724 = vrsqrt.f32 %v2558_v11 }
0x1edf   : > { %v6725_v13 = vpop.eup %6724 }
0x1ee0   : > { %6348 = vpush %v6725_v13 }
0x1f11   : > { %s6349_s22 = spop %6348 }
0x1f12   : > { %v2561_v20 = vstv %s6349_s22 }
0x1f13   : > { %v2562_v16 = vmul.f32 %v2561_v20, %v2538_v54  ;;  %v2563_v17 = vmul.f32 %v2561_v20, %v2539_v56 }
0x1f15   : > { %v2564_v55 = vsel %vm8954_vm3, %v2562_v16, -inf  ;;  %v2567_v59 = vsel %vm8954_vm3, %v2563_v17, -inf }
0x1f16   : > { %2565 = vmax.xlane.f32.xlu0 %v2564_v55 }
0x1f1a   : > { %2568 = vmax.xlane.f32.xlu0 %v2567_v59 }
0x1fa3   : > { %v2566_v18 = vpop.xlane.xlu0 %2565 }
0x1fa4   : > { %v2570_v15 = vsub.f32 %v2562_v16, %v2566_v18 }
0x1fa6   : > { %v2572_v41 = vmul.f32 1.442695, %v2570_v15 }
0x1fa7   : > { %v2569_v25 = vpop.xlane.xlu0 %2568 }
0x1fa8   : > { %6726 = vpow2.f32 %v2572_v41  ;;  %v2571_v12 = vsub.f32 %v2563_v17, %v2569_v25 }
0x1faa   : > { %v2574_v29 = vmul.f32 1.442695, %v2571_v12 }
0x1fac   : > { %6728 = vpow2.f32 %v2574_v29 }
0x1fb2   : > { %v6727_v31 = vpop.eup %6726 }
0x1fb3   : > { %v2576_v47 = vsel %vm8954_vm3, %v6727_v31, 0.0 }
0x1fb4   : > { %2577 = vadd.xlane.f32.xlu1 %v2576_v47 }
0x1fb6   : > { %v6729_v37 = vpop.eup %6728 }
0x1fb7   : > { %v2579_v48 = vsel %vm8954_vm3, %v6729_v37, 0.0 }
0x1fb8   : > { %2580 = vadd.xlane.f32.xlu0 %v2579_v48 }
0x1fc5   : > { %2591 = vrot.lane.b32.xlu1 %v7962_v10, %s8946_s25 }
0x1fc9   : > { %2593 = vrot.lane.b32.xlu1 %v7974_v30, %s8946_s25 }
0x1fcd   : > { %2869 = vrot.lane.b32.xlu1 %v7910_v14, %s7210_s21 }
0x1fce   : > { %2589 = vrot.lane.b32.xlu0 %v7964_v23, %s8946_s25 }
0x1fd2   : > { %2654 = vrot.lane.b32.xlu0 %v7910_v14, %s8960_s23 }
0x2041   : > { %v2578_v32 = vpop.xlane.xlu1 %2577 }
0x2042   : > { %6730 = vrcp.f32 %v2578_v32 }
0x2045   : > { %v2581_v49 = vpop.xlane.xlu0 %2580  ;;  %v8166_v51 = vpop.permute.xlu1 %2591 }
0x2046   : > { %6732 = vrcp.f32 %v2581_v49 }
0x2049   : > { %v8162_v50 = vpop.permute.xlu0 %2589  ;;  %v8174_v43 = vpop.permute.xlu1 %2593 }
0x204a   : > { %5967 = vmatpush3.bf16.msra.mxu1 %v8162_v50  ;;  %5991 = vmatpush3.bf16.msra.mxu0 %v8162_v50 }
0x204b   : > { %5968 = vmatprep.subr.bf16.mxu1 %v7204_v0  ;;  %5992 = vmatprep.subr.bf16.mxu0 %v7204_v0 }
0x204c   : > { %v6731_v52 = vpop.eup %6730 }
0x204d   : > { %v2584_v33 = vmul.f32 %v6731_v52, %v6727_v31  ;;  %v2655_v45 = vpop.permute.xlu0 %2654  ;;  %v2870_v46 = vpop.permute.xlu1 %2869 }
0x204e   : > { %5969 = vmatpush3.bf16.msra.mxu1 %v8166_v51  ;;  %5993 = vmatpush3.bf16.msra.mxu0 %v8166_v51 }
0x204f   : > { %5970 = vmatprep.subr.bf16.mxu1 %v7204_v0  ;;  %5994 = vmatprep.subr.bf16.mxu0 %v7204_v0 }
0x2050   : > { %v6733_v39 = vpop.eup %6732 }
0x2051   : > { %v2585_v53 = vmul.f32 %v6733_v39, %v6729_v37 }
0x2052   : > { %5971 = vmatpush3.bf16.msra.mxu1 %v8174_v43  ;;  %5995 = vmatpush3.bf16.msra.mxu0 %v8174_v43 }
0x2053   : > { %v2586_v36 = vpack.c.bf16 %v2585_v53, %v2584_v33  ;;  %5976 = vmatprep.subr.bf16.mxu1 %v7204_v0  ;;  %6000 = vmatprep.subr.bf16.mxu0 %v7204_v0 }
0x2055   : > { %5973 = vmatmul.mubr.msk.bf16.vlgmr.msra.gmra.mrb[32].mxu1 %vm8954_vm3, %v2586_v36 }
0x2056   : > { %5984 = vmatprep.mubr.msk.bf16.mxu1 %vm7205_vm0, %v7204_v0 }
0x205b   : > { %5977 = vmatpush3.bf16.xpose.msra.mxu1 %v8110_v19 }
0x205c   : > { %5978 = vmatprep.subr.bf16.mxu1 %v7204_v0 }
0x2063   : > { %5979 = vmatpush3.bf16.xpose.msra.mxu1 %v8115_v2 }
0x2064   : > { %5980 = vmatprep.subr.bf16.mxu1 %v7204_v0 }
0x206b   : > { %5981 = vmatpush3.bf16.xpose.msra.mxu1 %v8120_v22 }
0x206c   : > { %5982 = vmatprep.subr.bf16.mxu1 %v7204_v0 }
0x2073   : > { %5983 = vmatpush3.bf16.xpose.msra.mxu1 %v8125_v8 }
0x2074   : > { %6006 = vmatprep.subr.bf16.mxu1 %v7204_v0 }
0x207a   : > { %5985 = vmatmul.mubr.msk.bf16.vlgmr.msra.gmra.mrb[36].mxu1 %vm1621_vm2, %v2655_v45 }
0x207b   : > { %6007 = vmatpush3.bf16.xpose.msra.mxu1 %v8110_v19  ;;  %6014 = vmatprep.mubr.msk.bf16.mxu1 %vm7205_vm0, %v7204_v0 }
0x207c   : > { %6008 = vmatprep.subr.bf16.mxu1 %v7204_v0 }
0x2083   : > { %6009 = vmatpush3.bf16.xpose.msra.mxu1 %v8115_v2 }
0x2084   : > { %6010 = vmatprep.subr.bf16.mxu1 %v7204_v0 }
0x208b   : > { %6011 = vmatpush3.bf16.xpose.msra.mxu1 %v8120_v22 }
0x208c   : > { %6012 = vmatprep.subr.bf16.mxu1 %v7204_v0 }
0x2093   : > { %6013 = vmatpush3.bf16.xpose.msra.mxu1 %v8125_v8 }
0x2094   : > { %6048 = vmatprep.subr.bf16.mxu1 %v7204_v0 }
0x209a   : > { %6015 = vmatmul.mubr.msk.bf16.vlgmr.msra.gmra.mrb[40].mxu1 %vm1621_vm2, %v2870_v46 }
0x209b   : > { %6049 = vmatpush3.bf16.msra.mxu1 %v8142_v5  ;;  %6056 = vmatprep.mubr.msk.bf16.mxu1 %vm7205_vm0, %v7204_v0 }
0x209c   : > { %6050 = vmatprep.subr.bf16.mxu1 %v7204_v0 }
0x209f   : > { %6051 = vmatpush3.bf16.msra.mxu1 %v8162_v50 }
0x20a0   : > { %6052 = vmatprep.subr.bf16.mxu1 %v7204_v0 }
0x20a3   : > { %6053 = vmatpush3.bf16.msra.mxu1 %v8166_v51 }
0x20a4   : > { %6054 = vmatprep.subr.bf16.mxu1 %v7204_v0 }
0x20a7   : > { %6055 = vmatpush3.bf16.msra.mxu1 %v8174_v43 }
0x20a8   : > { %6060 = vmatprep.subr.bf16.mxu1 %v7204_v0 }
0x2128   : > { %v8213_v54 = vpop.f32.mrb[32].mxu1 }
0x2129   : > { %v5974_v56 = vpop.f32.mrb[33].mxu1 }
0x212a   : > { %v8215_v57 = vpop.f32.mrb[34].mxu1 }
0x212b   : > { %v5975_v58 = vpop.f32.mrb[35].mxu1 }
0x214d   : > { %v2693_v60 = vpop.f32.mrb[36].mxu1 }
0x214e   : > { %v5986_v61 = vpop.f32.mrb[37].mxu1  ;;  %v2700_v1 = vsel %vm8954_vm3, %v2693_v60, 0.0 }
0x214f   : > { %v2696_v62 = vpop.f32.mrb[38].mxu1 }
0x2150   : > { %v2701_v3 = vsel %vm8954_vm3, %v2696_v62, 0.0  ;;  %v5987_v4 = vpop.f32.mrb[39].mxu1 }
0x2151   : > { %v2702_v7 = vadd.f32 %v2701_v3, %v2700_v1 }
0x2153   : > { %2703 = vadd.xlane.f32.xlu0 %v2702_v7 }
0x216d   : > { %v2908_v6 = vpop.f32.mrb[40].mxu1 }
0x216e   : > { %v6016_v9 = vpop.f32.mrb[41].mxu1  ;;  %v2915_v11 = vsel %vm8954_vm3, %v2908_v6, 0.0 }
0x216f   : > { %v2911_v26 = vpop.f32.mrb[42].mxu1 }
0x2170   : > { %v2916_v13 = vsel %vm8954_vm3, %v2911_v26, 0.0  ;;  %v6017_v20 = vpop.f32.mrb[43].mxu1 }
0x2171   : > { %v2917_v16 = vadd.f32 %v2916_v13, %v2915_v11 }
0x2173   : > { %2918 = vadd.xlane.f32.xlu0 %v2917_v16 }
0x21e0   : > { %v2704_v17 = vpop.xlane.xlu0 %2703 }
0x21e1   : > { %v2705_v55 = vrot.slane %v2704_v17, 4 }
0x21e3   : > { %v2706_v59 = vadd.f32 %v2705_v55, %v2704_v17 }
0x21e5   : > { %v2707_v18 = vrot.slane %v2706_v59, 2 }
0x21e7   : > { %v2708_v15 = vadd.f32 %v2707_v18, %v2706_v59 }
0x21e9   : > { %v2709_v41 = vrot.slane %v2708_v15, 1 }
0x21eb   : > { %v2710_v25 = vadd.f32 %v2709_v41, %v2708_v15 }
0x21ed   : > { %6350 = vpush %v2710_v25 }
0x2200   : > { %v2919_v56 = vpop.xlane.xlu0 %2918 }
0x2201   : > { %v2920_v58 = vrot.slane %v2919_v56, 4 }
0x221e   : > { %s6351_s27 = spop %6350 }
0x221f   : > { %s2714_s2 = smul.f32 0.0009765625, %s6351_s27 }
0x2221   : > { %v2715_v12 = vstv %s2714_s2 }
0x2222   : > { %v2716_v29 = vsub.f32 %v2693_v60, %v2715_v12  ;;  %v2717_v31 = vsub.f32 %v2696_v62, %v2715_v12  ;;  %v2921_v60 = vadd.f32 %v2920_v58, %v2919_v56 }
0x2224   : > { %v2718_v47 = vmul.f32 %v2716_v29, %v2716_v29  ;;  %v2719_v37 = vmul.f32 %v2717_v31, %v2717_v31  ;;  %v2922_v61 = vrot.slane %v2921_v60, 2 }
0x2226   : > { %v2720_v48 = vsel %vm8954_vm3, %v2718_v47, 0.0  ;;  %v2721_v32 = vsel %vm8954_vm3, %v2719_v37, 0.0  ;;  %v2923_v1 = vadd.f32 %v2922_v61, %v2921_v60 }
0x2227   : > { %v2722_v49 = vadd.f32 %v2721_v32, %v2720_v48 }
0x2228   : > { %v2924_v3 = vrot.slane %v2923_v1, 1 }
0x2229   : > { %2723 = vadd.xlane.f32.xlu1 %v2722_v49 }
0x222a   : > { %v2925_v7 = vadd.f32 %v2924_v3, %v2923_v1 }
0x22b6   : > { %v2724_v52 = vpop.xlane.xlu1 %2723 }
0x22b7   : > { %v2725_v39 = vrot.slane %v2724_v52, 4 }
0x22b9   : > { %v2726_v33 = vadd.f32 %v2725_v39, %v2724_v52 }
0x22bb   : > { %v2727_v53 = vrot.slane %v2726_v33, 2 }
0x22bd   : > { %v2728_v36 = vadd.f32 %v2727_v53, %v2726_v33 }
0x22bf   : > { %v2729_v45 = vrot.slane %v2728_v36, 1 }
0x22c1   : > { %v2730_v46 = vadd.f32 %v2729_v45, %v2728_v36 }
0x22c3   : > { %6352 = vpush %v2730_v46 }
0x22f4   : > { %s6353_s29 = spop %6352 }
0x22f5   : > { %s2734_s9 = smul.f32 0.0009765625, %s6353_s29 }
0x22f7   : > { %s2735_s0 = sadd.f32 1e-05, %s2734_s9  ;;  %s8944_s9 = smov 24  }
0x22f9   : > { %v2736_v62 = vstv %s2735_s0  ;;  %s8948_s0 = smov 112  }
0x22fa   : > { %6734 = vrsqrt.f32 %v2736_v62 }
0x2304   : > { %v6735_v4 = vpop.eup %6734 }
0x2305   : > { %6354 = vpush %v6735_v4 }
0x2306   : > { %6356 = vpush %v2925_v7 }
0x2336   : > { %s6355_s4 = spop %6354 }
0x2337   : > { %v2739_v9 = vstv %s6355_s4  ;;  %s6357_s20 = spop %6356 }
0x2338   : > { %v2740_v11 = vmul.f32 %v2739_v9, %v2716_v29  ;;  %v2741_v13 = vmul.f32 %v2739_v9, %v2717_v31  ;;  %s2929_s24 = smul.f32 0.0009765625, %s6357_s20 }
0x233a   : > { %v2930_v20 = vstv %s2929_s24  ;;  %v2745_v16 = vsel %vm8954_vm3, %v2741_v13, -inf  ;;  %v2742_v17 = vsel %vm8954_vm3, %v2740_v11, -inf }
0x233b   : > { %v2931_v55 = vsub.f32 %v2908_v6, %v2930_v20  ;;  %v2932_v59 = vsub.f32 %v2911_v26, %v2930_v20  ;;  %2746 = vmax.xlane.f32.xlu1 %v2745_v16  ;;  %2743 = vmax.xlane.f32.xlu0 %v2742_v17 }
0x233d   : > { %v2933_v18 = vmul.f32 %v2931_v55, %v2931_v55  ;;  %v2934_v15 = vmul.f32 %v2932_v59, %v2932_v59 }
0x233f   : > { %v2935_v41 = vsel %vm8954_vm3, %v2933_v18, 0.0  ;;  %v2936_v25 = vsel %vm8954_vm3, %v2934_v15, 0.0 }
0x2340   : > { %v2937_v12 = vadd.f32 %v2936_v25, %v2935_v41 }
0x2342   : > { %2938 = vadd.xlane.f32.xlu0 %v2937_v12 }
0x23c8   : > { %v2747_v29 = vpop.xlane.xlu1 %2746  ;;  %v2744_v31 = vpop.xlane.xlu0 %2743 }
0x23c9   : > { %v2749_v47 = vsub.f32 %v2741_v13, %v2747_v29  ;;  %v2748_v37 = vsub.f32 %v2740_v11, %v2744_v31 }
0x23cb   : > { %v2752_v48 = vmul.f32 1.442695, %v2749_v47  ;;  %v2750_v32 = vmul.f32 1.442695, %v2748_v37 }
0x23cd   : > { %6736 = vpow2.f32 %v2752_v48 }
0x23ce   : > { %6738 = vpow2.f32 %v2750_v32 }
0x23cf   : > { %v2939_v6 = vpop.xlane.xlu0 %2938 }
0x23d0   : > { %v2940_v26 = vrot.slane %v2939_v6, 4 }
0x23d2   : > { %v2941_v49 = vadd.f32 %v2940_v26, %v2939_v6 }
0x23d4   : > { %v2942_v52 = vrot.slane %v2941_v49, 2 }
0x23d6   : > { %v2943_v39 = vadd.f32 %v2942_v52, %v2941_v49  ;;  %v8242_v49 = vld [vmem:[%s8995_s17] sm:$0xff]  }
0x23d7   : > { %v6737_v33 = vpop.eup %6736 }
0x23d8   : > { %v6739_v53 = vpop.eup %6738  ;;  %v2757_v36 = vsel %vm8954_vm3, %v6737_v33, 0.0  ;;  %v2944_v45 = vrot.slane %v2943_v39, 1 }
0x23d9   : > { %2758 = vadd.xlane.f32.xlu0 %v2757_v36  ;;  %v2754_v46 = vsel %vm8954_vm3, %v6739_v53, 0.0 }
0x23da   : > { %2755 = vadd.xlane.f32.xlu1 %v2754_v46  ;;  %v2945_v56 = vadd.f32 %v2944_v45, %v2943_v39 }
0x23dc   : > { %6358 = vpush %v2945_v56 }
0x240d   : > { %s6359_s22 = spop %6358 }
0x240e   : > { %s2949_s27 = smul.f32 0.0009765625, %s6359_s22 }
0x2410   : > { %s2950_s2 = sadd.f32 1e-05, %s2949_s27 }
0x2412   : > { %v2951_v58 = vstv %s2950_s2 }
0x2413   : > { %6740 = vrsqrt.f32 %v2951_v58 }
0x241d   : > { %v6741_v60 = vpop.eup %6740 }
0x241e   : > { %6360 = vpush %v6741_v60 }
0x244f   : > { %s6361_s29 = spop %6360 }
0x2450   : > { %v2954_v61 = vstv %s6361_s29 }
0x2451   : > { %v2955_v62 = vmul.f32 %v2954_v61, %v2931_v55  ;;  %v2956_v1 = vmul.f32 %v2954_v61, %v2932_v59 }
0x2453   : > { %v2960_v3 = vsel %vm8954_vm3, %v2956_v1, -inf  ;;  %v2957_v4 = vsel %vm8954_vm3, %v2955_v62, -inf }
0x2454   : > { %2961 = vmax.xlane.f32.xlu0 %v2960_v3  ;;  %2958 = vmax.xlane.f32.xlu1 %v2957_v4 }
0x2466   : > { %v2759_v7 = vpop.xlane.xlu0 %2758 }
0x2467   : > { %v2756_v9 = vpop.xlane.xlu1 %2755  ;;  %6742 = vrcp.f32 %v2759_v7 }
0x2468   : > { %6744 = vrcp.f32 %v2756_v9 }
0x2471   : > { %v6743_v11 = vpop.eup %6742 }
0x2472   : > { %v6745_v13 = vpop.eup %6744  ;;  %v2763_v20 = vmul.f32 %v6743_v11, %v6737_v33 }
0x2473   : > { %v2762_v16 = vmul.f32 %v6745_v13, %v6739_v53 }
0x2475   : > { %v2764_v17 = vpack.c.bf16 %v2763_v20, %v2762_v16 }
0x2477   : > { %5997 = vmatmul.mubr.msk.bf16.vlgmr.msra.gmra.mrb[60].mxu0 %vm8954_vm3, %v2764_v17 }
0x2478   : > { %6002 = vmatprep.mubr.msk.bf16.mxu0 %vm7205_vm0, %v7204_v0 }
0x24e1   : > { %v2959_v55 = vpop.xlane.xlu1 %2958  ;;  %v2962_v59 = vpop.xlane.xlu0 %2961 }
0x24e2   : > { %v2963_v18 = vsub.f32 %v2955_v62, %v2959_v55  ;;  %v2964_v15 = vsub.f32 %v2956_v1, %v2962_v59 }
0x24e4   : > { %v2965_v41 = vmul.f32 1.442695, %v2963_v18  ;;  %v2967_v25 = vmul.f32 1.442695, %v2964_v15 }
0x24e6   : > { %6746 = vpow2.f32 %v2965_v41 }
0x24e7   : > { %6748 = vpow2.f32 %v2967_v25 }
0x24f0   : > { %v6747_v12 = vpop.eup %6746 }
0x24f1   : > { %v6749_v29 = vpop.eup %6748  ;;  %v2969_v31 = vsel %vm8954_vm3, %v6747_v12, 0.0 }
0x24f2   : > { %2970 = vadd.xlane.f32.xlu1 %v2969_v31  ;;  %v2972_v47 = vsel %vm8954_vm3, %v6749_v29, 0.0 }
0x24f3   : > { %2973 = vadd.xlane.f32.xlu0 %v2972_v47 }
0x2503   : > { %3084 = vrot.lane.b32.xlu1 %v7910_v14, %s8944_s9 }
0x254a   : > { %v2802_v37 = vpop.f32.mrb[60].mxu0 }
0x254b   : > { %v5998_v48 = vpop.f32.mrb[61].mxu0 }
0x254c   : > { %v2805_v32 = vpop.f32.mrb[62].mxu0 }
0x254d   : > { %v2809_v6 = vpack.c.bf16 %v2805_v32, %v2802_v37  ;;  %v5999_v26 = vpop.f32.mrb[63].mxu0 }
0x254f   : > { %6001 = vmatpush3.bf16.msra.mxu0 %v2809_v6 }
0x2550   : > { %6018 = vmatprep.subr.bf16.mxu0 %v7204_v0 }
0x2552   : > { %6003 = vmatmul.mubr.msk.bf16.vlgmr.msra.gmra.mrb[64].mxu0 %vm8957_vm1, %v8242_v49 }
0x2553   : > { %6019 = vmatpush3.bf16.msra.mxu0 %v8142_v5  ;;  %6026 = vmatprep.mubr.msk.bf16.mxu0 %vm7205_vm0, %v7204_v0 }
0x2554   : > { %6020 = vmatprep.subr.bf16.mxu0 %v7204_v0 }
0x2557   : > { %6021 = vmatpush3.bf16.msra.mxu0 %v8162_v50 }
0x2558   : > { %6022 = vmatprep.subr.bf16.mxu0 %v7204_v0 }
0x255b   : > { %6023 = vmatpush3.bf16.msra.mxu0 %v8166_v51 }
0x255c   : > { %6024 = vmatprep.subr.bf16.mxu0 %v7204_v0 }
0x255f   : > { %6025 = vmatpush3.bf16.msra.mxu0 %v8174_v43 }
0x2560   : > { %6030 = vmatprep.subr.bf16.mxu0 %v7204_v0 }
0x257f   : > { %v2971_v52 = vpop.xlane.xlu1 %2970 }
0x2580   : > { %6750 = vrcp.f32 %v2971_v52  ;;  %v2974_v5 = vpop.xlane.xlu0 %2973 }
0x2581   : > { %6752 = vrcp.f32 %v2974_v5 }
0x2583   : > { %v3085_v1 = vpop.permute.xlu1 %3084 }
0x258a   : > { %v6751_v39 = vpop.eup %6750 }
0x258b   : > { %v6753_v33 = vpop.eup %6752  ;;  %v2977_v53 = vmul.f32 %v6751_v39, %v6747_v12 }
0x258c   : > { %v2978_v36 = vmul.f32 %v6753_v33, %v6749_v29 }
0x258e   : > { %v2979_v45 = vpack.c.bf16 %v2978_v36, %v2977_v53 }
0x2590   : > { %6027 = vmatmul.mubr.msk.bf16.vlgmr.msra.gmra.mrb[68].mxu0 %vm8954_vm3, %v2979_v45 }
0x2591   : > { %6032 = vmatprep.mubr.msk.bf16.mxu0 %vm7205_vm0, %v7204_v0 }
0x2625   : > { %v8259_v50 = vpop.f32.mrb[64].mxu0 }
0x2626   : > { %v6004_v51 = vpop.f32.mrb[65].mxu0 }
0x2627   : > { %v8261_v43 = vpop.f32.mrb[66].mxu0 }
0x2628   : > { %v6005_v46 = vpop.f32.mrb[67].mxu0 }
0x2663   : > { %v3017_v56 = vpop.f32.mrb[68].mxu0 }
0x2664   : > { %v6028_v58 = vpop.f32.mrb[69].mxu0 }
0x2665   : > { %v3020_v60 = vpop.f32.mrb[70].mxu0 }
0x2666   : > { %v3024_v61 = vpack.c.bf16 %v3020_v60, %v3017_v56  ;;  %v6029_v62 = vpop.f32.mrb[71].mxu0 }
0x2668   : > { %6031 = vmatpush3.bf16.msra.mxu0 %v3024_v61 }
0x2669   : > { %6036 = vmatprep.subr.bf16.mxu0 %v7204_v0 }
0x266b   : > { %6033 = vmatmul.mubr.msk.bf16.vlgmr.msra.gmra.mrb[72].mxu0 %vm8957_vm1, %v8242_v49 }
0x266c   : > { %6044 = vmatprep.mubr.msk.bf16.mxu0 %vm7205_vm0, %v7204_v0 }
0x2671   : > { %6037 = vmatpush3.bf16.xpose.msra.mxu0 %v8110_v19 }
0x2672   : > { %6038 = vmatprep.subr.bf16.mxu0 %v7204_v0 }
0x2679   : > { %6039 = vmatpush3.bf16.xpose.msra.mxu0 %v8115_v2 }
0x267a   : > { %6040 = vmatprep.subr.bf16.mxu0 %v7204_v0 }
0x2681   : > { %6041 = vmatpush3.bf16.xpose.msra.mxu0 %v8120_v22 }
0x2682   : > { %6042 = vmatprep.subr.bf16.mxu0 %v7204_v0 }
0x2689   : > { %6043 = vmatpush3.bf16.xpose.msra.mxu0 %v8125_v8 }
0x268a   : > { %6078 = vmatprep.subr.bf16.mxu0 %v7204_v0 }
0x2690   : > { %6045 = vmatmul.mubr.msk.bf16.vlgmr.msra.gmra.mrb[76].mxu0 %vm1621_vm2, %v3085_v1 }
0x2691   : > { %6086 = vmatprep.mubr.msk.bf16.mxu0 %vm7205_vm0, %v7204_v0 }
0x273e   : > { %v8279_v19 = vpop.f32.mrb[72].mxu0 }
0x273f   : > { %v6034_v3 = vpop.f32.mrb[73].mxu0 }
0x2740   : > { %v8281_v2 = vpop.f32.mrb[74].mxu0 }
0x2741   : > { %v6035_v4 = vpop.f32.mrb[75].mxu0 }
0x2763   : > { %v3123_v7 = vpop.f32.mrb[76].mxu0 }
0x2764   : > { %v6046_v22 = vpop.f32.mrb[77].mxu0  ;;  %v3130_v11 = vsel %vm8954_vm3, %v3123_v7, 0.0 }
0x2765   : > { %v3126_v9 = vpop.f32.mrb[78].mxu0 }
0x2766   : > { %v3131_v8 = vsel %vm8954_vm3, %v3126_v9, 0.0  ;;  %v6047_v13 = vpop.f32.mrb[79].mxu0 }
0x2767   : > { %v3132_v20 = vadd.f32 %v3131_v8, %v3130_v11 }
0x2769   : > { %3133 = vadd.xlane.f32.xlu0 %v3132_v20 }
0x27f6   : > { %v3134_v16 = vpop.xlane.xlu0 %3133 }
0x27f7   : > { %v3135_v17 = vrot.slane %v3134_v16, 4 }
0x27f9   : > { %v3136_v55 = vadd.f32 %v3135_v17, %v3134_v16 }
0x27fb   : > { %v3137_v59 = vrot.slane %v3136_v55, 2 }
0x27fd   : > { %v3138_v18 = vadd.f32 %v3137_v59, %v3136_v55 }
0x27ff   : > { %v3139_v15 = vrot.slane %v3138_v18, 1 }
0x2801   : > { %v3140_v41 = vadd.f32 %v3139_v15, %v3138_v18 }
0x2803   : > { %6362 = vpush %v3140_v41 }
0x2834   : > { %s6363_s20 = spop %6362 }
0x2835   : > { %s3144_s24 = smul.f32 0.0009765625, %s6363_s20 }
0x2837   : > { %v3145_v25 = vstv %s3144_s24  ;;  %s8962_s24 = smov 80  }
0x2838   : > { %v3146_v12 = vsub.f32 %v3123_v7, %v3145_v25  ;;  %v3147_v29 = vsub.f32 %v3126_v9, %v3145_v25 }
0x283a   : > { %v3148_v31 = vmul.f32 %v3146_v12, %v3146_v12  ;;  %v3149_v47 = vmul.f32 %v3147_v29, %v3147_v29 }
0x283c   : > { %v3150_v37 = vsel %vm8954_vm3, %v3148_v31, 0.0  ;;  %v3151_v48 = vsel %vm8954_vm3, %v3149_v47, 0.0 }
0x283d   : > { %v3152_v32 = vadd.f32 %v3151_v48, %v3150_v37 }
0x283f   : > { %3153 = vadd.xlane.f32.xlu0 %v3152_v32 }
0x28cc   : > { %v3154_v6 = vpop.xlane.xlu0 %3153 }
0x28cd   : > { %v3155_v26 = vrot.slane %v3154_v6, 4 }
0x28cf   : > { %v3156_v52 = vadd.f32 %v3155_v26, %v3154_v6 }
0x28d1   : > { %v3157_v5 = vrot.slane %v3156_v52, 2 }
0x28d3   : > { %v3158_v39 = vadd.f32 %v3157_v5, %v3156_v52 }
0x28d5   : > { %v3159_v33 = vrot.slane %v3158_v39, 1 }
0x28d7   : > { %v3160_v53 = vadd.f32 %v3159_v33, %v3158_v39 }
0x28d9   : > { %6364 = vpush %v3160_v53 }
0x290a   : > { %s6365_s22 = spop %6364 }
0x290b   : > { %s3164_s27 = smul.f32 0.0009765625, %s6365_s22 }
0x290d   : > { %s3165_s2 = sadd.f32 1e-05, %s3164_s27 }
0x290f   : > { %v3166_v36 = vstv %s3165_s2 }
0x2910   : > { %6754 = vrsqrt.f32 %v3166_v36 }
0x291a   : > { %v6755_v45 = vpop.eup %6754 }
0x291b   : > { %6366 = vpush %v6755_v45 }
0x294c   : > { %s6367_s29 = spop %6366 }
0x294d   : > { %v3169_v51 = vstv %s6367_s29 }
0x294e   : > { %v3170_v46 = vmul.f32 %v3169_v51, %v3146_v12  ;;  %v3171_v56 = vmul.f32 %v3169_v51, %v3147_v29 }
0x2950   : > { %v3172_v58 = vsel %vm8954_vm3, %v3170_v46, -inf  ;;  %v3175_v60 = vsel %vm8954_vm3, %v3171_v56, -inf }
0x2951   : > { %3173 = vmax.xlane.f32.xlu0 %v3172_v58 }
0x2955   : > { %3176 = vmax.xlane.f32.xlu0 %v3175_v60 }
0x29de   : > { %v3174_v61 = vpop.xlane.xlu0 %3173 }
0x29df   : > { %v3178_v62 = vsub.f32 %v3170_v46, %v3174_v61 }
0x29e1   : > { %v3180_v1 = vmul.f32 1.442695, %v3178_v62 }
0x29e2   : > { %v3177_v3 = vpop.xlane.xlu0 %3176 }
0x29e3   : > { %6756 = vpow2.f32 %v3180_v1  ;;  %v3179_v4 = vsub.f32 %v3171_v56, %v3177_v3 }
0x29e5   : > { %v3182_v7 = vmul.f32 1.442695, %v3179_v4 }
0x29e7   : > { %6758 = vpow2.f32 %v3182_v7 }
0x29ed   : > { %v6757_v22 = vpop.eup %6756 }
0x29ee   : > { %v3184_v9 = vsel %vm8954_vm3, %v6757_v22, 0.0 }
0x29ef   : > { %3185 = vadd.xlane.f32.xlu0 %v3184_v9 }
0x29f1   : > { %v6759_v11 = vpop.eup %6758 }
0x29f2   : > { %v3187_v8 = vsel %vm8954_vm3, %v6759_v11, 0.0 }
0x29f3   : > { %3188 = vadd.xlane.f32.xlu1 %v3187_v8 }
0x2a04   : > { %3299 = vrot.lane.b32.xlu1 %v7910_v14, %s8948_s0 }
0x2a05   : > { %3301 = vrot.lane.b32.xlu0 %v7896_v21, %s8948_s0 }
0x2a09   : > { %3303 = vrot.lane.b32.xlu0 %v7916_v34, %s8948_s0 }
0x2a0d   : > { %3305 = vrot.lane.b32.xlu0 %v7924_v27, %s8948_s0 }
0x2a11   : > { %3307 = vrot.lane.b32.xlu0 %v7932_v28, %s8948_s0 }
0x2a7c   : > { %v3186_v13 = vpop.xlane.xlu0 %3185 }
0x2a7d   : > { %6760 = vrcp.f32 %v3186_v13 }
0x2a80   : > { %v3189_v20 = vpop.xlane.xlu1 %3188  ;;  %v3302_v31 = vpop.permute.xlu0 %3301 }
0x2a81   : > { %6762 = vrcp.f32 %v3189_v20  ;;  %v8310_v47 = vsel %vm1621_vm2, %v3302_v31, 0 }
0x2a84   : > { %v3304_v37 = vpop.permute.xlu0 %3303  ;;  %v3300_v5 = vpop.permute.xlu1 %3299 }
0x2a85   : > { %v8315_v48 = vsel %vm1621_vm2, %v3304_v37, 0 }
0x2a87   : > { %v6761_v16 = vpop.eup %6760 }
0x2a88   : > { %v3192_v55 = vmul.f32 %v6761_v16, %v6757_v22  ;;  %v3306_v32 = vpop.permute.xlu0 %3305 }
0x2a89   : > { %v8320_v6 = vsel %vm1621_vm2, %v3306_v32, 0 }
0x2a8b   : > { %v6763_v17 = vpop.eup %6762 }
0x2a8c   : > { %v3193_v59 = vmul.f32 %v6763_v17, %v6759_v11  ;;  %v3308_v26 = vpop.permute.xlu0 %3307 }
0x2a8d   : > { %v8325_v52 = vsel %vm1621_vm2, %v3308_v26, 0 }
0x2a8e   : > { %v3194_v18 = vpack.c.bf16 %v3193_v59, %v3192_v55 }
0x2a90   : > { %6057 = vmatmul.mubr.msk.bf16.vlgmr.msra.gmra.mrb[44].mxu1 %vm8954_vm3, %v3194_v18 }
0x2a91   : > { %6062 = vmatprep.mubr.msk.bf16.mxu1 %vm7205_vm0, %v7204_v0 }
0x2b63   : > { %v3232_v15 = vpop.f32.mrb[44].mxu1 }
0x2b64   : > { %v6058_v41 = vpop.f32.mrb[45].mxu1 }
0x2b65   : > { %v3235_v25 = vpop.f32.mrb[46].mxu1 }
0x2b66   : > { %v3239_v12 = vpack.c.bf16 %v3235_v25, %v3232_v15  ;;  %v6059_v29 = vpop.f32.mrb[47].mxu1 }
0x2b68   : > { %6061 = vmatpush3.bf16.msra.mxu1 %v3239_v12 }
0x2b69   : > { %6066 = vmatprep.subr.bf16.mxu1 %v7204_v0 }
0x2b6b   : > { %6063 = vmatmul.mubr.msk.bf16.vlgmr.msra.gmra.mrb[48].mxu1 %vm8957_vm1, %v8242_v49 }
0x2b6c   : > { %6074 = vmatprep.mubr.msk.bf16.mxu1 %vm7205_vm0, %v7204_v0 }
0x2b71   : > { %6067 = vmatpush3.bf16.xpose.msra.mxu1 %v8310_v47 }
0x2b72   : > { %6068 = vmatprep.subr.bf16.mxu1 %v7204_v0 }
0x2b79   : > { %6069 = vmatpush3.bf16.xpose.msra.mxu1 %v8315_v48 }
0x2b7a   : > { %6070 = vmatprep.subr.bf16.mxu1 %v7204_v0 }
0x2b81   : > { %6071 = vmatpush3.bf16.xpose.msra.mxu1 %v8320_v6 }
0x2b82   : > { %6072 = vmatprep.subr.bf16.mxu1 %v7204_v0 }
0x2b89   : > { %6073 = vmatpush3.bf16.xpose.msra.mxu1 %v8325_v52 }
0x2b8a   : > { %6102 = vmatprep.subr.bf16.mxu1 %v7204_v0 }
0x2b90   : > { %6075 = vmatmul.mubr.msk.bf16.vlgmr.msra.gmra.mrb[52].mxu1 %vm1621_vm2, %v3300_v5 }
0x2b91   : > { %6110 = vmatprep.mubr.msk.bf16.mxu1 %vm7205_vm0, %v7204_v0 }
0x2c3e   : > { %v8332_v39 = vpop.f32.mrb[48].mxu1 }
0x2c3f   : > { %v6064_v33 = vpop.f32.mrb[49].mxu1 }
0x2c40   : > { %v8334_v53 = vpop.f32.mrb[50].mxu1 }
0x2c41   : > { %v6065_v36 = vpop.f32.mrb[51].mxu1 }
0x2c63   : > { %v3358_v45 = vpop.f32.mrb[52].mxu1 }
0x2c64   : > { %v6076_v51 = vpop.f32.mrb[53].mxu1  ;;  %v3365_v56 = vsel %vm8954_vm3, %v3358_v45, 0.0 }
0x2c65   : > { %v3361_v46 = vpop.f32.mrb[54].mxu1 }
0x2c66   : > { %v3366_v58 = vsel %vm8954_vm3, %v3361_v46, 0.0  ;;  %v6077_v60 = vpop.f32.mrb[55].mxu1 }
0x2c67   : > { %v3367_v61 = vadd.f32 %v3366_v58, %v3365_v56 }
0x2c69   : > { %3368 = vadd.xlane.f32.xlu0 %v3367_v61 }
0x2cf6   : > { %v3369_v62 = vpop.xlane.xlu0 %3368 }
0x2cf7   : > { %v3370_v1 = vrot.slane %v3369_v62, 4 }
0x2cf9   : > { %v3371_v3 = vadd.f32 %v3370_v1, %v3369_v62 }
0x2cfb   : > { %v3372_v4 = vrot.slane %v3371_v3, 2 }
0x2cfd   : > { %v3373_v7 = vadd.f32 %v3372_v4, %v3371_v3 }
0x2cff   : > { %v3374_v22 = vrot.slane %v3373_v7, 1 }
0x2d01   : > { %v3375_v9 = vadd.f32 %v3374_v22, %v3373_v7 }
0x2d03   : > { %6368 = vpush %v3375_v9 }
0x2d34   : > { %s6369_s4 = spop %6368 }
0x2d35   : > { %s3379_s20 = smul.f32 0.0009765625, %s6369_s4  ;;  %s7215_s4 = smov 48  }
0x2d37   : > { %v3380_v11 = vstv %s3379_s20 }
0x2d38   : > { %v3381_v8 = vsub.f32 %v3358_v45, %v3380_v11  ;;  %v3382_v13 = vsub.f32 %v3361_v46, %v3380_v11 }
0x2d3a   : > { %v3383_v20 = vmul.f32 %v3381_v8, %v3381_v8  ;;  %v3384_v16 = vmul.f32 %v3382_v13, %v3382_v13 }
0x2d3c   : > { %v3385_v17 = vsel %vm8954_vm3, %v3383_v20, 0.0  ;;  %v3386_v55 = vsel %vm8954_vm3, %v3384_v16, 0.0 }
0x2d3d   : > { %v3387_v59 = vadd.f32 %v3386_v55, %v3385_v17 }
0x2d3f   : > { %3388 = vadd.xlane.f32.xlu1 %v3387_v59 }
0x2d50   : > { %3432 = vrot.lane.b32.xlu1 %v7964_v23, %s8948_s0 }
0x2d54   : > { %3434 = vrot.lane.b32.xlu1 %v7962_v10, %s8948_s0 }
0x2d58   : > { %3497 = vrot.lane.b32.xlu1 %v7910_v14, %s8962_s24 }
0x2dcc   : > { %v3389_v18 = vpop.xlane.xlu1 %3388 }
0x2dcd   : > { %v3390_v15 = vrot.slane %v3389_v18, 4 }
0x2dcf   : > { %v3391_v41 = vadd.f32 %v3390_v15, %v3389_v18 }
0x2dd0   : > { %v8354_v1 = vpop.permute.xlu1 %3432 }
0x2dd1   : > { %v3392_v25 = vrot.slane %v3391_v41, 2 }
0x2dd3   : > { %v3393_v12 = vadd.f32 %v3392_v25, %v3391_v41 }
0x2dd4   : > { %v8362_v4 = vpop.permute.xlu1 %3434 }
0x2dd5   : > { %v3394_v29 = vrot.slane %v3393_v12, 1 }
0x2dd7   : > { %v3395_v31 = vadd.f32 %v3394_v29, %v3393_v12 }
0x2dd8   : > { %v3498_v18 = vpop.permute.xlu1 %3497 }
0x2dd9   : > { %6370 = vpush %v3395_v31 }
0x2e0a   : > { %s6371_s22 = spop %6370 }
0x2e0b   : > { %s3399_s27 = smul.f32 0.0009765625, %s6371_s22 }
0x2e0d   : > { %s3400_s2 = sadd.f32 1e-05, %s3399_s27 }
0x2e0f   : > { %v3401_v37 = vstv %s3400_s2 }
0x2e10   : > { %6764 = vrsqrt.f32 %v3401_v37 }
0x2e1a   : > { %v6765_v32 = vpop.eup %6764 }
0x2e1b   : > { %6372 = vpush %v6765_v32 }
0x2e4c   : > { %s6373_s29 = spop %6372 }
0x2e4d   : > { %v3404_v26 = vstv %s6373_s29 }
0x2e4e   : > { %v3405_v5 = vmul.f32 %v3404_v26, %v3381_v8  ;;  %v3406_v33 = vmul.f32 %v3404_v26, %v3382_v13 }
0x2e50   : > { %v3407_v36 = vsel %vm8954_vm3, %v3405_v5, -inf  ;;  %v3410_v45 = vsel %vm8954_vm3, %v3406_v33, -inf }
0x2e51   : > { %3408 = vmax.xlane.f32.xlu0 %v3407_v36 }
0x2e55   : > { %3411 = vmax.xlane.f32.xlu0 %v3410_v45 }
0x2e6b   : > { %3430 = vrot.lane.b32.xlu0 %v7912_v24, %s8948_s0 }
0x2ede   : > { %v3409_v51 = vpop.xlane.xlu0 %3408 }
0x2edf   : > { %v3413_v46 = vsub.f32 %v3405_v5, %v3409_v51 }
0x2ee1   : > { %v3415_v56 = vmul.f32 1.442695, %v3413_v46 }
0x2ee2   : > { %v3412_v58 = vpop.xlane.xlu0 %3411 }
0x2ee3   : > { %6766 = vpow2.f32 %v3415_v56  ;;  %v3414_v60 = vsub.f32 %v3406_v33, %v3412_v58 }
0x2ee5   : > { %v3417_v61 = vmul.f32 1.442695, %v3414_v60 }
0x2ee6   : > { %v8350_v62 = vpop.permute.xlu0 %3430 }
0x2ee7   : > { %6768 = vpow2.f32 %v3417_v61  ;;  %6079 = vmatpush3.bf16.msra.mxu0 %v8350_v62  ;;  %6103 = vmatpush3.bf16.msra.mxu1 %v8350_v62 }
0x2ee8   : > { %6080 = vmatprep.subr.bf16.mxu0 %v7204_v0  ;;  %6104 = vmatprep.subr.bf16.mxu1 %v7204_v0 }
0x2eeb   : > { %6081 = vmatpush3.bf16.msra.mxu0 %v8354_v1  ;;  %6105 = vmatpush3.bf16.msra.mxu1 %v8354_v1 }
0x2eec   : > { %6082 = vmatprep.subr.bf16.mxu0 %v7204_v0  ;;  %6106 = vmatprep.subr.bf16.mxu1 %v7204_v0 }
0x2eed   : > { %v6767_v3 = vpop.eup %6766 }
0x2eee   : > { %v3419_v7 = vsel %vm8954_vm3, %v6767_v3, 0.0 }
0x2eef   : > { %3420 = vadd.xlane.f32.xlu0 %v3419_v7  ;;  %6083 = vmatpush3.bf16.msra.mxu0 %v8362_v4 }
0x2ef0   : > { %6107 = vmatpush3.bf16.msra.mxu1 %v8362_v4  ;;  %6084 = vmatprep.subr.bf16.mxu0 %v7204_v0 }
0x2ef1   : > { %v6769_v22 = vpop.eup %6768  ;;  %6108 = vmatprep.subr.bf16.mxu1 %v7204_v0 }
0x2ef2   : > { %v3422_v9 = vsel %vm8954_vm3, %v6769_v22, 0.0 }
0x2ef3   : > { %3423 = vadd.xlane.f32.xlu0 %v3422_v9 }
0x2f09   : > { %3436 = vrot.lane.b32.xlu0 %v7974_v30, %s8948_s0 }
0x2f0d   : > { %3712 = vrot.lane.b32.xlu0 %v7910_v14, %s7215_s4 }
0x2f7c   : > { %v3421_v11 = vpop.xlane.xlu0 %3420 }
0x2f7d   : > { %6770 = vrcp.f32 %v3421_v11 }
0x2f80   : > { %v3424_v8 = vpop.xlane.xlu0 %3423 }
0x2f81   : > { %6772 = vrcp.f32 %v3424_v8 }
0x2f84   : > { %v8374_v13 = vpop.permute.xlu0 %3436 }
0x2f85   : > { %6085 = vmatpush3.bf16.msra.mxu0 %v8374_v13  ;;  %6109 = vmatpush3.bf16.msra.mxu1 %v8374_v13 }
0x2f86   : > { %6090 = vmatprep.subr.bf16.mxu0 %v7204_v0  ;;  %6114 = vmatprep.subr.bf16.mxu1 %v7204_v0 }
0x2f87   : > { %v6771_v20 = vpop.eup %6770 }
0x2f88   : > { %v3427_v17 = vmul.f32 %v6771_v20, %v6767_v3  ;;  %v3713_v15 = vpop.permute.xlu0 %3712 }
0x2f8b   : > { %v6773_v16 = vpop.eup %6772 }
0x2f8c   : > { %v3428_v55 = vmul.f32 %v6773_v16, %v6769_v22 }
0x2f8e   : > { %v3429_v59 = vpack.c.bf16 %v3428_v55, %v3427_v17 }
0x2f90   : > { %6087 = vmatmul.mubr.msk.bf16.vlgmr.msra.gmra.mrb[80].mxu0 %vm8954_vm3, %v3429_v59 }
0x2f91   : > { %6091 = vmatpush3.bf16.xpose.msra.mxu0 %v8310_v47  ;;  %6098 = vmatprep.mubr.msk.bf16.mxu0 %vm7205_vm0, %v7204_v0 }
0x2f92   : > { %6092 = vmatprep.subr.bf16.mxu0 %v7204_v0 }
0x2f99   : > { %6093 = vmatpush3.bf16.xpose.msra.mxu0 %v8315_v48 }
0x2f9a   : > { %6094 = vmatprep.subr.bf16.mxu0 %v7204_v0 }
0x2fa1   : > { %6095 = vmatpush3.bf16.xpose.msra.mxu0 %v8320_v6 }
0x2fa2   : > { %6096 = vmatprep.subr.bf16.mxu0 %v7204_v0 }
0x2fa9   : > { %6097 = vmatpush3.bf16.xpose.msra.mxu0 %v8325_v52 }
0x2faa   : > { %6120 = vmatprep.subr.bf16.mxu0 %v7204_v0 }
0x2fb0   : > { %6099 = vmatmul.mubr.msk.bf16.vlgmr.msra.gmra.mrb[84].mxu0 %vm1621_vm2, %v3498_v18 }
0x2fb1   : > { %6121 = vmatpush3.bf16.xpose.msra.mxu0 %v8310_v47  ;;  %6128 = vmatprep.mubr.msk.bf16.mxu0 %vm7205_vm0, %v7204_v0 }
0x2fb2   : > { %6122 = vmatprep.subr.bf16.mxu0 %v7204_v0 }
0x2fb9   : > { %6123 = vmatpush3.bf16.xpose.msra.mxu0 %v8315_v48 }
0x2fba   : > { %6124 = vmatprep.subr.bf16.mxu0 %v7204_v0 }
0x2fc1   : > { %6125 = vmatpush3.bf16.xpose.msra.mxu0 %v8320_v6 }
0x2fc2   : > { %6126 = vmatprep.subr.bf16.mxu0 %v7204_v0 }
0x2fc9   : > { %6127 = vmatpush3.bf16.xpose.msra.mxu0 %v8325_v52 }
0x2fca   : > { %6162 = vmatprep.subr.bf16.mxu0 %v7204_v0 }
0x2fd0   : > { %6129 = vmatmul.mubr.msk.bf16.vlgmr.msra.gmra.mrb[88].mxu0 %vm1621_vm2, %v3713_v15 }
0x2fd1   : > { %6163 = vmatpush3.bf16.msra.mxu0 %v8350_v62  ;;  %6170 = vmatprep.mubr.msk.bf16.mxu0 %vm7205_vm0, %v7204_v0 }
0x2fd2   : > { %6164 = vmatprep.subr.bf16.mxu0 %v7204_v0 }
0x2fd5   : > { %6165 = vmatpush3.bf16.msra.mxu0 %v8354_v1 }
0x2fd6   : > { %6166 = vmatprep.subr.bf16.mxu0 %v7204_v0 }
0x2fd9   : > { %6167 = vmatpush3.bf16.msra.mxu0 %v8362_v4 }
0x2fda   : > { %6168 = vmatprep.subr.bf16.mxu0 %v7204_v0 }
0x2fdd   : > { %6169 = vmatpush3.bf16.msra.mxu0 %v8374_v13 }
0x2fde   : > { %6174 = vmatprep.subr.bf16.mxu0 %v7204_v0 }
0x3063   : > { %v8413_v41 = vpop.f32.mrb[80].mxu0 }
0x3064   : > { %v6088_v25 = vpop.f32.mrb[81].mxu0 }
0x3065   : > { %v8415_v12 = vpop.f32.mrb[82].mxu0 }
0x3066   : > { %v6089_v29 = vpop.f32.mrb[83].mxu0 }
0x3083   : > { %v3536_v31 = vpop.f32.mrb[84].mxu0 }
0x3084   : > { %v6100_v37 = vpop.f32.mrb[85].mxu0  ;;  %v3543_v26 = vsel %vm8954_vm3, %v3536_v31, 0.0 }
0x3085   : > { %v3539_v32 = vpop.f32.mrb[86].mxu0 }
0x3086   : > { %v3544_v5 = vsel %vm8954_vm3, %v3539_v32, 0.0  ;;  %v6101_v33 = vpop.f32.mrb[87].mxu0 }
0x3087   : > { %v3545_v36 = vadd.f32 %v3544_v5, %v3543_v26 }
0x3089   : > { %3546 = vadd.xlane.f32.xlu1 %v3545_v36 }
0x30a3   : > { %v3751_v45 = vpop.f32.mrb[88].mxu0 }
0x30a4   : > { %v6130_v51 = vpop.f32.mrb[89].mxu0  ;;  %v3758_v56 = vsel %vm8954_vm3, %v3751_v45, 0.0 }
0x30a5   : > { %v3754_v46 = vpop.f32.mrb[90].mxu0 }
0x30a6   : > { %v3759_v58 = vsel %vm8954_vm3, %v3754_v46, 0.0  ;;  %v6131_v60 = vpop.f32.mrb[91].mxu0 }
0x30a7   : > { %v3760_v61 = vadd.f32 %v3759_v58, %v3758_v56 }
0x3116   : > { %v3547_v3 = vpop.xlane.xlu1 %3546 }
0x3117   : > { %v3548_v7 = vrot.slane %v3547_v3, 4 }
0x3119   : > { %v3549_v22 = vadd.f32 %v3548_v7, %v3547_v3 }
0x311b   : > { %v3550_v9 = vrot.slane %v3549_v22, 2 }
0x311d   : > { %v3551_v11 = vadd.f32 %v3550_v9, %v3549_v22 }
0x311f   : > { %v3552_v8 = vrot.slane %v3551_v11, 1 }
0x3121   : > { %v3553_v20 = vadd.f32 %v3552_v8, %v3551_v11 }
0x3123   : > { %6374 = vpush %v3553_v20 }
0x3154   : > { %s6375_s20 = spop %6374 }
0x3155   : > { %s3557_s22 = smul.f32 0.0009765625, %s6375_s20 }
0x3157   : > { %v3558_v16 = vstv %s3557_s22 }
0x3158   : > { %v3559_v17 = vsub.f32 %v3536_v31, %v3558_v16  ;;  %v3560_v55 = vsub.f32 %v3539_v32, %v3558_v16 }
0x315a   : > { %v3561_v59 = vmul.f32 %v3559_v17, %v3559_v17  ;;  %v3562_v18 = vmul.f32 %v3560_v55, %v3560_v55 }
0x315c   : > { %v3563_v15 = vsel %vm8954_vm3, %v3561_v59, 0.0  ;;  %v3564_v25 = vsel %vm8954_vm3, %v3562_v18, 0.0 }
0x315d   : > { %v3565_v29 = vadd.f32 %v3564_v25, %v3563_v15 }
0x315f   : > { %3566 = vadd.xlane.f32.xlu0 %v3565_v29 }
0x3163   : > { %3761 = vadd.xlane.f32.xlu0 %v3760_v61 }
0x31ec   : > { %v3567_v37 = vpop.xlane.xlu0 %3566 }
0x31ed   : > { %v3568_v26 = vrot.slane %v3567_v37, 4 }
0x31ef   : > { %v3569_v5 = vadd.f32 %v3568_v26, %v3567_v37 }
0x31f0   : > { %v3762_v58 = vpop.xlane.xlu0 %3761 }
0x31f1   : > { %v3570_v33 = vrot.slane %v3569_v5, 2  ;;  %v3763_v31 = vrot.slane %v3762_v58, 4 }
0x31f3   : > { %v3571_v36 = vadd.f32 %v3570_v33, %v3569_v5  ;;  %v3764_v32 = vadd.f32 %v3763_v31, %v3762_v58 }
0x31f5   : > { %v3572_v51 = vrot.slane %v3571_v36, 1  ;;  %v3765_v60 = vrot.slane %v3764_v32, 2 }
0x31f7   : > { %v3573_v56 = vadd.f32 %v3572_v51, %v3571_v36  ;;  %v3766_v7 = vadd.f32 %v3765_v60, %v3764_v32 }
0x31f9   : > { %6376 = vpush %v3573_v56  ;;  %v3767_v22 = vrot.slane %v3766_v7, 1 }
0x31fb   : > { %v3768_v9 = vadd.f32 %v3767_v22, %v3766_v7 }
0x322a   : > { %s6377_s27 = spop %6376 }
0x322b   : > { %s3577_s2 = smul.f32 0.0009765625, %s6377_s27 }
0x322d   : > { %s3578_s29 = sadd.f32 1e-05, %s3577_s2 }
0x322f   : > { %v3579_v3 = vstv %s3578_s29 }
0x3230   : > { %6774 = vrsqrt.f32 %v3579_v3 }
0x323a   : > { %v6775_v61 = vpop.eup %6774 }
0x323b   : > { %6378 = vpush %v6775_v61 }
0x323c   : > { %6380 = vpush %v3768_v9 }
0x326c   : > { %s6379_s20 = spop %6378 }
0x326d   : > { %v3582_v11 = vstv %s6379_s20  ;;  %s6381_s22 = spop %6380  ;;  %s7216_s20 = smov 16  }
0x326e   : > { %v3583_v8 = vmul.f32 %v3582_v11, %v3559_v17  ;;  %v3584_v20 = vmul.f32 %v3582_v11, %v3560_v55  ;;  %s3772_s9 = smul.f32 0.0009765625, %s6381_s22 }
0x3270   : > { %v3773_v16 = vstv %s3772_s9  ;;  %v3588_v59 = vsel %vm8954_vm3, %v3584_v20, -inf  ;;  %v3585_v18 = vsel %vm8954_vm3, %v3583_v8, -inf }
0x3271   : > { %v3774_v15 = vsub.f32 %v3751_v45, %v3773_v16  ;;  %v3775_v25 = vsub.f32 %v3754_v46, %v3773_v16  ;;  %3589 = vmax.xlane.f32.xlu1 %v3588_v59  ;;  %3586 = vmax.xlane.f32.xlu0 %v3585_v18 }
0x3273   : > { %v3776_v29 = vmul.f32 %v3774_v15, %v3774_v15  ;;  %v3777_v37 = vmul.f32 %v3775_v25, %v3775_v25 }
0x3275   : > { %v3778_v26 = vsel %vm8954_vm3, %v3776_v29, 0.0  ;;  %v3779_v5 = vsel %vm8954_vm3, %v3777_v37, 0.0 }
0x3276   : > { %v3780_v33 = vadd.f32 %v3779_v5, %v3778_v26 }
0x3278   : > { %3781 = vadd.xlane.f32.xlu0 %v3780_v33 }
0x32fe   : > { %v3590_v17 = vpop.xlane.xlu1 %3589  ;;  %v3587_v55 = vpop.xlane.xlu0 %3586 }
0x32ff   : > { %v3592_v36 = vsub.f32 %v3584_v20, %v3590_v17  ;;  %v3591_v51 = vsub.f32 %v3583_v8, %v3587_v55 }
0x3301   : > { %v3595_v56 = vmul.f32 1.442695, %v3592_v36  ;;  %v3593_v58 = vmul.f32 1.442695, %v3591_v51 }
0x3303   : > { %6776 = vpow2.f32 %v3595_v56 }
0x3304   : > { %6778 = vpow2.f32 %v3593_v58 }
0x3305   : > { %v3782_v45 = vpop.xlane.xlu0 %3781 }
0x3306   : > { %v3783_v46 = vrot.slane %v3782_v45, 4 }
0x3308   : > { %v3784_v31 = vadd.f32 %v3783_v46, %v3782_v45 }
0x330a   : > { %v3785_v32 = vrot.slane %v3784_v31, 2 }
0x330c   : > { %v3786_v60 = vadd.f32 %v3785_v32, %v3784_v31 }
0x330d   : > { %v6777_v3 = vpop.eup %6776 }
0x330e   : > { %v6779_v7 = vpop.eup %6778  ;;  %v3600_v22 = vsel %vm8954_vm3, %v6777_v3, 0.0  ;;  %v3787_v61 = vrot.slane %v3786_v60, 1 }
0x330f   : > { %3601 = vadd.xlane.f32.xlu0 %v3600_v22  ;;  %v3597_v9 = vsel %vm8954_vm3, %v6779_v7, 0.0 }
0x3310   : > { %3598 = vadd.xlane.f32.xlu1 %v3597_v9  ;;  %v3788_v11 = vadd.f32 %v3787_v61, %v3786_v60 }
0x3312   : > { %6382 = vpush %v3788_v11 }
0x3343   : > { %s6383_s9 = spop %6382 }
0x3344   : > { %s3792_s27 = smul.f32 0.0009765625, %s6383_s9 }
0x3346   : > { %s3793_s2 = sadd.f32 1e-05, %s3792_s27 }
0x3348   : > { %v3794_v8 = vstv %s3793_s2 }
0x3349   : > { %6780 = vrsqrt.f32 %v3794_v8 }
0x3353   : > { %v6781_v20 = vpop.eup %6780 }
0x3354   : > { %6384 = vpush %v6781_v20 }
0x3385   : > { %s6385_s29 = spop %6384 }
0x3386   : > { %v3797_v16 = vstv %s6385_s29 }
0x3387   : > { %v3798_v59 = vmul.f32 %v3797_v16, %v3774_v15  ;;  %v3799_v18 = vmul.f32 %v3797_v16, %v3775_v25 }
0x3389   : > { %v3803_v29 = vsel %vm8954_vm3, %v3799_v18, -inf  ;;  %v3800_v37 = vsel %vm8954_vm3, %v3798_v59, -inf }
0x338a   : > { %3804 = vmax.xlane.f32.xlu0 %v3803_v29  ;;  %3801 = vmax.xlane.f32.xlu1 %v3800_v37 }
0x339c   : > { %v3602_v26 = vpop.xlane.xlu0 %3601 }
0x339d   : > { %v3599_v5 = vpop.xlane.xlu1 %3598  ;;  %6782 = vrcp.f32 %v3602_v26 }
0x339e   : > { %6784 = vrcp.f32 %v3599_v5 }
0x33a7   : > { %v6783_v33 = vpop.eup %6782 }
0x33a8   : > { %v6785_v17 = vpop.eup %6784  ;;  %v3606_v55 = vmul.f32 %v6783_v33, %v6777_v3 }
0x33a9   : > { %v3605_v36 = vmul.f32 %v6785_v17, %v6779_v7 }
0x33ab   : > { %v3607_v51 = vpack.c.bf16 %v3606_v55, %v3605_v36 }
0x33ad   : > { %6111 = vmatmul.mubr.msk.bf16.vlgmr.msra.gmra.mrb[56].mxu1 %vm8954_vm3, %v3607_v51 }
0x33ae   : > { %6116 = vmatprep.mubr.msk.bf16.mxu1 %vm7205_vm0, %v7204_v0 }
0x3417   : > { %v3802_v15 = vpop.xlane.xlu1 %3801  ;;  %v3805_v25 = vpop.xlane.xlu0 %3804 }
0x3418   : > { %v3806_v56 = vsub.f32 %v3798_v59, %v3802_v15  ;;  %v3807_v58 = vsub.f32 %v3799_v18, %v3805_v25 }
0x341a   : > { %v3808_v45 = vmul.f32 1.442695, %v3806_v56  ;;  %v3810_v46 = vmul.f32 1.442695, %v3807_v58 }
0x341c   : > { %6786 = vpow2.f32 %v3808_v45 }
0x341d   : > { %6788 = vpow2.f32 %v3810_v46 }
0x3426   : > { %v6787_v31 = vpop.eup %6786 }
0x3427   : > { %v6789_v32 = vpop.eup %6788  ;;  %v3812_v60 = vsel %vm8954_vm3, %v6787_v31, 0.0 }
0x3428   : > { %3813 = vadd.xlane.f32.xlu1 %v3812_v60  ;;  %v3815_v3 = vsel %vm8954_vm3, %v6789_v32, 0.0 }
0x3429   : > { %3816 = vadd.xlane.f32.xlu0 %v3815_v3 }
0x3439   : > { %3927 = vrot.lane.b32.xlu1 %v7910_v14, %s7216_s20 }
0x3480   : > { %v3645_v7 = vpop.f32.mrb[56].mxu1 }
0x3481   : > { %v6112_v22 = vpop.f32.mrb[57].mxu1 }
0x3482   : > { %v3648_v61 = vpop.f32.mrb[58].mxu1 }
0x3483   : > { %v3652_v9 = vpack.c.bf16 %v3648_v61, %v3645_v7  ;;  %v6113_v11 = vpop.f32.mrb[59].mxu1 }
0x3485   : > { %6115 = vmatpush3.bf16.msra.mxu1 %v3652_v9 }
0x3486   : > { %6132 = vmatprep.subr.bf16.mxu1 %v7204_v0 }
0x3488   : > { %6117 = vmatmul.mubr.msk.bf16.vlgmr.msra.gmra.mrb[60].mxu1 %vm8957_vm1, %v8242_v49 }
0x3489   : > { %6133 = vmatpush3.bf16.msra.mxu1 %v8350_v62  ;;  %6140 = vmatprep.mubr.msk.bf16.mxu1 %vm7205_vm0, %v7204_v0 }
0x348a   : > { %6134 = vmatprep.subr.bf16.mxu1 %v7204_v0 }
0x348d   : > { %6135 = vmatpush3.bf16.msra.mxu1 %v8354_v1 }
0x348e   : > { %6136 = vmatprep.subr.bf16.mxu1 %v7204_v0 }
0x3491   : > { %6137 = vmatpush3.bf16.msra.mxu1 %v8362_v4 }
0x3492   : > { %6138 = vmatprep.subr.bf16.mxu1 %v7204_v0 }
0x3495   : > { %6139 = vmatpush3.bf16.msra.mxu1 %v8374_v13 }
0x3496   : > { %6144 = vmatprep.subr.bf16.mxu1 %v7204_v0 }
0x34b5   : > { %v3814_v8 = vpop.xlane.xlu1 %3813 }
0x34b6   : > { %6790 = vrcp.f32 %v3814_v8  ;;  %v3817_v62 = vpop.xlane.xlu0 %3816 }
0x34b7   : > { %6792 = vrcp.f32 %v3817_v62 }
0x34c0   : > { %v6791_v20 = vpop.eup %6790 }
0x34c1   : > { %v6793_v16 = vpop.eup %6792  ;;  %v3820_v59 = vmul.f32 %v6791_v20, %v6787_v31 }
0x34c2   : > { %v3821_v18 = vmul.f32 %v6793_v16, %v6789_v32 }
0x34c4   : > { %v3822_v29 = vpack.c.bf16 %v3821_v18, %v3820_v59 }
0x34c6   : > { %6141 = vmatmul.mubr.msk.bf16.vlgmr.msra.gmra.mrb[64].mxu1 %vm8954_vm3, %v3822_v29 }
0x34c7   : > { %6146 = vmatprep.mubr.msk.bf16.mxu1 %vm7205_vm0, %v7204_v0 }
0x355b   : > { %v8454_v1 = vpop.f32.mrb[60].mxu1 }
0x355c   : > { %v6118_v4 = vpop.f32.mrb[61].mxu1 }
0x355d   : > { %v8456_v13 = vpop.f32.mrb[62].mxu1 }
0x355e   : > { %v6119_v37 = vpop.f32.mrb[63].mxu1 }
0x3599   : > { %v3860_v26 = vpop.f32.mrb[64].mxu1 }
0x359a   : > { %v6142_v5 = vpop.f32.mrb[65].mxu1 }
0x359b   : > { %v3863_v33 = vpop.f32.mrb[66].mxu1 }
0x359c   : > { %v3867_v17 = vpack.c.bf16 %v3863_v33, %v3860_v26  ;;  %v6143_v55 = vpop.f32.mrb[67].mxu1 }
0x359e   : > { %6145 = vmatpush3.bf16.msra.mxu1 %v3867_v17 }
0x359f   : > { %6150 = vmatprep.subr.bf16.mxu1 %v7204_v0 }
0x35a1   : > { %6147 = vmatmul.mubr.msk.bf16.vlgmr.msra.gmra.mrb[68].mxu1 %vm8957_vm1, %v8242_v49  ;;  %v3928_v49 = vpop.permute.xlu1 %3927 }
0x35a2   : > { %6158 = vmatprep.mubr.msk.bf16.mxu1 %vm7205_vm0, %v7204_v0 }
0x35a7   : > { %6151 = vmatpush3.bf16.xpose.msra.mxu1 %v8310_v47 }
0x35a8   : > { %6152 = vmatprep.subr.bf16.mxu1 %v7204_v0 }
0x35af   : > { %6153 = vmatpush3.bf16.xpose.msra.mxu1 %v8315_v48 }
0x35b0   : > { %6154 = vmatprep.subr.bf16.mxu1 %v7204_v0 }
0x35b7   : > { %6155 = vmatpush3.bf16.xpose.msra.mxu1 %v8320_v6 }
0x35b8   : > { %6156 = vmatprep.subr.bf16.mxu1 %v7204_v0 }
0x35bf   : > { %6157 = vmatpush3.bf16.xpose.msra.mxu1 %v8325_v52 }
0x35c0   : > { %6192 = vmatprep.subr.bf16.mxu1 %v7204_v0 }
0x35c6   : > { %6159 = vmatmul.mubr.msk.bf16.vlgmr.msra.gmra.mrb[72].mxu1 %vm1621_vm2, %v3928_v49 }
0x35c7   : > { %6200 = vmatprep.mubr.msk.bf16.mxu1 %vm7205_vm0, %v7204_v0 }
0x3674   : > { %v8474_v47 = vpop.f32.mrb[68].mxu1 }
0x3675   : > { %v6148_v36 = vpop.f32.mrb[69].mxu1 }
0x3676   : > { %v8476_v48 = vpop.f32.mrb[70].mxu1 }
0x3677   : > { %v6149_v51 = vpop.f32.mrb[71].mxu1 }
0x3699   : > { %v3966_v15 = vpop.f32.mrb[72].mxu1 }
0x369a   : > { %v6160_v6 = vpop.f32.mrb[73].mxu1  ;;  %v3973_v56 = vsel %vm8954_vm3, %v3966_v15, 0.0 }
0x369b   : > { %v3969_v25 = vpop.f32.mrb[74].mxu1 }
0x369c   : > { %v3974_v52 = vsel %vm8954_vm3, %v3969_v25, 0.0  ;;  %v6161_v58 = vpop.f32.mrb[75].mxu1 }
0x369d   : > { %v3975_v45 = vadd.f32 %v3974_v52, %v3973_v56 }
0x369f   : > { %3976 = vadd.xlane.f32.xlu0 %v3975_v45 }
0x372c   : > { %v3977_v46 = vpop.xlane.xlu0 %3976 }
0x372d   : > { %v3978_v31 = vrot.slane %v3977_v46, 4 }
0x372f   : > { %v3979_v32 = vadd.f32 %v3978_v31, %v3977_v46 }
0x3731   : > { %v3980_v60 = vrot.slane %v3979_v32, 2 }
0x3733   : > { %v3981_v3 = vadd.f32 %v3980_v60, %v3979_v32 }
0x3735   : > { %v3982_v7 = vrot.slane %v3981_v3, 1 }
0x3737   : > { %v3983_v22 = vadd.f32 %v3982_v7, %v3981_v3 }
0x3739   : > { %6386 = vpush %v3983_v22 }
0x376a   : > { %s6387_s22 = spop %6386 }
0x376b   : > { %s3987_s9 = smul.f32 0.0009765625, %s6387_s22 }
0x376d   : > { %v3988_v61 = vstv %s3987_s9  ;;  %s8950_s9 = smov 104  }
0x376e   : > { %v3989_v9 = vsub.f32 %v3966_v15, %v3988_v61  ;;  %v3990_v11 = vsub.f32 %v3969_v25, %v3988_v61 }
0x3770   : > { %v3991_v8 = vmul.f32 %v3989_v9, %v3989_v9  ;;  %v3992_v62 = vmul.f32 %v3990_v11, %v3990_v11 }
0x3772   : > { %v3993_v20 = vsel %vm8954_vm3, %v3991_v8, 0.0  ;;  %v3994_v16 = vsel %vm8954_vm3, %v3992_v62, 0.0 }
0x3773   : > { %v3995_v59 = vadd.f32 %v3994_v16, %v3993_v20  ;;  %v8503_v16 = vld [vmem:[%s8995_s17] sm:$0xff]  }
0x3775   : > { %3996 = vadd.xlane.f32.xlu0 %v3995_v59 }
0x3802   : > { %v3997_v18 = vpop.xlane.xlu0 %3996 }
0x3803   : > { %v3998_v29 = vrot.slane %v3997_v18, 4 }
0x3805   : > { %v3999_v4 = vadd.f32 %v3998_v29, %v3997_v18 }
0x3807   : > { %v4000_v37 = vrot.slane %v3999_v4, 2 }
0x3809   : > { %v4001_v26 = vadd.f32 %v4000_v37, %v3999_v4 }
0x380b   : > { %v4002_v5 = vrot.slane %v4001_v26, 1 }
0x380d   : > { %v4003_v33 = vadd.f32 %v4002_v5, %v4001_v26 }
0x380f   : > { %6388 = vpush %v4003_v33 }
0x3840   : > { %s6389_s27 = spop %6388 }
0x3841   : > { %s4007_s2 = smul.f32 0.0009765625, %s6389_s27  ;;  %s7218_s27 = smov 72  }
0x3843   : > { %s4008_s29 = sadd.f32 1e-05, %s4007_s2 }
0x3845   : > { %v4009_v17 = vstv %s4008_s29 }
0x3846   : > { %6794 = vrsqrt.f32 %v4009_v17 }
0x3850   : > { %v6795_v55 = vpop.eup %6794 }
0x3851   : > { %6390 = vpush %v6795_v55 }
0x3882   : > { %s6391_s22 = spop %6390 }
0x3883   : > { %v4012_v49 = vstv %s6391_s22 }
0x3884   : > { %v4013_v36 = vmul.f32 %v4012_v49, %v3989_v9  ;;  %v4014_v51 = vmul.f32 %v4012_v49, %v3990_v11 }
0x3886   : > { %v4015_v15 = vsel %vm8954_vm3, %v4013_v36, -inf  ;;  %v4018_v6 = vsel %vm8954_vm3, %v4014_v51, -inf }
0x3887   : > { %4016 = vmax.xlane.f32.xlu0 %v4015_v15 }
0x388b   : > { %4019 = vmax.xlane.f32.xlu0 %v4018_v6 }
0x3914   : > { %v4017_v25 = vpop.xlane.xlu0 %4016 }
0x3915   : > { %v4021_v56 = vsub.f32 %v4013_v36, %v4017_v25 }
0x3917   : > { %v4023_v52 = vmul.f32 1.442695, %v4021_v56 }
0x3918   : > { %v4020_v58 = vpop.xlane.xlu0 %4019 }
0x3919   : > { %6796 = vpow2.f32 %v4023_v52  ;;  %v4022_v45 = vsub.f32 %v4014_v51, %v4020_v58 }
0x391b   : > { %v4025_v46 = vmul.f32 1.442695, %v4022_v45 }
0x391d   : > { %6798 = vpow2.f32 %v4025_v46 }
0x3923   : > { %v6797_v31 = vpop.eup %6796 }
0x3924   : > { %v4027_v32 = vsel %vm8954_vm3, %v6797_v31, 0.0 }
0x3925   : > { %4028 = vadd.xlane.f32.xlu1 %v4027_v32 }
0x3927   : > { %v6799_v60 = vpop.eup %6798 }
0x3928   : > { %v4030_v3 = vsel %vm8954_vm3, %v6799_v60, 0.0 }
0x3929   : > { %4031 = vadd.xlane.f32.xlu0 %v4030_v3 }
0x3936   : > { %4150 = vrot.lane.b32.xlu1 %v7932_v28, %s8950_s9 }
0x393f   : > { %4144 = vrot.lane.b32.xlu0 %v7896_v21, %s8950_s9 }
0x3943   : > { %4146 = vrot.lane.b32.xlu0 %v7916_v34, %s8950_s9 }
0x3947   : > { %4148 = vrot.lane.b32.xlu0 %v7924_v27, %s8950_s9 }
0x394b   : > { %4142 = vrot.lane.b32.xlu0 %v7910_v14, %s8950_s9 }
0x39b2   : > { %v4029_v7 = vpop.xlane.xlu1 %4028 }
0x39b3   : > { %6800 = vrcp.f32 %v4029_v7 }
0x39b6   : > { %v4032_v22 = vpop.xlane.xlu0 %4031  ;;  %v4151_v5 = vpop.permute.xlu1 %4150 }
0x39b7   : > { %6802 = vrcp.f32 %v4032_v22  ;;  %v8525_v33 = vsel %vm1621_vm2, %v4151_v5, 0 }
0x39ba   : > { %v4145_v59 = vpop.permute.xlu0 %4144 }
0x39bb   : > { %v8510_v18 = vsel %vm1621_vm2, %v4145_v59, 0 }
0x39bd   : > { %v6801_v61 = vpop.eup %6800 }
0x39be   : > { %v4035_v11 = vmul.f32 %v6801_v61, %v6797_v31  ;;  %v4147_v29 = vpop.permute.xlu0 %4146 }
0x39bf   : > { %v8515_v4 = vsel %vm1621_vm2, %v4147_v29, 0 }
0x39c1   : > { %v6803_v9 = vpop.eup %6802 }
0x39c2   : > { %v4036_v28 = vmul.f32 %v6803_v9, %v6799_v60  ;;  %v4149_v37 = vpop.permute.xlu0 %4148 }
0x39c3   : > { %v8520_v26 = vsel %vm1621_vm2, %v4149_v37, 0 }
0x39c4   : > { %v4037_v8 = vpack.c.bf16 %v4036_v28, %v4035_v11 }
0x39c6   : > { %6171 = vmatmul.mubr.msk.bf16.vlgmr.msra.gmra.mrb[92].mxu0 %vm8954_vm3, %v4037_v8  ;;  %v4143_v17 = vpop.permute.xlu0 %4142 }
0x39c7   : > { %6176 = vmatprep.mubr.msk.bf16.mxu0 %vm7205_vm0, %v7204_v0 }
0x3a99   : > { %v4075_v21 = vpop.f32.mrb[92].mxu0 }
0x3a9a   : > { %v6172_v34 = vpop.f32.mrb[93].mxu0 }
0x3a9b   : > { %v4078_v27 = vpop.f32.mrb[94].mxu0 }
0x3a9c   : > { %v4082_v62 = vpack.c.bf16 %v4078_v27, %v4075_v21  ;;  %v6173_v20 = vpop.f32.mrb[95].mxu0 }
0x3a9e   : > { %6175 = vmatpush3.bf16.msra.mxu0 %v4082_v62 }
0x3a9f   : > { %6180 = vmatprep.subr.bf16.mxu0 %v7204_v0 }
0x3aa1   : > { %6177 = vmatmul.mubr.msk.bf16.vlgmr.msra.gmra.mrb[96].mxu0 %vm8957_vm1, %v8503_v16 }
0x3aa2   : > { %6188 = vmatprep.mubr.msk.bf16.mxu0 %vm7205_vm0, %v7204_v0 }
0x3aa7   : > { %6181 = vmatpush3.bf16.xpose.msra.mxu0 %v8510_v18 }
0x3aa8   : > { %6182 = vmatprep.subr.bf16.mxu0 %v7204_v0 }
0x3aaf   : > { %6183 = vmatpush3.bf16.xpose.msra.mxu0 %v8515_v4 }
0x3ab0   : > { %6184 = vmatprep.subr.bf16.mxu0 %v7204_v0 }
0x3ab7   : > { %6185 = vmatpush3.bf16.xpose.msra.mxu0 %v8520_v26 }
0x3ab8   : > { %6186 = vmatprep.subr.bf16.mxu0 %v7204_v0 }
0x3abf   : > { %6187 = vmatpush3.bf16.xpose.msra.mxu0 %v8525_v33 }
0x3ac0   : > { %6216 = vmatprep.subr.bf16.mxu0 %v7204_v0 }
0x3ac6   : > { %6189 = vmatmul.mubr.msk.bf16.vlgmr.msra.gmra.mrb[100].mxu0 %vm1621_vm2, %v4143_v17 }
0x3ac7   : > { %6224 = vmatprep.mubr.msk.bf16.mxu0 %vm7205_vm0, %v7204_v0 }
0x3b74   : > { %v8532_v55 = vpop.f32.mrb[96].mxu0 }
0x3b75   : > { %v6178_v49 = vpop.f32.mrb[97].mxu0 }
0x3b76   : > { %v8534_v36 = vpop.f32.mrb[98].mxu0 }
0x3b77   : > { %v6179_v51 = vpop.f32.mrb[99].mxu0 }
0x3b99   : > { %v4201_v15 = vpop.f32.mrb[100].mxu0 }
0x3b9a   : > { %v6190_v6 = vpop.f32.mrb[101].mxu0  ;;  %v4208_v56 = vsel %vm8954_vm3, %v4201_v15, 0.0 }
0x3b9b   : > { %v4204_v25 = vpop.f32.mrb[102].mxu0 }
0x3b9c   : > { %v4209_v52 = vsel %vm8954_vm3, %v4204_v25, 0.0  ;;  %v6191_v58 = vpop.f32.mrb[103].mxu0 }
0x3b9d   : > { %v4210_v45 = vadd.f32 %v4209_v52, %v4208_v56 }
0x3b9f   : > { %4211 = vadd.xlane.f32.xlu0 %v4210_v45 }
0x3c2c   : > { %v4212_v46 = vpop.xlane.xlu0 %4211 }
0x3c2d   : > { %v4213_v31 = vrot.slane %v4212_v46, 4 }
0x3c2f   : > { %v4214_v32 = vadd.f32 %v4213_v31, %v4212_v46 }
0x3c31   : > { %v4215_v60 = vrot.slane %v4214_v32, 2 }
0x3c33   : > { %v4216_v3 = vadd.f32 %v4215_v60, %v4214_v32 }
0x3c35   : > { %v4217_v7 = vrot.slane %v4216_v3, 1 }
0x3c37   : > { %v4218_v22 = vadd.f32 %v4217_v7, %v4216_v3 }
0x3c39   : > { %6392 = vpush %v4218_v22 }
0x3c6a   : > { %s6393_s29 = spop %6392 }
0x3c6b   : > { %s4222_s22 = smul.f32 0.0009765625, %s6393_s29 }
0x3c6d   : > { %v4223_v61 = vstv %s4222_s22 }
0x3c6e   : > { %v4224_v9 = vsub.f32 %v4201_v15, %v4223_v61  ;;  %v4225_v11 = vsub.f32 %v4204_v25, %v4223_v61 }
0x3c70   : > { %v4226_v28 = vmul.f32 %v4224_v9, %v4224_v9  ;;  %v4227_v8 = vmul.f32 %v4225_v11, %v4225_v11 }
0x3c72   : > { %v4228_v21 = vsel %vm8954_vm3, %v4226_v28, 0.0  ;;  %v4229_v34 = vsel %vm8954_vm3, %v4227_v8, 0.0 }
0x3c73   : > { %v4230_v27 = vadd.f32 %v4229_v34, %v4228_v21 }
0x3c75   : > { %4231 = vadd.xlane.f32.xlu1 %v4230_v27 }
0x3c86   : > { %4275 = vrot.lane.b32.xlu1 %v7964_v23, %s8950_s9 }
0x3c8a   : > { %4277 = vrot.lane.b32.xlu1 %v7962_v10, %s8950_s9 }
0x3c8e   : > { %4340 = vrot.lane.b32.xlu1 %v7910_v14, %s7218_s27 }
0x3d02   : > { %v4232_v62 = vpop.xlane.xlu1 %4231 }
0x3d03   : > { %v4233_v20 = vrot.slane %v4232_v62, 4 }
0x3d05   : > { %v4234_v59 = vadd.f32 %v4233_v20, %v4232_v62 }
0x3d06   : > { %v8554_v60 = vpop.permute.xlu1 %4275 }
0x3d07   : > { %v4235_v29 = vrot.slane %v4234_v59, 2 }
0x3d09   : > { %v4236_v37 = vadd.f32 %v4235_v29, %v4234_v59 }
0x3d0a   : > { %v8562_v3 = vpop.permute.xlu1 %4277 }
0x3d0b   : > { %v4237_v5 = vrot.slane %v4236_v37, 1 }
0x3d0d   : > { %v4238_v17 = vadd.f32 %v4237_v5, %v4236_v37 }
0x3d0e   : > { %v4341_v62 = vpop.permute.xlu1 %4340 }
0x3d0f   : > { %6394 = vpush %v4238_v17 }
0x3d40   : > { %s6395_s2 = spop %6394 }
0x3d41   : > { %s4242_s29 = smul.f32 0.0009765625, %s6395_s2 }
0x3d43   : > { %s4243_s22 = sadd.f32 1e-05, %s4242_s29 }
0x3d45   : > { %v4244_v49 = vstv %s4243_s22 }
0x3d46   : > { %6804 = vrsqrt.f32 %v4244_v49 }
0x3d50   : > { %v6805_v23 = vpop.eup %6804 }
0x3d51   : > { %6396 = vpush %v6805_v23 }
0x3d82   : > { %s6397_s25 = spop %6396 }
0x3d83   : > { %v4247_v10 = vstv %s6397_s25  ;;  %s7219_s25 = smov 40  }
0x3d84   : > { %v4248_v51 = vmul.f32 %v4247_v10, %v4224_v9  ;;  %v4249_v15 = vmul.f32 %v4247_v10, %v4225_v11 }
0x3d86   : > { %v4250_v6 = vsel %vm8954_vm3, %v4248_v51, -inf  ;;  %v4253_v25 = vsel %vm8954_vm3, %v4249_v15, -inf }
0x3d87   : > { %4251 = vmax.xlane.f32.xlu0 %v4250_v6 }
0x3d8b   : > { %4254 = vmax.xlane.f32.xlu0 %v4253_v25 }
0x3da1   : > { %4273 = vrot.lane.b32.xlu0 %v7912_v24, %s8950_s9 }
0x3e14   : > { %v4252_v56 = vpop.xlane.xlu0 %4251 }
0x3e15   : > { %v4256_v52 = vsub.f32 %v4248_v51, %v4252_v56 }
0x3e17   : > { %v4258_v58 = vmul.f32 1.442695, %v4256_v52 }
0x3e18   : > { %v4255_v45 = vpop.xlane.xlu0 %4254 }
0x3e19   : > { %6806 = vpow2.f32 %v4258_v58  ;;  %v4257_v46 = vsub.f32 %v4249_v15, %v4255_v45 }
0x3e1b   : > { %v4260_v31 = vmul.f32 1.442695, %v4257_v46 }
0x3e1c   : > { %v8550_v32 = vpop.permute.xlu0 %4273 }
0x3e1d   : > { %6808 = vpow2.f32 %v4260_v31  ;;  %6193 = vmatpush3.bf16.msra.mxu1 %v8550_v32  ;;  %6217 = vmatpush3.bf16.msra.mxu0 %v8550_v32 }
0x3e1e   : > { %6194 = vmatprep.subr.bf16.mxu1 %v7204_v0  ;;  %6218 = vmatprep.subr.bf16.mxu0 %v7204_v0 }
0x3e21   : > { %6195 = vmatpush3.bf16.msra.mxu1 %v8554_v60  ;;  %6219 = vmatpush3.bf16.msra.mxu0 %v8554_v60 }
0x3e22   : > { %6196 = vmatprep.subr.bf16.mxu1 %v7204_v0  ;;  %6220 = vmatprep.subr.bf16.mxu0 %v7204_v0 }
0x3e23   : > { %v6807_v24 = vpop.eup %6806 }
0x3e24   : > { %v4262_v7 = vsel %vm8954_vm3, %v6807_v24, 0.0 }
0x3e25   : > { %4263 = vadd.xlane.f32.xlu0 %v4262_v7  ;;  %6197 = vmatpush3.bf16.msra.mxu1 %v8562_v3 }
0x3e26   : > { %6221 = vmatpush3.bf16.msra.mxu0 %v8562_v3  ;;  %6198 = vmatprep.subr.bf16.mxu1 %v7204_v0 }
0x3e27   : > { %v6809_v22 = vpop.eup %6808  ;;  %6222 = vmatprep.subr.bf16.mxu0 %v7204_v0 }
0x3e28   : > { %v4265_v61 = vsel %vm8954_vm3, %v6809_v22, 0.0 }
0x3e29   : > { %4266 = vadd.xlane.f32.xlu0 %v4265_v61 }
0x3e3f   : > { %4279 = vrot.lane.b32.xlu0 %v7974_v30, %s8950_s9 }
0x3e43   : > { %4555 = vrot.lane.b32.xlu0 %v7910_v14, %s7219_s25 }
0x3eb2   : > { %v4264_v9 = vpop.xlane.xlu0 %4263 }
0x3eb3   : > { %6810 = vrcp.f32 %v4264_v9 }
0x3eb6   : > { %v4267_v11 = vpop.xlane.xlu0 %4266 }
0x3eb7   : > { %6812 = vrcp.f32 %v4267_v11 }
0x3eba   : > { %v8574_v28 = vpop.permute.xlu0 %4279 }
0x3ebb   : > { %6199 = vmatpush3.bf16.msra.mxu1 %v8574_v28  ;;  %6223 = vmatpush3.bf16.msra.mxu0 %v8574_v28 }
0x3ebc   : > { %6204 = vmatprep.subr.bf16.mxu1 %v7204_v0  ;;  %6228 = vmatprep.subr.bf16.mxu0 %v7204_v0 }
0x3ebd   : > { %v6811_v8 = vpop.eup %6810 }
0x3ebe   : > { %v4270_v21 = vmul.f32 %v6811_v8, %v6807_v24  ;;  %v4556_v20 = vpop.permute.xlu0 %4555 }
0x3ec1   : > { %v6813_v30 = vpop.eup %6812 }
0x3ec2   : > { %v4271_v34 = vmul.f32 %v6813_v30, %v6809_v22 }
0x3ec4   : > { %v4272_v27 = vpack.c.bf16 %v4271_v34, %v4270_v21 }
0x3ec6   : > { %6201 = vmatmul.mubr.msk.bf16.vlgmr.msra.gmra.mrb[76].mxu1 %vm8954_vm3, %v4272_v27 }
0x3ec7   : > { %6205 = vmatpush3.bf16.xpose.msra.mxu1 %v8510_v18  ;;  %6212 = vmatprep.mubr.msk.bf16.mxu1 %vm7205_vm0, %v7204_v0 }
0x3ec8   : > { %6206 = vmatprep.subr.bf16.mxu1 %v7204_v0 }
0x3ecf   : > { %6207 = vmatpush3.bf16.xpose.msra.mxu1 %v8515_v4 }
0x3ed0   : > { %6208 = vmatprep.subr.bf16.mxu1 %v7204_v0 }
0x3ed7   : > { %6209 = vmatpush3.bf16.xpose.msra.mxu1 %v8520_v26 }
0x3ed8   : > { %6210 = vmatprep.subr.bf16.mxu1 %v7204_v0 }
0x3edf   : > { %6211 = vmatpush3.bf16.xpose.msra.mxu1 %v8525_v33 }
0x3ee0   : > { %6234 = vmatprep.subr.bf16.mxu1 %v7204_v0 }
0x3ee6   : > { %6213 = vmatmul.mubr.msk.bf16.vlgmr.msra.gmra.mrb[80].mxu1 %vm1621_vm2, %v4341_v62 }
0x3ee7   : > { %6235 = vmatpush3.bf16.xpose.msra.mxu1 %v8510_v18  ;;  %6242 = vmatprep.mubr.msk.bf16.mxu1 %vm7205_vm0, %v7204_v0 }
0x3ee8   : > { %6236 = vmatprep.subr.bf16.mxu1 %v7204_v0 }
0x3eef   : > { %6237 = vmatpush3.bf16.xpose.msra.mxu1 %v8515_v4 }
0x3ef0   : > { %6238 = vmatprep.subr.bf16.mxu1 %v7204_v0 }
0x3ef7   : > { %6239 = vmatpush3.bf16.xpose.msra.mxu1 %v8520_v26 }
0x3ef8   : > { %6240 = vmatprep.subr.bf16.mxu1 %v7204_v0 }
0x3eff   : > { %6241 = vmatpush3.bf16.xpose.msra.mxu1 %v8525_v33 }
0x3f00   : > { %6276 = vmatprep.subr.bf16.mxu1 %v7204_v0 }
0x3f06   : > { %6243 = vmatmul.mubr.msk.bf16.vlgmr.msra.gmra.mrb[84].mxu1 %vm1621_vm2, %v4556_v20 }
0x3f07   : > { %6277 = vmatpush3.bf16.msra.mxu1 %v8550_v32  ;;  %6284 = vmatprep.mubr.msk.bf16.mxu1 %vm7205_vm0, %v7204_v0 }
0x3f08   : > { %6278 = vmatprep.subr.bf16.mxu1 %v7204_v0 }
0x3f0b   : > { %6279 = vmatpush3.bf16.msra.mxu1 %v8554_v60 }
0x3f0c   : > { %6280 = vmatprep.subr.bf16.mxu1 %v7204_v0 }
0x3f0f   : > { %6281 = vmatpush3.bf16.msra.mxu1 %v8562_v3 }
0x3f10   : > { %6282 = vmatprep.subr.bf16.mxu1 %v7204_v0 }
0x3f13   : > { %6283 = vmatpush3.bf16.msra.mxu1 %v8574_v28 }
0x3f14   : > { %6288 = vmatprep.subr.bf16.mxu1 %v7204_v0 }
0x3f99   : > { %v8613_v59 = vpop.f32.mrb[76].mxu1 }
0x3f9a   : > { %v6202_v29 = vpop.f32.mrb[77].mxu1 }
0x3f9b   : > { %v8615_v37 = vpop.f32.mrb[78].mxu1 }
0x3f9c   : > { %v6203_v5 = vpop.f32.mrb[79].mxu1 }
0x3fb9   : > { %v4379_v17 = vpop.f32.mrb[80].mxu1 }
0x3fba   : > { %v6214_v49 = vpop.f32.mrb[81].mxu1  ;;  %v4386_v10 = vsel %vm8954_vm3, %v4379_v17, 0.0 }
0x3fbb   : > { %v4382_v23 = vpop.f32.mrb[82].mxu1 }
0x3fbc   : > { %v4387_v51 = vsel %vm8954_vm3, %v4382_v23, 0.0  ;;  %v6215_v15 = vpop.f32.mrb[83].mxu1 }
0x3fbd   : > { %v4388_v6 = vadd.f32 %v4387_v51, %v4386_v10 }
0x3fbf   : > { %4389 = vadd.xlane.f32.xlu1 %v4388_v6 }
0x3fd9   : > { %v4594_v25 = vpop.f32.mrb[84].mxu1 }
0x3fda   : > { %v6244_v56 = vpop.f32.mrb[85].mxu1  ;;  %v4601_v58 = vsel %vm8954_vm3, %v4594_v25, 0.0 }
0x3fdb   : > { %v4597_v52 = vpop.f32.mrb[86].mxu1 }
0x3fdc   : > { %v4602_v45 = vsel %vm8954_vm3, %v4597_v52, 0.0  ;;  %v6245_v46 = vpop.f32.mrb[87].mxu1 }
0x3fdd   : > { %v4603_v31 = vadd.f32 %v4602_v45, %v4601_v58 }
0x404c   : > { %v4390_v24 = vpop.xlane.xlu1 %4389 }
0x404d   : > { %v4391_v7 = vrot.slane %v4390_v24, 4 }
0x404f   : > { %v4392_v22 = vadd.f32 %v4391_v7, %v4390_v24 }
0x4051   : > { %v4393_v61 = vrot.slane %v4392_v22, 2 }
0x4053   : > { %v4394_v9 = vadd.f32 %v4393_v61, %v4392_v22 }
0x4055   : > { %v4395_v11 = vrot.slane %v4394_v9, 1 }
0x4057   : > { %v4396_v8 = vadd.f32 %v4395_v11, %v4394_v9 }
0x4059   : > { %6398 = vpush %v4396_v8 }
0x408a   : > { %s6399_s2 = spop %6398 }
0x408b   : > { %s4400_s29 = smul.f32 0.0009765625, %s6399_s2 }
0x408d   : > { %v4401_v30 = vstv %s4400_s29 }
0x408e   : > { %v4402_v21 = vsub.f32 %v4379_v17, %v4401_v30  ;;  %v4403_v34 = vsub.f32 %v4382_v23, %v4401_v30 }
0x4090   : > { %v4404_v27 = vmul.f32 %v4402_v21, %v4402_v21  ;;  %v4405_v62 = vmul.f32 %v4403_v34, %v4403_v34 }
0x4092   : > { %v4406_v20 = vsel %vm8954_vm3, %v4404_v27, 0.0  ;;  %v4407_v29 = vsel %vm8954_vm3, %v4405_v62, 0.0 }
0x4093   : > { %v4408_v5 = vadd.f32 %v4407_v29, %v4406_v20 }
0x4095   : > { %4409 = vadd.xlane.f32.xlu0 %v4408_v5 }
0x4099   : > { %4604 = vadd.xlane.f32.xlu0 %v4603_v31 }
0x4122   : > { %v4410_v49 = vpop.xlane.xlu0 %4409 }
0x4123   : > { %v4411_v10 = vrot.slane %v4410_v49, 4 }
0x4125   : > { %v4412_v51 = vadd.f32 %v4411_v10, %v4410_v49 }
0x4126   : > { %v4605_v45 = vpop.xlane.xlu0 %4604 }
0x4127   : > { %v4413_v15 = vrot.slane %v4412_v51, 2  ;;  %v4606_v17 = vrot.slane %v4605_v45, 4 }
0x4129   : > { %v4414_v6 = vadd.f32 %v4413_v15, %v4412_v51  ;;  %v4607_v23 = vadd.f32 %v4606_v17, %v4605_v45 }
0x412b   : > { %v4415_v56 = vrot.slane %v4414_v6, 1  ;;  %v4608_v46 = vrot.slane %v4607_v23, 2 }
0x412d   : > { %v4416_v58 = vadd.f32 %v4415_v56, %v4414_v6  ;;  %v4609_v7 = vadd.f32 %v4608_v46, %v4607_v23 }
0x412f   : > { %6400 = vpush %v4416_v58  ;;  %v4610_v22 = vrot.slane %v4609_v7, 1 }
0x4131   : > { %v4611_v61 = vadd.f32 %v4610_v22, %v4609_v7 }
0x4160   : > { %s6401_s22 = spop %6400 }
0x4161   : > { %s4420_s2 = smul.f32 0.0009765625, %s6401_s22 }
0x4163   : > { %s4421_s29 = sadd.f32 1e-05, %s4420_s2  ;;  %s7220_s2 = smov 8  }
0x4165   : > { %v4422_v24 = vstv %s4421_s29  ;;  %s8996_s29 = smov 96  }
0x4166   : > { %6814 = vrsqrt.f32 %v4422_v24 }
0x4170   : > { %v6815_v31 = vpop.eup %6814 }
0x4171   : > { %6402 = vpush %v6815_v31 }
0x4172   : > { %6404 = vpush %v4611_v61 }
0x41a2   : > { %s6403_s0 = spop %6402 }
0x41a3   : > { %v4425_v9 = vstv %s6403_s0  ;;  %s6405_s9 = spop %6404 }
0x41a4   : > { %v4426_v11 = vmul.f32 %v4425_v9, %v4402_v21  ;;  %v4427_v8 = vmul.f32 %v4425_v9, %v4403_v34  ;;  %s4615_s3 = smul.f32 0.0009765625, %s6405_s9 }
0x41a6   : > { %v4616_v30 = vstv %s4615_s3  ;;  %v4428_v27 = vsel %vm8954_vm3, %v4426_v11, -inf  ;;  %v4431_v62 = vsel %vm8954_vm3, %v4427_v8, -inf }
0x41a7   : > { %v4617_v20 = vsub.f32 %v4594_v25, %v4616_v30  ;;  %v4618_v29 = vsub.f32 %v4597_v52, %v4616_v30  ;;  %4429 = vmax.xlane.f32.xlu1 %v4428_v27  ;;  %4432 = vmax.xlane.f32.xlu0 %v4431_v62 }
0x41a9   : > { %v4619_v5 = vmul.f32 %v4617_v20, %v4617_v20  ;;  %v4620_v49 = vmul.f32 %v4618_v29, %v4618_v29 }
0x41ab   : > { %v4621_v10 = vsel %vm8954_vm3, %v4619_v5, 0.0  ;;  %v4622_v51 = vsel %vm8954_vm3, %v4620_v49, 0.0 }
0x41ac   : > { %v4623_v15 = vadd.f32 %v4622_v51, %v4621_v10 }
0x41ae   : > { %4624 = vadd.xlane.f32.xlu1 %v4623_v15 }
0x4234   : > { %v4430_v21 = vpop.xlane.xlu1 %4429  ;;  %v4433_v34 = vpop.xlane.xlu0 %4432 }
0x4235   : > { %v4434_v6 = vsub.f32 %v4426_v11, %v4430_v21  ;;  %v4435_v56 = vsub.f32 %v4427_v8, %v4433_v34 }
0x4237   : > { %v4436_v58 = vmul.f32 1.442695, %v4434_v6  ;;  %v4438_v45 = vmul.f32 1.442695, %v4435_v56 }
0x4239   : > { %6816 = vpow2.f32 %v4436_v58 }
0x423a   : > { %6818 = vpow2.f32 %v4438_v45 }
0x423b   : > { %v4625_v25 = vpop.xlane.xlu1 %4624 }
0x423c   : > { %v4626_v52 = vrot.slane %v4625_v25, 4 }
0x423e   : > { %v4627_v17 = vadd.f32 %v4626_v52, %v4625_v25 }
0x4240   : > { %v4628_v23 = vrot.slane %v4627_v17, 2 }
0x4242   : > { %v4629_v46 = vadd.f32 %v4628_v23, %v4627_v17 }
0x4243   : > { %v6817_v24 = vpop.eup %6816 }
0x4244   : > { %v6819_v7 = vpop.eup %6818  ;;  %v4440_v22 = vsel %vm8954_vm3, %v6817_v24, 0.0  ;;  %v4630_v31 = vrot.slane %v4629_v46, 1 }
0x4245   : > { %4441 = vadd.xlane.f32.xlu0 %v4440_v22  ;;  %v4443_v61 = vsel %vm8954_vm3, %v6819_v7, 0.0 }
0x4246   : > { %4444 = vadd.xlane.f32.xlu1 %v4443_v61  ;;  %v4631_v9 = vadd.f32 %v4630_v31, %v4629_v46 }
0x4248   : > { %6406 = vpush %v4631_v9 }
0x4279   : > { %s6407_s3 = spop %6406 }
0x427a   : > { %s4635_s0 = smul.f32 0.0009765625, %s6407_s3  ;;  %s8997_s3 = smov 104  }
0x427c   : > { %s4636_s9 = sadd.f32 1e-05, %s4635_s0  ;;  %s8998_s0 = smov 112  }
0x427e   : > { %v4637_v11 = vstv %s4636_s9  ;;  %s8999_s9 = smov 120  }
0x427f   : > { %6820 = vrsqrt.f32 %v4637_v11 }
0x4289   : > { %v6821_v8 = vpop.eup %6820 }
0x428a   : > { %6408 = vpush %v6821_v8 }
0x42bb   : > { %s6409_s22 = spop %6408 }
0x42bc   : > { %v4640_v30 = vstv %s6409_s22  ;;  %s9000_s22 = smov 24  }
0x42bd   : > { %v4641_v27 = vmul.f32 %v4640_v30, %v4617_v20  ;;  %v4642_v62 = vmul.f32 %v4640_v30, %v4618_v29 }
0x42bf   : > { %v4643_v5 = vsel %vm8954_vm3, %v4641_v27, -inf  ;;  %v4646_v49 = vsel %vm8954_vm3, %v4642_v62, -inf }
0x42c0   : > { %4644 = vmax.xlane.f32.xlu0 %v4643_v5  ;;  %4647 = vmax.xlane.f32.xlu1 %v4646_v49 }
0x42d2   : > { %v4442_v10 = vpop.xlane.xlu0 %4441 }
0x42d3   : > { %v4445_v51 = vpop.xlane.xlu1 %4444  ;;  %6822 = vrcp.f32 %v4442_v10 }
0x42d4   : > { %6824 = vrcp.f32 %v4445_v51 }
0x42dd   : > { %v6823_v15 = vpop.eup %6822 }
0x42de   : > { %v6825_v21 = vpop.eup %6824  ;;  %v4448_v34 = vmul.f32 %v6823_v15, %v6817_v24 }
0x42df   : > { %v4449_v6 = vmul.f32 %v6825_v21, %v6819_v7 }
0x42e1   : > { %v4450_v56 = vpack.c.bf16 %v4449_v6, %v4448_v34 }
0x42e3   : > { %6225 = vmatmul.mubr.msk.bf16.vlgmr.msra.gmra.mrb[104].mxu0 %vm8954_vm3, %v4450_v56 }
0x42e4   : > { %6230 = vmatprep.mubr.msk.bf16.mxu0 %vm7205_vm0, %v7204_v0 }
0x434d   : > { %v4648_v20 = vpop.xlane.xlu1 %4647  ;;  %v4645_v29 = vpop.xlane.xlu0 %4644 }
0x434e   : > { %v4650_v58 = vsub.f32 %v4642_v62, %v4648_v20  ;;  %v4649_v45 = vsub.f32 %v4641_v27, %v4645_v29 }
0x4350   : > { %v4653_v25 = vmul.f32 1.442695, %v4650_v58  ;;  %v4651_v52 = vmul.f32 1.442695, %v4649_v45 }
0x4352   : > { %6826 = vpow2.f32 %v4653_v25 }
0x4353   : > { %6828 = vpow2.f32 %v4651_v52 }
0x435c   : > { %v8634_v17 = vpop.eup %6826 }
0x435d   : > { %v8636_v23 = vpop.eup %6828  ;;  %v4658_v46 = vsel %vm8954_vm3, %v8634_v17, 0.0 }
0x435e   : > { %4659 = vadd.xlane.f32.xlu1 %v4658_v46  ;;  %v4655_v24 = vsel %vm8954_vm3, %v8636_v23, 0.0 }
0x435f   : > { %4656 = vadd.xlane.f32.xlu0 %v4655_v24 }
0x4375   : > { %4770 = vrot.lane.b32.xlu0 %v7910_v14, %s7220_s2 }
0x4379   : > { %1997 = vrot.lane.b32.xlu0 %v8046_v44, %s8959_s12 }
0x437d   : > { %2002 = vrot.lane.b32.xlu0 %v8046_v44, %s7219_s25 }
0x4381   : > { %3490 = vrot.lane.b32.xlu0 %v8415_v12, %s7216_s20 }
0x4385   : > { %2008 = vrot.lane.b32.xlu0 %v8048_v42, %s7215_s4 }
0x4389   : > { %3695 = vrot.lane.b32.xlu0 %v8454_v1, %s8959_s12 }
0x438d   : > { %2013 = vrot.lane.b32.xlu0 %v8048_v42, %s7210_s21 }
0x4391   : > { %2216 = vrot.lane.b32.xlu0 %v8079_v63, %s7206_s28 }
0x4395   : > { %2221 = vrot.lane.b32.xlu0 %v8079_v63, %s7218_s27 }
0x4399   : > { %2227 = vrot.lane.b32.xlu0 %v8081_v35, %s8962_s24 }
0x439d   : > { %2232 = vrot.lane.b32.xlu0 %v8081_v35, %s8960_s23 }
0x43a1   : > { %2435 = vrot.lane.b32.xlu0 %v8132_v38, %s8996_s29 }
0x43a5   : > { %2440 = vrot.lane.b32.xlu0 %v8132_v38, %s8997_s3 }
0x43a9   : > { %2446 = vrot.lane.b32.xlu0 %v8134_v40, %s8998_s0 }
0x43ad   : > { %2451 = vrot.lane.b32.xlu0 %v8134_v40, %s8999_s9 }
0x43b1   : > { %2645 = vrot.lane.b32.xlu0 %v8213_v54, %s7220_s2 }
0x43b5   : > { %2852 = vrot.lane.b32.xlu0 %v8259_v50, %s8959_s12 }
0x43b6   : > { %v4488_v14 = vpop.f32.mrb[104].mxu0 }
0x43b7   : > { %v6226_v44 = vpop.f32.mrb[105].mxu0 }
0x43b8   : > { %v4491_v42 = vpop.f32.mrb[106].mxu0 }
0x43b9   : > { %v4495_v63 = vpack.c.bf16 %v4491_v42, %v4488_v14  ;;  %2856 = vrot.lane.b32.xlu0 %v8259_v50, %s7219_s25  ;;  %v6227_v35 = vpop.f32.mrb[107].mxu0 }
0x43bb   : > { %6229 = vmatpush3.bf16.msra.mxu0 %v4495_v63 }
0x43bc   : > { %6246 = vmatprep.subr.bf16.mxu0 %v7204_v0 }
0x43bd   : > { %2861 = vrot.lane.b32.xlu0 %v8261_v43, %s7215_s4 }
0x43be   : > { %6231 = vmatmul.mubr.msk.bf16.vlgmr.msra.gmra.mrb[108].mxu0 %vm8957_vm1, %v8503_v16 }
0x43bf   : > { %6247 = vmatpush3.bf16.msra.mxu0 %v8550_v32  ;;  %6254 = vmatprep.mubr.msk.bf16.mxu0 %vm7205_vm0, %v7204_v0 }
0x43c0   : > { %6248 = vmatprep.subr.bf16.mxu0 %v7204_v0 }
0x43c1   : > { %2865 = vrot.lane.b32.xlu0 %v8261_v43, %s7210_s21 }
0x43c3   : > { %6249 = vmatpush3.bf16.msra.mxu0 %v8554_v60 }
0x43c4   : > { %6250 = vmatprep.subr.bf16.mxu0 %v7204_v0 }
0x43c5   : > { %3067 = vrot.lane.b32.xlu0 %v8279_v19, %s7206_s28 }
0x43c7   : > { %6251 = vmatpush3.bf16.msra.mxu0 %v8562_v3 }
0x43c8   : > { %6252 = vmatprep.subr.bf16.mxu0 %v7204_v0 }
0x43c9   : > { %3071 = vrot.lane.b32.xlu0 %v8279_v19, %s7218_s27 }
0x43cb   : > { %6253 = vmatpush3.bf16.msra.mxu0 %v8574_v28 }
0x43cc   : > { %6258 = vmatprep.subr.bf16.mxu0 %v7204_v0 }
0x43cd   : > { %3076 = vrot.lane.b32.xlu0 %v8281_v2, %s8962_s24 }
0x43d1   : > { %3080 = vrot.lane.b32.xlu0 %v8281_v2, %s8960_s23 }
0x43d5   : > { %3282 = vrot.lane.b32.xlu0 %v8332_v39, %s8996_s29 }
0x43d9   : > { %3286 = vrot.lane.b32.xlu0 %v8332_v39, %s8997_s3 }
0x43dd   : > { %3291 = vrot.lane.b32.xlu0 %v8334_v53, %s8998_s0 }
0x43e1   : > { %3295 = vrot.lane.b32.xlu0 %v8334_v53, %s8999_s9 }
0x43e5   : > { %3488 = vrot.lane.b32.xlu0 %v8413_v41, %s7216_s20 }
0x43e9   : > { %4331 = vrot.lane.b32.xlu0 %v8613_v59, %s9000_s22 }
0x43eb   : > { %v4660_v38 = vpop.xlane.xlu1 %4659 }
0x43ec   : > { %6830 = vrcp.f32 %v4660_v38  ;;  %v4657_v40 = vpop.xlane.xlu0 %4656 }
0x43ed   : > { %6832 = vrcp.f32 %v4657_v40 }
0x43f0   : > { %v8715_v54 = vpop.permute.xlu0 %4770 }
0x43f4   : > { %v1998_v50 = vpop.permute.xlu0 %1997 }
0x43f5   : > { %2001 = vst.msk [vmem:[#allocation2] sm:$0xf] %vm2000_vm4, %v1998_v50 }
0x43f6   : > { %v6831_v43 = vpop.eup %6830 }
0x43f7   : > { %v6833_v19 = vpop.eup %6832  ;;  %v4664_v2 = vmul.f32 %v6831_v43, %v8634_v17 }
0x43f8   : > { %v4663_v39 = vmul.f32 %v6833_v19, %v8636_v23  ;;  %v2003_v53 = vpop.permute.xlu0 %2002 }
0x43f9   : > { %2006 = vst.msk [vmem:[#allocation2 - $0x4] sm:$0xf0] %vm2005_vm5, %v2003_v53 }
0x43fa   : > { %v4665_v41 = vpack.c.bf16 %v4664_v2, %v4663_v39 }
0x43fc   : > { %6255 = vmatmul.mubr.msk.bf16.vlgmr.msra.gmra.mrb[112].mxu0 %vm8954_vm3, %v4665_v41  ;;  %v8722_v12 = vpop.permute.xlu0 %3490  ;;  %vm2651_vm3 = vcmask 130112  }
0x43fd   : > { %6260 = vmatprep.mubr.msk.bf16.mxu0 %vm7205_vm0, %v7204_v0 }
0x4400   : > { %v2009_v32 = vpop.permute.xlu0 %2008 }
0x4401   : > { %2012 = vst.msk [vmem:[#allocation2] sm:$0xf] %vm2011_vm6, %v2009_v32 }
0x4404   : > { %v8727_v60 = vpop.permute.xlu0 %3695 }
0x4408   : > { %v2014_v3 = vpop.permute.xlu0 %2013 }
0x4409   : > { %2017 = vst.msk [vmem:[#allocation2 - $0x4] sm:$0xf0] %vm2016_vm7, %v2014_v3 }
0x440c   : > { %v2217_v28 = vpop.permute.xlu0 %2216 }
0x440d   : > { %2220 = vst.msk [vmem:[#allocation2] sm:$0xf] %vm8955_vm8, %v2217_v28 }
0x4410   : > { %v2222_v59 = vpop.permute.xlu0 %2221 }
0x4411   : > { %2225 = vst.msk [vmem:[#allocation2 - $0x4] sm:$0xf0] %vm2224_vm9, %v2222_v59 }
0x4414   : > { %v2228_v7 = vpop.permute.xlu0 %2227 }
0x4415   : > { %2231 = vst.msk [vmem:[#allocation2] sm:$0xf] %vm8956_vm10, %v2228_v7 }
0x4418   : > { %v2233_v22 = vpop.permute.xlu0 %2232 }
0x4419   : > { %2236 = vst.msk [vmem:[#allocation2 - $0x4] sm:$0xf0] %vm2235_vm11, %v2233_v22 }
0x441c   : > { %v2436_v31 = vpop.permute.xlu0 %2435 }
0x441d   : > { %2439 = vst.msk [vmem:[#allocation2] sm:$0xf] %vm2438_vm12, %v2436_v31 }
0x4420   : > { %v2441_v61 = vpop.permute.xlu0 %2440 }
0x4421   : > { %2444 = vst.msk [vmem:[#allocation2 - $0x4] sm:$0xf0] %vm2443_vm13, %v2441_v61 }
0x4424   : > { %v2447_v9 = vpop.permute.xlu0 %2446 }
0x4425   : > { %2450 = vst.msk [vmem:[#allocation2] sm:$0xf] %vm2449_vm14, %v2447_v9 }
0x4428   : > { %v2452_v11 = vpop.permute.xlu0 %2451 }
0x4429   : > { %2455 = vst.msk [vmem:[#allocation2 - $0x4] sm:$0xf0] %vm8964_vm15, %v2452_v11 }
0x442c   : > { %v2646_v8 = vpop.permute.xlu0 %2645 }
0x442d   : > { %2652 = vst.msk [vmem:[#allocation2] sm:$0xff] %vm2651_vm3, %v2646_v8 }
0x4430   : > { %v2853_v30 = vpop.permute.xlu0 %2852 }
0x4431   : > { %2855 = vst.msk [vmem:[#allocation2 + $0x4] sm:$0xf] %vm2000_vm4, %v2853_v30 }
0x4434   : > { %v2857_v27 = vpop.permute.xlu0 %2856 }
0x4435   : > { %2859 = vst.msk [vmem:[#allocation2] sm:$0xf0] %vm2005_vm5, %v2857_v27 }
0x4438   : > { %v2862_v62 = vpop.permute.xlu0 %2861 }
0x4439   : > { %2864 = vst.msk [vmem:[#allocation2 + $0x4] sm:$0xf] %vm2011_vm6, %v2862_v62 }
0x443c   : > { %v2866_v5 = vpop.permute.xlu0 %2865 }
0x443d   : > { %2868 = vst.msk [vmem:[#allocation2] sm:$0xf0] %vm2016_vm7, %v2866_v5 }
0x4440   : > { %v3068_v49 = vpop.permute.xlu0 %3067 }
0x4441   : > { %3070 = vst.msk [vmem:[#allocation2 + $0x4] sm:$0xf] %vm8955_vm8, %v3068_v49  ;;  %vm3494_vm8 = vcmask 195712  }
0x4444   : > { %v3072_v10 = vpop.permute.xlu0 %3071 }
0x4445   : > { %3074 = vst.msk [vmem:[#allocation2] sm:$0xf0] %vm2224_vm9, %v3072_v10 }
0x4448   : > { %v3077_v51 = vpop.permute.xlu0 %3076 }
0x4449   : > { %3079 = vst.msk [vmem:[#allocation2 + $0x4] sm:$0xf] %vm8956_vm10, %v3077_v51  ;;  %vm8958_vm10 = vcmask 261312  }
0x444c   : > { %v3081_v15 = vpop.permute.xlu0 %3080 }
0x444d   : > { %3083 = vst.msk [vmem:[#allocation2] sm:$0xf0] %vm2235_vm11, %v3081_v15 }
0x4450   : > { %v3283_v21 = vpop.permute.xlu0 %3282 }
0x4451   : > { %3285 = vst.msk [vmem:[#allocation2 + $0x4] sm:$0xf] %vm2438_vm12, %v3283_v21 }
0x4454   : > { %v3287_v34 = vpop.permute.xlu0 %3286 }
0x4455   : > { %3289 = vst.msk [vmem:[#allocation2] sm:$0xf0] %vm2443_vm13, %v3287_v34 }
0x4458   : > { %v3292_v6 = vpop.permute.xlu0 %3291 }
0x4459   : > { %3294 = vst.msk [vmem:[#allocation2 + $0x4] sm:$0xf] %vm2449_vm14, %v3292_v6 }
0x445c   : > { %v3296_v56 = vpop.permute.xlu0 %3295 }
0x445d   : > { %3298 = vst.msk [vmem:[#allocation2] sm:$0xf0] %vm8964_vm15, %v3296_v56 }
0x4460   : > { %v3489_v20 = vpop.permute.xlu0 %3488 }
0x4461   : > { %3495 = vst.msk [vmem:[#allocation2] sm:$0xff] %vm3494_vm8, %v3489_v20 }
0x4464   : > { %v4332_v29 = vpop.permute.xlu0 %4331 }
0x4465   : > { %4338 = vst.msk [vmem:[#allocation2] sm:$0xff] %vm8958_vm10, %v4332_v29 }
0x4491   : > { %v8753_v58 = vpop.f32.mrb[108].mxu0 }
0x4492   : > { %v6232_v45 = vpop.f32.mrb[109].mxu0 }
0x4493   : > { %v8755_v25 = vpop.f32.mrb[110].mxu0 }
0x4494   : > { %v6233_v52 = vpop.f32.mrb[111].mxu0 }
0x44cf   : > { %v4703_v17 = vpop.f32.mrb[112].mxu0 }
0x44d0   : > { %v6256_v23 = vpop.f32.mrb[113].mxu0 }
0x44d1   : > { %v4706_v46 = vpop.f32.mrb[114].mxu0 }
0x44d2   : > { %v4710_v24 = vpack.c.bf16 %v4706_v46, %v4703_v17  ;;  %v6257_v14 = vpop.f32.mrb[115].mxu0 }
0x44d4   : > { %6259 = vmatpush3.bf16.msra.mxu0 %v4710_v24 }
0x44d5   : > { %6264 = vmatprep.subr.bf16.mxu0 %v7204_v0 }
0x44d7   : > { %6261 = vmatmul.mubr.msk.bf16.vlgmr.msra.gmra.mrb[116].mxu0 %vm8957_vm1, %v8503_v16  ;;  %vm9001_vm1 = vcmask 523264  }
0x44d8   : > { %6272 = vmatprep.mubr.msk.bf16.mxu0 %vm7205_vm0, %v7204_v0  ;;  %vm9002_vm10 = vmmov %vm9001_vm1 }
0x44d9   : > { %vm9006_vm15 = vmmov %vm9001_vm1 }
0x44dd   : > { %6265 = vmatpush3.bf16.xpose.msra.mxu0 %v8510_v18 }
0x44de   : > { %6266 = vmatprep.subr.bf16.mxu0 %v7204_v0 }
0x44e5   : > { %6267 = vmatpush3.bf16.xpose.msra.mxu0 %v8515_v4 }
0x44e6   : > { %6268 = vmatprep.subr.bf16.mxu0 %v7204_v0 }
0x44ed   : > { %6269 = vmatpush3.bf16.xpose.msra.mxu0 %v8520_v26 }
0x44ee   : > { %6270 = vmatprep.subr.bf16.mxu0 %v7204_v0 }
0x44f5   : > { %6271 = vmatpush3.bf16.xpose.msra.mxu0 %v8525_v33 }
0x44fc   : > { %6273 = vmatmul.mubr.msk.bf16.vlgmr.msra.gmra.mrb[120].mxu0 %vm1621_vm2, %v8715_v54  ;;  %vm9003_vm2 = vmmov %vm9001_vm1 }
0x45aa   : > { %v8771_v16 = vpop.f32.mrb[116].mxu0 }
0x45ab   : > { %v6262_v44 = vpop.f32.mrb[117].mxu0 }
0x45ac   : > { %v8773_v42 = vpop.f32.mrb[118].mxu0 }
0x45ad   : > { %v6263_v18 = vpop.f32.mrb[119].mxu0 }
0x45cf   : > { %v4809_v63 = vpop.f32.mrb[120].mxu0 }
0x45d0   : > { %v6274_v35 = vpop.f32.mrb[121].mxu0  ;;  %v4816_v38 = vsel %vm9001_vm1, %v4809_v63, 0.0 }
0x45d1   : > { %v4812_v4 = vpop.f32.mrb[122].mxu0 }
0x45d2   : > { %v4817_v26 = vsel %vm9002_vm10, %v4812_v4, 0.0  ;;  %v6275_v40 = vpop.f32.mrb[123].mxu0  ;;  %vm9004_vm10 = vmmov %vm9001_vm1 }
0x45d3   : > { %v4818_v50 = vadd.f32 %v4817_v26, %v4816_v38 }
0x45d5   : > { %4819 = vadd.xlane.f32.xlu1 %v4818_v50 }
0x4662   : > { %v4820_v33 = vpop.xlane.xlu1 %4819 }
0x4663   : > { %v4821_v43 = vrot.slane %v4820_v33, 4 }
0x4665   : > { %v4822_v19 = vadd.f32 %v4821_v43, %v4820_v33 }
0x4667   : > { %v4823_v54 = vrot.slane %v4822_v19, 2 }
0x4669   : > { %v4824_v2 = vadd.f32 %v4823_v54, %v4822_v19 }
0x466b   : > { %v4825_v39 = vrot.slane %v4824_v2, 1 }
0x466d   : > { %v4826_v53 = vadd.f32 %v4825_v39, %v4824_v2 }
0x466f   : > { %6410 = vpush %v4826_v53 }
0x46a0   : > { %s6411_s20 = spop %6410 }
0x46a1   : > { %s4830_s12 = smul.f32 0.0009765625, %s6411_s20 }
0x46a3   : > { %v4831_v41 = vstv %s4830_s12 }
0x46a4   : > { %v4832_v32 = vsub.f32 %v4809_v63, %v4831_v41  ;;  %v4833_v3 = vsub.f32 %v4812_v4, %v4831_v41 }
0x46a6   : > { %v4834_v28 = vmul.f32 %v4832_v32, %v4832_v32  ;;  %v4835_v59 = vmul.f32 %v4833_v3, %v4833_v3 }
0x46a8   : > { %v4836_v7 = vsel %vm9001_vm1, %v4834_v28, 0.0  ;;  %v4837_v22 = vsel %vm9003_vm2, %v4835_v59, 0.0  ;;  %vm9005_vm2 = vmmov %vm9001_vm1  ;;  %v6610_v28 = vld [vmem:[#allocation17] sm:$0xff]   ;;  %v6611_v59 = vld [vmem:[#allocation17 + $0x8] sm:$0xff]  }
0x46a9   : > { %v4838_v31 = vadd.f32 %v4837_v22, %v4836_v7  ;;  %v6612_v7 = vld [vmem:[#allocation17 + $0x10] sm:$0xff]   ;;  %v6613_v22 = vld [vmem:[#allocation17 + $0x18] sm:$0xff]  }
0x46ab   : > { %4839 = vadd.xlane.f32.xlu1 %v4838_v31  ;;  %v6614_v31 = vld [vmem:[#allocation17 + $0x20] sm:$0xff]  }
0x4738   : > { %v4840_v61 = vpop.xlane.xlu1 %4839 }
0x4739   : > { %v4841_v9 = vrot.slane %v4840_v61, 4 }
0x473b   : > { %v4842_v11 = vadd.f32 %v4841_v9, %v4840_v61  ;;  %v6615_v61 = vld [vmem:[#allocation17 + $0x28] sm:$0xff]  }
0x473d   : > { %v4843_v8 = vrot.slane %v4842_v11, 2 }
0x473f   : > { %v4844_v30 = vadd.f32 %v4843_v8, %v4842_v11  ;;  %v6616_v11 = vld [vmem:[#allocation17 + $0x30] sm:$0xff]  }
0x4741   : > { %v4845_v27 = vrot.slane %v4844_v30, 1 }
0x4743   : > { %v4846_v62 = vadd.f32 %v4845_v27, %v4844_v30  ;;  %v6617_v27 = vld [vmem:[#allocation17 + $0x38] sm:$0xff]  }
0x4745   : > { %6412 = vpush %v4846_v62 }
0x4776   : > { %s6413_s20 = spop %6412 }
0x4777   : > { %s4850_s12 = smul.f32 0.0009765625, %s6413_s20  ;;  %s9009_s20 = smov 32  }
0x4779   : > { %s4851_s23 = sadd.f32 1e-05, %s4850_s12 }
0x477b   : > { %v4852_v5 = vstv %s4851_s23  ;;  %s9007_s23 = smov 80  }
0x477c   : > { %6834 = vrsqrt.f32 %v4852_v5 }
0x4786   : > { %v6835_v49 = vpop.eup %6834 }
0x4787   : > { %6414 = vpush %v6835_v49 }
0x47b8   : > { %s6415_s24 = spop %6414 }
0x47b9   : > { %v4855_v10 = vstv %s6415_s24  ;;  %s9008_s24 = smov 88  }
0x47ba   : > { %v4856_v51 = vmul.f32 %v4855_v10, %v4832_v32  ;;  %v4857_v15 = vmul.f32 %v4855_v10, %v4833_v3  ;;  %v6846_v3 = vld [vmem:[%s8995_s17] sm:$0xff]  }
0x47bc   : > { %v4858_v21 = vsel %vm9004_vm10, %v4856_v51, -inf  ;;  %v4861_v34 = vsel %vm9001_vm1, %v4857_v15, -inf  ;;  %vm9013_vm10 = vcmask 1048516  }
0x47bd   : > { %4859 = vmax.xlane.f32.xlu1 %v4858_v21 }
0x47c1   : > { %4862 = vmax.xlane.f32.xlu1 %v4861_v34 }
0x484a   : > { %v4860_v6 = vpop.xlane.xlu1 %4859 }
0x484b   : > { %v4864_v56 = vsub.f32 %v4856_v51, %v4860_v6 }
0x484d   : > { %v4866_v20 = vmul.f32 1.442695, %v4864_v56 }
0x484e   : > { %v4863_v29 = vpop.xlane.xlu1 %4862 }
0x484f   : > { %6836 = vpow2.f32 %v4866_v20  ;;  %v4865_v45 = vsub.f32 %v4857_v15, %v4863_v29 }
0x4851   : > { %v4868_v52 = vmul.f32 1.442695, %v4865_v45 }
0x4853   : > { %6838 = vpow2.f32 %v4868_v52 }
0x4859   : > { %v6837_v17 = vpop.eup %6836 }
0x485a   : > { %v4870_v23 = vsel %vm9005_vm2, %v6837_v17, 0.0 }
0x485b   : > { %4871 = vadd.xlane.f32.xlu1 %v4870_v23 }
0x485d   : > { %v6839_v46 = vpop.eup %6838 }
0x485e   : > { %v4873_v24 = vsel %vm9006_vm15, %v6839_v46, 0.0  ;;  %vm9010_vm15 = vmmov %vm9001_vm1  ;;  %vm9014_vm1 = vcmask 261312  }
0x485f   : > { %4874 = vadd.xlane.f32.xlu1 %v4873_v24 }
0x4870   : > { %2647 = vrot.lane.b32.xlu1 %v8215_v57, %s7220_s2 }
0x4874   : > { %3699 = vrot.lane.b32.xlu1 %v8454_v1, %s7219_s25 }
0x4878   : > { %3704 = vrot.lane.b32.xlu1 %v8456_v13, %s7215_s4 }
0x487c   : > { %3708 = vrot.lane.b32.xlu1 %v8456_v13, %s7210_s21 }
0x4880   : > { %3910 = vrot.lane.b32.xlu1 %v8474_v47, %s7206_s28 }
0x4884   : > { %3914 = vrot.lane.b32.xlu1 %v8474_v47, %s7218_s27 }
0x4888   : > { %3919 = vrot.lane.b32.xlu1 %v8476_v48, %s9007_s23 }
0x488c   : > { %3923 = vrot.lane.b32.xlu1 %v8476_v48, %s9008_s24 }
0x4890   : > { %4125 = vrot.lane.b32.xlu1 %v8532_v55, %s8996_s29 }
0x4894   : > { %4129 = vrot.lane.b32.xlu1 %v8532_v55, %s8997_s3 }
0x4898   : > { %4134 = vrot.lane.b32.xlu1 %v8534_v36, %s8998_s0 }
0x489c   : > { %4138 = vrot.lane.b32.xlu1 %v8534_v36, %s8999_s9 }
0x48a0   : > { %4333 = vrot.lane.b32.xlu1 %v8615_v37, %s9000_s22  ;;  %s5096_s22 = scalar_lea.sflag [#allocation5], %s7614_s5 }
0x48a4   : > { %4538 = vrot.lane.b32.xlu1 %v8753_v58, %s9009_s20 }
0x48a8   : > { %4542 = vrot.lane.b32.xlu1 %v8753_v58, %s7219_s25  ;;  %s5414_s25 = sshll.u32 %s7299_s19, 8  ;;  %s7221_s19 = smov [#allocation18]  }
0x48a9   : > { %s7107_s12 = sshll.u32 %s7221_s19, 4  ;;  %s7108_s12 = int_to_ptr.vmem [resolvable:$false] %s7107_s12 }
0x48ac   : > { %4547 = vrot.lane.b32.xlu1 %v8755_v25, %s7215_s4  ;;  %s518_s4 = scalar_lea.vmem [#allocation18], %s7617_s18 }
0x48b0   : > { %4551 = vrot.lane.b32.xlu1 %v8755_v25, %s7210_s21 }
0x48b4   : > { %4753 = vrot.lane.b32.xlu1 %v8771_v16, %s7206_s28 }
0x48b8   : > { %4757 = vrot.lane.b32.xlu1 %v8771_v16, %s7218_s27  ;;  %s5109_s27 = sshll.u32 %s518_s4, 4  ;;  %s8877_s27 = int_to_ptr.vmem [resolvable:$true] %s5109_s27 }
0x48b9   : > { %s7103_s18 = scalar_lea.vmem %s8877_s27, 256  ;;  %p7110_p4 = scmp.lt.s32.totalorder %s8877_s27, %s7108_s12 }
0x48ba   : > { %p7104_p6 = scmp.ne.s32.totalorder %s8877_s27, %s7103_s18 }
0x48bc   : > { %4762 = vrot.lane.b32.xlu1 %v8773_v42, %s9007_s23  ;;  %p7105_p5 = pnand %p7104_p6, %p9020_p10  ;;  %s7109_s23 = scalar_lea.vmem %s7108_s12, 512 }
0x48bd   : > { %p7111_p8 = scmp.lt.s32.totalorder %s7109_s23, %s7103_s18 }
0x48be   : > { %p7106_p9 = pneg %p7105_p5 }
0x48bf   : > { %p7112_p11 = por %p7111_p8, %p7110_p4 }
0x48c0   : > { %4766 = vrot.lane.b32.xlu1 %v8773_v42, %s9008_s24 }
0x48c1   : > { %p7113_p3 = pnand %p7112_p11, %p7106_p9 }
0x48e8   : > { %v4872_v57 = vpop.xlane.xlu1 %4871 }
0x48e9   : > { %6840 = vrcp.f32 %v4872_v57 }
0x48ec   : > { %v4875_v1 = vpop.xlane.xlu1 %4874 }
0x48ed   : > { %6842 = vrcp.f32 %v4875_v1 }
0x48f0   : > { %v2648_v13 = vpop.permute.xlu1 %2647 }
0x48f1   : > { %2653 = vst.msk [vmem:[#allocation2 + $0x8] sm:$0xff] %vm2651_vm3, %v2648_v13  ;;  %vm9011_vm3 = vcmask 585216  }
0x48f2   : > { %3496 = vst.msk [vmem:[#allocation2 + $0x8] sm:$0xff] %vm3494_vm8, %v8722_v12  ;;  %vm9012_vm8 = vcmask 716416   ;;  %vm9015_vm2 = vmmov %vm9011_vm3 }
0x48f3   : > { %3698 = vst.msk [vmem:[#allocation2 + $0x8] sm:$0xf] %vm2000_vm4, %v8727_v60  ;;  %v6841_v48 = vpop.eup %6840 }
0x48f4   : > { %v3700_v47 = vpop.permute.xlu1 %3699  ;;  %v4878_v36 = vmul.f32 %v6841_v48, %v6837_v17 }
0x48f5   : > { %3702 = vst.msk [vmem:[#allocation2 + $0x4] sm:$0xf0] %vm2005_vm5, %v3700_v47 }
0x48f7   : > { %v6843_v55 = vpop.eup %6842 }
0x48f8   : > { %v4879_v37 = vmul.f32 %v6843_v55, %v6839_v46  ;;  %v3705_v58 = vpop.permute.xlu1 %3704 }
0x48f9   : > { %3707 = vst.msk [vmem:[#allocation2 + $0x8] sm:$0xf] %vm2011_vm6, %v3705_v58 }
0x48fa   : > { %v4880_v25 = vpack.c.bf16 %v4879_v37, %v4878_v36 }
0x48fc   : > { %6285 = vmatmul.mubr.msk.bf16.vlgmr.msra.gmra.mrb[88].mxu1 %vm9010_vm15, %v4880_v25  ;;  %v3709_v14 = vpop.permute.xlu1 %3708  ;;  %vm9016_vm15 = vmmov %vm9012_vm8 }
0x48fd   : > { %3711 = vst.msk [vmem:[#allocation2 + $0x4] sm:$0xf0] %vm2016_vm7, %v3709_v14  ;;  %6290 = vmatprep.mubr.msk.bf16.mxu1 %vm7205_vm0, %v7204_v0 }
0x4900   : > { %v3911_v12 = vpop.permute.xlu1 %3910 }
0x4901   : > { %3913 = vst.msk [vmem:[#allocation2 + $0x8] sm:$0xf] %vm9011_vm3, %v3911_v12 }
0x4904   : > { %v3915_v60 = vpop.permute.xlu1 %3914 }
0x4905   : > { %3917 = vst.msk [vmem:[#allocation2 + $0x4] sm:$0xf0] %vm2224_vm9, %v3915_v60 }
0x4908   : > { %v3920_v16 = vpop.permute.xlu1 %3919 }
0x4909   : > { %3922 = vst.msk [vmem:[#allocation2 + $0x8] sm:$0xf] %vm9012_vm8, %v3920_v16 }
0x490c   : > { %v3924_v44 = vpop.permute.xlu1 %3923 }
0x490d   : > { %3926 = vst.msk [vmem:[#allocation2 + $0x4] sm:$0xf0] %vm2235_vm11, %v3924_v44 }
0x4910   : > { %v4126_v42 = vpop.permute.xlu1 %4125 }
0x4911   : > { %4128 = vst.msk [vmem:[#allocation2 + $0x8] sm:$0xf] %vm2438_vm12, %v4126_v42 }
0x4914   : > { %v4130_v18 = vpop.permute.xlu1 %4129 }
0x4915   : > { %4132 = vst.msk [vmem:[#allocation2 + $0x4] sm:$0xf0] %vm2443_vm13, %v4130_v18 }
0x4918   : > { %v4135_v63 = vpop.permute.xlu1 %4134 }
0x4919   : > { %4137 = vst.msk [vmem:[#allocation2 + $0x8] sm:$0xf] %vm2449_vm14, %v4135_v63 }
0x491c   : > { %v4139_v35 = vpop.permute.xlu1 %4138 }
0x491d   : > { %4141 = vst.msk [vmem:[#allocation2 + $0x4] sm:$0xf0] %vm9013_vm10, %v4139_v35 }
0x4920   : > { %v4334_v4 = vpop.permute.xlu1 %4333 }
0x4921   : > { %4339 = vst.msk [vmem:[#allocation2 + $0x8] sm:$0xff] %vm9014_vm1, %v4334_v4 }
0x4924   : > { %v4539_v38 = vpop.permute.xlu1 %4538 }
0x4925   : > { %4541 = vst.msk [vmem:[#allocation2 + $0xc] sm:$0xf] %vm2000_vm4, %v4539_v38  ;;  %vm9017_vm4 = vcmask 130048  }
0x4928   : > { %v4543_v26 = vpop.permute.xlu1 %4542 }
0x4929   : > { %4545 = vst.msk [vmem:[#allocation2 + $0x8] sm:$0xf0] %vm2005_vm5, %v4543_v26 }
0x492c   : > { %v4548_v40 = vpop.permute.xlu1 %4547 }
0x492d   : > { %4550 = vst.msk [vmem:[#allocation2 + $0xc] sm:$0xf] %vm2011_vm6, %v4548_v40 }
0x4930   : > { %v4552_v50 = vpop.permute.xlu1 %4551 }
0x4931   : > { %4554 = vst.msk [vmem:[#allocation2 + $0x8] sm:$0xf0] %vm2016_vm7, %v4552_v50 }
0x4934   : > { %v4754_v33 = vpop.permute.xlu1 %4753 }
0x4935   : > { %4756 = vst.msk [vmem:[#allocation2 + $0xc] sm:$0xf] %vm9015_vm2, %v4754_v33 }
0x4938   : > { %v4758_v43 = vpop.permute.xlu1 %4757 }
0x4939   : > { %4760 = vst.msk [vmem:[#allocation2 + $0x8] sm:$0xf0] %vm2224_vm9, %v4758_v43 }
0x493c   : > { %v4763_v19 = vpop.permute.xlu1 %4762 }
0x493d   : > { %4765 = vst.msk [vmem:[#allocation2 + $0xc] sm:$0xf] %vm9016_vm15, %v4763_v19 }
0x4940   : > { %v4767_v54 = vpop.permute.xlu1 %4766 }
0x4941   : > { %4769 = vst.msk [vmem:[#allocation2 + $0x8] sm:$0xf0] %vm2235_vm11, %v4767_v54 }
0x49cf   : > { %v4918_v2 = vpop.f32.mrb[88].mxu1 }
0x49d0   : > { %v6286_v39 = vpop.f32.mrb[89].mxu1 }
0x49d1   : > { %v4921_v53 = vpop.f32.mrb[90].mxu1 }
0x49d2   : > { %v4925_v41 = vpack.c.bf16 %v4921_v53, %v4918_v2  ;;  %v6287_v32 = vpop.f32.mrb[91].mxu1 }
0x49d4   : > { %6289 = vmatpush3.bf16.msra.mxu1 %v4925_v41 }
0x49d5   : > { %6294 = vmatprep.subr.bf16.mxu1 %v7204_v0 }
0x49d7   : > { %6291 = vmatmul.mubr.msk.bf16.vlgmr.msra.gmra.mrb[92].mxu1 %vm9017_vm4, %v6846_v3 }
0x49d8   : > { %6310 = vmatprep.mubr.msk.bf16.mxu1 %vm7205_vm0, %v7204_v0  ;;  %6295 = vmatpush3.bf16.msra.mxu1 %v6610_v28  ;;  %vm9018_vm0 = vmmov %vm9013_vm10 }
0x49d9   : > { %6296 = vmatprep.subr.bf16.mxu1 %v7204_v0 }
0x49dc   : > { %6297 = vmatpush3.bf16.msra.mxu1 %v6611_v59 }
0x49dd   : > { %6298 = vmatprep.subr.bf16.mxu1 %v7204_v0 }
0x49e0   : > { %6299 = vmatpush3.bf16.msra.mxu1 %v6612_v7 }
0x49e1   : > { %6300 = vmatprep.subr.bf16.mxu1 %v7204_v0 }
0x49e4   : > { %6301 = vmatpush3.bf16.msra.mxu1 %v6613_v22 }
0x49e5   : > { %6302 = vmatprep.subr.bf16.mxu1 %v7204_v0 }
0x49e8   : > { %6303 = vmatpush3.bf16.msra.mxu1 %v6614_v31 }
0x49e9   : > { %6304 = vmatprep.subr.bf16.mxu1 %v7204_v0 }
0x49ec   : > { %6305 = vmatpush3.bf16.msra.mxu1 %v6615_v61 }
0x49ed   : > { %6306 = vmatprep.subr.bf16.mxu1 %v7204_v0 }
0x49f0   : > { %6307 = vmatpush3.bf16.msra.mxu1 %v6616_v11 }
0x49f1   : > { %6308 = vmatprep.subr.bf16.mxu1 %v7204_v0  ;;  %v4985_v0 = vld [vmem:[#allocation2] sm:$0xff] }
0x49f4   : > { %6309 = vmatpush3.bf16.msra.mxu1 %v6617_v27 }
0x4aaa   : > { %v4960_v9 = vpop.f32.mrb[92].mxu1 }
0x4aab   : > { %4968 = vrot.lane.b32.xlu1 %v4960_v9, %s8996_s29  ;;  %v6292_v8 = vpop.f32.mrb[93].mxu1 }
0x4aac   : > { %v4963_v30 = vpop.f32.mrb[94].mxu1 }
0x4aad   : > { %v6293_v62 = vpop.f32.mrb[95].mxu1 }
0x4aaf   : > { %4972 = vrot.lane.b32.xlu1 %v4960_v9, %s8997_s3 }
0x4ab3   : > { %4977 = vrot.lane.b32.xlu1 %v4963_v30, %s8998_s0  ;;  %s9019_s0 = sld [smem:[#allocation32_spill]] }
0x4ab7   : > { %4981 = vrot.lane.b32.xlu1 %v4963_v30, %s8999_s9 }
0x4ab9   : > { %s8882_s9 = scalar_lea.hbm %s9019_s0, %s5414_s25 }
0x4b1d   : > { %v4969_v5 = vpop.permute.xlu1 %4968 }
0x4b1e   : > { %4971 = vst.msk [vmem:[#allocation2 + $0xc] sm:$0xf] %vm2438_vm12, %v4969_v5 }
0x4b21   : > { %v4973_v49 = vpop.permute.xlu1 %4972 }
0x4b22   : > { %4975 = vst.msk [vmem:[#allocation2 + $0x8] sm:$0xf0] %vm2443_vm13, %v4973_v49 }
0x4b25   : > { %v4978_v10 = vpop.permute.xlu1 %4977 }
0x4b26   : > { %4980 = vst.msk [vmem:[#allocation2 + $0xc] sm:$0xf] %vm2449_vm14, %v4978_v10 }
0x4b29   : > { %v4982_v51 = vpop.permute.xlu1 %4981 }
0x4b2a   : > { %4984 = vst.msk [vmem:[#allocation2 + $0x8] sm:$0xf0] %vm9018_vm0, %v4982_v51 }
0x4b31   : > { %v4986_v15 = vld [vmem:[#allocation2 + $0x8] sm:$0xff] }
0x4b32   : > { %v4987_v21 = vpack.c.bf16 %v4986_v15, %v4985_v0 }
0x4b34   : > { %6311 = vmatmul.mubr.bf16.vlgmr.msra.gmra.mrb[96].mxu1 %v4987_v21 }
0x4c07   : > { %v5086_v34 = vpop.f32.mrb[96].mxu1 }
0x4c08   : > { %5093 = vst [vmem:[%s518_s4] sm:$0xff] %v5086_v34  ;;  %v6312_v6 = vpop.f32.mrb[97].mxu1 }
0x4c09   : > { %v5089_v56 = vpop.f32.mrb[98].mxu1 }
0x4c0a   : > { %5094 = vst [vmem:[%s518_s4 + $0x8] sm:$0xff] %v5089_v56  ;;  %v6313_v20 = vpop.f32.mrb[99].mxu1 }
0x4c0b   : > { %7116 = shalt.err (!%p7113_p3)
}
0x4c0c   : > { %s7117_s24 = scalar_lea.hbm %s8882_s9, 256  ;;  %s7121_s21 = scalar_lea.hbm %s9019_s0, 512 }
0x4c0d   : > { %p7118_p12 = scmp.ne.s32.totalorder %s8882_s9, %s7117_s24  ;;  %p7122_p0 = scmp.lt.u32.totalorder %s8882_s9, %s9019_s0 }
0x4c0e   : > { %p7123_p7 = scmp.lt.u32.totalorder %s7121_s21, %s7117_s24  ;;  %p7125_p6 = scmp.lt.u32.totalorder %s7117_s24, %s8882_s9 }
0x4c0f   : > { %p7119_p1 = pnand %p7118_p12, %p9020_p10 }
0x4c10   : > { %p7124_p2 = por %p7123_p7, %p7122_p0 }
0x4c11   : > { %p7120_p13 = pneg %p7119_p1 }
0x4c12   : > { %p7126_p5 = por %p7125_p6, %p7124_p2 }
0x4c14   : > { %p7127_p9 = pnand %p7126_p5, %p7120_p13 }
0x4c16   : > { %7130 = shalt.err (!%p7127_p9)
}
0x4c17   : > { %s7222_s29 = smov 128  }
0x4c18   : > { %6448 = dma.vmem_to_hbm [thread:$0]  (%p9020_p10), %s8877_s27, 256, %s8882_s9, %s5096_s22, %s7222_s29, %s7222_s29, %s7220_s2  }
0x4c19 PF: > { %s5124_s3 = sand.u32 1, %s7177_s13   ;;  %p9021_p4 = scmp.ne.s32.totalorder %s8982_s30, 0 }
0x4c1a   : > { %p9022_p8 = scmp.ge.s32.totalorder %s7189_s16, 2  ;;  %s5125_s18 = scalar_lea.sflag [#allocation5], %s5124_s3 }
0x4c1c   : > { %p6480_p11 = pnand %p9022_p8, %p9021_p4 }
0x4c1e   : > { %7172 = dma.done.wait (!%p6480_p11), %s5125_s18, 256  }
0x4c1f   : > { %7174 = vsyncadd (!%p6480_p11), %s5125_s18, 4294967040  ;;  %p29_p3 = scmp.ge.s32.totalorder %s7493_s11, 4   ;;  %s9023_s13 = smov %s7181_s14 }
0x4c20   : > { %s9024_s14 = smov %s7185_s15  ;;  %s9025_s15 = smov %s7505_s10 }
0x4c21   : > { %s9026_s16 = smov %s7493_s11  ;;  %31 = sbr.rel (!%p29_p3) target bundleno = 18 (0x12), region = 146 }
0x4c28   :  { %5130 = vsyncpa [#allocation4], 1 }
0x4c29   :  { %5132 = vsyncpa [#allocation4 + $0x1], 1 }
0x4c2a   :  { %5133 = vsyncpa [#allocation7], 1 }
0x4c2b   :  { %5135 = vsyncpa [#allocation7 + $0x1], 1 }
0x4c2c   :  { %5136 = vsyncpa [#allocation10], 1 }
0x4c2d   :  { %5137 = vsyncpa [#allocation13], 1 }
0x4c2e   :  { %5138 = vsyncpa [#allocation16], 1 }
0x4c2f   :  { %5139 = vsyncpa [#allocation5], 1 }
0x4c30   :  { %5141 = vsyncpa [#allocation5 + $0x1], 1 }

</bundles_post_ra>
